<compile_context>
chip_gen: v7x
topology: tpu7x:2x2x1
jax: 0.10.0
libtpu: 0.0.40
codegen_flags: <defaults>
</compile_context>

<pallas_src>
import functools

import jax
import jax.numpy as jnp
from jax.experimental import pallas as pl
from jax.experimental.pallas import tpu as pltpu

_CP = 128    # all channel counts zero-padded to one full lane tile
_K2 = 5      # conv2 / conv3 kernel size
_PH = 2      # halo of the 5x5 convs
_WOFF = 8    # sublane-aligned column offset of the interior inside the scratch


def _srcnn_kernel(p1_ref, w1_ref, b1_ref, w2_ref, b2_ref, w3_ref, b3_ref,
                  o_ref, h1_ref, h2_ref, *, H, W):
    # p1_ref : (1, H*W, K1P)       im2col patches of the padded input (conv1)
    # w1_ref : (K1P, 128)          conv1 RHS, K and Cout zero-padded
    # w2_ref : (5, 5*128, 128)     conv2 RHS per kh, Cin & Cout padded to 128
    # w3_ref : (5, 5*128, 128)     conv3 RHS per kh, Cin & Cout padded to 128
    # b*_ref : (1, 128)
    # o_ref  : (1, H*W, 128)       lane-dense padded output
    # h1_ref, h2_ref : (H+4, WP, 128) zero-padded VMEM intermediates
    HW = H * W

    def store_padded(h_ref, y):
        # Zero the halo (and unused columns), then write the interior at a
        # sublane-aligned offset -> unmasked, full-lane tile stores.
        h_ref[...] = jnp.zeros_like(h_ref)
        h_ref[_PH:_PH + H, _WOFF:_WOFF + W, :] = y.reshape(H, W, _CP)

    def conv5x5(h_ref, w_ref, b_ref, relu):
        base = _WOFF - _PH
        # Fold (kw, cin) into the contraction: (H+4, W, 5*128).  Every chunk is
        # a full 128-lane tile, so the concatenate is lane-aligned.
        cols = jnp.concatenate(
            [h_ref[:, base + kw:base + kw + W, :] for kw in range(_K2)],
            axis=-1)
        acc = jnp.zeros((HW, _CP), jnp.float32)
        for kh in range(_K2):                       # 5 MXU matmuls, K = 640
            lhs = cols[kh:kh + H].reshape(HW, _K2 * _CP)
            acc = acc + jnp.dot(lhs, w_ref[kh],
                                preferred_element_type=jnp.float32)
        acc = acc + b_ref[...]
        return jnp.maximum(acc, 0.0) if relu else acc

    # ---- conv1: one lane-aligned im2col matmul + bias + ReLU ----
    y1 = jnp.dot(p1_ref[0], w1_ref[...], preferred_element_type=jnp.float32)
    y1 = jnp.maximum(y1 + b1_ref[...], 0.0)          # (H*W, 128)
    store_padded(h1_ref, y1)

    # ---- conv2 (VMEM-resident input) ----
    y2 = conv5x5(h1_ref, w2_ref, b2_ref, relu=True)  # (H*W, 128)
    store_padded(h2_ref, y2)

    # ---- conv3 (padded out channels -> dense, unmasked store) ----
    y3 = conv5x5(h2_ref, w3_ref, b3_ref, relu=False)  # (H*W, 128)
    o_ref[...] = y3.reshape(1, HW, _CP)


def _im2col_input(xp, H, W, k):
    """(N, Hp, Wp, C) -> (N, H*W, k*k*C), columns ordered (kh, kw, c).

    Matches w.reshape(k*k*C, Cout) for HWIO weights.  Pure layout plumbing on
    the tiny padded network input, done by XLA in the wrapper."""
    n = xp.shape[0]
    c = xp.shape[-1]
    cols = jnp.concatenate([xp[:, :, j:j + W, :] for j in range(k)], axis=-1)
    pats = jnp.concatenate([cols[:, i:i + H, :, :] for i in range(k)], axis=-1)
    return pats.reshape(n, H * W, k * k * c)


@jax.jit
def srcnn_forward(params, x_nchw):
    """Forward matching the PyTorch module: relu(conv1), relu(conv2), conv3."""
    N, Cin, H, W = x_nchw.shape
    k1 = params["w1"].shape[0]                     # 9
    C1 = params["w1"].shape[-1]                    # 64
    C2 = params["w2"].shape[-1]                    # 32
    C_out = params["w3"].shape[-1]                 # num_channel
    f32 = jnp.float32

    # NCHW -> NHWC, pad for conv1, build conv1 im2col patches (layout plumbing).
    x = jnp.transpose(x_nchw, (0, 2, 3, 1)).astype(f32)
    p = k1 // 2
    xp = jnp.pad(x, ((0, 0), (p, p), (p, p), (0, 0)))
    p1 = _im2col_input(xp, H, W, k1)               # (N, H*W, 81*Cin)
    K1 = k1 * k1 * Cin
    K1P = ((K1 + _CP - 1) // _CP) * _CP            # pad contraction to 128-mult
    p1 = jnp.pad(p1, ((0, 0), (0, 0), (0, K1P - K1)))

    # Weights -> flattened matmul RHS, every channel axis padded to 128 lanes.
    w1 = jnp.zeros((K1P, _CP), f32).at[:K1, :C1].set(params["w1"].reshape(K1, C1))
    b1 = jnp.zeros((1, _CP), f32).at[:, :C1].set(params["b1"][None, :])
    w2 = jnp.zeros((_K2, _K2, _CP, _CP), f32).at[:, :, :C1, :C2].set(params["w2"])
    w2 = w2.reshape(_K2, _K2 * _CP, _CP)
    b2 = jnp.zeros((1, _CP), f32).at[:, :C2].set(params["b2"][None, :])
    w3 = jnp.zeros((_K2, _K2, _CP, _CP), f32).at[:, :, :C2, :C_out].set(params["w3"])
    w3 = w3.reshape(_K2, _K2 * _CP, _CP)
    b3 = jnp.zeros((1, _CP), f32).at[:, :C_out].set(params["b3"][None, :])

    HP = H + 2 * _PH
    WP = ((_WOFF + W + _PH + 7) // 8) * 8          # sublane-aligned scratch width

    kern = functools.partial(_srcnn_kernel, H=H, W=W)

    out = pl.pallas_call(
        kern,
        out_shape=jax.ShapeDtypeStruct((N, H * W, _CP), f32),
        grid_spec=pltpu.PrefetchScalarGridSpec(
            num_scalar_prefetch=0,
            grid=(N,),
            in_specs=[
                pl.BlockSpec((1, H * W, K1P), lambda n: (n, 0, 0)),
                pl.BlockSpec((K1P, _CP), lambda n: (0, 0)),
                pl.BlockSpec((1, _CP), lambda n: (0, 0)),
                pl.BlockSpec((_K2, _K2 * _CP, _CP), lambda n: (0, 0, 0)),
                pl.BlockSpec((1, _CP), lambda n: (0, 0)),
                pl.BlockSpec((_K2, _K2 * _CP, _CP), lambda n: (0, 0, 0)),
                pl.BlockSpec((1, _CP), lambda n: (0, 0)),
            ],
            out_specs=pl.BlockSpec((1, H * W, _CP), lambda n: (n, 0, 0)),
            scratch_shapes=[
                pltpu.VMEM((HP, WP, _CP), f32),    # padded conv1 output
                pltpu.VMEM((HP, WP, _CP), f32),    # padded conv2 output
            ],
        ),
        compiler_params=pltpu.CompilerParams(
            dimension_semantics=("parallel",),
            vmem_limit_bytes=32 * 1024 * 1024,
        ),
    )(p1, w1, b1, w2, b2, w3, b3)

    # Slice valid channels back out and return NCHW (layout plumbing in XLA).
    out = out[:, :, :C_out].reshape(N, H, W, C_out)
    return jnp.transpose(out, (0, 3, 1, 2))


def init_srcnn_params(key, num_channel=1):
    """Deterministic synthetic parameters matching SRCNN.__init__ shapes (HWIO)."""
    ks = jax.random.split(key, 6)

    def winit(k, kh, kw, cin, cout):
        fan_in = kh * kw * cin
        return (jax.random.normal(k, (kh, kw, cin, cout), jnp.float32)
                * (1.0 / jnp.sqrt(fan_in)))

    return {
        "w1": winit(ks[0], 9, 9, num_channel, 64),
        "b1": jax.random.normal(ks[1], (64,), jnp.float32) * 0.01,
        "w2": winit(ks[2], 5, 5, 64, 32),
        "b2": jax.random.normal(ks[3], (32,), jnp.float32) * 0.01,
        "w3": winit(ks[4], 5, 5, 32, num_channel),
        "b3": jax.random.normal(ks[5], (num_channel,), jnp.float32) * 0.01,
    }


def srcnn_reference(params, x_nchw):
    """Pure-JAX reference (XLA convs) for validation."""
    x = jnp.transpose(x_nchw, (0, 2, 3, 1))
    dn = ("NHWC", "HWIO", "NHWC")

    def conv(x, w, b):
        y = jax.lax.conv_general_dilated(x, w, (1, 1), "SAME",
                                         dimension_numbers=dn)
        return y + b[None, None, None, :]

    h = jax.nn.relu(conv(x, params["w1"], params["b1"]))
    h = jax.nn.relu(conv(h, params["w2"], params["b2"]))
    y = conv(h, params["w3"], params["b3"])
    return jnp.transpose(y, (0, 3, 1, 2))


if __name__ == "__main__":
    key = jax.random.PRNGKey(0)
    k_param, k_x = jax.random.split(key)

    num_channel = 1
    params = init_srcnn_params(k_param, num_channel=num_channel)
    x = jax.random.normal(k_x, (2, num_channel, 16, 16), jnp.float32)  # NCHW

    out = jax.block_until_ready(srcnn_forward(params, x))
    ref = jax.block_until_ready(srcnn_reference(params, x))

    assert out.shape == (2, num_channel, 16, 16), out.shape
    assert jnp.allclose(out, ref, atol=1e-4, rtol=1e-4), (
        float(jnp.max(jnp.abs(out - ref))))
    print("KERNEL_OK")
</pallas_src>

<mosaic_0001>
module attributes {stable_mosaic.version = 11 : i64} {
  func.func @_srcnn_kernel(%arg0: i32, %arg1: memref<1x256x128xf32, #tpu.memory_space<vmem>>, %arg2: memref<128x128xf32, #tpu.memory_space<vmem>>, %arg3: memref<1x128xf32, #tpu.memory_space<vmem>>, %arg4: memref<5x640x128xf32, #tpu.memory_space<vmem>>, %arg5: memref<1x128xf32, #tpu.memory_space<vmem>>, %arg6: memref<5x640x128xf32, #tpu.memory_space<vmem>>, %arg7: memref<1x128xf32, #tpu.memory_space<vmem>>, %arg8: memref<1x256x128xf32, #tpu.memory_space<vmem>>, %arg9: memref<20x32x128xf32, #tpu.memory_space<vmem>>, %arg10: memref<20x32x128xf32, #tpu.memory_space<vmem>>) attributes {dimension_semantics = [#tpu.dimension_semantics<parallel>], iteration_bounds = array<i64: 2>, scalar_prefetch = 0 : i64, scratch_operands = 2 : i64, tpu.core_type = #tpu.core_type<tc>, window_params = [{transform_indices = @transform_0, window_bounds = array<i64: 1, 256, 128>}, {pipeline_mode = #tpu.pipeline_mode<synchronous>, transform_indices = @transform_1, window_bounds = array<i64: 128, 128>}, {pipeline_mode = #tpu.pipeline_mode<synchronous>, transform_indices = @transform_2, window_bounds = array<i64: 1, 128>}, {pipeline_mode = #tpu.pipeline_mode<synchronous>, transform_indices = @transform_3, window_bounds = array<i64: 5, 640, 128>}, {pipeline_mode = #tpu.pipeline_mode<synchronous>, transform_indices = @transform_4, window_bounds = array<i64: 1, 128>}, {pipeline_mode = #tpu.pipeline_mode<synchronous>, transform_indices = @transform_5, window_bounds = array<i64: 5, 640, 128>}, {pipeline_mode = #tpu.pipeline_mode<synchronous>, transform_indices = @transform_6, window_bounds = array<i64: 1, 128>}, {transform_indices = @transform_7, window_bounds = array<i64: 1, 256, 128>}]} {
    %c0 = arith.constant 0 : index
    %c0_0 = arith.constant 0 : index
    %c0_1 = arith.constant 0 : index
    %0 = vector.load %arg1[%c0, %c0_0, %c0_1] : memref<1x256x128xf32, #tpu.memory_space<vmem>>, vector<1x256x128xf32>
    %1 = vector.shape_cast %0 : vector<1x256x128xf32> to vector<256x128xf32>
    %c0_2 = arith.constant 0 : index
    %c0_3 = arith.constant 0 : index
    %2 = vector.load %arg2[%c0_2, %c0_3] : memref<128x128xf32, #tpu.memory_space<vmem>>, vector<128x128xf32>
    %cst = arith.constant dense<0.000000e+00> : vector<256x128xf32>
    %3 = tpu.matmul %1, %2, %cst {dimension_numbers = #tpu.dot_dimension_numbers<[1], [0], [0], [1], [0, 0, 1, 1], [], []>} : vector<256x128xf32>, vector<128x128xf32>, vector<256x128xf32> -> vector<256x128xf32>
    %c0_4 = arith.constant 0 : index
    %c0_5 = arith.constant 0 : index
    %4 = vector.load %arg3[%c0_4, %c0_5] : memref<1x128xf32, #tpu.memory_space<vmem>>, vector<1x128xf32>
    %5 = vector.broadcast %4 : vector<1x128xf32> to vector<256x128xf32>
    %6 = arith.addf %3, %5 : vector<256x128xf32>
    %cst_6 = arith.constant 0.000000e+00 : f32
    %7 = vector.broadcast %cst_6 : f32 to vector<256x128xf32>
    %8 = arith.maximumf %6, %7 : vector<256x128xf32>
    %cst_7 = arith.constant 0.000000e+00 : f32
    %9 = vector.broadcast %cst_7 : f32 to vector<20x32x128xf32>
    %c0_8 = arith.constant 0 : index
    %c0_9 = arith.constant 0 : index
    %c0_10 = arith.constant 0 : index
    %10 = vector.load %arg9[%c0_8, %c0_9, %c0_10] : memref<20x32x128xf32, #tpu.memory_space<vmem>>, vector<20x32x128xf32>
    tpu.vector_store %arg9[%c0_8, %c0_9, %c0_10], %9 {strides = array<i32>} : memref<20x32x128xf32, #tpu.memory_space<vmem>>, vector<20x32x128xf32>,
    %11 = vector.shape_cast %8 : vector<256x128xf32> to vector<16x16x128xf32>
    %c2 = arith.constant 2 : index
    %c8 = arith.constant 8 : index
    %c0_11 = arith.constant 0 : index
    %12 = vector.load %arg9[%c2, %c8, %c0_11] : memref<20x32x128xf32, #tpu.memory_space<vmem>>, vector<16x16x128xf32>
    tpu.vector_store %arg9[%c2, %c8, %c0_11], %11 {strides = array<i32>} : memref<20x32x128xf32, #tpu.memory_space<vmem>>, vector<16x16x128xf32>,
    %c0_12 = arith.constant 0 : index
    %c6 = arith.constant 6 : index
    %c0_13 = arith.constant 0 : index
    %13 = vector.load %arg9[%c0_12, %c6, %c0_13] : memref<20x32x128xf32, #tpu.memory_space<vmem>>, vector<20x16x128xf32>
    %c0_14 = arith.constant 0 : index
    %c7 = arith.constant 7 : index
    %c0_15 = arith.constant 0 : index
    %14 = vector.load %arg9[%c0_14, %c7, %c0_15] : memref<20x32x128xf32, #tpu.memory_space<vmem>>, vector<20x16x128xf32>
    %c0_16 = arith.constant 0 : index
    %c8_17 = arith.constant 8 : index
    %c0_18 = arith.constant 0 : index
    %15 = vector.load %arg9[%c0_16, %c8_17, %c0_18] : memref<20x32x128xf32, #tpu.memory_space<vmem>>, vector<20x16x128xf32>
    %c0_19 = arith.constant 0 : index
    %c9 = arith.constant 9 : index
    %c0_20 = arith.constant 0 : index
    %16 = vector.load %arg9[%c0_19, %c9, %c0_20] : memref<20x32x128xf32, #tpu.memory_space<vmem>>, vector<20x16x128xf32>
    %c0_21 = arith.constant 0 : index
    %c10 = arith.constant 10 : index
    %c0_22 = arith.constant 0 : index
    %17 = vector.load %arg9[%c0_21, %c10, %c0_22] : memref<20x32x128xf32, #tpu.memory_space<vmem>>, vector<20x16x128xf32>
    %18 = tpu.concatenate %13, %14, %15, %16, %17 in 2 : vector<20x16x128xf32>, vector<20x16x128xf32>, vector<20x16x128xf32>, vector<20x16x128xf32>, vector<20x16x128xf32> -> vector<20x16x640xf32>
    %cst_23 = arith.constant 0.000000e+00 : f32
    %19 = vector.broadcast %cst_23 : f32 to vector<256x128xf32>
    %20 = vector.extract_strided_slice %18 {offsets = [0, 0, 0], sizes = [16, 16, 640], strides = [1, 1, 1]} : vector<20x16x640xf32> to vector<16x16x640xf32>
    %21 = vector.shape_cast %20 : vector<16x16x640xf32> to vector<256x640xf32>
    %c0_24 = arith.constant 0 : index
    %c0_25 = arith.constant 0 : index
    %c0_26 = arith.constant 0 : index
    %22 = vector.load %arg4[%c0_24, %c0_25, %c0_26] : memref<5x640x128xf32, #tpu.memory_space<vmem>>, vector<1x640x128xf32>
    %23 = vector.shape_cast %22 : vector<1x640x128xf32> to vector<640x128xf32>
    %cst_27 = arith.constant dense<0.000000e+00> : vector<256x128xf32>
    %24 = tpu.matmul %21, %23, %cst_27 {dimension_numbers = #tpu.dot_dimension_numbers<[1], [0], [0], [1], [0, 0, 1, 1], [], []>} : vector<256x640xf32>, vector<640x128xf32>, vector<256x128xf32> -> vector<256x128xf32>
    %25 = arith.addf %19, %24 : vector<256x128xf32>
    %26 = vector.extract_strided_slice %18 {offsets = [1, 0, 0], sizes = [16, 16, 640], strides = [1, 1, 1]} : vector<20x16x640xf32> to vector<16x16x640xf32>
    %27 = vector.shape_cast %26 : vector<16x16x640xf32> to vector<256x640xf32>
    %c1 = arith.constant 1 : index
    %c0_28 = arith.constant 0 : index
    %c0_29 = arith.constant 0 : index
    %28 = vector.load %arg4[%c1, %c0_28, %c0_29] : memref<5x640x128xf32, #tpu.memory_space<vmem>>, vector<1x640x128xf32>
    %29 = vector.shape_cast %28 : vector<1x640x128xf32> to vector<640x128xf32>
    %cst_30 = arith.constant dense<0.000000e+00> : vector<256x128xf32>
    %30 = tpu.matmul %27, %29, %cst_30 {dimension_numbers = #tpu.dot_dimension_numbers<[1], [0], [0], [1], [0, 0, 1, 1], [], []>} : vector<256x640xf32>, vector<640x128xf32>, vector<256x128xf32> -> vector<256x128xf32>
    %31 = arith.addf %25, %30 : vector<256x128xf32>
    %32 = vector.extract_strided_slice %18 {offsets = [2, 0, 0], sizes = [16, 16, 640], strides = [1, 1, 1]} : vector<20x16x640xf32> to vector<16x16x640xf32>
    %33 = vector.shape_cast %32 : vector<16x16x640xf32> to vector<256x640xf32>
    %c2_31 = arith.constant 2 : index
    %c0_32 = arith.constant 0 : index
    %c0_33 = arith.constant 0 : index
    %34 = vector.load %arg4[%c2_31, %c0_32, %c0_33] : memref<5x640x128xf32, #tpu.memory_space<vmem>>, vector<1x640x128xf32>
    %35 = vector.shape_cast %34 : vector<1x640x128xf32> to vector<640x128xf32>
    %cst_34 = arith.constant dense<0.000000e+00> : vector<256x128xf32>
    %36 = tpu.matmul %33, %35, %cst_34 {dimension_numbers = #tpu.dot_dimension_numbers<[1], [0], [0], [1], [0, 0, 1, 1], [], []>} : vector<256x640xf32>, vector<640x128xf32>, vector<256x128xf32> -> vector<256x128xf32>
    %37 = arith.addf %31, %36 : vector<256x128xf32>
    %38 = vector.extract_strided_slice %18 {offsets = [3, 0, 0], sizes = [16, 16, 640], strides = [1, 1, 1]} : vector<20x16x640xf32> to vector<16x16x640xf32>
    %39 = vector.shape_cast %38 : vector<16x16x640xf32> to vector<256x640xf32>
    %c3 = arith.constant 3 : index
    %c0_35 = arith.constant 0 : index
    %c0_36 = arith.constant 0 : index
    %40 = vector.load %arg4[%c3, %c0_35, %c0_36] : memref<5x640x128xf32, #tpu.memory_space<vmem>>, vector<1x640x128xf32>
    %41 = vector.shape_cast %40 : vector<1x640x128xf32> to vector<640x128xf32>
    %cst_37 = arith.constant dense<0.000000e+00> : vector<256x128xf32>
    %42 = tpu.matmul %39, %41, %cst_37 {dimension_numbers = #tpu.dot_dimension_numbers<[1], [0], [0], [1], [0, 0, 1, 1], [], []>} : vector<256x640xf32>, vector<640x128xf32>, vector<256x128xf32> -> vector<256x128xf32>
    %43 = arith.addf %37, %42 : vector<256x128xf32>
    %44 = vector.extract_strided_slice %18 {offsets = [4, 0, 0], sizes = [16, 16, 640], strides = [1, 1, 1]} : vector<20x16x640xf32> to vector<16x16x640xf32>
    %45 = vector.shape_cast %44 : vector<16x16x640xf32> to vector<256x640xf32>
    %c4 = arith.constant 4 : index
    %c0_38 = arith.constant 0 : index
    %c0_39 = arith.constant 0 : index
    %46 = vector.load %arg4[%c4, %c0_38, %c0_39] : memref<5x640x128xf32, #tpu.memory_space<vmem>>, vector<1x640x128xf32>
    %47 = vector.shape_cast %46 : vector<1x640x128xf32> to vector<640x128xf32>
    %cst_40 = arith.constant dense<0.000000e+00> : vector<256x128xf32>
    %48 = tpu.matmul %45, %47, %cst_40 {dimension_numbers = #tpu.dot_dimension_numbers<[1], [0], [0], [1], [0, 0, 1, 1], [], []>} : vector<256x640xf32>, vector<640x128xf32>, vector<256x128xf32> -> vector<256x128xf32>
    %49 = arith.addf %43, %48 : vector<256x128xf32>
    %c0_41 = arith.constant 0 : index
    %c0_42 = arith.constant 0 : index
    %50 = vector.load %arg5[%c0_41, %c0_42] : memref<1x128xf32, #tpu.memory_space<vmem>>, vector<1x128xf32>
    %51 = vector.broadcast %50 : vector<1x128xf32> to vector<256x128xf32>
    %52 = arith.addf %49, %51 : vector<256x128xf32>
    %cst_43 = arith.constant 0.000000e+00 : f32
    %53 = vector.broadcast %cst_43 : f32 to vector<256x128xf32>
    %54 = arith.maximumf %52, %53 : vector<256x128xf32>
    %cst_44 = arith.constant 0.000000e+00 : f32
    %55 = vector.broadcast %cst_44 : f32 to vector<20x32x128xf32>
    %c0_45 = arith.constant 0 : index
    %c0_46 = arith.constant 0 : index
    %c0_47 = arith.constant 0 : index
    %56 = vector.load %arg10[%c0_45, %c0_46, %c0_47] : memref<20x32x128xf32, #tpu.memory_space<vmem>>, vector<20x32x128xf32>
    tpu.vector_store %arg10[%c0_45, %c0_46, %c0_47], %55 {strides = array<i32>} : memref<20x32x128xf32, #tpu.memory_space<vmem>>, vector<20x32x128xf32>,
    %57 = vector.shape_cast %54 : vector<256x128xf32> to vector<16x16x128xf32>
    %c2_48 = arith.constant 2 : index
    %c8_49 = arith.constant 8 : index
    %c0_50 = arith.constant 0 : index
    %58 = vector.load %arg10[%c2_48, %c8_49, %c0_50] : memref<20x32x128xf32, #tpu.memory_space<vmem>>, vector<16x16x128xf32>
    tpu.vector_store %arg10[%c2_48, %c8_49, %c0_50], %57 {strides = array<i32>} : memref<20x32x128xf32, #tpu.memory_space<vmem>>, vector<16x16x128xf32>,
    %c0_51 = arith.constant 0 : index
    %c6_52 = arith.constant 6 : index
    %c0_53 = arith.constant 0 : index
    %59 = vector.load %arg10[%c0_51, %c6_52, %c0_53] : memref<20x32x128xf32, #tpu.memory_space<vmem>>, vector<20x16x128xf32>
    %c0_54 = arith.constant 0 : index
    %c7_55 = arith.constant 7 : index
    %c0_56 = arith.constant 0 : index
    %60 = vector.load %arg10[%c0_54, %c7_55, %c0_56] : memref<20x32x128xf32, #tpu.memory_space<vmem>>, vector<20x16x128xf32>
    %c0_57 = arith.constant 0 : index
    %c8_58 = arith.constant 8 : index
    %c0_59 = arith.constant 0 : index
    %61 = vector.load %arg10[%c0_57, %c8_58, %c0_59] : memref<20x32x128xf32, #tpu.memory_space<vmem>>, vector<20x16x128xf32>
    %c0_60 = arith.constant 0 : index
    %c9_61 = arith.constant 9 : index
    %c0_62 = arith.constant 0 : index
    %62 = vector.load %arg10[%c0_60, %c9_61, %c0_62] : memref<20x32x128xf32, #tpu.memory_space<vmem>>, vector<20x16x128xf32>
    %c0_63 = arith.constant 0 : index
    %c10_64 = arith.constant 10 : index
    %c0_65 = arith.constant 0 : index
    %63 = vector.load %arg10[%c0_63, %c10_64, %c0_65] : memref<20x32x128xf32, #tpu.memory_space<vmem>>, vector<20x16x128xf32>
    %64 = tpu.concatenate %59, %60, %61, %62, %63 in 2 : vector<20x16x128xf32>, vector<20x16x128xf32>, vector<20x16x128xf32>, vector<20x16x128xf32>, vector<20x16x128xf32> -> vector<20x16x640xf32>
    %cst_66 = arith.constant 0.000000e+00 : f32
    %65 = vector.broadcast %cst_66 : f32 to vector<256x128xf32>
    %66 = vector.extract_strided_slice %64 {offsets = [0, 0, 0], sizes = [16, 16, 640], strides = [1, 1, 1]} : vector<20x16x640xf32> to vector<16x16x640xf32>
    %67 = vector.shape_cast %66 : vector<16x16x640xf32> to vector<256x640xf32>
    %c0_67 = arith.constant 0 : index
    %c0_68 = arith.constant 0 : index
    %c0_69 = arith.constant 0 : index
    %68 = vector.load %arg6[%c0_67, %c0_68, %c0_69] : memref<5x640x128xf32, #tpu.memory_space<vmem>>, vector<1x640x128xf32>
    %69 = vector.shape_cast %68 : vector<1x640x128xf32> to vector<640x128xf32>
    %cst_70 = arith.constant dense<0.000000e+00> : vector<256x128xf32>
    %70 = tpu.matmul %67, %69, %cst_70 {dimension_numbers = #tpu.dot_dimension_numbers<[1], [0], [0], [1], [0, 0, 1, 1], [], []>} : vector<256x640xf32>, vector<640x128xf32>, vector<256x128xf32> -> vector<256x128xf32>
    %71 = arith.addf %65, %70 : vector<256x128xf32>
    %72 = vector.extract_strided_slice %64 {offsets = [1, 0, 0], sizes = [16, 16, 640], strides = [1, 1, 1]} : vector<20x16x640xf32> to vector<16x16x640xf32>
    %73 = vector.shape_cast %72 : vector<16x16x640xf32> to vector<256x640xf32>
    %c1_71 = arith.constant 1 : index
    %c0_72 = arith.constant 0 : index
    %c0_73 = arith.constant 0 : index
    %74 = vector.load %arg6[%c1_71, %c0_72, %c0_73] : memref<5x640x128xf32, #tpu.memory_space<vmem>>, vector<1x640x128xf32>
    %75 = vector.shape_cast %74 : vector<1x640x128xf32> to vector<640x128xf32>
    %cst_74 = arith.constant dense<0.000000e+00> : vector<256x128xf32>
    %76 = tpu.matmul %73, %75, %cst_74 {dimension_numbers = #tpu.dot_dimension_numbers<[1], [0], [0], [1], [0, 0, 1, 1], [], []>} : vector<256x640xf32>, vector<640x128xf32>, vector<256x128xf32> -> vector<256x128xf32>
    %77 = arith.addf %71, %76 : vector<256x128xf32>
    %78 = vector.extract_strided_slice %64 {offsets = [2, 0, 0], sizes = [16, 16, 640], strides = [1, 1, 1]} : vector<20x16x640xf32> to vector<16x16x640xf32>
    %79 = vector.shape_cast %78 : vector<16x16x640xf32> to vector<256x640xf32>
    %c2_75 = arith.constant 2 : index
    %c0_76 = arith.constant 0 : index
    %c0_77 = arith.constant 0 : index
    %80 = vector.load %arg6[%c2_75, %c0_76, %c0_77] : memref<5x640x128xf32, #tpu.memory_space<vmem>>, vector<1x640x128xf32>
    %81 = vector.shape_cast %80 : vector<1x640x128xf32> to vector<640x128xf32>
    %cst_78 = arith.constant dense<0.000000e+00> : vector<256x128xf32>
    %82 = tpu.matmul %79, %81, %cst_78 {dimension_numbers = #tpu.dot_dimension_numbers<[1], [0], [0], [1], [0, 0, 1, 1], [], []>} : vector<256x640xf32>, vector<640x128xf32>, vector<256x128xf32> -> vector<256x128xf32>
    %83 = arith.addf %77, %82 : vector<256x128xf32>
    %84 = vector.extract_strided_slice %64 {offsets = [3, 0, 0], sizes = [16, 16, 640], strides = [1, 1, 1]} : vector<20x16x640xf32> to vector<16x16x640xf32>
    %85 = vector.shape_cast %84 : vector<16x16x640xf32> to vector<256x640xf32>
    %c3_79 = arith.constant 3 : index
    %c0_80 = arith.constant 0 : index
    %c0_81 = arith.constant 0 : index
    %86 = vector.load %arg6[%c3_79, %c0_80, %c0_81] : memref<5x640x128xf32, #tpu.memory_space<vmem>>, vector<1x640x128xf32>
    %87 = vector.shape_cast %86 : vector<1x640x128xf32> to vector<640x128xf32>
    %cst_82 = arith.constant dense<0.000000e+00> : vector<256x128xf32>
    %88 = tpu.matmul %85, %87, %cst_82 {dimension_numbers = #tpu.dot_dimension_numbers<[1], [0], [0], [1], [0, 0, 1, 1], [], []>} : vector<256x640xf32>, vector<640x128xf32>, vector<256x128xf32> -> vector<256x128xf32>
    %89 = arith.addf %83, %88 : vector<256x128xf32>
    %90 = vector.extract_strided_slice %64 {offsets = [4, 0, 0], sizes = [16, 16, 640], strides = [1, 1, 1]} : vector<20x16x640xf32> to vector<16x16x640xf32>
    %91 = vector.shape_cast %90 : vector<16x16x640xf32> to vector<256x640xf32>
    %c4_83 = arith.constant 4 : index
    %c0_84 = arith.constant 0 : index
    %c0_85 = arith.constant 0 : index
    %92 = vector.load %arg6[%c4_83, %c0_84, %c0_85] : memref<5x640x128xf32, #tpu.memory_space<vmem>>, vector<1x640x128xf32>
    %93 = vector.shape_cast %92 : vector<1x640x128xf32> to vector<640x128xf32>
    %cst_86 = arith.constant dense<0.000000e+00> : vector<256x128xf32>
    %94 = tpu.matmul %91, %93, %cst_86 {dimension_numbers = #tpu.dot_dimension_numbers<[1], [0], [0], [1], [0, 0, 1, 1], [], []>} : vector<256x640xf32>, vector<640x128xf32>, vector<256x128xf32> -> vector<256x128xf32>
    %95 = arith.addf %89, %94 : vector<256x128xf32>
    %c0_87 = arith.constant 0 : index
    %c0_88 = arith.constant 0 : index
    %96 = vector.load %arg7[%c0_87, %c0_88] : memref<1x128xf32, #tpu.memory_space<vmem>>, vector<1x128xf32>
    %97 = vector.broadcast %96 : vector<1x128xf32> to vector<256x128xf32>
    %98 = arith.addf %95, %97 : vector<256x128xf32>
    %99 = vector.shape_cast %98 : vector<256x128xf32> to vector<1x256x128xf32>
    %c0_89 = arith.constant 0 : index
    %c0_90 = arith.constant 0 : index
    %c0_91 = arith.constant 0 : index
    %100 = vector.load %arg8[%c0_89, %c0_90, %c0_91] : memref<1x256x128xf32, #tpu.memory_space<vmem>>, vector<1x256x128xf32>
    tpu.vector_store %arg8[%c0_89, %c0_90, %c0_91], %99 {strides = array<i32>} : memref<1x256x128xf32, #tpu.memory_space<vmem>>, vector<1x256x128xf32>,
    return
  }
  func.func @transform_0(%arg0: i32) -> (i32, i32, i32) {
    %c0_i32 = arith.constant 0 : i32
    %c0_i32_0 = arith.constant 0 : i32
    %c0_i32_1 = arith.constant 0 : i32
    return %arg0, %c0_i32, %c0_i32_0 : i32, i32, i32
  }
  func.func @transform_1(%arg0: i32) -> (i32, i32) {
    %c0_i32 = arith.constant 0 : i32
    %c0_i32_0 = arith.constant 0 : i32
    %c0_i32_1 = arith.constant 0 : i32
    return %c0_i32, %c0_i32_0 : i32, i32
  }
  func.func @transform_2(%arg0: i32) -> (i32, i32) {
    %c0_i32 = arith.constant 0 : i32
    %c0_i32_0 = arith.constant 0 : i32
    %c0_i32_1 = arith.constant 0 : i32
    return %c0_i32, %c0_i32_0 : i32, i32
  }
  func.func @transform_3(%arg0: i32) -> (i32, i32, i32) {
    %c0_i32 = arith.constant 0 : i32
    %c0_i32_0 = arith.constant 0 : i32
    %c0_i32_1 = arith.constant 0 : i32
    %c0_i32_2 = arith.constant 0 : i32
    return %c0_i32, %c0_i32_0, %c0_i32_1 : i32, i32, i32
  }
  func.func @transform_4(%arg0: i32) -> (i32, i32) {
    %c0_i32 = arith.constant 0 : i32
    %c0_i32_0 = arith.constant 0 : i32
    %c0_i32_1 = arith.constant 0 : i32
    return %c0_i32, %c0_i32_0 : i32, i32
  }
  func.func @transform_5(%arg0: i32) -> (i32, i32, i32) {
    %c0_i32 = arith.constant 0 : i32
    %c0_i32_0 = arith.constant 0 : i32
    %c0_i32_1 = arith.constant 0 : i32
    %c0_i32_2 = arith.constant 0 : i32
    return %c0_i32, %c0_i32_0, %c0_i32_1 : i32, i32, i32
  }
  func.func @transform_6(%arg0: i32) -> (i32, i32) {
    %c0_i32 = arith.constant 0 : i32
    %c0_i32_0 = arith.constant 0 : i32
    %c0_i32_1 = arith.constant 0 : i32
    return %c0_i32, %c0_i32_0 : i32, i32
  }
  func.func @transform_7(%arg0: i32) -> (i32, i32, i32) {
    %c0_i32 = arith.constant 0 : i32
    %c0_i32_0 = arith.constant 0 : i32
    %c0_i32_1 = arith.constant 0 : i32
    return %arg0, %c0_i32, %c0_i32_0 : i32, i32, i32
  }
}

</mosaic_0001>

<bundles_post_ra>
// kernel: srcnn_forward.1
= control target key start
LH: loop header
LB: loop body
LE: loop exit
PB: predicated region body
PF: predicated region fallthrough
CT: control target
= control target key end

     0   :  { %s13827_s24 = smov 0   ;;  %s21003_s0 = inlined_call_operand.vmem [shape: f32[2,256,128], index: 0, kind: input, shape index: {}]   ;;  %s21004_s1 = inlined_call_operand.vmem [shape: f32[128,128], index: 1, kind: input, shape index: {}]   ;;  %s21005_s2 = inlined_call_operand.vmem [shape: f32[1,128], index: 2, kind: input, shape index: {}]   ;;  %s21006_s3 = inlined_call_operand.vmem [shape: f32[5,640,128], index: 3, kind: input, shape index: {}]   ;;  %s21007_s4 = inlined_call_operand.vmem [shape: f32[1,128], index: 4, kind: input, shape index: {}]   ;;  %s21008_s5 = inlined_call_operand.vmem [shape: f32[5,640,128], index: 5, kind: input, shape index: {}]   ;;  %s21009_s6 = inlined_call_operand.vmem [shape: f32[1,128], index: 6, kind: input, shape index: {}]   ;;  %s21010_s7 = inlined_call_operand.vmem [shape: f32[2,256,128], index: 7, kind: output, shape index: {}]  }
   0x1 LB: > { %s9164_s25 = sadd.s32 4294967295, %s13783_s24   ;;  %p9168_p0 = scmp.ge.s32.totalorder %s13783_s24, 1  ;;  %s13783_s24 = sphi %s13827_s24, %s17_s24  }
   0x2   : > { %p237_p1 = scmp.lt.s32.totalorder %s13783_s24, 3 }
   0x4   : > { %p238_p2 = pnand %p9168_p0, %p237_p1 }
   0x6   : > { %241 = sbr.rel (%p238_p2) target bundleno = 2368 (0x940), region = 48 }
   0xd   : > { %v311_v0 = vld [vmem:[%s21004_s1] sm:$0xff]  ;;  %v312_v1 = vld [vmem:[%s21004_s1 + $0x8] sm:$0xff]  ;;  %v313_v2 = vld [vmem:[%s21004_s1 + $0x10] sm:$0xff]  ;;  %p269_p3 = scmp.lt.s32.totalorder %s9164_s25, 1  ;;  %v21011_v5 = vmov 0.0|0.0  }
   0xe   : > { %v11228_v3 = vpack.c.bf16 %v312_v1, %v311_v0  ;;  %v314_v4 = vld [vmem:[%s21004_s1 + $0x18] sm:$0xff]  ;;  %11260 = vmatprep.subr.bf16.mxu1 %v21011_v5  ;;  %v315_v7 = vld [vmem:[%s21004_s1 + $0x20] sm:$0xff]  ;;  %v316_v8 = vld [vmem:[%s21004_s1 + $0x28] sm:$0xff] }
   0xf   : > { %v11232_v6 = vpack.c.bf16 %v314_v4, %v313_v2  ;;  %s21691_s25 = smov (!%p269_p3, %s9164_s25), 1  ;;  %v11236_v9 = vpack.c.bf16 %v316_v8, %v315_v7  ;;  %v9174_v10 = vld [vmem:[%s21006_s3 + $0x280] sm:$0xff]  ;;  %v9175_v11 = vld [vmem:[%s21006_s3 + $0x288] sm:$0xff]  ;;  %v317_v12 = vld [vmem:[%s21004_s1 + $0x30] sm:$0xff] }
  0x10   : > { %11229 = vmatprep.subr.bf16.mxu0 %v11228_v3  ;;  %s9818_s15 = sshll.u32 %s21691_s25, 8  ;;  %v318_v13 = vld [vmem:[%s21004_s1 + $0x38] sm:$0xff]  ;;  %v11261_v15 = vpack.c.bf16 %v9175_v11, %v9174_v10  ;;  %v319_v17 = vld [vmem:[%s21004_s1 + $0x40] sm:$0xff]  ;;  %v320_v18 = vld [vmem:[%s21004_s1 + $0x48] sm:$0xff] }
  0x11   : > { %11231 = vmatpush3.bf16.msra.mxu0 %v11228_v3  ;;  %s13862_s18 = scalar_lea.vmem %s21003_s0, %s9818_s15  ;;  %v11240_v16 = vpack.c.bf16 %v318_v13, %v317_v12  ;;  %v11244_v19 = vpack.c.bf16 %v320_v18, %v319_v17  ;;  %v321_v20 = vld [vmem:[%s21004_s1 + $0x50] sm:$0xff]  ;;  %v322_v21 = vld [vmem:[%s21004_s1 + $0x58] sm:$0xff]  ;;  %v9178_v24 = vld [vmem:[%s21006_s3 + $0x2a0] sm:$0xff]  ;;  %s20877_s11 = scalar_lea.vmem %s21010_s7, %s9818_s15 }
  0x12   : > { %11233 = vmatprep.subr.bf16.mxu0 %v11232_v6  ;;  %v279_v14 = vld [vmem:[%s13862_s18] sm:$0xff]  ;;  %11262 = vmatpush1.bf16.msra.mxu1 %v11261_v15  ;;  %v9176_v22 = vld [vmem:[%s21006_s3 + $0x290] sm:$0xff]  ;;  %v9177_v23 = vld [vmem:[%s21006_s3 + $0x298] sm:$0xff]  ;;  %v11248_v25 = vpack.c.bf16 %v322_v21, %v321_v20 }
  0x13   : > { %10380 = vmatprep.mubr.f32.mxu0 %v279_v14  ;;  %11263 = vmatprep.subr.bf16.mxu1 %v21011_v5  ;;  %v11264_v26 = vpack.c.bf16 %v9177_v23, %v9176_v22  ;;  %v9179_v27 = vld [vmem:[%s21006_s3 + $0x2a8] sm:$0xff]  ;;  %v323_v28 = vld [vmem:[%s21004_s1 + $0x60] sm:$0xff]  ;;  %v9180_v31 = vld [vmem:[%s21006_s3 + $0x2b0] sm:$0xff] }
  0x14   : > { %v324_v29 = vld [vmem:[%s21004_s1 + $0x68] sm:$0xff]  ;;  %v11267_v30 = vpack.c.bf16 %v9179_v27, %v9178_v24  ;;  %v9181_v32 = vld [vmem:[%s21006_s3 + $0x2b8] sm:$0xff]  ;;  %v325_v34 = vld [vmem:[%s21004_s1 + $0x70] sm:$0xff] }
  0x15   : > { %11235 = vmatpush3.bf16.msra.mxu0 %v11232_v6  ;;  %v11252_v33 = vpack.c.bf16 %v324_v29, %v323_v28  ;;  %v326_v35 = vld [vmem:[%s21004_s1 + $0x78] sm:$0xff]  ;;  %v11270_v36 = vpack.c.bf16 %v9181_v32, %v9180_v31  ;;  %v9182_v37 = vld [vmem:[%s21006_s3 + $0x2c0] sm:$0xff]  ;;  %v9183_v38 = vld [vmem:[%s21006_s3 + $0x2c8] sm:$0xff] }
  0x16   : > { %11237 = vmatprep.subr.bf16.mxu0 %v11236_v9  ;;  %11265 = vmatpush1.bf16.msra.mxu1 %v11264_v26  ;;  %v11256_v39 = vpack.c.bf16 %v326_v35, %v325_v34  ;;  %v9238_v40 = vld [vmem:[%s21006_s3 + $0x480] sm:$0xff]  ;;  %v9239_v41 = vld [vmem:[%s21006_s3 + $0x488] sm:$0xff]  ;;  %v11273_v42 = vpack.c.bf16 %v9183_v38, %v9182_v37  ;;  %v9184_v43 = vld [vmem:[%s21006_s3 + $0x2d0] sm:$0xff] }
  0x17   : > { %11266 = vmatprep.subr.bf16.mxu1 %v21011_v5  ;;  %v9185_v44 = vld [vmem:[%s21006_s3 + $0x2d8] sm:$0xff]  ;;  %v11356_v45 = vpack.c.bf16 %v9239_v41, %v9238_v40  ;;  %v9240_v47 = vld [vmem:[%s21006_s3 + $0x490] sm:$0xff]  ;;  %v280_v49 = vld [vmem:[%s13862_s18 + $0x8] sm:$0xff] }
  0x18   : > { %v11276_v46 = vpack.c.bf16 %v9185_v44, %v9184_v43  ;;  %v9241_v48 = vld [vmem:[%s21006_s3 + $0x498] sm:$0xff]  ;;  %v9186_v50 = vld [vmem:[%s21006_s3 + $0x2e0] sm:$0xff]  ;;  %v9187_v51 = vld [vmem:[%s21006_s3 + $0x2e8] sm:$0xff] }
  0x19   : > { %11239 = vmatpush3.bf16.msra.mxu0 %v11236_v9  ;;  %v281_v52 = vld [vmem:[%s13862_s18 + $0x10] sm:$0xff]  ;;  %v11360_v53 = vpack.c.bf16 %v9241_v48, %v9240_v47  ;;  %v11279_v54 = vpack.c.bf16 %v9187_v51, %v9186_v50  ;;  %v9242_v55 = vld [vmem:[%s21006_s3 + $0x4a0] sm:$0xff]  ;;  %v9243_v56 = vld [vmem:[%s21006_s3 + $0x4a8] sm:$0xff] }
  0x1a   : > { %11241 = vmatprep.subr.bf16.mxu0 %v11240_v16  ;;  %11268 = vmatpush1.bf16.msra.mxu1 %v11267_v30  ;;  %v282_v57 = vld [vmem:[%s13862_s18 + $0x18] sm:$0xff]  ;;  %v9188_v58 = vld [vmem:[%s21006_s3 + $0x2f0] sm:$0xff]  ;;  %v283_v60 = vld [vmem:[%s13862_s18 + $0x20] sm:$0xff]  ;;  %v11364_v61 = vpack.c.bf16 %v9243_v56, %v9242_v55  ;;  %v13786_v55 = vmov 0.0  }
  0x1b   : > { %11269 = vmatprep.subr.bf16.mxu1 %v21011_v5  ;;  %v9189_v59 = vld [vmem:[%s21006_s3 + $0x2f8] sm:$0xff]  ;;  %v9244_v63 = vld [vmem:[%s21006_s3 + $0x4b0] sm:$0xff]  ;;  %v284_v1 = vld [vmem:[%s13862_s18 + $0x28] sm:$0xff]  ;;  %591 = vst [vmem:[#allocation2] sm:$0xff] %v13786_v55 }
  0x1c   : > { %v11282_v62 = vpack.c.bf16 %v9189_v59, %v9188_v58  ;;  %v9245_v0 = vld [vmem:[%s21006_s3 + $0x4b8] sm:$0xff]  ;;  %v9190_v2 = vld [vmem:[%s21006_s3 + $0x300] sm:$0xff]  ;;  %v9191_v3 = vld [vmem:[%s21006_s3 + $0x308] sm:$0xff]  ;;  %592 = vst [vmem:[#allocation2 + $0x8] sm:$0xff] %v13786_v55 }
  0x1d   : > { %11243 = vmatpush3.bf16.msra.mxu0 %v11240_v16  ;;  %v285_v4 = vld [vmem:[%s13862_s18 + $0x30] sm:$0xff]  ;;  %v11368_v6 = vpack.c.bf16 %v9245_v0, %v9244_v63  ;;  %v11285_v7 = vpack.c.bf16 %v9191_v3, %v9190_v2  ;;  %v9246_v8 = vld [vmem:[%s21006_s3 + $0x4c0] sm:$0xff]  ;;  %v9247_v9 = vld [vmem:[%s21006_s3 + $0x4c8] sm:$0xff]  ;;  %593 = vst [vmem:[#allocation2 + $0x10] sm:$0xff] %v13786_v55 }
  0x1e   : > { %11245 = vmatprep.subr.bf16.mxu0 %v11244_v19  ;;  %11271 = vmatpush1.bf16.msra.mxu1 %v11270_v36  ;;  %v286_v10 = vld [vmem:[%s13862_s18 + $0x38] sm:$0xff]  ;;  %v9192_v11 = vld [vmem:[%s21006_s3 + $0x310] sm:$0xff]  ;;  %v287_v13 = vld [vmem:[%s13862_s18 + $0x40] sm:$0xff]  ;;  %v11372_v14 = vpack.c.bf16 %v9247_v9, %v9246_v8  ;;  %594 = vst [vmem:[#allocation2 + $0x18] sm:$0xff] %v13786_v55 }
  0x1f   : > { %11272 = vmatprep.subr.bf16.mxu1 %v21011_v5  ;;  %v9193_v12 = vld [vmem:[%s21006_s3 + $0x318] sm:$0xff]  ;;  %v9248_v16 = vld [vmem:[%s21006_s3 + $0x4d0] sm:$0xff]  ;;  %v288_v18 = vld [vmem:[%s13862_s18 + $0x48] sm:$0xff]  ;;  %595 = vst [vmem:[#allocation2 + $0x20] sm:$0xff] %v13786_v55 }
  0x20   : > { %v11288_v15 = vpack.c.bf16 %v9193_v12, %v9192_v11  ;;  %v9249_v17 = vld [vmem:[%s21006_s3 + $0x4d8] sm:$0xff]  ;;  %v9195_v20 = vld [vmem:[%s21006_s3 + $0x328] sm:$0xff]  ;;  %v289_v21 = vld [vmem:[%s13862_s18 + $0x50] sm:$0xff]  ;;  %596 = vst [vmem:[#allocation2 + $0x28] sm:$0xff] %v13786_v55 }
  0x21   : > { %11247 = vmatpush3.bf16.msra.mxu0 %v11244_v19  ;;  %v9194_v19 = vld [vmem:[%s21006_s3 + $0x320] sm:$0xff]  ;;  %v11376_v22 = vpack.c.bf16 %v9249_v17, %v9248_v16  ;;  %v290_v24 = vld [vmem:[%s13862_s18 + $0x58] sm:$0xff]  ;;  %v292_v29 = vld [vmem:[%s13862_s18 + $0x68] sm:$0xff]  ;;  %597 = vst [vmem:[#allocation2 + $0x30] sm:$0xff] %v13786_v55 }
  0x22   : > { %11249 = vmatprep.subr.bf16.mxu0 %v11248_v25  ;;  %11274 = vmatpush1.bf16.msra.mxu1 %v11273_v42  ;;  %v11291_v23 = vpack.c.bf16 %v9195_v20, %v9194_v19  ;;  %v9197_v26 = vld [vmem:[%s21006_s3 + $0x338] sm:$0xff]  ;;  %v291_v27 = vld [vmem:[%s13862_s18 + $0x60] sm:$0xff]  ;;  %v9199_v31 = vld [vmem:[%s21006_s3 + $0x348] sm:$0xff]  ;;  %598 = vst [vmem:[#allocation2 + $0x38] sm:$0xff] %v13786_v55 }
  0x23   : > { %11275 = vmatprep.subr.bf16.mxu1 %v21011_v5  ;;  %v9198_v30 = vld [vmem:[%s21006_s3 + $0x340] sm:$0xff]  ;;  %v293_v32 = vld [vmem:[%s13862_s18 + $0x70] sm:$0xff]  ;;  %v294_v34 = vld [vmem:[%s13862_s18 + $0x78] sm:$0xff]  ;;  %599 = vst [vmem:[#allocation2 + $0x40] sm:$0xff] %v13786_v55 }
  0x24   : > { %v9200_v35 = vld [vmem:[%s21006_s3 + $0x350] sm:$0xff]  ;;  %v9201_v36 = vld [vmem:[%s21006_s3 + $0x358] sm:$0xff]  ;;  %v295_v37 = vld [vmem:[%s13862_s18 + $0x80] sm:$0xff]  ;;  %602 = vst [vmem:[#allocation2 + $0x58] sm:$0xff] %v13786_v55 }
  0x25   : > { %11251 = vmatpush3.bf16.msra.mxu0 %v11248_v25  ;;  %v9196_v25 = vld [vmem:[%s21006_s3 + $0x330] sm:$0xff]  ;;  %v11300_v38 = vpack.c.bf16 %v9201_v36, %v9200_v35  ;;  %v9202_v40 = vld [vmem:[%s21006_s3 + $0x360] sm:$0xff]  ;;  %v9203_v41 = vld [vmem:[%s21006_s3 + $0x368] sm:$0xff]  ;;  %603 = vst [vmem:[#allocation2 + $0x60] sm:$0xff] %v13786_v55 }
  0x26   : > { %11253 = vmatprep.subr.bf16.mxu0 %v11252_v33  ;;  %11277 = vmatpush1.bf16.msra.mxu1 %v11276_v46  ;;  %v11294_v28 = vpack.c.bf16 %v9197_v26, %v9196_v25  ;;  %v297_v42 = vld [vmem:[%s13862_s18 + $0x90] sm:$0xff]  ;;  %v11303_v43 = vpack.c.bf16 %v9203_v41, %v9202_v40  ;;  %v298_v44 = vld [vmem:[%s13862_s18 + $0x98] sm:$0xff]  ;;  %v300_v46 = vld [vmem:[%s13862_s18 + $0xa8] sm:$0xff]  ;;  %606 = vst [vmem:[#allocation2 + $0x78] sm:$0xff] %v13786_v55 }
  0x27   : > { %11278 = vmatprep.subr.bf16.mxu1 %v21011_v5  ;;  %v301_v47 = vld [vmem:[%s13862_s18 + $0xb0] sm:$0xff]  ;;  %v302_v48 = vld [vmem:[%s13862_s18 + $0xb8] sm:$0xff]  ;;  %v304_v50 = vld [vmem:[%s13862_s18 + $0xc8] sm:$0xff]  ;;  %607 = vst [vmem:[#allocation2 + $0x80] sm:$0xff] %v13786_v55 }
  0x28   : > { %v305_v51 = vld [vmem:[%s13862_s18 + $0xd0] sm:$0xff]  ;;  %610 = vst [vmem:[#allocation2 + $0x98] sm:$0xff] %v13786_v55  ;;  %611 = vst [vmem:[#allocation2 + $0xa0] sm:$0xff] %v13786_v55  ;;  %v9250_v56 = vld [vmem:[%s21006_s3 + $0x4e0] sm:$0xff] }
  0x29   : > { %11255 = vmatpush3.bf16.msra.mxu0 %v11252_v33  ;;  %v11297_v33 = vpack.c.bf16 %v9199_v31, %v9198_v30  ;;  %614 = vst [vmem:[#allocation2 + $0xb8] sm:$0xff] %v13786_v55  ;;  %615 = vst [vmem:[#allocation2 + $0xc0] sm:$0xff] %v13786_v55  ;;  %v9204_v58 = vld [vmem:[%s21006_s3 + $0x370] sm:$0xff]  ;;  %v9205_v59 = vld [vmem:[%s21006_s3 + $0x378] sm:$0xff] }
  0x2a   : > { %11257 = vmatprep.subr.bf16.mxu0 %v11256_v39  ;;  %11280 = vmatpush1.bf16.msra.mxu1 %v11279_v54  ;;  %v308_v54 = vld [vmem:[%s13862_s18 + $0xe8] sm:$0xff]  ;;  %618 = vst [vmem:[#allocation2 + $0xd8] sm:$0xff] %v13786_v55  ;;  %619 = vst [vmem:[#allocation2 + $0xe0] sm:$0xff] %v13786_v55  ;;  %v9253_v63 = vld [vmem:[%s21006_s3 + $0x4f8] sm:$0xff] }
  0x2b   : > { %11281 = vmatprep.subr.bf16.mxu1 %v21011_v5  ;;  %622 = vst [vmem:[#allocation2 + $0xf8] sm:$0xff] %v13786_v55  ;;  %623 = vst [vmem:[#allocation2 + $0x100] sm:$0xff] %v13786_v55  ;;  %v309_v0 = vld [vmem:[%s13862_s18 + $0xf0] sm:$0xff]  ;;  %v310_v3 = vld [vmem:[%s13862_s18 + $0xf8] sm:$0xff] }
  0x2c   : > { %626 = vst [vmem:[#allocation2 + $0x118] sm:$0xff] %v13786_v55  ;;  %627 = vst [vmem:[#allocation2 + $0x120] sm:$0xff] %v13786_v55  ;;  %v904_v8 = vld [vmem:[%s21006_s3] sm:$0xff]  ;;  %v14200_v11 = vld [vmem:[#allocation2 + $0x2e] sm:$0xff] }
  0x2d   : > { %11259 = vmatpush3.bf16.msra.mxu0 %v11256_v39  ;;  %v296_v39 = vld [vmem:[%s13862_s18 + $0x88] sm:$0xff]  ;;  %630 = vst [vmem:[#allocation2 + $0x138] sm:$0xff] %v13786_v55  ;;  %631 = vst [vmem:[#allocation2 + $0x140] sm:$0xff] %v13786_v55  ;;  %v9206_v9 = vld [vmem:[%s21006_s3 + $0x380] sm:$0xff] }
  0x2e   : > { %11357 = vmatprep.subr.bf16.mxu0 %v11356_v45  ;;  %11283 = vmatpush1.bf16.msra.mxu1 %v11282_v62  ;;  %634 = vst [vmem:[#allocation2 + $0x158] sm:$0xff] %v13786_v55  ;;  %635 = vst [vmem:[#allocation2 + $0x160] sm:$0xff] %v13786_v55  ;;  %v9252_v62 = vld [vmem:[%s21006_s3 + $0x4f0] sm:$0xff]  ;;  %v907_v17 = vld [vmem:[%s21006_s3 + $0x18] sm:$0xff] }
  0x2f   : > { %11284 = vmatprep.subr.bf16.mxu1 %v21011_v5  ;;  %638 = vst [vmem:[#allocation2 + $0x178] sm:$0xff] %v13786_v55  ;;  %639 = vst [vmem:[#allocation2 + $0x180] sm:$0xff] %v13786_v55  ;;  %v11384_v2 = vpack.c.bf16 %v9253_v63, %v9252_v62  ;;  %v906_v16 = vld [vmem:[%s21006_s3 + $0x10] sm:$0xff]  ;;  %v9209_v20 = vld [vmem:[%s21006_s3 + $0x398] sm:$0xff] }
  0x30   : > { %10381 = vmatmul.mubr.f32.vlgmr.msra.gmra.mrb[0].mxu0 %v280_v49  ;;  %v303_v49 = vld [vmem:[%s13862_s18 + $0xc0] sm:$0xff]  ;;  %642 = vst [vmem:[#allocation2 + $0x198] sm:$0xff] %v13786_v55  ;;  %643 = vst [vmem:[#allocation2 + $0x1a0] sm:$0xff] %v13786_v55  ;;  %v9208_v19 = vld [vmem:[%s21006_s3 + $0x390] sm:$0xff] }
  0x31   : > { %10383 = vmatprep.mubr.f32.mxu0 %v281_v52  ;;  %11359 = vmatpush3.bf16.msra.mxu0 %v11356_v45  ;;  %v299_v45 = vld [vmem:[%s13862_s18 + $0xa0] sm:$0xff]  ;;  %v306_v52 = vld [vmem:[%s13862_s18 + $0xd8] sm:$0xff]  ;;  %646 = vst [vmem:[#allocation2 + $0x1b8] sm:$0xff] %v13786_v55  ;;  %647 = vst [vmem:[#allocation2 + $0x1c0] sm:$0xff] %v13786_v55 }
  0x32   : > { %11361 = vmatprep.subr.bf16.mxu0 %v11360_v53  ;;  %11286 = vmatpush1.bf16.msra.mxu1 %v11285_v7  ;;  %650 = vst [vmem:[#allocation2 + $0x1d8] sm:$0xff] %v13786_v55  ;;  %651 = vst [vmem:[#allocation2 + $0x1e0] sm:$0xff] %v13786_v55  ;;  %v866_v7 = vld [vmem:[#allocation2 + $0x2a] sm:$0xff]  ;;  %v911_v26 = vld [vmem:[%s21006_s3 + $0x38] sm:$0xff] }
  0x33   : > { %11287 = vmatprep.subr.bf16.mxu1 %v21011_v5  ;;  %654 = vst [vmem:[#allocation2 + $0x1f8] sm:$0xff] %v13786_v55  ;;  %655 = vst [vmem:[#allocation2 + $0x200] sm:$0xff] %v13786_v55  ;;  %v910_v25 = vld [vmem:[%s21006_s3 + $0x30] sm:$0xff]  ;;  %v912_v30 = vld [vmem:[%s21006_s3 + $0x40] sm:$0xff] }
  0x34   : > { %10384 = vmatmul.mubr.f32.gmra.mrb[2].mxu0 %v282_v57  ;;  %658 = vst [vmem:[#allocation2 + $0x218] sm:$0xff] %v13786_v55  ;;  %659 = vst [vmem:[#allocation2 + $0x220] sm:$0xff] %v13786_v55  ;;  %v9251_v57 = vld [vmem:[%s21006_s3 + $0x4e8] sm:$0xff]  ;;  %v915_v35 = vld [vmem:[%s21006_s3 + $0x58] sm:$0xff] }
  0x35   : > { %10386 = vmatprep.mubr.f32.mxu0 %v283_v60  ;;  %11363 = vmatpush3.bf16.msra.mxu0 %v11360_v53  ;;  %v307_v53 = vld [vmem:[%s13862_s18 + $0xe0] sm:$0xff]  ;;  %662 = vst [vmem:[#allocation2 + $0x238] sm:$0xff] %v13786_v55  ;;  %663 = vst [vmem:[#allocation2 + $0x240] sm:$0xff] %v13786_v55  ;;  %v11380_v60 = vpack.c.bf16 %v9251_v57, %v9250_v56  ;;  %v917_v41 = vld [vmem:[%s21006_s3 + $0x68] sm:$0xff] }
  0x36   : > { %11365 = vmatprep.subr.bf16.mxu0 %v11364_v61  ;;  %11289 = vmatpush1.bf16.msra.mxu1 %v11288_v15  ;;  %664 = vst [vmem:[#allocation2 + $0x248] sm:$0xff] %v13786_v55  ;;  %665 = vst [vmem:[#allocation2 + $0x250] sm:$0xff] %v13786_v55  ;;  %v9217_v56 = vld [vmem:[%s21006_s3 + $0x3d8] sm:$0xff]  ;;  %v924_v57 = vld [vmem:[%s21006_s3 + $0xa0] sm:$0xff] }
  0x37   : > { %11290 = vmatprep.subr.bf16.mxu1 %v21011_v5  ;;  %666 = vst [vmem:[#allocation2 + $0x258] sm:$0xff] %v13786_v55  ;;  %667 = vst [vmem:[#allocation2 + $0x260] sm:$0xff] %v13786_v55  ;;  %v927_v62 = vld [vmem:[%s21006_s3 + $0xb8] sm:$0xff] }
  0x38   : > { %10387 = vmatmul.mubr.f32.gmra.mrb[4].mxu0 %v284_v1  ;;  %668 = vst [vmem:[#allocation2 + $0x268] sm:$0xff] %v13786_v55  ;;  %669 = vst [vmem:[#allocation2 + $0x270] sm:$0xff] %v13786_v55  ;;  %v14180_v1 = vld [vmem:[#allocation2 + $0x27] sm:$0xff] }
  0x39   : > { %10389 = vmatprep.mubr.f32.mxu0 %v285_v4  ;;  %11367 = vmatpush3.bf16.msra.mxu0 %v11364_v61  ;;  %670 = vst [vmem:[#allocation2 + $0x278] sm:$0xff] %v13786_v55  ;;  %4850 = vst [vmem:[#allocation3] sm:$0xff] %v13786_v55  ;;  %v11306_v61 = vpack.c.bf16 %v9205_v59, %v9204_v58  ;;  %v14185_v4 = vld [vmem:[#allocation2 + $0x26] sm:$0xff] }
  0x3a   : > { %11369 = vmatprep.subr.bf16.mxu0 %v11368_v6  ;;  %11292 = vmatpush1.bf16.msra.mxu1 %v11291_v23  ;;  %4851 = vst [vmem:[#allocation3 + $0x8] sm:$0xff] %v13786_v55  ;;  %4852 = vst [vmem:[#allocation3 + $0x10] sm:$0xff] %v13786_v55  ;;  %v909_v23 = vld [vmem:[%s21006_s3 + $0x28] sm:$0xff] }
  0x3b   : > { %11293 = vmatprep.subr.bf16.mxu1 %v21011_v5  ;;  %4853 = vst [vmem:[#allocation3 + $0x18] sm:$0xff] %v13786_v55  ;;  %4854 = vst [vmem:[#allocation3 + $0x20] sm:$0xff] %v13786_v55  ;;  %1129 = vmatprep.mubr.f32.mxu1 %v14180_v1  ;;  %v925_v59 = vld [vmem:[%s21006_s3 + $0xa8] sm:$0xff] }
  0x3c   : > { %10390 = vmatmul.mubr.f32.gmra.mrb[6].mxu0 %v286_v10  ;;  %4855 = vst [vmem:[#allocation3 + $0x28] sm:$0xff] %v13786_v55  ;;  %4856 = vst [vmem:[#allocation3 + $0x30] sm:$0xff] %v13786_v55  ;;  %v9207_v10 = vld [vmem:[%s21006_s3 + $0x388] sm:$0xff] }
  0x3d   : > { %10392 = vmatprep.mubr.f32.mxu0 %v287_v13  ;;  %11371 = vmatpush3.bf16.msra.mxu0 %v11368_v6  ;;  %4857 = vst [vmem:[#allocation3 + $0x38] sm:$0xff] %v13786_v55  ;;  %4858 = vst [vmem:[#allocation3 + $0x40] sm:$0xff] %v13786_v55  ;;  %v14188_v6 = vld [vmem:[#allocation2 + $0x2f] sm:$0xff]  ;;  %v11309_v12 = vpack.c.bf16 %v9207_v10, %v9206_v9 }
  0x3e   : > { %11373 = vmatprep.subr.bf16.mxu0 %v11372_v14  ;;  %11295 = vmatpush1.bf16.msra.mxu1 %v11294_v28  ;;  %4861 = vst [vmem:[#allocation3 + $0x58] sm:$0xff] %v13786_v55  ;;  %4862 = vst [vmem:[#allocation3 + $0x60] sm:$0xff] %v13786_v55  ;;  %v867_v13 = vld [vmem:[#allocation2 + $0x32] sm:$0xff]  ;;  %v9210_v28 = vld [vmem:[%s21006_s3 + $0x3a0] sm:$0xff] }
  0x3f   : > { %11296 = vmatprep.subr.bf16.mxu1 %v21011_v5  ;;  %4865 = vst [vmem:[#allocation3 + $0x78] sm:$0xff] %v13786_v55  ;;  %4866 = vst [vmem:[#allocation3 + $0x80] sm:$0xff] %v13786_v55  ;;  %v930_v10 = vld [vmem:[%s21006_s3 + $0xd0] sm:$0xff] }
  0x40   : > { %10393 = vmatmul.mubr.f32.gmra.mrb[8].mxu0 %v288_v18  ;;  %4869 = vst [vmem:[#allocation3 + $0x98] sm:$0xff] %v13786_v55  ;;  %4870 = vst [vmem:[#allocation3 + $0xa0] sm:$0xff] %v13786_v55  ;;  %v11392_v18 = vpack.c.bf16 %v907_v17, %v906_v16  ;;  %v932_v17 = vld [vmem:[%s21006_s3 + $0xe0] sm:$0xff] }
  0x41   : > { %10395 = vmatprep.mubr.f32.mxu0 %v289_v21  ;;  %11375 = vmatpush3.bf16.msra.mxu0 %v11372_v14  ;;  %4873 = vst [vmem:[#allocation3 + $0xb8] sm:$0xff] %v13786_v55  ;;  %4874 = vst [vmem:[#allocation3 + $0xc0] sm:$0xff] %v13786_v55  ;;  %v905_v14 = vld [vmem:[%s21006_s3 + $0x8] sm:$0xff]  ;;  %v908_v21 = vld [vmem:[%s21006_s3 + $0x20] sm:$0xff] }
  0x42   : > { %11377 = vmatprep.subr.bf16.mxu0 %v11376_v22  ;;  %11298 = vmatpush1.bf16.msra.mxu1 %v11297_v33  ;;  %4877 = vst [vmem:[#allocation3 + $0xd8] sm:$0xff] %v13786_v55  ;;  %4878 = vst [vmem:[#allocation3 + $0xe0] sm:$0xff] %v13786_v55  ;;  %v11389_v15 = vpack.c.bf16 %v905_v14, %v904_v8  ;;  %v929_v8 = vld [vmem:[%s21006_s3 + $0xc8] sm:$0xff]  ;;  %v9221_v14 = vld [vmem:[%s21006_s3 + $0x3f8] sm:$0xff] }
  0x43   : > { %11299 = vmatprep.subr.bf16.mxu1 %v21011_v5  ;;  %4881 = vst [vmem:[#allocation3 + $0xf8] sm:$0xff] %v13786_v55  ;;  %4882 = vst [vmem:[#allocation3 + $0x100] sm:$0xff] %v13786_v55 }
  0x44   : > { %10396 = vmatmul.mubr.f32.gmra.mrb[10].mxu0 %v290_v24  ;;  %4885 = vst [vmem:[#allocation3 + $0x118] sm:$0xff] %v13786_v55  ;;  %4886 = vst [vmem:[#allocation3 + $0x120] sm:$0xff] %v13786_v55  ;;  %v11395_v24 = vpack.c.bf16 %v909_v23, %v908_v21  ;;  %v935_v21 = vld [vmem:[%s21006_s3 + $0xf8] sm:$0xff]  ;;  %v9223_v23 = vld [vmem:[%s21006_s3 + $0x408] sm:$0xff] }
  0x45   : > { %10398 = vmatprep.mubr.f32.mxu0 %v291_v27  ;;  %11379 = vmatpush3.bf16.msra.mxu0 %v11376_v22  ;;  %4889 = vst [vmem:[#allocation3 + $0x138] sm:$0xff] %v13786_v55  ;;  %4890 = vst [vmem:[#allocation3 + $0x140] sm:$0xff] %v13786_v55  ;;  %v11312_v22 = vpack.c.bf16 %v9209_v20, %v9208_v19  ;;  %v11398_v27 = vpack.c.bf16 %v911_v26, %v910_v25  ;;  %v934_v20 = vld [vmem:[%s21006_s3 + $0xf0] sm:$0xff] }
  0x46   : > { %11301 = vmatpush1.bf16.msra.mxu1 %v11300_v38  ;;  %4893 = vst [vmem:[#allocation3 + $0x158] sm:$0xff] %v13786_v55  ;;  %4894 = vst [vmem:[#allocation3 + $0x160] sm:$0xff] %v13786_v55  ;;  %11381 = vmatprep.subr.bf16.mxu0 %v11380_v60  ;;  %v9213_v38 = vld [vmem:[%s21006_s3 + $0x3b8] sm:$0xff]  ;;  %v9224_v26 = vld [vmem:[%s21006_s3 + $0x410] sm:$0xff] }
  0x47   : > { %11302 = vmatprep.subr.bf16.mxu1 %v21011_v5  ;;  %4897 = vst [vmem:[#allocation3 + $0x178] sm:$0xff] %v13786_v55  ;;  %4898 = vst [vmem:[#allocation3 + $0x180] sm:$0xff] %v13786_v55 }
  0x48   : > { %10399 = vmatmul.mubr.f32.gmra.mrb[12].mxu0 %v292_v29  ;;  %4901 = vst [vmem:[#allocation3 + $0x198] sm:$0xff] %v13786_v55  ;;  %4902 = vst [vmem:[#allocation3 + $0x1a0] sm:$0xff] %v13786_v55  ;;  %v9211_v29 = vld [vmem:[%s21006_s3 + $0x3a8] sm:$0xff] }
  0x49   : > { %10401 = vmatprep.mubr.f32.mxu0 %v293_v32  ;;  %4905 = vst [vmem:[#allocation3 + $0x1b8] sm:$0xff] %v13786_v55  ;;  %4906 = vst [vmem:[#allocation3 + $0x1c0] sm:$0xff] %v13786_v55  ;;  %11383 = vmatpush3.bf16.msra.mxu0 %v11380_v60  ;;  %v11315_v31 = vpack.c.bf16 %v9211_v29, %v9210_v28  ;;  %v913_v32 = vld [vmem:[%s21006_s3 + $0x48] sm:$0xff]  ;;  %v11419_v60 = vpack.c.bf16 %v925_v59, %v924_v57  ;;  %v9226_v29 = vld [vmem:[%s21006_s3 + $0x420] sm:$0xff] }
  0x4a   : > { %11304 = vmatpush1.bf16.msra.mxu1 %v11303_v43  ;;  %4909 = vst [vmem:[#allocation3 + $0x1d8] sm:$0xff] %v13786_v55  ;;  %4910 = vst [vmem:[#allocation3 + $0x1e0] sm:$0xff] %v13786_v55  ;;  %11385 = vmatprep.subr.bf16.mxu0 %v11384_v2  ;;  %v11401_v33 = vpack.c.bf16 %v913_v32, %v912_v30  ;;  %v918_v43 = vld [vmem:[%s21006_s3 + $0x70] sm:$0xff]  ;;  %v9227_v30 = vld [vmem:[%s21006_s3 + $0x428] sm:$0xff] }
  0x4b   : > { %11305 = vmatprep.subr.bf16.mxu1 %v21011_v5  ;;  %4913 = vst [vmem:[#allocation3 + $0x1f8] sm:$0xff] %v13786_v55  ;;  %4914 = vst [vmem:[#allocation3 + $0x200] sm:$0xff] %v13786_v55  ;;  %v9228_v32 = vld [vmem:[%s21006_s3 + $0x430] sm:$0xff] }
  0x4c   : > { %10402 = vmatmul.mubr.f32.gmra.mrb[14].mxu0 %v294_v34  ;;  %4917 = vst [vmem:[#allocation3 + $0x218] sm:$0xff] %v13786_v55  ;;  %4918 = vst [vmem:[#allocation3 + $0x220] sm:$0xff] %v13786_v55  ;;  %v914_v34 = vld [vmem:[%s21006_s3 + $0x50] sm:$0xff] }
  0x4d   : > { %10404 = vmatprep.mubr.f32.mxu0 %v295_v37  ;;  %4921 = vst [vmem:[#allocation3 + $0x238] sm:$0xff] %v13786_v55  ;;  %4922 = vst [vmem:[#allocation3 + $0x240] sm:$0xff] %v13786_v55  ;;  %11387 = vmatpush3.bf16.msra.mxu0 %v11384_v2  ;;  %v11404_v36 = vpack.c.bf16 %v915_v35, %v914_v34  ;;  %v9212_v37 = vld [vmem:[%s21006_s3 + $0x3b0] sm:$0xff]  ;;  %v9219_v2 = vld [vmem:[%s21006_s3 + $0x3e8] sm:$0xff] }
  0x4e   : > { %4923 = vst [vmem:[#allocation3 + $0x248] sm:$0xff] %v13786_v55  ;;  %4924 = vst [vmem:[#allocation3 + $0x250] sm:$0xff] %v13786_v55  ;;  %11307 = vmatpush1.bf16.msra.mxu1 %v11306_v61  ;;  %11388 = vmatprep.subr.bf16.mxu0 %v21011_v5  ;;  %v11318_v40 = vpack.c.bf16 %v9213_v38, %v9212_v37  ;;  %v926_v61 = vld [vmem:[%s21006_s3 + $0xb0] sm:$0xff]  ;;  %v9230_v35 = vld [vmem:[%s21006_s3 + $0x440] sm:$0xff] }
  0x4f   : > { %4925 = vst [vmem:[#allocation3 + $0x258] sm:$0xff] %v13786_v55  ;;  %4926 = vst [vmem:[#allocation3 + $0x260] sm:$0xff] %v13786_v55  ;;  %11308 = vmatprep.subr.bf16.mxu1 %v21011_v5  ;;  %v11422_v63 = vpack.c.bf16 %v927_v62, %v926_v61  ;;  %v9232_v38 = vld [vmem:[%s21006_s3 + $0x450] sm:$0xff] }
  0x50   : > { %10405 = vmatmul.mubr.f32.gmra.mrb[16].mxu0 %v296_v39  ;;  %4927 = vst [vmem:[#allocation3 + $0x268] sm:$0xff] %v13786_v55  ;;  %4928 = vst [vmem:[#allocation3 + $0x270] sm:$0xff] %v13786_v55  ;;  %v916_v39 = vld [vmem:[%s21006_s3 + $0x60] sm:$0xff] }
  0x51   : > { %10407 = vmatprep.mubr.f32.mxu0 %v297_v42  ;;  %4929 = vst [vmem:[#allocation3 + $0x278] sm:$0xff] %v13786_v55  ;;  %1130 = vmatmul.mubr.f32.vlgmr.msra.gmra.mrb[0].mxu1 %v14185_v4  ;;  %v11407_v42 = vpack.c.bf16 %v917_v41, %v916_v39  ;;  %v9216_v55 = vld [vmem:[%s21006_s3 + $0x3d0] sm:$0xff]  ;;  %v9233_v39 = vld [vmem:[%s21006_s3 + $0x458] sm:$0xff]  ;;  %v9234_v41 = vld [vmem:[%s21006_s3 + $0x460] sm:$0xff] }
  0x52   : > { %1134 = vmatprep.mubr.f32.mxu1 %v14188_v6  ;;  %11310 = vmatpush1.bf16.msra.mxu1 %v11309_v12  ;;  %v11324_v58 = vpack.c.bf16 %v9217_v56, %v9216_v55  ;;  %v931_v12 = vld [vmem:[%s21006_s3 + $0xd8] sm:$0xff]  ;;  %v968_v55 = vld [vmem:[%s21006_s3 + $0x200] sm:$0xff]  ;;  %v969_v56 = vld [vmem:[%s21006_s3 + $0x208] sm:$0xff] }
  0x53   : > { %11311 = vmatprep.subr.bf16.mxu1 %v21011_v5  ;;  %v14432_v59 = vpack.c.bf16 %v969_v56, %v968_v55 }
  0x54   : > { %10408 = vmatmul.mubr.f32.gmra.mrb[18].mxu0 %v298_v44  ;;  %v919_v44 = vld [vmem:[%s21006_s3 + $0x78] sm:$0xff] }
  0x55   : > { %10410 = vmatprep.mubr.f32.mxu0 %v299_v45  ;;  %1135 = vmatmul.mubr.f32.gmra.mrb[2].mxu1 %v14200_v11  ;;  %v11410_v45 = vpack.c.bf16 %v919_v44, %v918_v43  ;;  %v14415_v44 = vld [vmem:[%s21005_s2] ss:$0 sm:$0xff] }
  0x56   : > { %11313 = vmatpush1.bf16.msra.mxu1 %v11312_v22  ;;  %v9222_v22 = vld [vmem:[%s21006_s3 + $0x400] sm:$0xff] }
  0x57   : > { %11314 = vmatprep.subr.bf16.mxu1 %v21011_v5  ;;  %v11333_v25 = vpack.c.bf16 %v9223_v23, %v9222_v22 }
  0x58   : > { %10411 = vmatmul.mubr.f32.gmra.mrb[20].mxu0 %v300_v46  ;;  %v9214_v46 = vld [vmem:[%s21006_s3 + $0x3c0] sm:$0xff] }
  0x59   : > { %10413 = vmatprep.mubr.f32.mxu0 %v301_v47  ;;  %v9215_v47 = vld [vmem:[%s21006_s3 + $0x3c8] sm:$0xff] }
  0x5a   : > { %11316 = vmatpush1.bf16.msra.mxu1 %v11315_v31  ;;  %v11339_v31 = vpack.c.bf16 %v9227_v30, %v9226_v29 }
  0x5b   : > { %11317 = vmatprep.subr.bf16.mxu1 %v21011_v5 }
  0x5c   : > { %10414 = vmatmul.mubr.f32.gmra.mrb[22].mxu0 %v302_v48  ;;  %v920_v48 = vld [vmem:[%s21006_s3 + $0x80] sm:$0xff] }
  0x5d   : > { %10416 = vmatprep.mubr.f32.mxu0 %v303_v49  ;;  %v11321_v49 = vpack.c.bf16 %v9215_v47, %v9214_v46  ;;  %v9237_v46 = vld [vmem:[%s21006_s3 + $0x478] sm:$0xff] }
  0x5e   : > { %11319 = vmatpush1.bf16.msra.mxu1 %v11318_v40  ;;  %v11348_v40 = vpack.c.bf16 %v9233_v39, %v9232_v38 }
  0x5f   : > { %11320 = vmatprep.subr.bf16.mxu1 %v21011_v5 }
  0x60   : > { %10417 = vmatmul.mubr.f32.gmra.mrb[24].mxu0 %v304_v50  ;;  %v921_v50 = vld [vmem:[%s21006_s3 + $0x88] sm:$0xff] }
  0x61   : > { %10419 = vmatprep.mubr.f32.mxu0 %v305_v51  ;;  %v11413_v51 = vpack.c.bf16 %v921_v50, %v920_v48 }
  0x62   : > { %11322 = vmatpush1.bf16.msra.mxu1 %v11321_v49 }
  0x63   : > { %11323 = vmatprep.subr.bf16.mxu1 %v21011_v5 }
  0x64   : > { %10420 = vmatmul.mubr.f32.gmra.mrb[26].mxu0 %v306_v52  ;;  %v922_v52 = vld [vmem:[%s21006_s3 + $0x90] sm:$0xff] }
  0x65   : > { %10422 = vmatprep.mubr.f32.mxu0 %v307_v53  ;;  %v923_v53 = vld [vmem:[%s21006_s3 + $0x98] sm:$0xff] }
  0x66   : > { %11325 = vmatpush1.bf16.msra.mxu1 %v11324_v58 }
  0x67   : > { %11326 = vmatprep.subr.bf16.mxu1 %v21011_v5 }
  0x68   : > { %10423 = vmatmul.mubr.f32.gmra.mrb[28].mxu0 %v308_v54  ;;  %v11416_v54 = vpack.c.bf16 %v923_v53, %v922_v52 }
  0x69   : > { %10425 = vmatprep.mubr.f32.mxu0 %v309_v0  ;;  %v9218_v0 = vld [vmem:[%s21006_s3 + $0x3e0] sm:$0xff] }
  0x6c   : > { %10426 = vmatmul.mubr.f32.gmra.mrb[30].mxu0 %v310_v3  ;;  %v928_v3 = vld [vmem:[%s21006_s3 + $0xc0] sm:$0xff] }
  0x6d   : > { %10460 = vmatprep.mubr.f32.mxu0 %v866_v7  ;;  %v11327_v7 = vpack.c.bf16 %v9219_v2, %v9218_v0  ;;  %v11425_v9 = vpack.c.bf16 %v929_v8, %v928_v3 }
  0x6f   : > { %11328 = vmatpush1.bf16.msra.mxu1 %v11327_v7 }
  0x70   : > { %10461 = vmatmul.mubr.f32.vlgmr.msra.gmra.mrb[32].mxu0 %v867_v13  ;;  %11329 = vmatprep.subr.bf16.mxu1 %v21011_v5  ;;  %v9220_v13 = vld [vmem:[%s21006_s3 + $0x3f0] sm:$0xff] }
  0x71   : > { %11390 = vmatpush1.bf16.msra.mxu0 %v11389_v15  ;;  %v11428_v15 = vpack.c.bf16 %v931_v12, %v930_v10  ;;  %v11330_v16 = vpack.c.bf16 %v9221_v14, %v9220_v13 }
  0x72   : > { %11391 = vmatprep.subr.bf16.mxu0 %v21011_v5 }
  0x73   : > { %11331 = vmatpush1.bf16.msra.mxu1 %v11330_v16 }
  0x74   : > { %11332 = vmatprep.subr.bf16.mxu1 %v21011_v5 }
  0x75   : > { %11393 = vmatpush1.bf16.msra.mxu0 %v11392_v18  ;;  %v933_v18 = vld [vmem:[%s21006_s3 + $0xe8] sm:$0xff] }
  0x76   : > { %11394 = vmatprep.subr.bf16.mxu0 %v21011_v5  ;;  %v11431_v19 = vpack.c.bf16 %v933_v18, %v932_v17 }
  0x77   : > { %11334 = vmatpush1.bf16.msra.mxu1 %v11333_v25 }
  0x78   : > { %11335 = vmatprep.subr.bf16.mxu1 %v21011_v5 }
  0x79   : > { %11396 = vmatpush1.bf16.msra.mxu0 %v11395_v24  ;;  %v11434_v24 = vpack.c.bf16 %v935_v21, %v934_v20 }
  0x7a   : > { %11397 = vmatprep.subr.bf16.mxu0 %v21011_v5 }
  0x7d   : > { %11399 = vmatpush1.bf16.msra.mxu0 %v11398_v27  ;;  %v9225_v27 = vld [vmem:[%s21006_s3 + $0x418] sm:$0xff] }
  0x7e   : > { %11400 = vmatprep.subr.bf16.mxu0 %v21011_v5  ;;  %v11336_v28 = vpack.c.bf16 %v9225_v27, %v9224_v26 }
  0x80   : > { %11337 = vmatpush1.bf16.msra.mxu1 %v11336_v28 }
  0x81   : > { %11402 = vmatpush1.bf16.msra.mxu0 %v11401_v33  ;;  %11338 = vmatprep.subr.bf16.mxu1 %v21011_v5  ;;  %v9229_v33 = vld [vmem:[%s21006_s3 + $0x438] sm:$0xff] }
  0x82   : > { %11403 = vmatprep.subr.bf16.mxu0 %v21011_v5  ;;  %v11342_v34 = vpack.c.bf16 %v9229_v33, %v9228_v32 }
  0x84   : > { %11340 = vmatpush1.bf16.msra.mxu1 %v11339_v31 }
  0x85   : > { %11405 = vmatpush1.bf16.msra.mxu0 %v11404_v36  ;;  %11341 = vmatprep.subr.bf16.mxu1 %v21011_v5  ;;  %v9231_v36 = vld [vmem:[%s21006_s3 + $0x448] sm:$0xff] }
  0x86   : > { %11406 = vmatprep.subr.bf16.mxu0 %v21011_v5  ;;  %v11345_v37 = vpack.c.bf16 %v9231_v36, %v9230_v35 }
  0x88   : > { %11343 = vmatpush1.bf16.msra.mxu1 %v11342_v34 }
  0x89   : > { %11408 = vmatpush1.bf16.msra.mxu0 %v11407_v42  ;;  %11344 = vmatprep.subr.bf16.mxu1 %v21011_v5  ;;  %v9235_v42 = vld [vmem:[%s21006_s3 + $0x468] sm:$0xff] }
  0x8a   : > { %11409 = vmatprep.subr.bf16.mxu0 %v21011_v5  ;;  %v11351_v43 = vpack.c.bf16 %v9235_v42, %v9234_v41 }
  0x8c   : > { %11346 = vmatpush1.bf16.msra.mxu1 %v11345_v37 }
  0x8d   : > { %11411 = vmatpush1.bf16.msra.mxu0 %v11410_v45  ;;  %11347 = vmatprep.subr.bf16.mxu1 %v21011_v5  ;;  %v9236_v45 = vld [vmem:[%s21006_s3 + $0x470] sm:$0xff] }
  0x8e   : > { %11412 = vmatprep.subr.bf16.mxu0 %v21011_v5  ;;  %v11354_v48 = vpack.c.bf16 %v9237_v46, %v9236_v45 }
  0x90   : > { %11349 = vmatpush1.bf16.msra.mxu1 %v11348_v40 }
  0x91   : > { %11414 = vmatpush1.bf16.msra.mxu0 %v11413_v51  ;;  %11350 = vmatprep.subr.bf16.mxu1 %v21011_v5 }
  0x92   : > { %11415 = vmatprep.subr.bf16.mxu0 %v21011_v5 }
  0x94   : > { %11352 = vmatpush1.bf16.msra.mxu1 %v11351_v43 }
  0x95   : > { %11417 = vmatpush1.bf16.msra.mxu0 %v11416_v54  ;;  %11353 = vmatprep.subr.bf16.mxu1 %v21011_v5 }
  0x96   : > { %11418 = vmatprep.subr.bf16.mxu0 %v21011_v5 }
  0x98   : > { %11355 = vmatpush1.bf16.msra.mxu1 %v11354_v48 }
  0x99   : > { %11420 = vmatpush1.bf16.msra.mxu0 %v11419_v60  ;;  %11485 = vmatprep.subr.bf16.mxu1 %v14432_v59 }
  0x9a   : > { %11421 = vmatprep.subr.bf16.mxu0 %v21011_v5 }
  0x9d   : > { %11423 = vmatpush1.bf16.msra.mxu0 %v11422_v63 }
  0x9e   : > { %11424 = vmatprep.subr.bf16.mxu0 %v21011_v5 }
  0xa1   : > { %11426 = vmatpush1.bf16.msra.mxu0 %v11425_v9 }
  0xa2   : > { %11427 = vmatprep.subr.bf16.mxu0 %v21011_v5 }
  0xa5   : > { %11429 = vmatpush1.bf16.msra.mxu0 %v11428_v15 }
  0xa6   : > { %11430 = vmatprep.subr.bf16.mxu0 %v21011_v5 }
  0xa9   : > { %11432 = vmatpush1.bf16.msra.mxu0 %v11431_v19 }
  0xaa   : > { %11433 = vmatprep.subr.bf16.mxu0 %v21011_v5 }
  0xad   : > { %11435 = vmatpush1.bf16.msra.mxu0 %v11434_v24 }
  0xae   : > { %11436 = vmatprep.subr.bf16.mxu0 %v21011_v5 }
 0x103   : > { %v10382_v47 = vpop.f32.mrb[0].mxu0 }
 0x104   : > { %v406_v49 = vadd.f32 %v10382_v47, %v14415_v44  ;;  %v400_v50 = vpop.f32.mrb[1].mxu0 }
 0x105   : > { %v401_v51 = vadd.f32 %v14415_v44, %v400_v50 }
 0x106   : > { %v560_v52 = vmax.f32 %v406_v49, 0.0 }
 0x107   : > { %v559_v53 = vmax.f32 %v401_v51, 0.0  ;;  %v10385_v54 = vpop.f32.mrb[2].mxu0 }
 0x108   : > { %673 = vst [vmem:[#allocation2 + $0x50] sm:$0xff] %v560_v52  ;;  %v416_v57 = vadd.f32 %v10385_v54, %v14415_v44  ;;  %v410_v58 = vpop.f32.mrb[3].mxu0 }
 0x109   : > { %672 = vst [vmem:[#allocation2 + $0x48] sm:$0xff] %v559_v53  ;;  %v411_v60 = vadd.f32 %v14415_v44, %v410_v58 }
 0x10a   : > { %v562_v61 = vmax.f32 %v416_v57, 0.0 }
 0x10b   : > { %v561_v62 = vmax.f32 %v411_v60, 0.0  ;;  %v10388_v63 = vpop.f32.mrb[4].mxu0 }
 0x10c   : > { %675 = vst [vmem:[#allocation2 + $0x70] sm:$0xff] %v562_v61  ;;  %v426_v0 = vadd.f32 %v10388_v63, %v14415_v44  ;;  %v420_v2 = vpop.f32.mrb[5].mxu0 }
 0x10d   : > { %674 = vst [vmem:[#allocation2 + $0x68] sm:$0xff] %v561_v62  ;;  %v421_v3 = vadd.f32 %v14415_v44, %v420_v2 }
 0x10e   : > { %v564_v7 = vmax.f32 %v426_v0, 0.0 }
 0x10f   : > { %v563_v8 = vmax.f32 %v421_v3, 0.0  ;;  %v10391_v9 = vpop.f32.mrb[6].mxu0  ;;  %v869_v17 = vld [vmem:[#allocation2 + $0x52] sm:$0xff] }
 0x110   : > { %677 = vst [vmem:[#allocation2 + $0x90] sm:$0xff] %v564_v7  ;;  %v436_v10 = vadd.f32 %v10391_v9, %v14415_v44  ;;  %v430_v12 = vpop.f32.mrb[7].mxu0  ;;  %v14439_v13 = vld [vmem:[#allocation2 + $0x47] sm:$0xff]  ;;  %v14446_v19 = vld [vmem:[#allocation2 + $0x4f] sm:$0xff] }
 0x111   : > { %v868_v14 = vld [vmem:[#allocation2 + $0x4a] sm:$0xff]  ;;  %676 = vst [vmem:[#allocation2 + $0x88] sm:$0xff] %v563_v8  ;;  %v431_v16 = vadd.f32 %v14415_v44, %v430_v12  ;;  %1139 = vmatprep.mubr.f32.mxu1 %v14439_v13 }
 0x112   : > { %v14441_v15 = vld [vmem:[#allocation2 + $0x46] sm:$0xff]  ;;  %10463 = vmatprep.mubr.f32.mxu0 %v868_v14  ;;  %v566_v18 = vmax.f32 %v436_v10, 0.0  ;;  %v14453_v28 = vld [vmem:[#allocation2 + $0x4e] sm:$0xff] }
 0x113   : > { %1140 = vmatmul.mubr.f32.gmra.mrb[4].mxu1 %v14441_v15  ;;  %10464 = vmatmul.mubr.f32.gmra.mrb[34].mxu0 %v869_v17  ;;  %v565_v20 = vmax.f32 %v431_v16, 0.0  ;;  %v10394_v21 = vpop.f32.mrb[8].mxu0  ;;  %v871_v22 = vld [vmem:[#allocation2 + $0x72] sm:$0xff] }
 0x114   : > { %1144 = vmatprep.mubr.f32.mxu1 %v14446_v19  ;;  %679 = vst [vmem:[#allocation2 + $0xb0] sm:$0xff] %v566_v18  ;;  %v446_v23 = vadd.f32 %v10394_v21, %v14415_v44  ;;  %v440_v24 = vpop.f32.mrb[9].mxu0  ;;  %v870_v25 = vld [vmem:[#allocation2 + $0x6a] sm:$0xff] }
 0x115   : > { %v14450_v26 = vld [vmem:[#allocation2 + $0x67] sm:$0xff]  ;;  %678 = vst [vmem:[#allocation2 + $0xa8] sm:$0xff] %v565_v20  ;;  %v441_v27 = vadd.f32 %v14415_v44, %v440_v24  ;;  %10466 = vmatprep.mubr.f32.mxu0 %v870_v25  ;;  %v14462_v39 = vld [vmem:[#allocation2 + $0x6f] sm:$0xff] }
 0x116   : > { %v568_v29 = vmax.f32 %v446_v23, 0.0  ;;  %v14459_v37 = vld [vmem:[#allocation2 + $0x66] sm:$0xff]  ;;  %v14469_v49 = vld [vmem:[#allocation2 + $0x6e] sm:$0xff] }
 0x117   : > { %1145 = vmatmul.mubr.f32.gmra.mrb[6].mxu1 %v14453_v28  ;;  %10467 = vmatmul.mubr.f32.gmra.mrb[36].mxu0 %v871_v22  ;;  %v567_v30 = vmax.f32 %v441_v27, 0.0  ;;  %v10397_v31 = vpop.f32.mrb[10].mxu0  ;;  %v873_v32 = vld [vmem:[#allocation2 + $0x92] sm:$0xff] }
 0x118   : > { %1149 = vmatprep.mubr.f32.mxu1 %v14450_v26  ;;  %681 = vst [vmem:[#allocation2 + $0xd0] sm:$0xff] %v568_v29  ;;  %v456_v33 = vadd.f32 %v10397_v31, %v14415_v44  ;;  %v450_v34 = vpop.f32.mrb[11].mxu0  ;;  %v872_v35 = vld [vmem:[#allocation2 + $0x8a] sm:$0xff] }
 0x119   : > { %680 = vst [vmem:[#allocation2 + $0xc8] sm:$0xff] %v567_v30  ;;  %v451_v36 = vadd.f32 %v14415_v44, %v450_v34  ;;  %10469 = vmatprep.mubr.f32.mxu0 %v872_v35  ;;  %v14466_v47 = vld [vmem:[#allocation2 + $0x87] sm:$0xff]  ;;  %v14478_v61 = vld [vmem:[#allocation2 + $0x8f] sm:$0xff] }
 0x11a   : > { %v570_v38 = vmax.f32 %v456_v33, 0.0  ;;  %v14475_v58 = vld [vmem:[#allocation2 + $0x86] sm:$0xff]  ;;  %v14485_v10 = vld [vmem:[#allocation2 + $0x8e] sm:$0xff] }
 0x11b   : > { %1150 = vmatmul.mubr.f32.gmra.mrb[8].mxu1 %v14459_v37  ;;  %10470 = vmatmul.mubr.f32.gmra.mrb[38].mxu0 %v873_v32  ;;  %v569_v40 = vmax.f32 %v451_v36, 0.0  ;;  %v10400_v41 = vpop.f32.mrb[12].mxu0  ;;  %v875_v42 = vld [vmem:[#allocation2 + $0xb2] sm:$0xff] }
 0x11c   : > { %1154 = vmatprep.mubr.f32.mxu1 %v14462_v39  ;;  %683 = vst [vmem:[#allocation2 + $0xf0] sm:$0xff] %v570_v38  ;;  %v466_v43 = vadd.f32 %v10400_v41, %v14415_v44  ;;  %v460_v45 = vpop.f32.mrb[13].mxu0  ;;  %v874_v46 = vld [vmem:[#allocation2 + $0xaa] sm:$0xff] }
 0x11d   : > { %682 = vst [vmem:[#allocation2 + $0xe8] sm:$0xff] %v569_v40  ;;  %v461_v48 = vadd.f32 %v14415_v44, %v460_v45  ;;  %10472 = vmatprep.mubr.f32.mxu0 %v874_v46  ;;  %v14482_v8 = vld [vmem:[#allocation2 + $0xa7] sm:$0xff]  ;;  %v14494_v25 = vld [vmem:[#allocation2 + $0xaf] sm:$0xff] }
 0x11e   : > { %v572_v50 = vmax.f32 %v466_v43, 0.0  ;;  %v14491_v23 = vld [vmem:[#allocation2 + $0xa6] sm:$0xff]  ;;  %v14501_v36 = vld [vmem:[#allocation2 + $0xae] sm:$0xff] }
 0x11f   : > { %1155 = vmatmul.mubr.f32.gmra.mrb[10].mxu1 %v14469_v49  ;;  %10473 = vmatmul.mubr.f32.gmra.mrb[40].mxu0 %v875_v42  ;;  %v571_v51 = vmax.f32 %v461_v48, 0.0  ;;  %v10403_v52 = vpop.f32.mrb[14].mxu0  ;;  %v877_v53 = vld [vmem:[#allocation2 + $0xd2] sm:$0xff] }
 0x120   : > { %1159 = vmatprep.mubr.f32.mxu1 %v14466_v47  ;;  %685 = vst [vmem:[#allocation2 + $0x110] sm:$0xff] %v572_v50  ;;  %v476_v54 = vadd.f32 %v10403_v52, %v14415_v44  ;;  %v470_v55 = vpop.f32.mrb[15].mxu0  ;;  %v876_v56 = vld [vmem:[#allocation2 + $0xca] sm:$0xff] }
 0x121   : > { %684 = vst [vmem:[#allocation2 + $0x108] sm:$0xff] %v571_v51  ;;  %v471_v57 = vadd.f32 %v14415_v44, %v470_v55  ;;  %10475 = vmatprep.mubr.f32.mxu0 %v876_v56  ;;  %v14498_v34 = vld [vmem:[#allocation2 + $0xc7] sm:$0xff]  ;;  %v14510_v52 = vld [vmem:[#allocation2 + $0xcf] sm:$0xff] }
 0x122   : > { %v574_v60 = vmax.f32 %v476_v54, 0.0  ;;  %v14507_v50 = vld [vmem:[#allocation2 + $0xc6] sm:$0xff] }
 0x123   : > { %1160 = vmatmul.mubr.f32.gmra.mrb[12].mxu1 %v14475_v58  ;;  %10476 = vmatmul.mubr.f32.gmra.mrb[42].mxu0 %v877_v53  ;;  %v573_v62 = vmax.f32 %v471_v57, 0.0  ;;  %v10406_v63 = vpop.f32.mrb[16].mxu0  ;;  %v879_v0 = vld [vmem:[#allocation2 + $0xf2] sm:$0xff] }
 0x124   : > { %1164 = vmatprep.mubr.f32.mxu1 %v14478_v61  ;;  %687 = vst [vmem:[#allocation2 + $0x130] sm:$0xff] %v574_v60  ;;  %v486_v2 = vadd.f32 %v10406_v63, %v14415_v44  ;;  %v480_v3 = vpop.f32.mrb[17].mxu0  ;;  %v878_v7 = vld [vmem:[#allocation2 + $0xea] sm:$0xff] }
 0x125   : > { %686 = vst [vmem:[#allocation2 + $0x128] sm:$0xff] %v573_v62  ;;  %v481_v9 = vadd.f32 %v14415_v44, %v480_v3  ;;  %10478 = vmatprep.mubr.f32.mxu0 %v878_v7  ;;  %v14514_v62 = vld [vmem:[#allocation2 + $0xe7] sm:$0xff] }
 0x126   : > { %v576_v12 = vmax.f32 %v486_v2, 0.0 }
 0x127   : > { %1165 = vmatmul.mubr.f32.gmra.mrb[14].mxu1 %v14485_v10  ;;  %10479 = vmatmul.mubr.f32.gmra.mrb[44].mxu0 %v879_v0  ;;  %v575_v14 = vmax.f32 %v481_v9, 0.0  ;;  %v10409_v16 = vpop.f32.mrb[18].mxu0  ;;  %v881_v17 = vld [vmem:[#allocation2 + $0x112] sm:$0xff] }
 0x128   : > { %1169 = vmatprep.mubr.f32.mxu1 %v14482_v8  ;;  %689 = vst [vmem:[#allocation2 + $0x150] sm:$0xff] %v576_v12  ;;  %v496_v18 = vadd.f32 %v10409_v16, %v14415_v44  ;;  %v490_v20 = vpop.f32.mrb[19].mxu0  ;;  %v880_v21 = vld [vmem:[#allocation2 + $0x10a] sm:$0xff] }
 0x129   : > { %688 = vst [vmem:[#allocation2 + $0x148] sm:$0xff] %v575_v14  ;;  %v491_v22 = vadd.f32 %v14415_v44, %v490_v20  ;;  %10481 = vmatprep.mubr.f32.mxu0 %v880_v21  ;;  %v14517_v0 = vld [vmem:[#allocation2 + $0xce] sm:$0xff] }
 0x12a   : > { %v578_v24 = vmax.f32 %v496_v18, 0.0  ;;  %v14523_v18 = vld [vmem:[#allocation2 + $0xe6] sm:$0xff]  ;;  %v14526_v21 = vld [vmem:[#allocation2 + $0xef] sm:$0xff] }
 0x12b   : > { %1170 = vmatmul.mubr.f32.gmra.mrb[16].mxu1 %v14491_v23  ;;  %10482 = vmatmul.mubr.f32.gmra.mrb[46].mxu0 %v881_v17  ;;  %v577_v27 = vmax.f32 %v491_v22, 0.0  ;;  %v10412_v29 = vpop.f32.mrb[20].mxu0  ;;  %v883_v30 = vld [vmem:[#allocation2 + $0x132] sm:$0xff] }
 0x12c   : > { %1174 = vmatprep.mubr.f32.mxu1 %v14494_v25  ;;  %691 = vst [vmem:[#allocation2 + $0x170] sm:$0xff] %v578_v24  ;;  %v506_v31 = vadd.f32 %v10412_v29, %v14415_v44  ;;  %v500_v32 = vpop.f32.mrb[21].mxu0  ;;  %v882_v33 = vld [vmem:[#allocation2 + $0x12a] sm:$0xff] }
 0x12d   : > { %690 = vst [vmem:[#allocation2 + $0x168] sm:$0xff] %v577_v27  ;;  %v501_v35 = vadd.f32 %v14415_v44, %v500_v32  ;;  %10484 = vmatprep.mubr.f32.mxu0 %v882_v33  ;;  %v14530_v32 = vld [vmem:[#allocation2 + $0x107] sm:$0xff] }
 0x12e   : > { %v580_v38 = vmax.f32 %v506_v31, 0.0 }
 0x12f   : > { %1175 = vmatmul.mubr.f32.gmra.mrb[18].mxu1 %v14501_v36  ;;  %10485 = vmatmul.mubr.f32.gmra.mrb[48].mxu0 %v883_v30  ;;  %v579_v40 = vmax.f32 %v501_v35, 0.0  ;;  %v10415_v41 = vpop.f32.mrb[22].mxu0  ;;  %v885_v42 = vld [vmem:[#allocation2 + $0x152] sm:$0xff] }
 0x130   : > { %1179 = vmatprep.mubr.f32.mxu1 %v14498_v34  ;;  %693 = vst [vmem:[#allocation2 + $0x190] sm:$0xff] %v580_v38  ;;  %v516_v43 = vadd.f32 %v10415_v41, %v14415_v44  ;;  %v510_v45 = vpop.f32.mrb[23].mxu0  ;;  %v884_v46 = vld [vmem:[#allocation2 + $0x14a] sm:$0xff] }
 0x131   : > { %692 = vst [vmem:[#allocation2 + $0x188] sm:$0xff] %v579_v40  ;;  %v511_v48 = vadd.f32 %v14415_v44, %v510_v45  ;;  %10487 = vmatprep.mubr.f32.mxu0 %v884_v46  ;;  %v14533_v35 = vld [vmem:[#allocation2 + $0xee] sm:$0xff] }
 0x132   : > { %v582_v51 = vmax.f32 %v516_v43, 0.0  ;;  %v14537_v43 = vld [vmem:[#allocation2 + $0x106] sm:$0xff]  ;;  %v14540_v45 = vld [vmem:[#allocation2 + $0x10f] sm:$0xff] }
 0x133   : > { %1180 = vmatmul.mubr.f32.gmra.mrb[20].mxu1 %v14507_v50  ;;  %10488 = vmatmul.mubr.f32.gmra.mrb[50].mxu0 %v885_v42  ;;  %v581_v53 = vmax.f32 %v511_v48, 0.0  ;;  %v10418_v54 = vpop.f32.mrb[24].mxu0  ;;  %v887_v55 = vld [vmem:[#allocation2 + $0x172] sm:$0xff] }
 0x134   : > { %1184 = vmatprep.mubr.f32.mxu1 %v14510_v52  ;;  %695 = vst [vmem:[#allocation2 + $0x1b0] sm:$0xff] %v582_v51  ;;  %v526_v56 = vadd.f32 %v10418_v54, %v14415_v44  ;;  %v520_v57 = vpop.f32.mrb[25].mxu0  ;;  %v886_v60 = vld [vmem:[#allocation2 + $0x16a] sm:$0xff] }
 0x135   : > { %694 = vst [vmem:[#allocation2 + $0x1a8] sm:$0xff] %v581_v53  ;;  %v521_v63 = vadd.f32 %v14415_v44, %v520_v57  ;;  %10490 = vmatprep.mubr.f32.mxu0 %v886_v60  ;;  %v14543_v51 = vld [vmem:[#allocation2 + $0x127] sm:$0xff] }
 0x136   : > { %v584_v2 = vmax.f32 %v526_v56, 0.0  ;;  %v14545_v53 = vld [vmem:[#allocation2 + $0x10e] sm:$0xff]  ;;  %v14549_v57 = vld [vmem:[#allocation2 + $0x126] sm:$0xff] }
 0x137   : > { %1185 = vmatmul.mubr.f32.gmra.mrb[22].mxu1 %v14517_v0  ;;  %10491 = vmatmul.mubr.f32.gmra.mrb[52].mxu0 %v887_v55  ;;  %v583_v3 = vmax.f32 %v521_v63, 0.0  ;;  %v10421_v7 = vpop.f32.mrb[26].mxu0  ;;  %v889_v9 = vld [vmem:[#allocation2 + $0x192] sm:$0xff]  ;;  %v744_v56 = vld [vmem:[#allocation2 + $0x7] sm:$0xff] }
 0x138   : > { %1189 = vmatprep.mubr.f32.mxu1 %v14514_v62  ;;  %697 = vst [vmem:[#allocation2 + $0x1d0] sm:$0xff] %v584_v2  ;;  %v536_v12 = vadd.f32 %v10421_v7, %v14415_v44  ;;  %v530_v14 = vpop.f32.mrb[27].mxu0  ;;  %v888_v16 = vld [vmem:[#allocation2 + $0x18a] sm:$0xff]  ;;  %v936_v60 = vld [vmem:[%s21006_s3 + $0x100] sm:$0xff] }
 0x139   : > { %696 = vst [vmem:[#allocation2 + $0x1c8] sm:$0xff] %v583_v3  ;;  %v531_v17 = vadd.f32 %v14415_v44, %v530_v14  ;;  %10493 = vmatprep.mubr.f32.mxu0 %v888_v16  ;;  %v937_v63 = vld [vmem:[%s21006_s3 + $0x108] sm:$0xff]  ;;  %v938_v16 = vld [vmem:[%s21006_s3 + $0x110] sm:$0xff] }
 0x13a   : > { %v586_v20 = vmax.f32 %v536_v12, 0.0  ;;  %v14558_v2 = vld [vmem:[#allocation2 + $0x12f] sm:$0xff]  ;;  %v704_v3 = vld [vmem:[#allocation2 + $0x6] sm:$0xff]  ;;  %v11437_v12 = vpack.c.bf16 %v937_v63, %v936_v60 }
 0x13b   : > { %1190 = vmatmul.mubr.f32.gmra.mrb[24].mxu1 %v14523_v18  ;;  %10494 = vmatmul.mubr.f32.gmra.mrb[54].mxu0 %v889_v9  ;;  %v585_v22 = vmax.f32 %v531_v17, 0.0  ;;  %v10424_v24 = vpop.f32.mrb[28].mxu0  ;;  %v891_v27 = vld [vmem:[#allocation2 + $0x1b2] sm:$0xff]  ;;  %v14561_v7 = vld [vmem:[#allocation2 + $0x147] sm:$0xff] }
 0x13c   : > { %1194 = vmatprep.mubr.f32.mxu1 %v14526_v21  ;;  %699 = vst [vmem:[#allocation2 + $0x1f0] sm:$0xff] %v586_v20  ;;  %v546_v29 = vadd.f32 %v10424_v24, %v14415_v44  ;;  %v540_v30 = vpop.f32.mrb[29].mxu0  ;;  %v890_v31 = vld [vmem:[#allocation2 + $0x1aa] sm:$0xff]  ;;  %v939_v17 = vld [vmem:[%s21006_s3 + $0x118] sm:$0xff] }
 0x13d   : > { %698 = vst [vmem:[#allocation2 + $0x1e8] sm:$0xff] %v585_v22  ;;  %v541_v33 = vadd.f32 %v14415_v44, %v540_v30  ;;  %10496 = vmatprep.mubr.f32.mxu0 %v890_v31  ;;  %v745_v9 = vld [vmem:[#allocation2 + $0xf] sm:$0xff]  ;;  %v11440_v22 = vpack.c.bf16 %v939_v17, %v938_v16  ;;  %v14573_v24 = vld [vmem:[#allocation2 + $0x146] sm:$0xff] }
 0x13e   : > { %v588_v38 = vmax.f32 %v546_v29, 0.0  ;;  %v14563_v14 = vld [vmem:[#allocation2 + $0x12e] sm:$0xff] }
 0x13f   : > { %1195 = vmatmul.mubr.f32.gmra.mrb[26].mxu1 %v14533_v35  ;;  %10497 = vmatmul.mubr.f32.gmra.mrb[56].mxu0 %v891_v27  ;;  %v587_v40 = vmax.f32 %v541_v33, 0.0  ;;  %v893_v41 = vld [vmem:[#allocation2 + $0x1d2] sm:$0xff]  ;;  %v940_v27 = vld [vmem:[%s21006_s3 + $0x120] sm:$0xff]  ;;  %v941_v29 = vld [vmem:[%s21006_s3 + $0x128] sm:$0xff] }
 0x140   : > { %1199 = vmatprep.mubr.f32.mxu1 %v14530_v32  ;;  %701 = vst [vmem:[#allocation2 + $0x210] sm:$0xff] %v588_v38  ;;  %v892_v42 = vld [vmem:[#allocation2 + $0x1ca] sm:$0xff]  ;;  %v11443_v33 = vpack.c.bf16 %v941_v29, %v940_v27 }
 0x141   : > { %700 = vst [vmem:[#allocation2 + $0x208] sm:$0xff] %v587_v40  ;;  %10499 = vmatprep.mubr.f32.mxu0 %v892_v42  ;;  %v705_v20 = vld [vmem:[#allocation2 + $0xe] sm:$0xff]  ;;  %v14602_v42 = vld [vmem:[#allocation2 + $0x166] sm:$0xff] }
 0x142   : > { %v14583_v30 = vld [vmem:[#allocation2 + $0x14f] sm:$0xff]  ;;  %v14587_v31 = vld [vmem:[#allocation2 + $0x167] sm:$0xff] }
 0x143   : > { %1200 = vmatmul.mubr.f32.gmra.mrb[28].mxu1 %v14537_v43  ;;  %10500 = vmatmul.mubr.f32.gmra.mrb[58].mxu0 %v893_v41  ;;  %v895_v46 = vld [vmem:[#allocation2 + $0x1f2] sm:$0xff]  ;;  %v14651_v27 = vld [vmem:[#allocation2 + $0x1a7] sm:$0xff] }
 0x144   : > { %1204 = vmatprep.mubr.f32.mxu1 %v14540_v45  ;;  %v894_v48 = vld [vmem:[#allocation2 + $0x1ea] sm:$0xff]  ;;  %v943_v41 = vld [vmem:[%s21006_s3 + $0x138] sm:$0xff] }
 0x145   : > { %10502 = vmatprep.mubr.f32.mxu0 %v894_v48  ;;  %v14589_v38 = vld [vmem:[#allocation2 + $0x14e] sm:$0xff] }
 0x146   : > { %v942_v40 = vld [vmem:[%s21006_s3 + $0x130] sm:$0xff]  ;;  %v945_v48 = vld [vmem:[%s21006_s3 + $0x148] sm:$0xff] }
 0x147   : > { %1205 = vmatmul.mubr.f32.gmra.mrb[30].mxu1 %v14545_v53  ;;  %10503 = vmatmul.mubr.f32.gmra.mrb[60].mxu0 %v895_v46  ;;  %v897_v54 = vld [vmem:[#allocation2 + $0x212] sm:$0xff]  ;;  %v944_v46 = vld [vmem:[%s21006_s3 + $0x140] sm:$0xff] }
 0x148   : > { %1209 = vmatprep.mubr.f32.mxu1 %v14543_v51  ;;  %v896_v55 = vld [vmem:[#allocation2 + $0x20a] sm:$0xff] }
 0x149   : > { %10505 = vmatprep.mubr.f32.mxu0 %v896_v55  ;;  %v14619_v55 = vld [vmem:[#allocation2 + $0x16e] sm:$0xff] }
 0x14a   : > { %v14645_v16 = vld [vmem:[#allocation2 + $0x18f] sm:$0xff] }
 0x14b   : > { %1210 = vmatmul.mubr.f32.gmra.mrb[32].mxu1 %v14549_v57  ;;  %10506 = vmatmul.mubr.f32.gmra.mrb[62].mxu0 %v897_v54  ;;  %v11449_v54 = vpack.c.bf16 %v945_v48, %v944_v46  ;;  %v953_v46 = vld [vmem:[%s21006_s3 + $0x188] sm:$0xff] }
 0x14c   : > { %1214 = vmatprep.mubr.f32.mxu1 %v14558_v2  ;;  %1804 = vmatprep.mubr.f32.mxu0 %v744_v56  ;;  %v946_v56 = vld [vmem:[%s21006_s3 + $0x150] sm:$0xff] }
 0x14f   : > { %1215 = vmatmul.mubr.f32.gmra.mrb[34].mxu1 %v14563_v14  ;;  %1805 = vmatmul.mubr.f32.vlgmr.msra.gmra.mrb[64].mxu0 %v704_v3 }
 0x150   : > { %1219 = vmatprep.mubr.f32.mxu1 %v14561_v7  ;;  %1809 = vmatprep.mubr.f32.mxu0 %v745_v9  ;;  %v14633_v9 = vld [vmem:[#allocation2 + $0x186] sm:$0xff] }
 0x151   : > { %11438 = vmatpush1.bf16.msra.mxu0 %v11437_v12  ;;  %v948_v12 = vld [vmem:[%s21006_s3 + $0x160] sm:$0xff] }
 0x152   : > { %11439 = vmatprep.subr.bf16.mxu0 %v21011_v5 }
 0x153   : > { %1220 = vmatmul.mubr.f32.gmra.mrb[36].mxu1 %v14573_v24  ;;  %1810 = vmatmul.mubr.f32.gmra.mrb[66].mxu0 %v705_v20 }
 0x154   : > { %1224 = vmatprep.mubr.f32.mxu1 %v14583_v30  ;;  %1814 = vmatprep.mubr.f32.mxu0 %v14180_v1  ;;  %v11446_v1 = vpack.c.bf16 %v943_v41, %v942_v40  ;;  %v14668_v41 = vld [vmem:[#allocation2 + $0x1a6] sm:$0xff] }
 0x155   : > { %11441 = vmatpush1.bf16.msra.mxu0 %v11440_v22 }
 0x156   : > { %11442 = vmatprep.subr.bf16.mxu0 %v21011_v5 }
 0x157   : > { %1225 = vmatmul.mubr.f32.gmra.mrb[38].mxu1 %v14589_v38  ;;  %1815 = vmatmul.mubr.f32.gmra.mrb[68].mxu0 %v14185_v4  ;;  %v14613_v4 = vld [vmem:[#allocation2 + $0x16f] sm:$0xff] }
 0x158   : > { %1229 = vmatprep.mubr.f32.mxu1 %v14587_v31  ;;  %1819 = vmatprep.mubr.f32.mxu0 %v14188_v6  ;;  %v14617_v6 = vld [vmem:[#allocation2 + $0x187] sm:$0xff] }
 0x159   : > { %11444 = vmatpush1.bf16.msra.mxu0 %v11443_v33  ;;  %v14655_v33 = vld [vmem:[#allocation2 + $0x18e] sm:$0xff] }
 0x15a   : > { %11445 = vmatprep.subr.bf16.mxu0 %v21011_v5 }
 0x15b   : > { %1230 = vmatmul.mubr.f32.gmra.mrb[40].mxu1 %v14602_v42  ;;  %1820 = vmatmul.mubr.f32.gmra.mrb[70].mxu0 %v14200_v11  ;;  %v947_v11 = vld [vmem:[%s21006_s3 + $0x158] sm:$0xff] }
 0x15c   : > { %1234 = vmatprep.mubr.f32.mxu1 %v14613_v4  ;;  %1824 = vmatprep.mubr.f32.mxu0 %v14439_v13  ;;  %v10427_v13 = vpop.f32.mrb[30].mxu0  ;;  %v11452_v60 = vpack.c.bf16 %v947_v11, %v946_v56  ;;  %v954_v56 = vld [vmem:[%s21006_s3 + $0x190] sm:$0xff]  ;;  %v14698_v11 = vld [vmem:[#allocation2 + $0x1c6] sm:$0xff] }
 0x15d   : > { %11447 = vmatpush1.bf16.msra.mxu0 %v11446_v1  ;;  %v556_v63 = vadd.f32 %v10427_v13, %v14415_v44  ;;  %v550_v3 = vpop.f32.mrb[31].mxu0  ;;  %v952_v1 = vld [vmem:[%s21006_s3 + $0x180] sm:$0xff] }
 0x15e   : > { %11448 = vmatprep.subr.bf16.mxu0 %v21011_v5  ;;  %v14649_v22 = vpop.f32.mrb[32].mxu0  ;;  %v11461_v48 = vpack.c.bf16 %v953_v46, %v952_v1  ;;  %v956_v13 = vld [vmem:[%s21006_s3 + $0x1a0] sm:$0xff]  ;;  %v965_v1 = vld [vmem:[%s21006_s3 + $0x1e8] sm:$0xff] }
 0x15f   : > { %1235 = vmatmul.mubr.f32.gmra.mrb[42].mxu1 %v14619_v55  ;;  %1825 = vmatmul.mubr.f32.gmra.mrb[72].mxu0 %v14441_v15  ;;  %v949_v15 = vld [vmem:[%s21006_s3 + $0x168] sm:$0xff]  ;;  %v590_v17 = vmax.f32 %v556_v63, 0.0 }
 0x160   : > { %1829 = vmatprep.mubr.f32.mxu0 %v14446_v19  ;;  %1239 = vmatprep.mubr.f32.mxu1 %v14617_v6  ;;  %v551_v19 = vadd.f32 %v14415_v44, %v550_v3  ;;  %v11455_v29 = vpack.c.bf16 %v949_v15, %v948_v12  ;;  %v14653_v44 = vpop.f32.mrb[33].mxu0  ;;  %v14715_v3 = vld [vmem:[#allocation2 + $0x1ce] sm:$0xff]  ;;  %v14728_v15 = vld [vmem:[#allocation2 + $0x1e6] sm:$0xff] }
 0x161   : > { %11450 = vmatpush1.bf16.msra.mxu0 %v11449_v54  ;;  %703 = vst [vmem:[#allocation2 + $0x230] sm:$0xff] %v590_v17  ;;  %v14685_v54 = vld [vmem:[#allocation2 + $0x1ae] sm:$0xff] }
 0x162   : > { %11451 = vmatprep.subr.bf16.mxu0 %v21011_v5  ;;  %v589_v20 = vmax.f32 %v551_v19, 0.0  ;;  %v958_v12 = vld [vmem:[%s21006_s3 + $0x1b0] sm:$0xff]  ;;  %v960_v19 = vld [vmem:[%s21006_s3 + $0x1c0] sm:$0xff]  ;;  %v961_v17 = vld [vmem:[%s21006_s3 + $0x1c8] sm:$0xff] }
 0x163   : > { %1240 = vmatmul.mubr.f32.gmra.mrb[44].mxu1 %v14633_v9  ;;  %1830 = vmatmul.mubr.f32.gmra.mrb[74].mxu0 %v14453_v28  ;;  %v950_v28 = vld [vmem:[%s21006_s3 + $0x170] sm:$0xff] }
 0x164   : > { %1244 = vmatprep.mubr.f32.mxu1 %v14645_v16  ;;  %1834 = vmatprep.mubr.f32.mxu0 %v14450_v26  ;;  %v951_v26 = vld [vmem:[%s21006_s3 + $0x178] sm:$0xff]  ;;  %702 = vst [vmem:[#allocation2 + $0x228] sm:$0xff] %v589_v20  ;;  %v11473_v20 = vpack.c.bf16 %v961_v17, %v960_v19  ;;  %v976_v19 = vld [vmem:[%s21006_s3 + $0x240] sm:$0xff]  ;;  %v977_v17 = vld [vmem:[%s21006_s3 + $0x248] sm:$0xff] }
 0x165   : > { %11453 = vmatpush1.bf16.msra.mxu0 %v11452_v60  ;;  %v11458_v40 = vpack.c.bf16 %v951_v26, %v950_v28  ;;  %v957_v60 = vld [vmem:[%s21006_s3 + $0x1a8] sm:$0xff]  ;;  %v962_v28 = vld [vmem:[%s21006_s3 + $0x1d0] sm:$0xff] }
 0x166   : > { %11454 = vmatprep.subr.bf16.mxu0 %v21011_v5  ;;  %v11467_v63 = vpack.c.bf16 %v957_v60, %v956_v13  ;;  %v736_v26 = vld [vmem:[#allocation2 + $0x206] sm:$0xff]  ;;  %v14782_v13 = vld [vmem:[#allocation2 + $0x31] sm:$0xff] }
 0x167   : > { %1245 = vmatmul.mubr.f32.gmra.mrb[46].mxu1 %v14655_v33  ;;  %1835 = vmatmul.mubr.f32.gmra.mrb[76].mxu0 %v14459_v37  ;;  %v14679_v37 = vld [vmem:[#allocation2 + $0x1af] sm:$0xff] }
 0x168   : > { %1839 = vmatprep.mubr.f32.mxu0 %v14462_v39  ;;  %1249 = vmatprep.mubr.f32.mxu1 %v14651_v27  ;;  %v14683_v39 = vld [vmem:[#allocation2 + $0x1c7] sm:$0xff] }
 0x169   : > { %11456 = vmatpush1.bf16.msra.mxu0 %v11455_v29  ;;  %v14743_v29 = vld [vmem:[#allocation2 + $0x1ee] sm:$0xff] }
 0x16a   : > { %11457 = vmatprep.subr.bf16.mxu0 %v21011_v5 }
 0x16b   : > { %1250 = vmatmul.mubr.f32.gmra.mrb[48].mxu1 %v14668_v41  ;;  %1840 = vmatmul.mubr.f32.gmra.mrb[78].mxu0 %v14469_v49  ;;  %v955_v49 = vld [vmem:[%s21006_s3 + $0x198] sm:$0xff] }
 0x16c   : > { %1254 = vmatprep.mubr.f32.mxu1 %v14679_v37  ;;  %1844 = vmatprep.mubr.f32.mxu0 %v14466_v47  ;;  %v11464_v47 = vpack.c.bf16 %v955_v49, %v954_v56  ;;  %v970_v56 = vld [vmem:[%s21006_s3 + $0x210] sm:$0xff]  ;;  %v971_v49 = vld [vmem:[%s21006_s3 + $0x218] sm:$0xff] }
 0x16d   : > { %11459 = vmatpush1.bf16.msra.mxu0 %v11458_v40  ;;  %v964_v40 = vld [vmem:[%s21006_s3 + $0x1e0] sm:$0xff] }
 0x16e   : > { %11460 = vmatprep.subr.bf16.mxu0 %v21011_v5  ;;  %v11479_v46 = vpack.c.bf16 %v965_v1, %v964_v40  ;;  %v982_v1 = vld [vmem:[%s21006_s3 + $0x270] sm:$0xff] }
 0x16f   : > { %1255 = vmatmul.mubr.f32.gmra.mrb[50].mxu1 %v14685_v54  ;;  %1845 = vmatmul.mubr.f32.gmra.mrb[80].mxu0 %v14475_v58  ;;  %v14709_v58 = vld [vmem:[#allocation2 + $0x1cf] sm:$0xff] }
 0x170   : > { %1849 = vmatprep.mubr.f32.mxu0 %v14478_v61  ;;  %1259 = vmatprep.mubr.f32.mxu1 %v14683_v39  ;;  %v14713_v61 = vld [vmem:[#allocation2 + $0x1e7] sm:$0xff] }
 0x171   : > { %11462 = vmatpush1.bf16.msra.mxu0 %v11461_v48  ;;  %v737_v48 = vld [vmem:[#allocation2 + $0x20e] sm:$0xff] }
 0x172   : > { %11463 = vmatprep.subr.bf16.mxu0 %v21011_v5 }
 0x173   : > { %1260 = vmatmul.mubr.f32.gmra.mrb[52].mxu1 %v14698_v11  ;;  %1850 = vmatmul.mubr.f32.gmra.mrb[82].mxu0 %v14485_v10  ;;  %v959_v10 = vld [vmem:[%s21006_s3 + $0x1b8] sm:$0xff] }
 0x174   : > { %1264 = vmatprep.mubr.f32.mxu1 %v14709_v58  ;;  %1854 = vmatprep.mubr.f32.mxu0 %v14482_v8  ;;  %v11470_v8 = vpack.c.bf16 %v959_v10, %v958_v12  ;;  %v974_v10 = vld [vmem:[%s21006_s3 + $0x230] sm:$0xff] }
 0x175   : > { %11465 = vmatpush1.bf16.msra.mxu0 %v11464_v47  ;;  %v11488_v47 = vpack.c.bf16 %v971_v49, %v970_v56  ;;  %v9319_v56 = vld [vmem:[%s21006_s3 + $0x708] sm:$0xff] }
 0x176   : > { %11466 = vmatprep.subr.bf16.mxu0 %v21011_v5 }
 0x177   : > { %1265 = vmatmul.mubr.f32.gmra.mrb[54].mxu1 %v14715_v3  ;;  %1855 = vmatmul.mubr.f32.gmra.mrb[84].mxu0 %v14491_v23  ;;  %v14739_v23 = vld [vmem:[#allocation2 + $0x1ef] sm:$0xff] }
 0x178   : > { %1859 = vmatprep.mubr.f32.mxu0 %v14494_v25  ;;  %1269 = vmatprep.mubr.f32.mxu1 %v14713_v61  ;;  %v776_v25 = vld [vmem:[#allocation2 + $0x207] sm:$0xff] }
 0x179   : > { %11468 = vmatpush1.bf16.msra.mxu0 %v11467_v63  ;;  %v972_v63 = vld [vmem:[%s21006_s3 + $0x220] sm:$0xff] }
 0x17a   : > { %11469 = vmatprep.subr.bf16.mxu0 %v21011_v5 }
 0x17b   : > { %1270 = vmatmul.mubr.f32.gmra.mrb[56].mxu1 %v14728_v15  ;;  %1860 = vmatmul.mubr.f32.gmra.mrb[86].mxu0 %v14501_v36  ;;  %v963_v36 = vld [vmem:[%s21006_s3 + $0x1d8] sm:$0xff] }
 0x17c   : > { %1274 = vmatprep.mubr.f32.mxu1 %v14739_v23  ;;  %1864 = vmatprep.mubr.f32.mxu0 %v14498_v34  ;;  %v11476_v34 = vpack.c.bf16 %v963_v36, %v962_v28  ;;  %v979_v28 = vld [vmem:[%s21006_s3 + $0x258] sm:$0xff] }
 0x17d   : > { %11471 = vmatpush1.bf16.msra.mxu0 %v11470_v8 }
 0x17e   : > { %11472 = vmatprep.subr.bf16.mxu0 %v21011_v5 }
 0x17f   : > { %1275 = vmatmul.mubr.f32.gmra.mrb[58].mxu1 %v14743_v29  ;;  %1865 = vmatmul.mubr.f32.gmra.mrb[88].mxu0 %v14507_v50  ;;  %v777_v50 = vld [vmem:[#allocation2 + $0x20f] sm:$0xff] }
 0x180   : > { %1869 = vmatprep.mubr.f32.mxu0 %v14510_v52  ;;  %1279 = vmatprep.mubr.f32.mxu1 %v776_v25  ;;  %v14764_v52 = vld [vmem:[#allocation2 + $0x29] sm:$0xff]  ;;  %v11500_v25 = vpack.c.bf16 %v977_v17, %v976_v19  ;;  %v9325_v17 = vld [vmem:[%s21006_s3 + $0x738] sm:$0xff] }
 0x181   : > { %11474 = vmatpush1.bf16.msra.mxu0 %v11473_v20  ;;  %v978_v20 = vld [vmem:[%s21006_s3 + $0x250] sm:$0xff] }
 0x182   : > { %11475 = vmatprep.subr.bf16.mxu0 %v21011_v5  ;;  %v11504_v36 = vpack.c.bf16 %v979_v28, %v978_v20  ;;  %v9324_v19 = vld [vmem:[%s21006_s3 + $0x730] sm:$0xff] }
 0x183   : > { %1280 = vmatmul.mubr.f32.gmra.mrb[60].mxu1 %v736_v26  ;;  %1870 = vmatmul.mubr.f32.gmra.mrb[90].mxu0 %v14517_v0  ;;  %v967_v0 = vld [vmem:[%s21006_s3 + $0x1f8] sm:$0xff]  ;;  %v981_v26 = vld [vmem:[%s21006_s3 + $0x268] sm:$0xff]  ;;  %v11624_v20 = vpack.c.bf16 %v9325_v17, %v9324_v19 }
 0x184   : > { %1284 = vmatprep.mubr.f32.mxu1 %v777_v50  ;;  %1874 = vmatprep.mubr.f32.mxu0 %v14514_v62  ;;  %v966_v62 = vld [vmem:[%s21006_s3 + $0x1f0] sm:$0xff]  ;;  %v983_v50 = vld [vmem:[%s21006_s3 + $0x278] sm:$0xff] }
 0x185   : > { %11477 = vmatpush1.bf16.msra.mxu0 %v11476_v34  ;;  %v11482_v60 = vpack.c.bf16 %v967_v0, %v966_v62  ;;  %v980_v34 = vld [vmem:[%s21006_s3 + $0x260] sm:$0xff]  ;;  %v14909_v62 = vld [vmem:[#allocation2 + $0xd1] sm:$0xff]  ;;  %v14921_v0 = vld [vmem:[#allocation2 + $0xe8] sm:$0xff] }
 0x186   : > { %11478 = vmatprep.subr.bf16.mxu0 %v21011_v5  ;;  %v11508_v40 = vpack.c.bf16 %v981_v26, %v980_v34  ;;  %v14997_v28 = vld [vmem:[#allocation2 + $0x169] sm:$0xff] }
 0x187   : > { %1285 = vmatmul.mubr.f32.gmra.mrb[62].mxu1 %v737_v48  ;;  %1875 = vmatmul.mubr.f32.gmra.mrb[92].mxu0 %v14523_v18  ;;  %v14785_v18 = vld [vmem:[#allocation2] sm:$0xff]  ;;  %v14874_v48 = vld [vmem:[#allocation2 + $0x90] sm:$0xff]  ;;  %v9327_v34 = vld [vmem:[%s21006_s3 + $0x748] sm:$0xff] }
 0x188   : > { %1879 = vmatprep.mubr.f32.mxu0 %v14526_v21  ;;  %1354 = vmatprep.mubr.f32.mxu1 %v14764_v52  ;;  %v973_v21 = vld [vmem:[%s21006_s3 + $0x228] sm:$0xff] }
 0x189   : > { %11480 = vmatpush1.bf16.msra.mxu0 %v11479_v46  ;;  %v11492_v12 = vpack.c.bf16 %v973_v21, %v972_v63  ;;  %v11512_v46 = vpack.c.bf16 %v983_v50, %v982_v1  ;;  %v9322_v21 = vld [vmem:[%s21006_s3 + $0x720] sm:$0xff]  ;;  %v9328_v1 = vld [vmem:[%s21006_s3 + $0x750] sm:$0xff]  ;;  %v9329_v50 = vld [vmem:[%s21006_s3 + $0x758] sm:$0xff] }
 0x18a   : > { %11481 = vmatprep.subr.bf16.mxu0 %v21011_v5 }
 0x18b   : > { %1355 = vmatmul.mubr.f32.vlgmr.msra.gmra.mrb[0].mxu1 %v14785_v18  ;;  %1880 = vmatmul.mubr.f32.gmra.mrb[94].mxu0 %v14533_v35  ;;  %v14800_v35 = vld [vmem:[#allocation2 + $0x49] sm:$0xff] }
 0x18c   : > { %11487 = vmatpush3.bf16.msra.mxu1 %v14432_v59  ;;  %1884 = vmatprep.mubr.f32.mxu0 %v14530_v32  ;;  %v975_v59 = vld [vmem:[%s21006_s3 + $0x238] sm:$0xff]  ;;  %v14810_v32 = vld [vmem:[#allocation2 + $0x48] sm:$0xff] }
 0x18d   : > { %1359 = vmatprep.mubr.f32.mxu1 %v14782_v13  ;;  %11489 = vmatprep.subr.bf16.mxu1 %v11488_v47  ;;  %v11496_v8 = vpack.c.bf16 %v975_v59, %v974_v10  ;;  %v14979_v10 = vld [vmem:[#allocation2 + $0x148] sm:$0xff] }
 0x18e   : > { %11483 = vmatpush1.bf16.msra.mxu0 %v11482_v60  ;;  %v14966_v60 = vld [vmem:[#allocation2 + $0x130] sm:$0xff] }
 0x18f   : > { %1360 = vmatmul.mubr.f32.gmra.mrb[2].mxu1 %v14785_v18  ;;  %1885 = vmatmul.mubr.f32.gmra.mrb[96].mxu0 %v14537_v43  ;;  %v14814_v43 = vld [vmem:[#allocation2 + $0x51] sm:$0xff] }
 0x190   : > { %1364 = vmatprep.mubr.f32.mxu1 %v14800_v35  ;;  %1889 = vmatprep.mubr.f32.mxu0 %v14540_v45  ;;  %v14824_v45 = vld [vmem:[#allocation2 + $0x50] sm:$0xff] }
 0x191   : > { %11491 = vmatpush3.bf16.msra.mxu1 %v11488_v47  ;;  %v9320_v47 = vld [vmem:[%s21006_s3 + $0x710] sm:$0xff] }
 0x192   : > { %11493 = vmatprep.subr.bf16.mxu1 %v11492_v12 }
 0x193   : > { %1365 = vmatmul.mubr.f32.gmra.mrb[4].mxu1 %v14810_v32  ;;  %1890 = vmatmul.mubr.f32.gmra.mrb[98].mxu0 %v14545_v53  ;;  %v14828_v53 = vld [vmem:[#allocation2 + $0x69] sm:$0xff] }
 0x194   : > { %1369 = vmatprep.mubr.f32.mxu1 %v14814_v43  ;;  %1894 = vmatprep.mubr.f32.mxu0 %v14543_v51  ;;  %v14838_v51 = vld [vmem:[#allocation2 + $0x68] sm:$0xff] }
 0x195   : > { %11495 = vmatpush3.bf16.msra.mxu1 %v11492_v12  ;;  %v9323_v12 = vld [vmem:[%s21006_s3 + $0x728] sm:$0xff] }
 0x196   : > { %11497 = vmatprep.subr.bf16.mxu1 %v11496_v8  ;;  %v11620_v59 = vpack.c.bf16 %v9323_v12, %v9322_v21  ;;  %v15067_v12 = vld [vmem:[#allocation2 + $0x1b1] sm:$0xff] }
 0x197   : > { %1370 = vmatmul.mubr.f32.gmra.mrb[6].mxu1 %v14824_v45  ;;  %1895 = vmatmul.mubr.f32.gmra.mrb[100].mxu0 %v14549_v57  ;;  %v14842_v57 = vld [vmem:[#allocation2 + $0x71] sm:$0xff] }
 0x198   : > { %1374 = vmatprep.mubr.f32.mxu1 %v14828_v53  ;;  %1899 = vmatprep.mubr.f32.mxu0 %v14558_v2  ;;  %v14852_v2 = vld [vmem:[#allocation2 + $0x70] sm:$0xff] }
 0x199   : > { %11499 = vmatpush3.bf16.msra.mxu1 %v11496_v8  ;;  %v14983_v8 = vld [vmem:[#allocation2 + $0x151] sm:$0xff] }
 0x19a   : > { %11501 = vmatprep.subr.bf16.mxu1 %v11500_v25 }
 0x19b   : > { %1375 = vmatmul.mubr.f32.gmra.mrb[8].mxu1 %v14838_v51  ;;  %1900 = vmatmul.mubr.f32.gmra.mrb[102].mxu0 %v14563_v14  ;;  %v14856_v14 = vld [vmem:[#allocation2 + $0x89] sm:$0xff] }
 0x19c   : > { %1379 = vmatprep.mubr.f32.mxu1 %v14842_v57  ;;  %1904 = vmatprep.mubr.f32.mxu0 %v14561_v7  ;;  %v14866_v7 = vld [vmem:[#allocation2 + $0x88] sm:$0xff] }
 0x19d   : > { %11503 = vmatpush3.bf16.msra.mxu1 %v11500_v25  ;;  %v14993_v25 = vld [vmem:[#allocation2 + $0x150] sm:$0xff] }
 0x19e   : > { %11505 = vmatprep.subr.bf16.mxu1 %v11504_v36 }
 0x19f   : > { %1380 = vmatmul.mubr.f32.gmra.mrb[10].mxu1 %v14852_v2  ;;  %1905 = vmatmul.mubr.f32.gmra.mrb[104].mxu0 %v14573_v24  ;;  %v14870_v24 = vld [vmem:[#allocation2 + $0x91] sm:$0xff] }
 0x1a0   : > { %1384 = vmatprep.mubr.f32.mxu1 %v14856_v14  ;;  %1909 = vmatprep.mubr.f32.mxu0 %v14583_v30  ;;  %v14878_v30 = vld [vmem:[#allocation2 + $0xa9] sm:$0xff] }
 0x1a1   : > { %11507 = vmatpush3.bf16.msra.mxu1 %v11504_v36  ;;  %v9326_v36 = vld [vmem:[%s21006_s3 + $0x740] sm:$0xff] }
 0x1a2   : > { %11509 = vmatprep.subr.bf16.mxu1 %v11508_v40  ;;  %v11628_v26 = vpack.c.bf16 %v9327_v34, %v9326_v36 }
 0x1a3   : > { %1385 = vmatmul.mubr.f32.gmra.mrb[12].mxu1 %v14866_v7  ;;  %1910 = vmatmul.mubr.f32.gmra.mrb[106].mxu0 %v14589_v38  ;;  %v14882_v38 = vld [vmem:[#allocation2 + $0xa8] sm:$0xff] }
 0x1a4   : > { %1389 = vmatprep.mubr.f32.mxu1 %v14870_v24  ;;  %1914 = vmatprep.mubr.f32.mxu0 %v14587_v31  ;;  %v14887_v31 = vld [vmem:[#allocation2 + $0xb1] sm:$0xff] }
 0x1a5   : > { %11511 = vmatpush3.bf16.msra.mxu1 %v11508_v40  ;;  %v15011_v40 = vld [vmem:[#allocation2 + $0x171] sm:$0xff] }
 0x1a6   : > { %11513 = vmatprep.subr.bf16.mxu1 %v11512_v46 }
 0x1a7   : > { %1390 = vmatmul.mubr.f32.gmra.mrb[14].mxu1 %v14874_v48  ;;  %1915 = vmatmul.mubr.f32.gmra.mrb[108].mxu0 %v14602_v42  ;;  %v14891_v42 = vld [vmem:[#allocation2 + $0xb0] sm:$0xff] }
 0x1a8   : > { %1394 = vmatprep.mubr.f32.mxu1 %v14878_v30  ;;  %1919 = vmatprep.mubr.f32.mxu0 %v14613_v4  ;;  %v9318_v4 = vld [vmem:[%s21006_s3 + $0x700] sm:$0xff] }
 0x1a9   : > { %11515 = vmatpush3.bf16.msra.mxu1 %v11512_v46  ;;  %v11612_v49 = vpack.c.bf16 %v9319_v56, %v9318_v4  ;;  %v11632_v46 = vpack.c.bf16 %v9329_v50, %v9328_v1  ;;  %v9330_v4 = vld [vmem:[%s21006_s3 + $0x760] sm:$0xff]  ;;  %v9331_v56 = vld [vmem:[%s21006_s3 + $0x768] sm:$0xff] }
 0x1aa   : > { %11516 = vmatprep.subr.bf16.mxu1 %v21011_v5 }
 0x1ab   : > { %1395 = vmatmul.mubr.f32.gmra.mrb[16].mxu1 %v14882_v38  ;;  %1920 = vmatmul.mubr.f32.gmra.mrb[110].mxu0 %v14619_v55  ;;  %v14901_v55 = vld [vmem:[#allocation2 + $0xc9] sm:$0xff] }
 0x1ac   : > { %1399 = vmatprep.mubr.f32.mxu1 %v14887_v31  ;;  %1924 = vmatprep.mubr.f32.mxu0 %v14617_v6  ;;  %v14905_v6 = vld [vmem:[#allocation2 + $0xc8] sm:$0xff] }
 0x1ad   : > { %11613 = vmatprep.subr.bf16.mxu0 %v11612_v49 }
 0x1af   : > { %1400 = vmatmul.mubr.f32.gmra.mrb[18].mxu1 %v14891_v42  ;;  %1925 = vmatmul.mubr.f32.gmra.mrb[112].mxu0 %v14633_v9  ;;  %v14913_v9 = vld [vmem:[#allocation2 + $0xd0] sm:$0xff] }
 0x1b0   : > { %1404 = vmatprep.mubr.f32.mxu1 %v14901_v55  ;;  %1929 = vmatprep.mubr.f32.mxu0 %v14645_v16  ;;  %v14917_v16 = vld [vmem:[#allocation2 + $0xe9] sm:$0xff] }
 0x1b3   : > { %1405 = vmatmul.mubr.f32.gmra.mrb[20].mxu1 %v14905_v6  ;;  %1930 = vmatmul.mubr.f32.gmra.mrb[114].mxu0 %v14655_v33  ;;  %v14925_v33 = vld [vmem:[#allocation2 + $0xf1] sm:$0xff] }
 0x1b4   : > { %1409 = vmatprep.mubr.f32.mxu1 %v14909_v62  ;;  %1934 = vmatprep.mubr.f32.mxu0 %v14651_v27  ;;  %v14929_v27 = vld [vmem:[#allocation2 + $0xf0] sm:$0xff] }
 0x1b7   : > { %1410 = vmatmul.mubr.f32.gmra.mrb[22].mxu1 %v14913_v9  ;;  %1935 = vmatmul.mubr.f32.gmra.mrb[116].mxu0 %v14668_v41  ;;  %v14933_v41 = vld [vmem:[#allocation2 + $0x109] sm:$0xff] }
 0x1b8   : > { %1414 = vmatprep.mubr.f32.mxu1 %v14917_v16  ;;  %1939 = vmatprep.mubr.f32.mxu0 %v14679_v37  ;;  %v14937_v37 = vld [vmem:[#allocation2 + $0x108] sm:$0xff] }
 0x1bb   : > { %1415 = vmatmul.mubr.f32.gmra.mrb[24].mxu1 %v14921_v0  ;;  %1940 = vmatmul.mubr.f32.gmra.mrb[118].mxu0 %v14685_v54  ;;  %v14941_v54 = vld [vmem:[#allocation2 + $0x111] sm:$0xff] }
 0x1bc   : > { %1419 = vmatprep.mubr.f32.mxu1 %v14925_v33  ;;  %1944 = vmatprep.mubr.f32.mxu0 %v14683_v39  ;;  %v14945_v39 = vld [vmem:[#allocation2 + $0x110] sm:$0xff] }
 0x1bf   : > { %1420 = vmatmul.mubr.f32.gmra.mrb[26].mxu1 %v14929_v27  ;;  %1945 = vmatmul.mubr.f32.gmra.mrb[120].mxu0 %v14698_v11  ;;  %v14949_v11 = vld [vmem:[#allocation2 + $0x129] sm:$0xff] }
 0x1c0   : > { %1424 = vmatprep.mubr.f32.mxu1 %v14933_v41  ;;  %1949 = vmatprep.mubr.f32.mxu0 %v14709_v58  ;;  %v824_v58 = vld [vmem:[#allocation2 + $0x9] sm:$0xff] }
 0x1c3   : > { %1425 = vmatmul.mubr.f32.gmra.mrb[28].mxu1 %v14937_v37  ;;  %1950 = vmatmul.mubr.f32.gmra.mrb[122].mxu0 %v14715_v3  ;;  %v14953_v3 = vld [vmem:[#allocation2 + $0x128] sm:$0xff] }
 0x1c4   : > { %1429 = vmatprep.mubr.f32.mxu1 %v14941_v54  ;;  %1954 = vmatprep.mubr.f32.mxu0 %v14713_v61  ;;  %v14957_v61 = vld [vmem:[#allocation2 + $0x131] sm:$0xff] }
 0x1c7   : > { %1430 = vmatmul.mubr.f32.gmra.mrb[30].mxu1 %v14945_v39  ;;  %1955 = vmatmul.mubr.f32.gmra.mrb[124].mxu0 %v14728_v15  ;;  %v9321_v15 = vld [vmem:[%s21006_s3 + $0x718] sm:$0xff] }
 0x1c8   : > { %1434 = vmatprep.mubr.f32.mxu1 %v14949_v11  ;;  %1959 = vmatprep.mubr.f32.mxu0 %v14739_v23  ;;  %v825_v23 = vld [vmem:[#allocation2 + $0x11] sm:$0xff]  ;;  %v11616_v63 = vpack.c.bf16 %v9321_v15, %v9320_v47 }
 0x1c9   : > { %v9333_v47 = vld [vmem:[%s21006_s3 + $0x778] sm:$0xff]  ;;  %v15051_v15 = vld [vmem:[#allocation2 + $0x190] sm:$0xff] }
 0x1cb   : > { %1435 = vmatmul.mubr.f32.gmra.mrb[32].mxu1 %v14953_v3  ;;  %1960 = vmatmul.mubr.f32.gmra.mrb[126].mxu0 %v14743_v29  ;;  %v14970_v29 = vld [vmem:[#allocation2 + $0x149] sm:$0xff] }
 0x1cc   : > { %1439 = vmatprep.mubr.f32.mxu1 %v14957_v61  ;;  %2029 = vmatprep.mubr.f32.mxu0 %v824_v58  ;;  %v9332_v58 = vld [vmem:[%s21006_s3 + $0x770] sm:$0xff] }
 0x1cf   : > { %1440 = vmatmul.mubr.f32.gmra.mrb[34].mxu1 %v14966_v60  ;;  %2030 = vmatmul.mubr.f32.vlgmr.msra.gmra.mrb[64].mxu0 %v14785_v18 }
 0x1d0   : > { %1444 = vmatprep.mubr.f32.mxu1 %v14970_v29  ;;  %2034 = vmatprep.mubr.f32.mxu0 %v825_v23 }
 0x1d1   : > { %11615 = vmatpush3.bf16.msra.mxu0 %v11612_v49  ;;  %v11636_v49 = vpack.c.bf16 %v9331_v56, %v9330_v4 }
 0x1d2   : > { %11617 = vmatprep.subr.bf16.mxu0 %v11616_v63 }
 0x1d3   : > { %1445 = vmatmul.mubr.f32.gmra.mrb[36].mxu1 %v14979_v10  ;;  %2035 = vmatmul.mubr.f32.gmra.mrb[128].mxu0 %v14785_v18 }
 0x1d4   : > { %1449 = vmatprep.mubr.f32.mxu1 %v14983_v8  ;;  %2039 = vmatprep.mubr.f32.mxu0 %v14764_v52  ;;  %v15007_v52 = vld [vmem:[#allocation2 + $0x168] sm:$0xff] }
 0x1d5   : > { %11619 = vmatpush3.bf16.msra.mxu0 %v11616_v63  ;;  %v15057_v63 = vld [vmem:[#allocation2 + $0x1a9] sm:$0xff] }
 0x1d6   : > { %11621 = vmatprep.subr.bf16.mxu0 %v11620_v59 }
 0x1d7   : > { %1450 = vmatmul.mubr.f32.gmra.mrb[38].mxu1 %v14993_v25  ;;  %2040 = vmatmul.mubr.f32.gmra.mrb[68].mxu0 %v14785_v18 }
 0x1d8   : > { %1454 = vmatprep.mubr.f32.mxu1 %v14997_v28  ;;  %2044 = vmatprep.mubr.f32.mxu0 %v14782_v13  ;;  %v15021_v13 = vld [vmem:[#allocation2 + $0x170] sm:$0xff] }
 0x1d9   : > { %11623 = vmatpush3.bf16.msra.mxu0 %v11620_v59 }
 0x1da   : > { %11625 = vmatprep.subr.bf16.mxu0 %v11624_v20 }
 0x1db   : > { %1455 = vmatmul.mubr.f32.gmra.mrb[40].mxu1 %v15007_v52  ;;  %2045 = vmatmul.mubr.f32.gmra.mrb[130].mxu0 %v14785_v18  ;;  %v15025_v18 = vld [vmem:[#allocation2 + $0x189] sm:$0xff] }
 0x1dc   : > { %1459 = vmatprep.mubr.f32.mxu1 %v15011_v40  ;;  %2049 = vmatprep.mubr.f32.mxu0 %v14800_v35  ;;  %v15035_v35 = vld [vmem:[#allocation2 + $0x188] sm:$0xff] }
 0x1dd   : > { %11627 = vmatpush3.bf16.msra.mxu0 %v11624_v20  ;;  %v15092_v20 = vld [vmem:[#allocation2 + $0x1d1] sm:$0xff] }
 0x1de   : > { %11629 = vmatprep.subr.bf16.mxu0 %v11628_v26 }
 0x1df   : > { %1460 = vmatmul.mubr.f32.gmra.mrb[42].mxu1 %v15021_v13  ;;  %2050 = vmatmul.mubr.f32.gmra.mrb[72].mxu0 %v14810_v32  ;;  %v15039_v32 = vld [vmem:[#allocation2 + $0x191] sm:$0xff] }
 0x1e0   : > { %1464 = vmatprep.mubr.f32.mxu1 %v15025_v18  ;;  %2054 = vmatprep.mubr.f32.mxu0 %v14814_v43 }
 0x1e1   : > { %11631 = vmatpush3.bf16.msra.mxu0 %v11628_v26 }
 0x1e2   : > { %11633 = vmatprep.subr.bf16.mxu0 %v11632_v46 }
 0x1e3   : > { %1465 = vmatmul.mubr.f32.gmra.mrb[44].mxu1 %v15035_v35  ;;  %2055 = vmatmul.mubr.f32.gmra.mrb[132].mxu0 %v14824_v45  ;;  %v11640_v45 = vpack.c.bf16 %v9333_v47, %v9332_v58  ;;  %v864_v58 = vld [vmem:[#allocation2 + $0xa] sm:$0xff] }
 0x1e4   : > { %1469 = vmatprep.mubr.f32.mxu1 %v15039_v32  ;;  %2059 = vmatprep.mubr.f32.mxu0 %v14828_v53  ;;  %v15061_v53 = vld [vmem:[#allocation2 + $0x1a8] sm:$0xff]  ;;  %v817_v47 = vld [vmem:[#allocation2 + $0x210] sm:$0xff] }
 0x1e5   : > { %11635 = vmatpush3.bf16.msra.mxu0 %v11632_v46 }
 0x1e6   : > { %v15049_v43 = vpop.f32.mrb[34].mxu0  ;;  %11637 = vmatprep.subr.bf16.mxu0 %v11636_v49 }
 0x1e7   : > { %1470 = vmatmul.mubr.f32.gmra.mrb[46].mxu1 %v15051_v15  ;;  %v15054_v23 = vpop.f32.mrb[35].mxu0  ;;  %2060 = vmatmul.mubr.f32.gmra.mrb[76].mxu0 %v14838_v51  ;;  %v15073_v51 = vld [vmem:[#allocation2 + $0x1b0] sm:$0xff] }
 0x1e8   : > { %1474 = vmatprep.mubr.f32.mxu1 %v15057_v63  ;;  %2064 = vmatprep.mubr.f32.mxu0 %v14842_v57 }
 0x1e9   : > { %11639 = vmatpush3.bf16.msra.mxu0 %v11636_v49 }
 0x1ea   : > { %v15063_v21 = vpop.f32.mrb[36].mxu0  ;;  %11641 = vmatprep.subr.bf16.mxu0 %v11640_v45 }
 0x1eb   : > { %1475 = vmatmul.mubr.f32.gmra.mrb[48].mxu1 %v15061_v53  ;;  %2065 = vmatmul.mubr.f32.gmra.mrb[134].mxu0 %v14852_v2  ;;  %v15069_v59 = vpop.f32.mrb[37].mxu0  ;;  %v15080_v2 = vld [vmem:[#allocation2 + $0x1c9] sm:$0xff] }
 0x1ec   : > { %1479 = vmatprep.mubr.f32.mxu1 %v15067_v12  ;;  %2069 = vmatprep.mubr.f32.mxu0 %v14856_v14  ;;  %v15086_v14 = vld [vmem:[#allocation2 + $0x1c8] sm:$0xff] }
 0x1ed   : > { %11643 = vmatpush3.bf16.msra.mxu0 %v11640_v45 }
 0x1ee   : > { %v15075_v57 = vpop.f32.mrb[38].mxu0  ;;  %11644 = vmatprep.subr.bf16.mxu0 %v21011_v5 }
 0x1ef   : > { %1480 = vmatmul.mubr.f32.gmra.mrb[50].mxu1 %v15073_v51  ;;  %2070 = vmatmul.mubr.f32.gmra.mrb[80].mxu0 %v14866_v7  ;;  %v15082_v19 = vpop.f32.mrb[39].mxu0  ;;  %v15098_v7 = vld [vmem:[#allocation2 + $0x1d0] sm:$0xff] }
 0x1f0   : > { %1484 = vmatprep.mubr.f32.mxu1 %v15080_v2  ;;  %2074 = vmatprep.mubr.f32.mxu0 %v14870_v24  ;;  %v15104_v24 = vld [vmem:[#allocation2 + $0x1e9] sm:$0xff] }
 0x1f2   : > { %v15088_v17 = vpop.f32.mrb[40].mxu0 }
 0x1f3   : > { %1485 = vmatmul.mubr.f32.gmra.mrb[52].mxu1 %v15086_v14  ;;  %2075 = vmatmul.mubr.f32.gmra.mrb[136].mxu0 %v14874_v48  ;;  %v15094_v36 = vpop.f32.mrb[41].mxu0  ;;  %v15110_v48 = vld [vmem:[#allocation2 + $0x1e8] sm:$0xff] }
 0x1f4   : > { %1489 = vmatprep.mubr.f32.mxu1 %v15092_v20  ;;  %2079 = vmatprep.mubr.f32.mxu0 %v14878_v30  ;;  %v15116_v30 = vld [vmem:[#allocation2 + $0x1f1] sm:$0xff] }
 0x1f6   : > { %v15100_v34 = vpop.f32.mrb[42].mxu0 }
 0x1f7   : > { %1490 = vmatmul.mubr.f32.gmra.mrb[54].mxu1 %v15098_v7  ;;  %2080 = vmatmul.mubr.f32.gmra.mrb[84].mxu0 %v14882_v38  ;;  %v15106_v26 = vpop.f32.mrb[43].mxu0  ;;  %v15122_v38 = vld [vmem:[#allocation2 + $0x1f0] sm:$0xff] }
 0x1f8   : > { %1494 = vmatprep.mubr.f32.mxu1 %v15104_v24  ;;  %2084 = vmatprep.mubr.f32.mxu0 %v14887_v31  ;;  %v856_v31 = vld [vmem:[#allocation2 + $0x209] sm:$0xff] }
 0x1fa   : > { %v15112_v1 = vpop.f32.mrb[44].mxu0 }
 0x1fb   : > { %1495 = vmatmul.mubr.f32.gmra.mrb[56].mxu1 %v15110_v48  ;;  %2085 = vmatmul.mubr.f32.gmra.mrb[138].mxu0 %v14891_v42  ;;  %v15118_v50 = vpop.f32.mrb[45].mxu0  ;;  %v816_v42 = vld [vmem:[#allocation2 + $0x208] sm:$0xff] }
 0x1fc   : > { %1499 = vmatprep.mubr.f32.mxu1 %v15116_v30  ;;  %2089 = vmatprep.mubr.f32.mxu0 %v14901_v55  ;;  %v857_v55 = vld [vmem:[#allocation2 + $0x211] sm:$0xff] }
 0x1fe   : > { %v15124_v46 = vpop.f32.mrb[46].mxu0 }
 0x1ff   : > { %1500 = vmatmul.mubr.f32.gmra.mrb[58].mxu1 %v15122_v38  ;;  %2090 = vmatmul.mubr.f32.gmra.mrb[88].mxu0 %v14905_v6  ;;  %v15128_v4 = vpop.f32.mrb[47].mxu0  ;;  %v9254_v6 = vld [vmem:[%s21006_s3 + $0x500] sm:$0xff] }
 0x200   : > { %1504 = vmatprep.mubr.f32.mxu1 %v856_v31  ;;  %2094 = vmatprep.mubr.f32.mxu0 %v14909_v62  ;;  %v9255_v62 = vld [vmem:[%s21006_s3 + $0x508] sm:$0xff] }
 0x201   : > { %v11517_v31 = vpack.c.bf16 %v9255_v62, %v9254_v6  ;;  %v21127_v6 = vmov 0.0|0.0   ;;  %v9258_v62 = vld [vmem:[%s21006_s3 + $0x520] sm:$0xff] }
 0x202   : > { %v15131_v56 = vpop.f32.mrb[48].mxu0 }
 0x203   : > { %21121 = vst [vmem:[#allocation4_spill] sm:$0xff] %v15131_v56  ;;  %1505 = vmatmul.mubr.f32.gmra.mrb[60].mxu1 %v816_v42  ;;  %2095 = vmatmul.mubr.f32.gmra.mrb[140].mxu0 %v14913_v9  ;;  %v15134_v49 = vpop.f32.mrb[49].mxu0  ;;  %v9256_v42 = vld [vmem:[%s21006_s3 + $0x510] sm:$0xff] }
 0x204   : > { %21122 = vst [vmem:[#allocation5_spill] sm:$0xff] %v15134_v49  ;;  %1509 = vmatprep.mubr.f32.mxu1 %v857_v55  ;;  %2099 = vmatprep.mubr.f32.mxu0 %v14917_v16  ;;  %v865_v16 = vld [vmem:[#allocation2 + $0x12] sm:$0xff] }
 0x205   : > { %v9257_v55 = vld [vmem:[%s21006_s3 + $0x518] sm:$0xff] }
 0x206   : > { %v15143_v45 = vpop.f32.mrb[50].mxu0 }
 0x207   : > { %21123 = vst [vmem:[#allocation6_spill] sm:$0xff] %v15143_v45  ;;  %1510 = vmatmul.mubr.f32.gmra.mrb[62].mxu1 %v817_v47  ;;  %2100 = vmatmul.mubr.f32.gmra.mrb[92].mxu0 %v14921_v0  ;;  %v15146_v9 = vpop.f32.mrb[51].mxu0  ;;  %v9259_v47 = vld [vmem:[%s21006_s3 + $0x528] sm:$0xff]  ;;  %v9336_v45 = vld [vmem:[%s21006_s3 + $0x790] sm:$0xff] }
 0x208   : > { %21124 = vst [vmem:[#allocation7_spill] sm:$0xff] %v15146_v9  ;;  %2104 = vmatprep.mubr.f32.mxu0 %v14925_v33  ;;  %10540 = vmatprep.mubr.f32.mxu1 %v864_v58  ;;  %v11520_v33 = vpack.c.bf16 %v9257_v55, %v9256_v42  ;;  %v13159_v58 = vld [vmem:[#allocation2 + $0x2a] sm:$0xff] }
 0x209   : > { %v15174_v42 = vld [vmem:[#allocation2 + $0x4a] sm:$0xff] }
 0x20a   : > { %v15155_v5 = vpop.f32.mrb[52].mxu0  ;;  %v9260_v55 = vld [vmem:[%s21006_s3 + $0x530] sm:$0xff] }
 0x20b   : > { %21125 = vst [vmem:[#allocation8_spill] sm:$0xff] %v15155_v5  ;;  %2105 = vmatmul.mubr.f32.gmra.mrb[142].mxu0 %v14929_v27  ;;  %10541 = vmatmul.mubr.f32.vlgmr.msra.gmra.mrb[64].mxu1 %v865_v16  ;;  %v15158_v0 = vpop.f32.mrb[53].mxu0  ;;  %v13160_v16 = vld [vmem:[#allocation2 + $0x32] sm:$0xff] }
 0x20c   : > { %21126 = vst [vmem:[#allocation9_spill] sm:$0xff] %v15158_v0  ;;  %11518 = vmatpush1.bf16.msra.mxu1 %v11517_v31  ;;  %2109 = vmatprep.mubr.f32.mxu0 %v14933_v41  ;;  %v11523_v31 = vpack.c.bf16 %v9259_v47, %v9258_v62  ;;  %v15193_v47 = vld [vmem:[#allocation2 + $0x6a] sm:$0xff]  ;;  %v9334_v0 = vld [vmem:[%s21006_s3 + $0x780] sm:$0xff] }
 0x20d   : > { %10543 = vmatprep.mubr.f32.mxu1 %v13159_v58  ;;  %11519 = vmatprep.subr.bf16.mxu1 %v21127_v6 }
 0x20e   : > { %v15168_v27 = vpop.f32.mrb[54].mxu0 }
 0x20f   : > { %21128 = vst [vmem:[#allocation10_spill] sm:$0xff] %v15168_v27  ;;  %2110 = vmatmul.mubr.f32.gmra.mrb[96].mxu0 %v14937_v37  ;;  %10544 = vmatmul.mubr.f32.gmra.mrb[66].mxu1 %v13160_v16  ;;  %v15171_v41 = vpop.f32.mrb[55].mxu0  ;;  %v9261_v37 = vld [vmem:[%s21006_s3 + $0x538] sm:$0xff]  ;;  %v9263_v16 = vld [vmem:[%s21006_s3 + $0x548] sm:$0xff]  ;;  %v9276_v27 = vld [vmem:[%s21006_s3 + $0x5b0] sm:$0xff] }
 0x210   : > { %21129 = vst [vmem:[#allocation11_spill] sm:$0xff] %v15171_v41  ;;  %11521 = vmatpush1.bf16.msra.mxu1 %v11520_v33  ;;  %2114 = vmatprep.mubr.f32.mxu0 %v14941_v54  ;;  %v15187_v54 = vld [vmem:[#allocation2 + $0x52] sm:$0xff]  ;;  %v11526_v62 = vpack.c.bf16 %v9261_v37, %v9260_v55  ;;  %v15212_v37 = vld [vmem:[#allocation2 + $0x8a] sm:$0xff] }
 0x211   : > { %10546 = vmatprep.mubr.f32.mxu1 %v15174_v42  ;;  %11522 = vmatprep.subr.bf16.mxu1 %v21127_v6 }
 0x212   : > { %v15184_v58 = vpop.f32.mrb[56].mxu0 }
 0x213   : > { %21130 = vst [vmem:[#allocation12_spill] sm:$0xff] %v15184_v58  ;;  %2115 = vmatmul.mubr.f32.gmra.mrb[144].mxu0 %v14945_v39  ;;  %10547 = vmatmul.mubr.f32.gmra.mrb[68].mxu1 %v15187_v54  ;;  %v15190_v33 = vpop.f32.mrb[57].mxu0  ;;  %v9262_v39 = vld [vmem:[%s21006_s3 + $0x540] sm:$0xff] }
 0x214   : > { %21131 = vst [vmem:[#allocation13_spill] sm:$0xff] %v15190_v33  ;;  %11524 = vmatpush1.bf16.msra.mxu1 %v11523_v31  ;;  %2119 = vmatprep.mubr.f32.mxu0 %v14949_v11  ;;  %v15206_v11 = vld [vmem:[#allocation2 + $0x72] sm:$0xff]  ;;  %v11529_v55 = vpack.c.bf16 %v9263_v16, %v9262_v39  ;;  %v15231_v16 = vld [vmem:[#allocation2 + $0xaa] sm:$0xff] }
 0x215   : > { %10549 = vmatprep.mubr.f32.mxu1 %v15193_v47  ;;  %11525 = vmatprep.subr.bf16.mxu1 %v21127_v6 }
 0x216   : > { %v15203_v58 = vpop.f32.mrb[58].mxu0 }
 0x217   : > { %21132 = vst [vmem:[#allocation14_spill] sm:$0xff] %v15203_v58  ;;  %2120 = vmatmul.mubr.f32.gmra.mrb[100].mxu0 %v14953_v3  ;;  %10550 = vmatmul.mubr.f32.gmra.mrb[70].mxu1 %v15206_v11  ;;  %v15209_v31 = vpop.f32.mrb[59].mxu0  ;;  %v9264_v3 = vld [vmem:[%s21006_s3 + $0x550] sm:$0xff]  ;;  %v9265_v58 = vld [vmem:[%s21006_s3 + $0x558] sm:$0xff] }
 0x218   : > { %21133 = vst [vmem:[#allocation15_spill] sm:$0xff] %v15209_v31  ;;  %11527 = vmatpush1.bf16.msra.mxu1 %v11526_v62  ;;  %2124 = vmatprep.mubr.f32.mxu0 %v14957_v61  ;;  %v15225_v61 = vld [vmem:[#allocation2 + $0x92] sm:$0xff]  ;;  %v11532_v39 = vpack.c.bf16 %v9265_v58, %v9264_v3  ;;  %v15250_v3 = vld [vmem:[#allocation2 + $0xca] sm:$0xff] }
 0x219   : > { %10552 = vmatprep.mubr.f32.mxu1 %v15212_v37  ;;  %11528 = vmatprep.subr.bf16.mxu1 %v21127_v6 }
 0x21a   : > { %v15222_v33 = vpop.f32.mrb[60].mxu0 }
 0x21b   : > { %21134 = vst [vmem:[#allocation16_spill] sm:$0xff] %v15222_v33  ;;  %2125 = vmatmul.mubr.f32.gmra.mrb[146].mxu0 %v14966_v60  ;;  %10553 = vmatmul.mubr.f32.gmra.mrb[72].mxu1 %v15225_v61  ;;  %v15228_v62 = vpop.f32.mrb[61].mxu0  ;;  %v9266_v60 = vld [vmem:[%s21006_s3 + $0x560] sm:$0xff]  ;;  %v9267_v33 = vld [vmem:[%s21006_s3 + $0x568] sm:$0xff] }
 0x21c   : > { %21135 = vst [vmem:[#allocation17_spill] sm:$0xff] %v15228_v62  ;;  %11530 = vmatpush1.bf16.msra.mxu1 %v11529_v55  ;;  %2129 = vmatprep.mubr.f32.mxu0 %v14970_v29  ;;  %v15244_v29 = vld [vmem:[#allocation2 + $0xb2] sm:$0xff]  ;;  %v11535_v55 = vpack.c.bf16 %v9267_v33, %v9266_v60  ;;  %v15265_v33 = vld [vmem:[#allocation2 + $0xea] sm:$0xff]  ;;  %v9270_v60 = vld [vmem:[%s21006_s3 + $0x580] sm:$0xff] }
 0x21d   : > { %10555 = vmatprep.mubr.f32.mxu1 %v15231_v16  ;;  %11531 = vmatprep.subr.bf16.mxu1 %v21127_v6  ;;  %v9272_v62 = vld [vmem:[%s21006_s3 + $0x590] sm:$0xff] }
 0x21e   : > { %v15241_v31 = vpop.f32.mrb[62].mxu0 }
 0x21f   : > { %21136 = vst [vmem:[#allocation18_spill] sm:$0xff] %v15241_v31  ;;  %2130 = vmatmul.mubr.f32.gmra.mrb[104].mxu0 %v14979_v10  ;;  %10556 = vmatmul.mubr.f32.gmra.mrb[74].mxu1 %v15244_v29  ;;  %v15247_v58 = vpop.f32.mrb[63].mxu0  ;;  %v9268_v10 = vld [vmem:[%s21006_s3 + $0x570] sm:$0xff]  ;;  %v9269_v31 = vld [vmem:[%s21006_s3 + $0x578] sm:$0xff] }
 0x220   : > { %21137 = vst [vmem:[#allocation19_spill] sm:$0xff] %v15247_v58  ;;  %11533 = vmatpush1.bf16.msra.mxu1 %v11532_v39  ;;  %2134 = vmatprep.mubr.f32.mxu0 %v14983_v8  ;;  %v15261_v39 = vld [vmem:[#allocation2 + $0xd2] sm:$0xff]  ;;  %v11538_v8 = vpack.c.bf16 %v9269_v31, %v9268_v10  ;;  %v15282_v10 = vld [vmem:[#allocation2 + $0x10a] sm:$0xff] }
 0x221   : > { %10558 = vmatprep.mubr.f32.mxu1 %v15250_v3  ;;  %11534 = vmatprep.subr.bf16.mxu1 %v21127_v6 }
 0x223   : > { %2135 = vmatmul.mubr.f32.gmra.mrb[148].mxu0 %v14993_v25  ;;  %10559 = vmatmul.mubr.f32.gmra.mrb[76].mxu1 %v15261_v39  ;;  %v9271_v25 = vld [vmem:[%s21006_s3 + $0x588] sm:$0xff] }
 0x224   : > { %11536 = vmatpush1.bf16.msra.mxu1 %v11535_v55  ;;  %2139 = vmatprep.mubr.f32.mxu0 %v14997_v28  ;;  %v15278_v28 = vld [vmem:[#allocation2 + $0xf2] sm:$0xff]  ;;  %v11541_v55 = vpack.c.bf16 %v9271_v25, %v9270_v60  ;;  %v15297_v60 = vld [vmem:[#allocation2 + $0x12a] sm:$0xff]  ;;  %v9274_v25 = vld [vmem:[%s21006_s3 + $0x5a0] sm:$0xff] }
 0x225   : > { %10561 = vmatprep.mubr.f32.mxu1 %v15265_v33  ;;  %11537 = vmatprep.subr.bf16.mxu1 %v21127_v6 }
 0x226   : > { %v15275_v58 = vpop.f32.mrb[66].mxu0 }
 0x227   : > { %2140 = vmatmul.mubr.f32.gmra.mrb[108].mxu0 %v15007_v52  ;;  %10562 = vmatmul.mubr.f32.gmra.mrb[78].mxu1 %v15278_v28  ;;  %v1813_v31 = vpop.f32.mrb[67].mxu0  ;;  %v9273_v52 = vld [vmem:[%s21006_s3 + $0x598] sm:$0xff] }
 0x228   : > { %11539 = vmatpush1.bf16.msra.mxu1 %v11538_v8  ;;  %2144 = vmatprep.mubr.f32.mxu0 %v15011_v40  ;;  %v15293_v8 = vld [vmem:[#allocation2 + $0x112] sm:$0xff]  ;;  %v11544_v40 = vpack.c.bf16 %v9273_v52, %v9272_v62  ;;  %v15314_v52 = vld [vmem:[#allocation2 + $0x14a] sm:$0xff] }
 0x229   : > { %10564 = vmatprep.mubr.f32.mxu1 %v15282_v10  ;;  %11540 = vmatprep.subr.bf16.mxu1 %v21127_v6 }
 0x22b   : > { %2145 = vmatmul.mubr.f32.gmra.mrb[150].mxu0 %v15021_v13  ;;  %10565 = vmatmul.mubr.f32.gmra.mrb[80].mxu1 %v15293_v8  ;;  %v9275_v13 = vld [vmem:[%s21006_s3 + $0x5a8] sm:$0xff] }
 0x22c   : > { %11542 = vmatpush1.bf16.msra.mxu1 %v11541_v55  ;;  %2149 = vmatprep.mubr.f32.mxu0 %v15025_v18  ;;  %v15310_v18 = vld [vmem:[#allocation2 + $0x132] sm:$0xff]  ;;  %v11547_v55 = vpack.c.bf16 %v9275_v13, %v9274_v25  ;;  %v15329_v25 = vld [vmem:[#allocation2 + $0x16a] sm:$0xff]  ;;  %v9278_v13 = vld [vmem:[%s21006_s3 + $0x5c0] sm:$0xff] }
 0x22d   : > { %10567 = vmatprep.mubr.f32.mxu1 %v15297_v60  ;;  %11543 = vmatprep.subr.bf16.mxu1 %v21127_v6 }
 0x22e   : > { %v15307_v31 = vpop.f32.mrb[70].mxu0 }
 0x22f   : > { %2150 = vmatmul.mubr.f32.gmra.mrb[112].mxu0 %v15035_v35  ;;  %10568 = vmatmul.mubr.f32.gmra.mrb[82].mxu1 %v15310_v18  ;;  %v1823_v62 = vpop.f32.mrb[71].mxu0  ;;  %v9277_v35 = vld [vmem:[%s21006_s3 + $0x5b8] sm:$0xff] }
 0x230   : > { %11545 = vmatpush1.bf16.msra.mxu1 %v11544_v40  ;;  %2154 = vmatprep.mubr.f32.mxu0 %v15039_v32  ;;  %v15325_v40 = vld [vmem:[#allocation2 + $0x152] sm:$0xff]  ;;  %v11550_v32 = vpack.c.bf16 %v9277_v35, %v9276_v27  ;;  %v15346_v35 = vld [vmem:[#allocation2 + $0x18a] sm:$0xff] }
 0x231   : > { %10570 = vmatprep.mubr.f32.mxu1 %v15314_v52  ;;  %11546 = vmatprep.subr.bf16.mxu1 %v21127_v6 }
 0x233   : > { %2155 = vmatmul.mubr.f32.gmra.mrb[152].mxu0 %v15051_v15  ;;  %10571 = vmatmul.mubr.f32.gmra.mrb[84].mxu1 %v15325_v40  ;;  %v9279_v15 = vld [vmem:[%s21006_s3 + $0x5c8] sm:$0xff] }
 0x234   : > { %11548 = vmatpush1.bf16.msra.mxu1 %v11547_v55  ;;  %2159 = vmatprep.mubr.f32.mxu0 %v15057_v63  ;;  %v15342_v63 = vld [vmem:[#allocation2 + $0x172] sm:$0xff]  ;;  %v11553_v27 = vpack.c.bf16 %v9279_v15, %v9278_v13  ;;  %v15361_v13 = vld [vmem:[#allocation2 + $0x1aa] sm:$0xff]  ;;  %v9282_v15 = vld [vmem:[%s21006_s3 + $0x5e0] sm:$0xff] }
 0x235   : > { %10573 = vmatprep.mubr.f32.mxu1 %v15329_v25  ;;  %11549 = vmatprep.subr.bf16.mxu1 %v21127_v6 }
 0x236   : > { %v15339_v62 = vpop.f32.mrb[74].mxu0 }
 0x237   : > { %v1833_v55 = vpop.f32.mrb[75].mxu0  ;;  %2160 = vmatmul.mubr.f32.gmra.mrb[116].mxu0 %v15061_v53  ;;  %10574 = vmatmul.mubr.f32.gmra.mrb[86].mxu1 %v15342_v63  ;;  %v9281_v53 = vld [vmem:[%s21006_s3 + $0x5d8] sm:$0xff] }
 0x238   : > { %11551 = vmatpush1.bf16.msra.mxu1 %v11550_v32  ;;  %2164 = vmatprep.mubr.f32.mxu0 %v15067_v12  ;;  %v9280_v55 = vld [vmem:[%s21006_s3 + $0x5d0] sm:$0xff] }
 0x239   : > { %10576 = vmatprep.mubr.f32.mxu1 %v15346_v35  ;;  %11552 = vmatprep.subr.bf16.mxu1 %v21127_v6  ;;  %v15357_v32 = vld [vmem:[#allocation2 + $0x192] sm:$0xff]  ;;  %v11556_v12 = vpack.c.bf16 %v9281_v53, %v9280_v55  ;;  %v15378_v53 = vld [vmem:[#allocation2 + $0x1ca] sm:$0xff] }
 0x23b   : > { %2165 = vmatmul.mubr.f32.gmra.mrb[154].mxu0 %v15073_v51  ;;  %10577 = vmatmul.mubr.f32.gmra.mrb[88].mxu1 %v15357_v32  ;;  %v9283_v51 = vld [vmem:[%s21006_s3 + $0x5e8] sm:$0xff] }
 0x23c   : > { %11554 = vmatpush1.bf16.msra.mxu1 %v11553_v27  ;;  %2169 = vmatprep.mubr.f32.mxu0 %v15080_v2  ;;  %v15374_v2 = vld [vmem:[#allocation2 + $0x1b2] sm:$0xff]  ;;  %v11559_v55 = vpack.c.bf16 %v9283_v51, %v9282_v15  ;;  %v15393_v15 = vld [vmem:[#allocation2 + $0x1ea] sm:$0xff]  ;;  %v9286_v51 = vld [vmem:[%s21006_s3 + $0x600] sm:$0xff] }
 0x23d   : > { %10579 = vmatprep.mubr.f32.mxu1 %v15361_v13  ;;  %11555 = vmatprep.subr.bf16.mxu1 %v21127_v6 }
 0x23e   : > { %v15371_v41 = vpop.f32.mrb[78].mxu0 }
 0x23f   : > { %v1843_v27 = vpop.f32.mrb[79].mxu0  ;;  %2170 = vmatmul.mubr.f32.gmra.mrb[120].mxu0 %v15086_v14  ;;  %10580 = vmatmul.mubr.f32.gmra.mrb[90].mxu1 %v15374_v2  ;;  %v9285_v14 = vld [vmem:[%s21006_s3 + $0x5f8] sm:$0xff] }
 0x240   : > { %11557 = vmatpush1.bf16.msra.mxu1 %v11556_v12  ;;  %2174 = vmatprep.mubr.f32.mxu0 %v15092_v20  ;;  %v9284_v27 = vld [vmem:[%s21006_s3 + $0x5f0] sm:$0xff] }
 0x241   : > { %10582 = vmatprep.mubr.f32.mxu1 %v15378_v53  ;;  %11558 = vmatprep.subr.bf16.mxu1 %v21127_v6  ;;  %v15389_v12 = vld [vmem:[#allocation2 + $0x1d2] sm:$0xff]  ;;  %v11562_v20 = vpack.c.bf16 %v9285_v14, %v9284_v27  ;;  %v13189_v14 = vld [vmem:[#allocation2 + $0x47] sm:$0xff] }
 0x243   : > { %2175 = vmatmul.mubr.f32.gmra.mrb[156].mxu0 %v15098_v7  ;;  %10583 = vmatmul.mubr.f32.gmra.mrb[92].mxu1 %v15389_v12  ;;  %v9287_v7 = vld [vmem:[%s21006_s3 + $0x608] sm:$0xff] }
 0x244   : > { %11560 = vmatpush1.bf16.msra.mxu1 %v11559_v55  ;;  %2179 = vmatprep.mubr.f32.mxu0 %v15104_v24  ;;  %v15406_v24 = vld [vmem:[#allocation2 + $0x1f2] sm:$0xff]  ;;  %v11565_v27 = vpack.c.bf16 %v9287_v7, %v9286_v51 }
 0x245   : > { %10585 = vmatprep.mubr.f32.mxu1 %v15393_v15  ;;  %11561 = vmatprep.subr.bf16.mxu1 %v21127_v6  ;;  %v13191_v51 = vld [vmem:[#allocation2 + $0x4f] sm:$0xff] }
 0x246   : > { %v15403_v5 = vpop.f32.mrb[82].mxu0 }
 0x247   : > { %v1853_v55 = vpop.f32.mrb[83].mxu0  ;;  %2180 = vmatmul.mubr.f32.gmra.mrb[124].mxu0 %v15110_v48  ;;  %10586 = vmatmul.mubr.f32.gmra.mrb[94].mxu1 %v15406_v24  ;;  %v9335_v48 = vld [vmem:[%s21006_s3 + $0x788] sm:$0xff] }
 0x248   : > { %11563 = vmatpush1.bf16.msra.mxu1 %v11562_v20  ;;  %2184 = vmatprep.mubr.f32.mxu0 %v15116_v30  ;;  %v9288_v55 = vld [vmem:[%s21006_s3 + $0x610] sm:$0xff]  ;;  %v9289_v30 = vld [vmem:[%s21006_s3 + $0x618] sm:$0xff]  ;;  %v13190_v20 = vld [vmem:[#allocation2 + $0x46] sm:$0xff]  ;;  %v11645_v7 = vpack.c.bf16 %v9335_v48, %v9334_v0 }
 0x249   : > { %2560 = vmatprep.mubr.f32.mxu1 %v13189_v14  ;;  %11564 = vmatprep.subr.bf16.mxu1 %v21127_v6  ;;  %v11568_v14 = vpack.c.bf16 %v9289_v30, %v9288_v55  ;;  %v9291_v0 = vld [vmem:[%s21006_s3 + $0x628] sm:$0xff] }
 0x24a   : > { %v13192_v48 = vld [vmem:[#allocation2 + $0x4e] sm:$0xff] }
 0x24b   : > { %2185 = vmatmul.mubr.f32.gmra.mrb[158].mxu0 %v15122_v38  ;;  %2561 = vmatmul.mubr.f32.vlgmr.msra.gmra.mrb[96].mxu1 %v13190_v20  ;;  %v9337_v38 = vld [vmem:[%s21006_s3 + $0x798] sm:$0xff]  ;;  %v15441_v55 = vld [vmem:[#allocation2 + $0x67] sm:$0xff] }
 0x24c   : > { %11566 = vmatpush1.bf16.msra.mxu1 %v11565_v27  ;;  %2565 = vmatprep.mubr.f32.mxu1 %v13191_v51  ;;  %v9290_v27 = vld [vmem:[%s21006_s3 + $0x620] sm:$0xff]  ;;  %v11648_v30 = vpack.c.bf16 %v9337_v38, %v9336_v45  ;;  %v9293_v45 = vld [vmem:[%s21006_s3 + $0x638] sm:$0xff] }
 0x24d   : > { %10620 = vmatprep.mubr.f32.mxu0 %v15174_v42  ;;  %11567 = vmatprep.subr.bf16.mxu1 %v21127_v6  ;;  %v9338_v20 = vld [vmem:[%s21006_s3 + $0x7a0] sm:$0xff]  ;;  %v11571_v51 = vpack.c.bf16 %v9291_v0, %v9290_v27  ;;  %v9340_v27 = vld [vmem:[%s21006_s3 + $0x7b0] sm:$0xff] }
 0x24e   : > { %v15429_v9 = vpop.f32.mrb[86].mxu0 }
 0x24f   : > { %v1863_v42 = vpop.f32.mrb[87].mxu0  ;;  %2566 = vmatmul.mubr.f32.gmra.mrb[98].mxu1 %v13192_v48  ;;  %10621 = vmatmul.mubr.f32.vlgmr.msra.gmra.mrb[160].mxu0 %v15187_v54  ;;  %v9339_v54 = vld [vmem:[%s21006_s3 + $0x7a8] sm:$0xff] }
 0x250   : > { %2570 = vmatprep.mubr.f32.mxu1 %v15441_v55  ;;  %10623 = vmatprep.mubr.f32.mxu0 %v15193_v47  ;;  %v9292_v47 = vld [vmem:[%s21006_s3 + $0x630] sm:$0xff]  ;;  %v11651_v38 = vpack.c.bf16 %v9339_v54, %v9338_v20  ;;  %v9295_v48 = vld [vmem:[%s21006_s3 + $0x648] sm:$0xff] }
 0x251   : > { %11646 = vmatpush1.bf16.msra.mxu0 %v11645_v7  ;;  %11569 = vmatpush1.bf16.msra.mxu1 %v11568_v14  ;;  %v15459_v7 = vld [vmem:[#allocation2 + $0x66] sm:$0xff]  ;;  %v15463_v14 = vld [vmem:[#allocation2 + $0x6f] sm:$0xff]  ;;  %v11574_v0 = vpack.c.bf16 %v9293_v45, %v9292_v47 }
 0x252   : > { %11647 = vmatprep.subr.bf16.mxu0 %v21127_v6  ;;  %11570 = vmatprep.subr.bf16.mxu1 %v21127_v6  ;;  %v15483_v20 = vld [vmem:[#allocation2 + $0x6e] sm:$0xff]  ;;  %v9342_v47 = vld [vmem:[%s21006_s3 + $0x7c0] sm:$0xff] }
 0x253   : > { %2571 = vmatmul.mubr.f32.gmra.mrb[100].mxu1 %v15459_v7  ;;  %10624 = vmatmul.mubr.f32.gmra.mrb[162].mxu0 %v15206_v11  ;;  %v9341_v11 = vld [vmem:[%s21006_s3 + $0x7b8] sm:$0xff] }
 0x254   : > { %2575 = vmatprep.mubr.f32.mxu1 %v15463_v14  ;;  %10626 = vmatprep.mubr.f32.mxu0 %v15212_v37  ;;  %v9294_v37 = vld [vmem:[%s21006_s3 + $0x640] sm:$0xff]  ;;  %v11654_v54 = vpack.c.bf16 %v9341_v11, %v9340_v27 }
 0x255   : > { %11649 = vmatpush1.bf16.msra.mxu0 %v11648_v30  ;;  %11572 = vmatpush1.bf16.msra.mxu1 %v11571_v51  ;;  %v15487_v51 = vld [vmem:[#allocation2 + $0x87] sm:$0xff]  ;;  %v11577_v45 = vpack.c.bf16 %v9295_v48, %v9294_v37  ;;  %v9344_v37 = vld [vmem:[%s21006_s3 + $0x7d0] sm:$0xff] }
 0x256   : > { %v15470_v42 = vpop.f32.mrb[90].mxu0  ;;  %11650 = vmatprep.subr.bf16.mxu0 %v21127_v6  ;;  %11573 = vmatprep.subr.bf16.mxu1 %v21127_v6  ;;  %v15505_v27 = vld [vmem:[#allocation2 + $0x86] sm:$0xff] }
 0x257   : > { %v1873_v30 = vpop.f32.mrb[91].mxu0  ;;  %2576 = vmatmul.mubr.f32.gmra.mrb[102].mxu1 %v15483_v20  ;;  %10627 = vmatmul.mubr.f32.gmra.mrb[164].mxu0 %v15225_v61  ;;  %v9343_v61 = vld [vmem:[%s21006_s3 + $0x7c8] sm:$0xff] }
 0x258   : > { %2580 = vmatprep.mubr.f32.mxu1 %v15487_v51  ;;  %10629 = vmatprep.mubr.f32.mxu0 %v15231_v16  ;;  %v9296_v16 = vld [vmem:[%s21006_s3 + $0x650] sm:$0xff]  ;;  %v11657_v11 = vpack.c.bf16 %v9343_v61, %v9342_v47 }
 0x259   : > { %11652 = vmatpush1.bf16.msra.mxu0 %v11651_v38  ;;  %11575 = vmatpush1.bf16.msra.mxu1 %v11574_v0  ;;  %v9297_v38 = vld [vmem:[%s21006_s3 + $0x658] sm:$0xff]  ;;  %v15509_v0 = vld [vmem:[#allocation2 + $0x8f] sm:$0xff] }
 0x25a   : > { %11653 = vmatprep.subr.bf16.mxu0 %v21127_v6  ;;  %11576 = vmatprep.subr.bf16.mxu1 %v21127_v6  ;;  %v11580_v48 = vpack.c.bf16 %v9297_v38, %v9296_v16  ;;  %v15532_v16 = vld [vmem:[#allocation2 + $0x8e] sm:$0xff] }
 0x25b   : > { %2581 = vmatmul.mubr.f32.gmra.mrb[104].mxu1 %v15505_v27  ;;  %10630 = vmatmul.mubr.f32.gmra.mrb[166].mxu0 %v15244_v29  ;;  %v9345_v29 = vld [vmem:[%s21006_s3 + $0x7d8] sm:$0xff]  ;;  %v15536_v38 = vld [vmem:[#allocation2 + $0xa7] sm:$0xff] }
 0x25c   : > { %2585 = vmatprep.mubr.f32.mxu1 %v15509_v0  ;;  %10632 = vmatprep.mubr.f32.mxu0 %v15250_v3  ;;  %v9298_v3 = vld [vmem:[%s21006_s3 + $0x660] sm:$0xff]  ;;  %v11660_v49 = vpack.c.bf16 %v9345_v29, %v9344_v37 }
 0x25d   : > { %11655 = vmatpush1.bf16.msra.mxu0 %v11654_v54  ;;  %11578 = vmatpush1.bf16.msra.mxu1 %v11577_v45  ;;  %v9299_v54 = vld [vmem:[%s21006_s3 + $0x668] sm:$0xff] }
 0x25e   : > { %v1356_v30 = vpop.f32.mrb[0].mxu1  ;;  %v15516_v56 = vpop.f32.mrb[94].mxu0  ;;  %11656 = vmatprep.subr.bf16.mxu0 %v21127_v6  ;;  %11579 = vmatprep.subr.bf16.mxu1 %v21127_v6  ;;  %v15555_v29 = vld [vmem:[#allocation2 + $0xa6] sm:$0xff] }
 0x25f   : > { %v15530_v47 = vadd.f32 %v14653_v44, %v1356_v30  ;;  %v1358_v45 = vpop.f32.mrb[1].mxu1  ;;  %v1883_v61 = vpop.f32.mrb[95].mxu0  ;;  %2586 = vmatmul.mubr.f32.gmra.mrb[106].mxu1 %v15532_v16  ;;  %10633 = vmatmul.mubr.f32.gmra.mrb[168].mxu0 %v15261_v39  ;;  %v9346_v44 = vld [vmem:[%s21006_s3 + $0x7e0] sm:$0xff]  ;;  %v11583_v30 = vpack.c.bf16 %v9299_v54, %v9298_v3  ;;  %v9347_v39 = vld [vmem:[%s21006_s3 + $0x7e8] sm:$0xff] }
 0x260   : > { %2590 = vmatprep.mubr.f32.mxu1 %v15536_v38  ;;  %10635 = vmatprep.mubr.f32.mxu0 %v15265_v33  ;;  %v9300_v33 = vld [vmem:[%s21006_s3 + $0x670] sm:$0xff]  ;;  %v11663_v54 = vpack.c.bf16 %v9347_v39, %v9346_v44 }
 0x261   : > { %21138 = vst [vmem:[#allocation20_spill] sm:$0xff] %v15530_v47  ;;  %11658 = vmatpush1.bf16.msra.mxu0 %v11657_v11  ;;  %11581 = vmatpush1.bf16.msra.mxu1 %v11580_v48  ;;  %v9301_v11 = vld [vmem:[%s21006_s3 + $0x678] sm:$0xff]  ;;  %v15559_v3 = vld [vmem:[#allocation2 + $0xaf] sm:$0xff] }
 0x262   : > { %v1361_v45 = vpop.f32.mrb[2].mxu1  ;;  %11659 = vmatprep.subr.bf16.mxu0 %v21127_v6  ;;  %11582 = vmatprep.subr.bf16.mxu1 %v21127_v6  ;;  %v9348_v61 = vld [vmem:[%s21006_s3 + $0x7f0] sm:$0xff] }
 0x263   : > { %v1587_v37 = vadd.f32 %v14649_v22, %v1361_v45  ;;  %v1363_v48 = vpop.f32.mrb[3].mxu1  ;;  %2591 = vmatmul.mubr.f32.gmra.mrb[108].mxu1 %v15555_v29  ;;  %10636 = vmatmul.mubr.f32.gmra.mrb[170].mxu0 %v15278_v28  ;;  %v11586_v22 = vpack.c.bf16 %v9301_v11, %v9300_v33  ;;  %v9349_v28 = vld [vmem:[%s21006_s3 + $0x7f8] sm:$0xff]  ;;  %v15585_v39 = vld [vmem:[#allocation2 + $0xae] sm:$0xff] }
 0x264   : > { %2595 = vmatprep.mubr.f32.mxu1 %v15559_v3  ;;  %10638 = vmatprep.mubr.f32.mxu0 %v15282_v10  ;;  %v15589_v33 = vld [vmem:[#allocation2 + $0xc7] sm:$0xff]  ;;  %v11666_v11 = vpack.c.bf16 %v9349_v28, %v9348_v61 }
 0x265   : > { %11661 = vmatpush1.bf16.msra.mxu0 %v11660_v49  ;;  %11584 = vmatpush1.bf16.msra.mxu1 %v11583_v30  ;;  %v15567_v45 = vadd.f32 %v15275_v58, %v1587_v37  ;;  %v9302_v49 = vld [vmem:[%s21006_s3 + $0x680] sm:$0xff]  ;;  %v9303_v58 = vld [vmem:[%s21006_s3 + $0x688] sm:$0xff] }
 0x266   : > { %v1366_v48 = vpop.f32.mrb[4].mxu1  ;;  %v15569_v47 = vpop.f32.mrb[98].mxu0  ;;  %11662 = vmatprep.subr.bf16.mxu0 %v21127_v6  ;;  %11585 = vmatprep.subr.bf16.mxu1 %v21127_v6  ;;  %v11589_v37 = vpack.c.bf16 %v9303_v58, %v9302_v49  ;;  %v15608_v28 = vld [vmem:[#allocation2 + $0xc6] sm:$0xff]  ;;  %v15612_v49 = vld [vmem:[#allocation2 + $0xcf] sm:$0xff] }
 0x267   : > { %v15583_v10 = vadd.f32 %v15054_v23, %v1366_v48  ;;  %v1368_v44 = vpop.f32.mrb[5].mxu1  ;;  %v1893_v30 = vpop.f32.mrb[99].mxu0  ;;  %2596 = vmatmul.mubr.f32.gmra.mrb[110].mxu1 %v15585_v39  ;;  %10639 = vmatmul.mubr.f32.gmra.mrb[172].mxu0 %v15293_v8  ;;  %v9350_v23 = vld [vmem:[%s21006_s3 + $0x800] sm:$0xff]  ;;  %v9351_v8 = vld [vmem:[%s21006_s3 + $0x808] sm:$0xff] }
 0x268   : > { %2600 = vmatprep.mubr.f32.mxu1 %v15589_v33  ;;  %10641 = vmatprep.mubr.f32.mxu0 %v15297_v60  ;;  %v9304_v60 = vld [vmem:[%s21006_s3 + $0x690] sm:$0xff]  ;;  %v11669_v58 = vpack.c.bf16 %v9351_v8, %v9350_v23 }
 0x269   : > { %11664 = vmatpush1.bf16.msra.mxu0 %v11663_v54  ;;  %11587 = vmatpush1.bf16.msra.mxu1 %v11586_v22  ;;  %v9305_v54 = vld [vmem:[%s21006_s3 + $0x698] sm:$0xff]  ;;  %v9352_v44 = vld [vmem:[%s21006_s3 + $0x810] sm:$0xff] }
 0x26a   : > { %v1371_v48 = vpop.f32.mrb[6].mxu1  ;;  %11665 = vmatprep.subr.bf16.mxu0 %v21127_v6  ;;  %11588 = vmatprep.subr.bf16.mxu1 %v21127_v6  ;;  %v15638_v8 = vld [vmem:[#allocation2 + $0xce] sm:$0xff] }
 0x26b   : > { %v1597_v61 = vadd.f32 %v15049_v43, %v1371_v48  ;;  %v1373_v22 = vpop.f32.mrb[7].mxu1  ;;  %2601 = vmatmul.mubr.f32.gmra.mrb[112].mxu1 %v15608_v28  ;;  %10642 = vmatmul.mubr.f32.gmra.mrb[174].mxu0 %v15310_v18  ;;  %v11592_v43 = vpack.c.bf16 %v9305_v54, %v9304_v60  ;;  %v9353_v18 = vld [vmem:[%s21006_s3 + $0x818] sm:$0xff]  ;;  %v15642_v60 = vld [vmem:[#allocation2 + $0xe7] sm:$0xff] }
 0x26c   : > { %2605 = vmatprep.mubr.f32.mxu1 %v15612_v49  ;;  %10644 = vmatprep.mubr.f32.mxu0 %v15314_v52  ;;  %v9306_v52 = vld [vmem:[%s21006_s3 + $0x6a0] sm:$0xff]  ;;  %v11672_v54 = vpack.c.bf16 %v9353_v18, %v9352_v44 }
 0x26d   : > { %11667 = vmatpush1.bf16.msra.mxu0 %v11666_v11  ;;  %11590 = vmatpush1.bf16.msra.mxu1 %v11589_v37  ;;  %v15620_v30 = vadd.f32 %v15307_v31, %v1597_v61  ;;  %v9307_v31 = vld [vmem:[%s21006_s3 + $0x6a8] sm:$0xff] }
 0x26e   : > { %v1376_v48 = vpop.f32.mrb[8].mxu1  ;;  %v15622_v22 = vpop.f32.mrb[102].mxu0  ;;  %11668 = vmatprep.subr.bf16.mxu0 %v21127_v6  ;;  %11591 = vmatprep.subr.bf16.mxu1 %v21127_v6  ;;  %v11595_v61 = vpack.c.bf16 %v9307_v31, %v9306_v52  ;;  %v15661_v18 = vld [vmem:[#allocation2 + $0xe6] sm:$0xff]  ;;  %v15665_v52 = vld [vmem:[#allocation2 + $0xef] sm:$0xff] }
 0x26f   : > { %v15636_v11 = vadd.f32 %v15069_v59, %v1376_v48  ;;  %v1378_v23 = vpop.f32.mrb[9].mxu1  ;;  %v1903_v37 = vpop.f32.mrb[103].mxu0  ;;  %2606 = vmatmul.mubr.f32.gmra.mrb[114].mxu1 %v15638_v8  ;;  %10645 = vmatmul.mubr.f32.gmra.mrb[176].mxu0 %v15325_v40  ;;  %v9354_v59 = vld [vmem:[%s21006_s3 + $0x820] sm:$0xff]  ;;  %v9355_v40 = vld [vmem:[%s21006_s3 + $0x828] sm:$0xff] }
 0x270   : > { %2610 = vmatprep.mubr.f32.mxu1 %v15642_v60  ;;  %10647 = vmatprep.mubr.f32.mxu0 %v15329_v25  ;;  %v9308_v25 = vld [vmem:[%s21006_s3 + $0x6b0] sm:$0xff]  ;;  %v11675_v31 = vpack.c.bf16 %v9355_v40, %v9354_v59 }
 0x271   : > { %11670 = vmatpush1.bf16.msra.mxu0 %v11669_v58  ;;  %11593 = vmatpush1.bf16.msra.mxu1 %v11592_v43  ;;  %v9309_v58 = vld [vmem:[%s21006_s3 + $0x6b8] sm:$0xff]  ;;  %v9356_v23 = vld [vmem:[%s21006_s3 + $0x830] sm:$0xff] }
 0x272   : > { %v1381_v48 = vpop.f32.mrb[10].mxu1  ;;  %11671 = vmatprep.subr.bf16.mxu0 %v21127_v6  ;;  %11594 = vmatprep.subr.bf16.mxu1 %v21127_v6  ;;  %v15691_v40 = vld [vmem:[#allocation2 + $0xee] sm:$0xff] }
 0x273   : > { %v1607_v44 = vadd.f32 %v15063_v21, %v1381_v48  ;;  %v1383_v43 = vpop.f32.mrb[11].mxu1  ;;  %2611 = vmatmul.mubr.f32.gmra.mrb[116].mxu1 %v15661_v18  ;;  %10648 = vmatmul.mubr.f32.gmra.mrb[178].mxu0 %v15342_v63  ;;  %v11598_v21 = vpack.c.bf16 %v9309_v58, %v9308_v25  ;;  %v9357_v63 = vld [vmem:[%s21006_s3 + $0x838] sm:$0xff]  ;;  %v15695_v25 = vld [vmem:[#allocation2 + $0x107] sm:$0xff] }
 0x274   : > { %2615 = vmatprep.mubr.f32.mxu1 %v15665_v52  ;;  %10650 = vmatprep.mubr.f32.mxu0 %v15346_v35  ;;  %v9310_v35 = vld [vmem:[%s21006_s3 + $0x6c0] sm:$0xff]  ;;  %v11678_v58 = vpack.c.bf16 %v9357_v63, %v9356_v23 }
 0x275   : > { %11673 = vmatpush1.bf16.msra.mxu0 %v11672_v54  ;;  %11596 = vmatpush1.bf16.msra.mxu1 %v11595_v61  ;;  %v15673_v37 = vadd.f32 %v15339_v62, %v1607_v44  ;;  %v9311_v62 = vld [vmem:[%s21006_s3 + $0x6c8] sm:$0xff] }
 0x276   : > { %v1386_v48 = vpop.f32.mrb[12].mxu1  ;;  %v15675_v43 = vpop.f32.mrb[106].mxu0  ;;  %11674 = vmatprep.subr.bf16.mxu0 %v21127_v6  ;;  %11597 = vmatprep.subr.bf16.mxu1 %v21127_v6  ;;  %v11601_v44 = vpack.c.bf16 %v9311_v62, %v9310_v35  ;;  %v15714_v63 = vld [vmem:[#allocation2 + $0x106] sm:$0xff]  ;;  %v15718_v35 = vld [vmem:[#allocation2 + $0x10f] sm:$0xff] }
 0x277   : > { %v15689_v54 = vadd.f32 %v15082_v19, %v1386_v48  ;;  %v1388_v59 = vpop.f32.mrb[13].mxu1  ;;  %v1913_v61 = vpop.f32.mrb[107].mxu0  ;;  %2616 = vmatmul.mubr.f32.gmra.mrb[118].mxu1 %v15691_v40  ;;  %10651 = vmatmul.mubr.f32.gmra.mrb[180].mxu0 %v15357_v32  ;;  %v9358_v19 = vld [vmem:[%s21006_s3 + $0x840] sm:$0xff]  ;;  %v9359_v32 = vld [vmem:[%s21006_s3 + $0x848] sm:$0xff] }
 0x278   : > { %2620 = vmatprep.mubr.f32.mxu1 %v15695_v25  ;;  %10653 = vmatprep.mubr.f32.mxu0 %v15361_v13  ;;  %v9312_v13 = vld [vmem:[%s21006_s3 + $0x6d0] sm:$0xff]  ;;  %v11681_v62 = vpack.c.bf16 %v9359_v32, %v9358_v19 }
 0x279   : > { %11676 = vmatpush1.bf16.msra.mxu0 %v11675_v31  ;;  %11599 = vmatpush1.bf16.msra.mxu1 %v11598_v21  ;;  %v9313_v31 = vld [vmem:[%s21006_s3 + $0x6d8] sm:$0xff]  ;;  %v9360_v59 = vld [vmem:[%s21006_s3 + $0x850] sm:$0xff] }
 0x27a   : > { %v1391_v48 = vpop.f32.mrb[14].mxu1  ;;  %11677 = vmatprep.subr.bf16.mxu0 %v21127_v6  ;;  %11600 = vmatprep.subr.bf16.mxu1 %v21127_v6  ;;  %v15744_v32 = vld [vmem:[#allocation2 + $0x10e] sm:$0xff] }
 0x27b   : > { %v1617_v23 = vadd.f32 %v15075_v57, %v1391_v48  ;;  %v1393_v21 = vpop.f32.mrb[15].mxu1  ;;  %2621 = vmatmul.mubr.f32.gmra.mrb[120].mxu1 %v15714_v63  ;;  %10654 = vmatmul.mubr.f32.gmra.mrb[182].mxu0 %v15374_v2  ;;  %v11604_v57 = vpack.c.bf16 %v9313_v31, %v9312_v13  ;;  %v9361_v2 = vld [vmem:[%s21006_s3 + $0x858] sm:$0xff]  ;;  %v15748_v13 = vld [vmem:[#allocation2 + $0x127] sm:$0xff] }
 0x27c   : > { %2625 = vmatprep.mubr.f32.mxu1 %v15718_v35  ;;  %10656 = vmatprep.mubr.f32.mxu0 %v15378_v53  ;;  %v9314_v53 = vld [vmem:[%s21006_s3 + $0x6e0] sm:$0xff]  ;;  %v11684_v31 = vpack.c.bf16 %v9361_v2, %v9360_v59 }
 0x27d   : > { %11679 = vmatpush1.bf16.msra.mxu0 %v11678_v58  ;;  %11602 = vmatpush1.bf16.msra.mxu1 %v11601_v44  ;;  %v15726_v61 = vadd.f32 %v15371_v41, %v1617_v23  ;;  %v9315_v41 = vld [vmem:[%s21006_s3 + $0x6e8] sm:$0xff] }
 0x27e   : > { %v1396_v48 = vpop.f32.mrb[16].mxu1  ;;  %v15728_v21 = vpop.f32.mrb[110].mxu0  ;;  %11680 = vmatprep.subr.bf16.mxu0 %v21127_v6  ;;  %11603 = vmatprep.subr.bf16.mxu1 %v21127_v6  ;;  %v11607_v23 = vpack.c.bf16 %v9315_v41, %v9314_v53  ;;  %v15767_v2 = vld [vmem:[#allocation2 + $0x126] sm:$0xff] }
 0x27f   : > { %v15742_v58 = vadd.f32 %v15094_v36, %v1396_v48  ;;  %v1398_v19 = vpop.f32.mrb[17].mxu1  ;;  %v1923_v44 = vpop.f32.mrb[111].mxu0  ;;  %2626 = vmatmul.mubr.f32.gmra.mrb[122].mxu1 %v15744_v32  ;;  %10657 = vmatmul.mubr.f32.gmra.mrb[184].mxu0 %v15389_v12  ;;  %v9362_v36 = vld [vmem:[%s21006_s3 + $0x860] sm:$0xff]  ;;  %v9363_v12 = vld [vmem:[%s21006_s3 + $0x868] sm:$0xff]  ;;  %21140 = vst [vmem:[#allocation22_spill] sm:$0xff] %v15767_v2 }
 0x280   : > { %2630 = vmatprep.mubr.f32.mxu1 %v15748_v13  ;;  %10659 = vmatprep.mubr.f32.mxu0 %v15393_v15  ;;  %v9316_v15 = vld [vmem:[%s21006_s3 + $0x6f0] sm:$0xff]  ;;  %v9398_v53 = vld [vmem:[%s21006_s3 + $0x980] sm:$0xff]  ;;  %v9399_v41 = vld [vmem:[%s21006_s3 + $0x988] sm:$0xff]  ;;  %v11687_v44 = vpack.c.bf16 %v9363_v12, %v9362_v36 }
 0x281   : > { %21139 = vst [vmem:[#allocation21_spill] sm:$0xff] %v15742_v58  ;;  %11682 = vmatpush1.bf16.msra.mxu0 %v11681_v62  ;;  %11605 = vmatpush1.bf16.msra.mxu1 %v11604_v57  ;;  %v9317_v62 = vld [vmem:[%s21006_s3 + $0x6f8] sm:$0xff]  ;;  %v15777_v19 = vld [vmem:[#allocation2 + $0x12f] sm:$0xff] }
 0x282   : > { %v1401_v48 = vpop.f32.mrb[18].mxu1  ;;  %11683 = vmatprep.subr.bf16.mxu0 %v21127_v6  ;;  %11606 = vmatprep.subr.bf16.mxu1 %v21127_v6  ;;  %v15798_v12 = vld [vmem:[#allocation2 + $0x12e] sm:$0xff] }
 0x283   : > { %v1627_v59 = vadd.f32 %v15088_v17, %v1401_v48  ;;  %v1403_v57 = vpop.f32.mrb[19].mxu1  ;;  %2631 = vmatmul.mubr.f32.gmra.mrb[124].mxu1 %v15767_v2  ;;  %10660 = vmatmul.mubr.f32.gmra.mrb[186].mxu0 %v15406_v24  ;;  %v13220_v17 = vld [vmem:[#allocation2 + $0x20a] sm:$0xff]  ;;  %v11610_v48 = vpack.c.bf16 %v9317_v62, %v9316_v15  ;;  %v13222_v15 = vld [vmem:[#allocation2 + $0x212] sm:$0xff] }
 0x284   : > { %2635 = vmatprep.mubr.f32.mxu1 %v15777_v19  ;;  %10662 = vmatprep.mubr.f32.mxu0 %v13220_v17  ;;  %v9364_v2 = vld [vmem:[%s21006_s3 + $0x870] sm:$0xff]  ;;  %v9365_v17 = vld [vmem:[%s21006_s3 + $0x878] sm:$0xff] }
 0x285   : > { %11685 = vmatpush1.bf16.msra.mxu0 %v11684_v31  ;;  %11608 = vmatpush1.bf16.msra.mxu1 %v11607_v23  ;;  %v15781_v24 = vadd.f32 %v15403_v5, %v1627_v59  ;;  %v15793_v31 = vpack.c.bf16 %v9399_v41, %v9398_v53  ;;  %v898_v62 = vld [vmem:[#allocation2 + $0x22a] sm:$0xff]  ;;  %v11690_v53 = vpack.c.bf16 %v9365_v17, %v9364_v2 }
 0x286   : > { %v1406_v57 = vpop.f32.mrb[20].mxu1  ;;  %v15783_v58 = vpop.f32.mrb[114].mxu0  ;;  %11686 = vmatprep.subr.bf16.mxu0 %v21127_v6  ;;  %11609 = vmatprep.subr.bf16.mxu1 %v21127_v6  ;;  %v15801_v59 = vld [vmem:[#allocation2 + $0x147] sm:$0xff]  ;;  %v15816_v2 = vld [vmem:[#allocation2 + $0x14f] sm:$0xff] }
 0x287   : > { %21141 = vst [vmem:[#allocation23_spill] sm:$0xff] %v15793_v31  ;;  %v15796_v5 = vadd.f32 %v15106_v26, %v1406_v57  ;;  %v1408_v36 = vpop.f32.mrb[21].mxu1  ;;  %v1933_v23 = vpop.f32.mrb[115].mxu0  ;;  %2636 = vmatmul.mubr.f32.gmra.mrb[126].mxu1 %v15798_v12  ;;  %10663 = vmatmul.mubr.f32.gmra.mrb[188].mxu0 %v13222_v15  ;;  %v899_v26 = vld [vmem:[#allocation2 + $0x232] sm:$0xff]  ;;  %v9366_v57 = vld [vmem:[%s21006_s3 + $0x880] sm:$0xff] }
 0x288   : > { %2640 = vmatprep.mubr.f32.mxu1 %v15801_v59  ;;  %10665 = vmatprep.mubr.f32.mxu0 %v898_v62  ;;  %v9367_v36 = vld [vmem:[%s21006_s3 + $0x888] sm:$0xff] }
 0x289   : > { %11688 = vmatpush1.bf16.msra.mxu0 %v11687_v44  ;;  %11611 = vmatpush1.bf16.msra.mxu1 %v11610_v48  ;;  %v15813_v44 = vld [vmem:[#allocation2 + $0x146] sm:$0xff]  ;;  %v11693_v17 = vpack.c.bf16 %v9367_v36, %v9366_v57 }
 0x28a   : > { %v1411_v41 = vpop.f32.mrb[22].mxu1  ;;  %11689 = vmatprep.subr.bf16.mxu0 %v21127_v6  ;;  %11741 = vmatprep.subr.bf16.mxu1 %v15793_v31  ;;  %v15839_v57 = vld [vmem:[#allocation2 + $0x167] sm:$0xff] }
 0x28b   : > { %v1637_v23 = vadd.f32 %v15100_v34, %v1411_v41  ;;  %v1413_v15 = vpop.f32.mrb[23].mxu1  ;;  %2641 = vmatmul.mubr.f32.gmra.mrb[128].mxu1 %v15813_v44  ;;  %10666 = vmatmul.mubr.f32.gmra.mrb[190].mxu0 %v899_v26  ;;  %v9368_v34 = vld [vmem:[%s21006_s3 + $0x890] sm:$0xff]  ;;  %v9369_v41 = vld [vmem:[%s21006_s3 + $0x898] sm:$0xff] }
 0x28c   : > { %2645 = vmatprep.mubr.f32.mxu1 %v15816_v2  ;;  %3348 = vmatprep.mubr.f32.mxu0 %v15441_v55  ;;  %v15835_v26 = vld [vmem:[#allocation2 + $0x14e] sm:$0xff]  ;;  %v11696_v36 = vpack.c.bf16 %v9369_v41, %v9368_v34 }
 0x28d   : > { %11691 = vmatpush1.bf16.msra.mxu0 %v11690_v53  ;;  %v15821_v48 = vadd.f32 %v15429_v9, %v1637_v23  ;;  %v9371_v15 = vld [vmem:[%s21006_s3 + $0x8a8] sm:$0xff] }
 0x28e   : > { %v1416_v62 = vpop.f32.mrb[24].mxu1  ;;  %v15823_v31 = vpop.f32.mrb[118].mxu0  ;;  %11692 = vmatprep.subr.bf16.mxu0 %v21127_v6 }
 0x28f   : > { %v15833_v55 = vadd.f32 %v15118_v50, %v1416_v62  ;;  %v1418_v53 = vpop.f32.mrb[25].mxu1  ;;  %v1943_v9 = vpop.f32.mrb[119].mxu0  ;;  %2646 = vmatmul.mubr.f32.gmra.mrb[130].mxu1 %v15835_v26  ;;  %v9370_v50 = vld [vmem:[%s21006_s3 + $0x8a0] sm:$0xff] }
 0x290   : > { %3349 = vmatmul.mubr.f32.vlgmr.msra.gmra.mrb[192].mxu0 %v15459_v7  ;;  %2650 = vmatprep.mubr.f32.mxu1 %v15839_v57  ;;  %v15851_v53 = vld [vmem:[#allocation2 + $0x166] sm:$0xff]  ;;  %v11699_v34 = vpack.c.bf16 %v9371_v15, %v9370_v50  ;;  %v9373_v9 = vld [vmem:[%s21006_s3 + $0x8b8] sm:$0xff] }
 0x291   : > { %3353 = vmatprep.mubr.f32.mxu0 %v15463_v14  ;;  %11694 = vmatpush1.bf16.msra.mxu0 %v11693_v17  ;;  %v15855_v14 = vld [vmem:[#allocation2 + $0x16f] sm:$0xff]  ;;  %v15878_v50 = vld [vmem:[#allocation2 + $0x187] sm:$0xff] }
 0x292   : > { %v1421_v23 = vpop.f32.mrb[26].mxu1  ;;  %11695 = vmatprep.subr.bf16.mxu0 %v21127_v6 }
 0x293   : > { %v1647_v7 = vadd.f32 %v15112_v1, %v1421_v23  ;;  %v1423_v62 = vpop.f32.mrb[27].mxu1  ;;  %2651 = vmatmul.mubr.f32.gmra.mrb[132].mxu1 %v15851_v53  ;;  %v15874_v23 = vld [vmem:[#allocation2 + $0x16e] sm:$0xff] }
 0x294   : > { %3354 = vmatmul.mubr.f32.gmra.mrb[194].mxu0 %v15483_v20  ;;  %2655 = vmatprep.mubr.f32.mxu1 %v15855_v14  ;;  %v9372_v20 = vld [vmem:[%s21006_s3 + $0x8b0] sm:$0xff]  ;;  %v9375_v62 = vld [vmem:[%s21006_s3 + $0x8c8] sm:$0xff] }
 0x295   : > { %3358 = vmatprep.mubr.f32.mxu0 %v15487_v51  ;;  %11697 = vmatpush1.bf16.msra.mxu0 %v11696_v36  ;;  %v15860_v17 = vadd.f32 %v15470_v42, %v1647_v7  ;;  %v11702_v15 = vpack.c.bf16 %v9373_v9, %v9372_v20 }
 0x296   : > { %v1426_v41 = vpop.f32.mrb[28].mxu1  ;;  %v15862_v1 = vpop.f32.mrb[122].mxu0  ;;  %11698 = vmatprep.subr.bf16.mxu0 %v21127_v6 }
 0x297   : > { %v15872_v51 = vadd.f32 %v15128_v4, %v1426_v41  ;;  %v1428_v36 = vpop.f32.mrb[29].mxu1  ;;  %v1953_v42 = vpop.f32.mrb[123].mxu0  ;;  %2656 = vmatmul.mubr.f32.gmra.mrb[134].mxu1 %v15874_v23  ;;  %v9374_v4 = vld [vmem:[%s21006_s3 + $0x8c0] sm:$0xff] }
 0x298   : > { %3359 = vmatmul.mubr.f32.gmra.mrb[196].mxu0 %v15505_v27  ;;  %2660 = vmatprep.mubr.f32.mxu1 %v15878_v50  ;;  %v15890_v36 = vld [vmem:[#allocation2 + $0x186] sm:$0xff]  ;;  %v11705_v20 = vpack.c.bf16 %v9375_v62, %v9374_v4  ;;  %v9377_v42 = vld [vmem:[%s21006_s3 + $0x8d8] sm:$0xff] }
 0x299   : > { %3363 = vmatprep.mubr.f32.mxu0 %v15509_v0  ;;  %11700 = vmatpush1.bf16.msra.mxu0 %v11699_v34  ;;  %v15894_v0 = vld [vmem:[#allocation2 + $0x18f] sm:$0xff]  ;;  %v15917_v4 = vld [vmem:[#allocation2 + $0x1a7] sm:$0xff] }
 0x29a   : > { %v1431_v7 = vpop.f32.mrb[30].mxu1  ;;  %11701 = vmatprep.subr.bf16.mxu0 %v21127_v6  ;;  %21145 = vst [vmem:[#allocation25_spill] sm:$0xff] %v15917_v4 }
 0x29b   : > { %v1657_v27 = vadd.f32 %v15124_v46, %v1431_v7  ;;  %v1433_v41 = vpop.f32.mrb[31].mxu1  ;;  %2661 = vmatmul.mubr.f32.gmra.mrb[136].mxu1 %v15890_v36  ;;  %v21143_v7 = vld [vmem:[#allocation5_spill] sm:$0xff] }
 0x29c   : > { %3364 = vmatmul.mubr.f32.gmra.mrb[198].mxu0 %v15532_v16  ;;  %2665 = vmatprep.mubr.f32.mxu1 %v15894_v0  ;;  %v9376_v16 = vld [vmem:[%s21006_s3 + $0x8d0] sm:$0xff] }
 0x29d   : > { %3368 = vmatprep.mubr.f32.mxu0 %v15536_v38  ;;  %11703 = vmatpush1.bf16.msra.mxu0 %v11702_v15  ;;  %v15899_v34 = vadd.f32 %v15516_v56, %v1657_v27  ;;  %v15913_v27 = vld [vmem:[#allocation2 + $0x18e] sm:$0xff]  ;;  %v11708_v62 = vpack.c.bf16 %v9377_v42, %v9376_v16  ;;  %v15932_v16 = vld [vmem:[#allocation2 + $0x1a6] sm:$0xff] }
 0x29e   : > { %v1436_v9 = vpop.f32.mrb[32].mxu1  ;;  %v15901_v46 = vpop.f32.mrb[126].mxu0  ;;  %11704 = vmatprep.subr.bf16.mxu0 %v21127_v6  ;;  %v15936_v42 = vld [vmem:[#allocation2 + $0x1af] sm:$0xff] }
 0x29f   : > { %21142 = vst [vmem:[#allocation24_spill] sm:$0xff] %v15899_v34  ;;  %v15911_v38 = vadd.f32 %v21143_v7, %v1436_v9  ;;  %v1438_v15 = vpop.f32.mrb[33].mxu1  ;;  %v1963_v56 = vpop.f32.mrb[127].mxu0  ;;  %2666 = vmatmul.mubr.f32.gmra.mrb[138].mxu1 %v15913_v27  ;;  %v9378_v9 = vld [vmem:[%s21006_s3 + $0x8e0] sm:$0xff] }
 0x2a0   : > { %3369 = vmatmul.mubr.f32.gmra.mrb[200].mxu0 %v15555_v29  ;;  %2670 = vmatprep.mubr.f32.mxu1 %v15917_v4  ;;  %v9379_v29 = vld [vmem:[%s21006_s3 + $0x8e8] sm:$0xff]  ;;  %v21146_v7 = vld [vmem:[#allocation4_spill] sm:$0xff] }
 0x2a1   : > { %21144 = vst [vmem:[#allocation5_spill] sm:$0xff] %v15911_v38  ;;  %3373 = vmatprep.mubr.f32.mxu0 %v15559_v3  ;;  %11706 = vmatpush1.bf16.msra.mxu0 %v11705_v20  ;;  %v21147_v56 = vld [vmem:[#allocation20_spill] sm:$0xff] }
 0x2a2   : > { %v1441_v41 = vpop.f32.mrb[34].mxu1  ;;  %v2031_v34 = vpop.f32.mrb[64].mxu0  ;;  %11707 = vmatprep.subr.bf16.mxu0 %v21127_v6 }
 0x2a3   : > { %v1667_v15 = vadd.f32 %v21146_v7, %v1441_v41  ;;  %v15930_v38 = vadd.f32 %v2031_v34, %v21147_v56  ;;  %v1443_v3 = vpop.f32.mrb[35].mxu1  ;;  %v2033_v20 = vpop.f32.mrb[65].mxu0  ;;  %2671 = vmatmul.mubr.f32.gmra.mrb[140].mxu1 %v15932_v16  ;;  %v11711_v34 = vpack.c.bf16 %v9379_v29, %v9378_v9  ;;  %v9380_v56 = vld [vmem:[%s21006_s3 + $0x8f0] sm:$0xff]  ;;  %v15960_v29 = vld [vmem:[#allocation2 + $0x1c7] sm:$0xff] }
 0x2a4   : > { %3374 = vmatmul.mubr.f32.gmra.mrb[202].mxu0 %v15585_v39  ;;  %2675 = vmatprep.mubr.f32.mxu1 %v15936_v42  ;;  %v9381_v39 = vld [vmem:[%s21006_s3 + $0x8f8] sm:$0xff] }
 0x2a5   : > { %v15940_v4 = vadd.f32 %v15569_v47, %v1667_v15  ;;  %3378 = vmatprep.mubr.f32.mxu0 %v15589_v33  ;;  %11709 = vmatpush1.bf16.msra.mxu0 %v11708_v62  ;;  %v21148_v3 = vld [vmem:[#allocation7_spill] sm:$0xff]  ;;  %v15956_v62 = vld [vmem:[#allocation2 + $0x1ae] sm:$0xff]  ;;  %v11714_v15 = vpack.c.bf16 %v9381_v39, %v9380_v56  ;;  %v15975_v56 = vld [vmem:[#allocation2 + $0x1c6] sm:$0xff] }
 0x2a6   : > { %v1446_v41 = vpop.f32.mrb[36].mxu1  ;;  %v2036_v7 = vpop.f32.mrb[128].mxu0  ;;  %11710 = vmatprep.subr.bf16.mxu0 %v21127_v6  ;;  %v15979_v39 = vld [vmem:[#allocation2 + $0x1cf] sm:$0xff] }
 0x2a7   : > { %v15951_v20 = vadd.f32 %v21148_v3, %v1446_v41  ;;  %v15954_v47 = vadd.f32 %v2036_v7, %v15567_v45  ;;  %v1448_v33 = vpop.f32.mrb[37].mxu1  ;;  %2676 = vmatmul.mubr.f32.gmra.mrb[142].mxu1 %v15956_v62  ;;  %v2038_v9 = vpop.f32.mrb[129].mxu0  ;;  %v9382_v45 = vld [vmem:[%s21006_s3 + $0x900] sm:$0xff]  ;;  %v21150_v7 = vld [vmem:[#allocation6_spill] sm:$0xff] }
 0x2a8   : > { %3379 = vmatmul.mubr.f32.gmra.mrb[204].mxu0 %v15608_v28  ;;  %2680 = vmatprep.mubr.f32.mxu1 %v15960_v29  ;;  %v9383_v28 = vld [vmem:[%s21006_s3 + $0x908] sm:$0xff] }
 0x2a9   : > { %21149 = vst [vmem:[#allocation4_spill] sm:$0xff] %v15951_v20  ;;  %3383 = vmatprep.mubr.f32.mxu0 %v15612_v49  ;;  %11712 = vmatpush1.bf16.msra.mxu0 %v11711_v34 }
 0x2aa   : > { %v1451_v41 = vpop.f32.mrb[38].mxu1  ;;  %v2041_v3 = vpop.f32.mrb[68].mxu0  ;;  %11713 = vmatprep.subr.bf16.mxu0 %v21127_v6 }
 0x2ab   : > { %v1677_v33 = vadd.f32 %v21150_v7, %v1451_v41  ;;  %v15973_v9 = vadd.f32 %v2041_v3, %v15583_v10  ;;  %v1453_v49 = vpop.f32.mrb[39].mxu1  ;;  %v2043_v34 = vpop.f32.mrb[69].mxu0  ;;  %2681 = vmatmul.mubr.f32.gmra.mrb[144].mxu1 %v15975_v56  ;;  %v11717_v10 = vpack.c.bf16 %v9383_v28, %v9382_v45  ;;  %v9384_v7 = vld [vmem:[%s21006_s3 + $0x910] sm:$0xff]  ;;  %v16003_v28 = vld [vmem:[#allocation2 + $0x1e7] sm:$0xff] }
 0x2ac   : > { %3384 = vmatmul.mubr.f32.gmra.mrb[206].mxu0 %v15638_v8  ;;  %2685 = vmatprep.mubr.f32.mxu1 %v15979_v39  ;;  %v9385_v8 = vld [vmem:[%s21006_s3 + $0x918] sm:$0xff]  ;;  %v21151_v49 = vld [vmem:[#allocation9_spill] sm:$0xff] }
 0x2ad   : > { %v15983_v20 = vadd.f32 %v15622_v22, %v1677_v33  ;;  %3388 = vmatprep.mubr.f32.mxu0 %v15642_v60  ;;  %11715 = vmatpush1.bf16.msra.mxu0 %v11714_v15  ;;  %v15999_v15 = vld [vmem:[#allocation2 + $0x1ce] sm:$0xff]  ;;  %v11720_v33 = vpack.c.bf16 %v9385_v8, %v9384_v7  ;;  %v16018_v7 = vld [vmem:[#allocation2 + $0x1e6] sm:$0xff] }
 0x2ae   : > { %v1456_v41 = vpop.f32.mrb[40].mxu1  ;;  %v2046_v3 = vpop.f32.mrb[130].mxu0  ;;  %11716 = vmatprep.subr.bf16.mxu0 %v21127_v6  ;;  %v16022_v8 = vld [vmem:[#allocation2 + $0x1ef] sm:$0xff] }
 0x2af   : > { %v15994_v34 = vadd.f32 %v21151_v49, %v1456_v41  ;;  %v15997_v22 = vadd.f32 %v2046_v3, %v15620_v30  ;;  %v1458_v60 = vpop.f32.mrb[41].mxu1  ;;  %2686 = vmatmul.mubr.f32.gmra.mrb[146].mxu1 %v15999_v15  ;;  %v2048_v45 = vpop.f32.mrb[131].mxu0  ;;  %v9386_v30 = vld [vmem:[%s21006_s3 + $0x920] sm:$0xff] }
 0x2b0   : > { %3389 = vmatmul.mubr.f32.gmra.mrb[208].mxu0 %v15661_v18  ;;  %2690 = vmatprep.mubr.f32.mxu1 %v16003_v28  ;;  %v9387_v18 = vld [vmem:[%s21006_s3 + $0x928] sm:$0xff]  ;;  %v21153_v3 = vld [vmem:[#allocation8_spill] sm:$0xff] }
 0x2b1   : > { %21152 = vst [vmem:[#allocation20_spill] sm:$0xff] %v15994_v34  ;;  %3393 = vmatprep.mubr.f32.mxu0 %v15665_v52  ;;  %11718 = vmatpush1.bf16.msra.mxu0 %v11717_v10 }
 0x2b2   : > { %v1461_v41 = vpop.f32.mrb[42].mxu1  ;;  %v2051_v49 = vpop.f32.mrb[72].mxu0  ;;  %11719 = vmatprep.subr.bf16.mxu0 %v21127_v6 }
 0x2b3   : > { %v1687_v60 = vadd.f32 %v21153_v3, %v1461_v41  ;;  %v16016_v45 = vadd.f32 %v2051_v49, %v15636_v11  ;;  %v1463_v52 = vpop.f32.mrb[43].mxu1  ;;  %v2053_v10 = vpop.f32.mrb[73].mxu0  ;;  %2691 = vmatmul.mubr.f32.gmra.mrb[148].mxu1 %v16018_v7  ;;  %v11723_v11 = vpack.c.bf16 %v9387_v18, %v9386_v30  ;;  %v9388_v3 = vld [vmem:[%s21006_s3 + $0x930] sm:$0xff]  ;;  %v16046_v18 = vld [vmem:[#allocation2 + $0x207] sm:$0xff] }
 0x2b4   : > { %3394 = vmatmul.mubr.f32.gmra.mrb[210].mxu0 %v15691_v40  ;;  %2695 = vmatprep.mubr.f32.mxu1 %v16022_v8  ;;  %v9389_v40 = vld [vmem:[%s21006_s3 + $0x938] sm:$0xff]  ;;  %v16042_v30 = vld [vmem:[#allocation2 + $0x1ee] sm:$0xff] }
 0x2b5   : > { %v16026_v34 = vadd.f32 %v15675_v43, %v1687_v60  ;;  %3398 = vmatprep.mubr.f32.mxu0 %v15695_v25  ;;  %11721 = vmatpush1.bf16.msra.mxu0 %v11720_v33  ;;  %v21154_v52 = vld [vmem:[#allocation11_spill] sm:$0xff]  ;;  %v11726_v60 = vpack.c.bf16 %v9389_v40, %v9388_v3  ;;  %v16061_v3 = vld [vmem:[#allocation2 + $0x206] sm:$0xff]  ;;  %v16065_v40 = vld [vmem:[#allocation2 + $0x20f] sm:$0xff] }
 0x2b6   : > { %v1466_v41 = vpop.f32.mrb[44].mxu1  ;;  %v2056_v49 = vpop.f32.mrb[132].mxu0  ;;  %11722 = vmatprep.subr.bf16.mxu0 %v21127_v6 }
 0x2b7   : > { %v16037_v10 = vadd.f32 %v21154_v52, %v1466_v41  ;;  %v16040_v43 = vadd.f32 %v2056_v49, %v15673_v37  ;;  %v1468_v25 = vpop.f32.mrb[45].mxu1  ;;  %v2058_v33 = vpop.f32.mrb[133].mxu0  ;;  %2696 = vmatmul.mubr.f32.gmra.mrb[150].mxu1 %v16042_v30  ;;  %v9390_v37 = vld [vmem:[%s21006_s3 + $0x940] sm:$0xff]  ;;  %v21156_v49 = vld [vmem:[#allocation10_spill] sm:$0xff] }
 0x2b8   : > { %3399 = vmatmul.mubr.f32.gmra.mrb[212].mxu0 %v15714_v63  ;;  %2700 = vmatprep.mubr.f32.mxu1 %v16046_v18  ;;  %v9391_v63 = vld [vmem:[%s21006_s3 + $0x948] sm:$0xff] }
 0x2b9   : > { %21155 = vst [vmem:[#allocation7_spill] sm:$0xff] %v16037_v10  ;;  %3403 = vmatprep.mubr.f32.mxu0 %v15718_v35  ;;  %11724 = vmatpush1.bf16.msra.mxu0 %v11723_v11 }
 0x2ba   : > { %v1471_v41 = vpop.f32.mrb[46].mxu1  ;;  %v2061_v52 = vpop.f32.mrb[76].mxu0  ;;  %11725 = vmatprep.subr.bf16.mxu0 %v21127_v6 }
 0x2bb   : > { %v1697_v25 = vadd.f32 %v21156_v49, %v1471_v41  ;;  %v16059_v33 = vadd.f32 %v2061_v52, %v15689_v54  ;;  %v1473_v35 = vpop.f32.mrb[47].mxu1  ;;  %v2063_v11 = vpop.f32.mrb[77].mxu0  ;;  %2701 = vmatmul.mubr.f32.gmra.mrb[152].mxu1 %v16061_v3  ;;  %v11729_v54 = vpack.c.bf16 %v9391_v63, %v9390_v37  ;;  %v9392_v49 = vld [vmem:[%s21006_s3 + $0x950] sm:$0xff]  ;;  %v16088_v63 = vld [vmem:[#allocation2 + $0x227] sm:$0xff] }
 0x2bc   : > { %3404 = vmatmul.mubr.f32.gmra.mrb[214].mxu0 %v15744_v32  ;;  %2705 = vmatprep.mubr.f32.mxu1 %v16065_v40  ;;  %v9393_v32 = vld [vmem:[%s21006_s3 + $0x958] sm:$0xff]  ;;  %v21158_v35 = vld [vmem:[#allocation13_spill] sm:$0xff]  ;;  %21160 = vst [vmem:[#allocation8_spill] sm:$0xff] %v16088_v63 }
 0x2bd   : > { %v16069_v10 = vadd.f32 %v15728_v21, %v1697_v25  ;;  %3408 = vmatprep.mubr.f32.mxu0 %v15748_v13  ;;  %11727 = vmatpush1.bf16.msra.mxu0 %v11726_v60  ;;  %v16085_v37 = vld [vmem:[#allocation2 + $0x20e] sm:$0xff] }
 0x2be   : > { %v1476_v41 = vpop.f32.mrb[48].mxu1  ;;  %v2066_v52 = vpop.f32.mrb[134].mxu0  ;;  %11728 = vmatprep.subr.bf16.mxu0 %v21127_v6  ;;  %v21161_v25 = vld [vmem:[#allocation22_spill] sm:$0xff] }
 0x2bf   : > { %21157 = vst [vmem:[#allocation6_spill] sm:$0xff] %v16069_v10  ;;  %v16080_v11 = vadd.f32 %v21158_v35, %v1476_v41  ;;  %v16083_v21 = vadd.f32 %v2066_v52, %v15726_v61  ;;  %v1478_v13 = vpop.f32.mrb[49].mxu1  ;;  %v2068_v60 = vpop.f32.mrb[135].mxu0  ;;  %2706 = vmatmul.mubr.f32.gmra.mrb[154].mxu1 %v16085_v37  ;;  %v11732_v41 = vpack.c.bf16 %v9393_v32, %v9392_v49  ;;  %v16093_v61 = vld [vmem:[#allocation2 + $0x226] sm:$0xff]  ;;  %v16107_v32 = vld [vmem:[#allocation2 + $0x22f] sm:$0xff] }
 0x2c0   : > { %3409 = vmatmul.mubr.f32.gmra.mrb[216].mxu0 %v21161_v25  ;;  %2710 = vmatprep.mubr.f32.mxu1 %v16088_v63  ;;  %21162 = vst [vmem:[#allocation11_spill] sm:$0xff] %v16093_v61  ;;  %v9394_v52 = vld [vmem:[%s21006_s3 + $0x960] sm:$0xff]  ;;  %v9395_v13 = vld [vmem:[%s21006_s3 + $0x968] sm:$0xff]  ;;  %21165 = vst [vmem:[#allocation10_spill] sm:$0xff] %v16107_v32 }
 0x2c1   : > { %21159 = vst [vmem:[#allocation9_spill] sm:$0xff] %v16080_v11  ;;  %3413 = vmatprep.mubr.f32.mxu0 %v15777_v19  ;;  %11730 = vmatpush1.bf16.msra.mxu0 %v11729_v54  ;;  %v21163_v60 = vld [vmem:[#allocation12_spill] sm:$0xff]  ;;  %v21164_v10 = vld [vmem:[#allocation21_spill] sm:$0xff] }
 0x2c2   : > { %v1481_v35 = vpop.f32.mrb[50].mxu1  ;;  %v2071_v11 = vpop.f32.mrb[80].mxu0  ;;  %11731 = vmatprep.subr.bf16.mxu0 %v21127_v6 }
 0x2c3   : > { %v1707_v25 = vadd.f32 %v21163_v60, %v1481_v35  ;;  %v16104_v19 = vadd.f32 %v2071_v11, %v21164_v10  ;;  %v1483_v54 = vpop.f32.mrb[51].mxu1  ;;  %v2073_v49 = vpop.f32.mrb[81].mxu0  ;;  %2711 = vmatmul.mubr.f32.gmra.mrb[156].mxu1 %v16093_v61  ;;  %v11735_v35 = vpack.c.bf16 %v9395_v13, %v9394_v52  ;;  %v16115_v11 = vld [vmem:[#allocation2 + $0x22e] sm:$0xff]  ;;  %v9397_v13 = vld [vmem:[%s21006_s3 + $0x978] sm:$0xff] }
 0x2c4   : > { %3414 = vmatmul.mubr.f32.gmra.mrb[218].mxu0 %v15798_v12  ;;  %2715 = vmatprep.mubr.f32.mxu1 %v16107_v32  ;;  %21167 = vst [vmem:[#allocation22_spill] sm:$0xff] %v16115_v11  ;;  %v9400_v54 = vld [vmem:[%s21006_s3 + $0x990] sm:$0xff]  ;;  %v21168_v12 = vld [vmem:[#allocation15_spill] sm:$0xff]  ;;  %v13252_v61 = vld [vmem:[#allocation2 + $0x48] sm:$0xff] }
 0x2c5   : > { %v16112_v63 = vadd.f32 %v15783_v58, %v1707_v25  ;;  %3418 = vmatprep.mubr.f32.mxu0 %v15801_v59  ;;  %11733 = vmatpush1.bf16.msra.mxu0 %v11732_v41  ;;  %v9401_v41 = vld [vmem:[%s21006_s3 + $0x998] sm:$0xff]  ;;  %v9396_v52 = vld [vmem:[%s21006_s3 + $0x970] sm:$0xff] }
 0x2c6   : > { %v1486_v60 = vpop.f32.mrb[52].mxu1  ;;  %v2076_v10 = vpop.f32.mrb[136].mxu0  ;;  %11734 = vmatprep.subr.bf16.mxu0 %v21127_v6 }
 0x2c7   : > { %21166 = vst [vmem:[#allocation13_spill] sm:$0xff] %v16112_v63  ;;  %v16122_v49 = vadd.f32 %v21168_v12, %v1486_v60  ;;  %v16125_v58 = vadd.f32 %v2076_v10, %v15781_v24  ;;  %v1488_v25 = vpop.f32.mrb[53].mxu1  ;;  %v2078_v59 = vpop.f32.mrb[137].mxu0  ;;  %2716 = vmatmul.mubr.f32.gmra.mrb[158].mxu1 %v16115_v11  ;;  %v13251_v24 = vld [vmem:[#allocation2 + $0x49] sm:$0xff]  ;;  %v11744_v12 = vpack.c.bf16 %v9401_v41, %v9400_v54 }
 0x2c8   : > { %3419 = vmatmul.mubr.f32.gmra.mrb[220].mxu0 %v15813_v44  ;;  %2785 = vmatprep.mubr.f32.mxu1 %v13251_v24  ;;  %v11738_v25 = vpack.c.bf16 %v9397_v13, %v9396_v52  ;;  %v21170_v59 = vld [vmem:[#allocation14_spill] sm:$0xff]  ;;  %v9402_v44 = vld [vmem:[%s21006_s3 + $0x9a0] sm:$0xff]  ;;  %v21172_v41 = vld [vmem:[#allocation17_spill] sm:$0xff] }
 0x2c9   : > { %21169 = vst [vmem:[#allocation12_spill] sm:$0xff] %v16122_v49  ;;  %3423 = vmatprep.mubr.f32.mxu0 %v15816_v2  ;;  %11736 = vmatpush1.bf16.msra.mxu0 %v11735_v35  ;;  %v9403_v2 = vld [vmem:[%s21006_s3 + $0x9a8] sm:$0xff]  ;;  %v21171_v35 = vld [vmem:[#allocation23_spill] sm:$0xff] }
 0x2ca   : > { %v1491_v60 = vpop.f32.mrb[54].mxu1  ;;  %v2081_v10 = vpop.f32.mrb[84].mxu0  ;;  %11737 = vmatprep.subr.bf16.mxu0 %v21127_v6 }
 0x2cb   : > { %v1717_v49 = vadd.f32 %v21170_v59, %v1491_v60  ;;  %v16142_v63 = vadd.f32 %v2081_v10, %v15796_v5  ;;  %v1493_v11 = vpop.f32.mrb[55].mxu1  ;;  %v2083_v32 = vpop.f32.mrb[85].mxu0  ;;  %2786 = vmatmul.mubr.f32.vlgmr.msra.gmra.mrb[96].mxu1 %v13252_v61  ;;  %v13253_v5 = vld [vmem:[#allocation2 + $0x51] sm:$0xff]  ;;  %v21173_v59 = vld [vmem:[#allocation16_spill] sm:$0xff] }
 0x2cc   : > { %3424 = vmatmul.mubr.f32.gmra.mrb[222].mxu0 %v15835_v26  ;;  %11743 = vmatpush3.bf16.msra.mxu1 %v21171_v35  ;;  %v11748_v11 = vpack.c.bf16 %v9403_v2, %v9402_v44  ;;  %v13254_v60 = vld [vmem:[#allocation2 + $0x50] sm:$0xff] }
 0x2cd   : > { %v16153_v54 = vadd.f32 %v15823_v31, %v1717_v49  ;;  %2790 = vmatprep.mubr.f32.mxu1 %v13253_v5  ;;  %3428 = vmatprep.mubr.f32.mxu0 %v15839_v57  ;;  %v9404_v31 = vld [vmem:[%s21006_s3 + $0x9b0] sm:$0xff]  ;;  %v9405_v57 = vld [vmem:[%s21006_s3 + $0x9b8] sm:$0xff] }
 0x2ce   : > { %v1496_v61 = vpop.f32.mrb[56].mxu1  ;;  %v2086_v32 = vpop.f32.mrb[138].mxu0  ;;  %11745 = vmatprep.subr.bf16.mxu1 %v11744_v12  ;;  %11739 = vmatpush1.bf16.msra.mxu0 %v11738_v25  ;;  %v16169_v49 = vld [vmem:[#allocation2 + $0x69] sm:$0xff]  ;;  %v11752_v25 = vpack.c.bf16 %v9405_v57, %v9404_v31 }
 0x2cf   : > { %v16157_v52 = vadd.f32 %v21172_v41, %v1496_v61  ;;  %v16160_v13 = vadd.f32 %v2086_v32, %v15821_v48  ;;  %v1498_v26 = vpop.f32.mrb[57].mxu1  ;;  %v2088_v24 = vpop.f32.mrb[139].mxu0  ;;  %2791 = vmatmul.mubr.f32.gmra.mrb[98].mxu1 %v13254_v60  ;;  %v16177_v61 = vld [vmem:[#allocation2 + $0x68] sm:$0xff] }
 0x2d0   : > { %3429 = vmatmul.mubr.f32.gmra.mrb[224].mxu0 %v15851_v53  ;;  %2795 = vmatprep.mubr.f32.mxu1 %v16169_v49  ;;  %v9406_v53 = vld [vmem:[%s21006_s3 + $0x9c0] sm:$0xff]  ;;  %v21174_v24 = vld [vmem:[#allocation19_spill] sm:$0xff] }
 0x2d1   : > { %3433 = vmatprep.mubr.f32.mxu0 %v15855_v14  ;;  %11747 = vmatpush3.bf16.msra.mxu1 %v11744_v12  ;;  %v9407_v14 = vld [vmem:[%s21006_s3 + $0x9c8] sm:$0xff]  ;;  %v16187_v12 = vld [vmem:[#allocation2 + $0x71] sm:$0xff] }
 0x2d2   : > { %v1501_v48 = vpop.f32.mrb[58].mxu1  ;;  %v2091_v10 = vpop.f32.mrb[88].mxu0  ;;  %11749 = vmatprep.subr.bf16.mxu1 %v11748_v11  ;;  %v11756_v26 = vpack.c.bf16 %v9407_v14, %v9406_v53 }
 0x2d3   : > { %v1727_v44 = vadd.f32 %v21173_v59, %v1501_v48  ;;  %v16175_v2 = vadd.f32 %v2091_v10, %v15833_v55  ;;  %v1503_v35 = vpop.f32.mrb[59].mxu1  ;;  %v2093_v5 = vpop.f32.mrb[89].mxu0  ;;  %2796 = vmatmul.mubr.f32.gmra.mrb[100].mxu1 %v16177_v61  ;;  %v16200_v48 = vld [vmem:[#allocation2 + $0x70] sm:$0xff] }
 0x2d4   : > { %3434 = vmatmul.mubr.f32.gmra.mrb[226].mxu0 %v15874_v23  ;;  %2800 = vmatprep.mubr.f32.mxu1 %v16187_v12 }
 0x2d5   : > { %v16191_v55 = vadd.f32 %v15862_v1, %v1727_v44  ;;  %3438 = vmatprep.mubr.f32.mxu0 %v15878_v50  ;;  %11751 = vmatpush3.bf16.msra.mxu1 %v11748_v11  ;;  %v9408_v1 = vld [vmem:[%s21006_s3 + $0x9d0] sm:$0xff]  ;;  %v9409_v50 = vld [vmem:[%s21006_s3 + $0x9d8] sm:$0xff] }
 0x2d6   : > { %v1506_v32 = vpop.f32.mrb[60].mxu1  ;;  %v2096_v41 = vpop.f32.mrb[140].mxu0  ;;  %11753 = vmatprep.subr.bf16.mxu1 %v11752_v25  ;;  %v16210_v11 = vld [vmem:[#allocation2 + $0x89] sm:$0xff]  ;;  %v11760_v59 = vpack.c.bf16 %v9409_v50, %v9408_v1  ;;  %v21177_v1 = vld [vmem:[#allocation24_spill] sm:$0xff] }
 0x2d7   : > { %v16195_v60 = vadd.f32 %v21174_v24, %v1506_v32  ;;  %v16198_v31 = vadd.f32 %v2096_v41, %v15860_v17  ;;  %v1508_v23 = vpop.f32.mrb[61].mxu1  ;;  %v2098_v57 = vpop.f32.mrb[141].mxu0  ;;  %2801 = vmatmul.mubr.f32.gmra.mrb[102].mxu1 %v16200_v48  ;;  %v21175_v44 = vld [vmem:[#allocation18_spill] sm:$0xff]  ;;  %v16218_v32 = vld [vmem:[#allocation2 + $0x88] sm:$0xff] }
 0x2d8   : > { %3439 = vmatmul.mubr.f32.gmra.mrb[228].mxu0 %v15890_v36  ;;  %2805 = vmatprep.mubr.f32.mxu1 %v16210_v11  ;;  %v9410_v36 = vld [vmem:[%s21006_s3 + $0x9e0] sm:$0xff]  ;;  %v21176_v41 = vld [vmem:[#allocation25_spill] sm:$0xff] }
 0x2d9   : > { %3443 = vmatprep.mubr.f32.mxu0 %v15894_v0  ;;  %11755 = vmatpush3.bf16.msra.mxu1 %v11752_v25  ;;  %v9411_v0 = vld [vmem:[%s21006_s3 + $0x9e8] sm:$0xff]  ;;  %v16228_v25 = vld [vmem:[#allocation2 + $0x91] sm:$0xff] }
 0x2da   : > { %v1511_v17 = vpop.f32.mrb[62].mxu1  ;;  %v2101_v10 = vpop.f32.mrb[92].mxu0  ;;  %11757 = vmatprep.subr.bf16.mxu1 %v11756_v26  ;;  %v11764_v57 = vpack.c.bf16 %v9411_v0, %v9410_v36  ;;  %v21178_v0 = vld [vmem:[#allocation5_spill] sm:$0xff] }
 0x2db   : > { %v1737_v35 = vadd.f32 %v21175_v44, %v1511_v17  ;;  %v16216_v5 = vadd.f32 %v2101_v10, %v15872_v51  ;;  %v1513_v53 = vpop.f32.mrb[63].mxu1  ;;  %v2103_v14 = vpop.f32.mrb[93].mxu0  ;;  %2806 = vmatmul.mubr.f32.gmra.mrb[104].mxu1 %v16218_v32  ;;  %v16241_v44 = vld [vmem:[#allocation2 + $0x90] sm:$0xff] }
 0x2dc   : > { %3444 = vmatmul.mubr.f32.gmra.mrb[230].mxu0 %v15913_v27  ;;  %2810 = vmatprep.mubr.f32.mxu1 %v16228_v25 }
 0x2dd   : > { %v16232_v51 = vadd.f32 %v15901_v46, %v1737_v35  ;;  %3448 = vmatprep.mubr.f32.mxu0 %v21176_v41  ;;  %11759 = vmatpush3.bf16.msra.mxu1 %v11756_v26  ;;  %v9412_v46 = vld [vmem:[%s21006_s3 + $0x9f0] sm:$0xff]  ;;  %v9413_v26 = vld [vmem:[%s21006_s3 + $0x9f8] sm:$0xff] }
 0x2de   : > { %v2106_v24 = vpop.f32.mrb[142].mxu0  ;;  %v10542_v23 = vpop.f32.mrb[64].mxu1  ;;  %11761 = vmatprep.subr.bf16.mxu1 %v11760_v59  ;;  %v11768_v36 = vpack.c.bf16 %v9413_v26, %v9412_v46  ;;  %v16281_v26 = vld [vmem:[#allocation2 + $0xb0] sm:$0xff] }
 0x2df   : > { %v16236_v50 = vadd.f32 %v2106_v24, %v21177_v1  ;;  %v16239_v17 = vadd.f32 %v10542_v23, %v15954_v47  ;;  %v2108_v27 = vpop.f32.mrb[143].mxu0  ;;  %v2256_v10 = vpop.f32.mrb[65].mxu1  ;;  %2811 = vmatmul.mubr.f32.gmra.mrb[106].mxu1 %v16241_v44  ;;  %v16254_v47 = vld [vmem:[#allocation2 + $0xa9] sm:$0xff] }
 0x2e0   : > { %v16251_v35 = vadd.f32 %v15930_v38, %v2256_v10  ;;  %3449 = vmatmul.mubr.f32.gmra.mrb[232].mxu0 %v15932_v16  ;;  %2815 = vmatprep.mubr.f32.mxu1 %v16254_v47  ;;  %v16264_v16 = vld [vmem:[#allocation2 + $0xa8] sm:$0xff] }
 0x2e1   : > { %3453 = vmatprep.mubr.f32.mxu0 %v15936_v42  ;;  %11763 = vmatpush3.bf16.msra.mxu1 %v11760_v59  ;;  %v16271_v42 = vld [vmem:[#allocation2 + $0xb1] sm:$0xff] }
 0x2e2   : > { %v2111_v53 = vpop.f32.mrb[96].mxu0  ;;  %v10545_v14 = vpop.f32.mrb[66].mxu1  ;;  %11765 = vmatprep.subr.bf16.mxu1 %v11764_v57 }
 0x2e3   : > { %v16259_v41 = vadd.f32 %v2111_v53, %v21178_v0  ;;  %v16262_v24 = vadd.f32 %v10545_v14, %v15997_v22  ;;  %v2113_v38 = vpop.f32.mrb[97].mxu0  ;;  %v2266_v23 = vpop.f32.mrb[67].mxu1  ;;  %2816 = vmatmul.mubr.f32.gmra.mrb[108].mxu1 %v16264_v16 }
 0x2e4   : > { %v16268_v1 = vadd.f32 %v15973_v9, %v2266_v23  ;;  %3454 = vmatmul.mubr.f32.gmra.mrb[234].mxu0 %v15956_v62  ;;  %2820 = vmatprep.mubr.f32.mxu1 %v16271_v42  ;;  %v9478_v23 = vld [vmem:[%s21006_s3 + $0xc00] sm:$0xff] }
 0x2e5   : > { %3458 = vmatprep.mubr.f32.mxu0 %v15960_v29  ;;  %11767 = vmatpush3.bf16.msra.mxu1 %v11764_v57  ;;  %v16288_v29 = vld [vmem:[#allocation2 + $0xc9] sm:$0xff] }
 0x2e6   : > { %v2116_v22 = vpop.f32.mrb[144].mxu0  ;;  %v10548_v59 = vpop.f32.mrb[68].mxu1  ;;  %11769 = vmatprep.subr.bf16.mxu1 %v11768_v36 }
 0x2e7   : > { %v16276_v27 = vadd.f32 %v2116_v22, %v15940_v4  ;;  %v16279_v10 = vadd.f32 %v10548_v59, %v16040_v43  ;;  %v2118_v9 = vpop.f32.mrb[145].mxu0  ;;  %v2276_v46 = vpop.f32.mrb[69].mxu1  ;;  %2821 = vmatmul.mubr.f32.gmra.mrb[110].mxu1 %v16281_v26  ;;  %v9479_v22 = vld [vmem:[%s21006_s3 + $0xc08] sm:$0xff] }
 0x2e8   : > { %v16285_v62 = vadd.f32 %v16016_v45, %v2276_v46  ;;  %3459 = vmatmul.mubr.f32.gmra.mrb[236].mxu0 %v15975_v56  ;;  %2825 = vmatprep.mubr.f32.mxu1 %v16288_v29  ;;  %v16296_v45 = vld [vmem:[#allocation2 + $0xc8] sm:$0xff]  ;;  %v21179_v56 = vld [vmem:[#allocation4_spill] sm:$0xff]  ;;  %v16319_v9 = vld [vmem:[#allocation2 + $0xd0] sm:$0xff]  ;;  %v16325_v46 = vpack.c.bf16 %v9479_v22, %v9478_v23 }
 0x2e9   : > { %3463 = vmatprep.mubr.f32.mxu0 %v15979_v39  ;;  %11771 = vmatpush3.bf16.msra.mxu1 %v11768_v36  ;;  %v16306_v39 = vld [vmem:[#allocation2 + $0xd1] sm:$0xff] }
 0x2ea   : > { %v2121_v4 = vpop.f32.mrb[100].mxu0  ;;  %v10551_v43 = vpop.f32.mrb[70].mxu1  ;;  %11772 = vmatprep.subr.bf16.mxu1 %v21127_v6  ;;  %11869 = vmatprep.subr.bf16.mxu0 %v16325_v46 }
 0x2eb   : > { %v16294_v57 = vadd.f32 %v10551_v43, %v16083_v21  ;;  %v2123_v53 = vpop.f32.mrb[101].mxu0  ;;  %v2286_v14 = vpop.f32.mrb[71].mxu1  ;;  %2826 = vmatmul.mubr.f32.gmra.mrb[112].mxu1 %v16296_v45  ;;  %v16300_v0 = vadd.f32 %v2121_v4, %v21179_v56  ;;  %v16331_v43 = vld [vmem:[#allocation2 + $0xe9] sm:$0xff] }
 0x2ec   : > { %v16303_v38 = vadd.f32 %v16059_v33, %v2286_v14  ;;  %3464 = vmatmul.mubr.f32.gmra.mrb[238].mxu0 %v15999_v15  ;;  %2830 = vmatprep.mubr.f32.mxu1 %v16306_v39  ;;  %v21180_v14 = vld [vmem:[#allocation20_spill] sm:$0xff] }
 0x2ed   : > { %3468 = vmatprep.mubr.f32.mxu0 %v16003_v28 }
 0x2ee   : > { %v2126_v21 = vpop.f32.mrb[146].mxu0  ;;  %v10554_v36 = vpop.f32.mrb[72].mxu1 }
 0x2ef   : > { %v16317_v33 = vadd.f32 %v10554_v36, %v16125_v58  ;;  %v2128_v15 = vpop.f32.mrb[147].mxu0  ;;  %v2296_v59 = vpop.f32.mrb[73].mxu1  ;;  %2831 = vmatmul.mubr.f32.gmra.mrb[114].mxu1 %v16319_v9  ;;  %v16323_v28 = vadd.f32 %v2126_v21, %v15983_v20  ;;  %v16342_v36 = vld [vmem:[#allocation2 + $0xe8] sm:$0xff] }
 0x2f0   : > { %v16328_v4 = vadd.f32 %v16104_v19, %v2296_v59  ;;  %3469 = vmatmul.mubr.f32.gmra.mrb[240].mxu0 %v16018_v7  ;;  %2835 = vmatprep.mubr.f32.mxu1 %v16331_v43 }
 0x2f1   : > { %3473 = vmatprep.mubr.f32.mxu0 %v16022_v8  ;;  %v16349_v8 = vld [vmem:[#allocation2 + $0xf1] sm:$0xff] }
 0x2f2   : > { %v2131_v58 = vpop.f32.mrb[104].mxu0  ;;  %v10557_v53 = vpop.f32.mrb[74].mxu1 }
 0x2f3   : > { %v16337_v20 = vadd.f32 %v2131_v58, %v21180_v14  ;;  %v16340_v56 = vadd.f32 %v10557_v53, %v16160_v13  ;;  %v2133_v19 = vpop.f32.mrb[105].mxu0  ;;  %v2306_v21 = vpop.f32.mrb[75].mxu1  ;;  %2836 = vmatmul.mubr.f32.gmra.mrb[116].mxu1 %v16342_v36  ;;  %v16357_v53 = vld [vmem:[#allocation2 + $0xf0] sm:$0xff] }
 0x2f4   : > { %v16346_v7 = vadd.f32 %v16142_v63, %v2306_v21  ;;  %3474 = vmatmul.mubr.f32.gmra.mrb[242].mxu0 %v16042_v30  ;;  %2840 = vmatprep.mubr.f32.mxu1 %v16349_v8  ;;  %v16364_v63 = vld [vmem:[#allocation2 + $0x109] sm:$0xff] }
 0x2f5   : > { %21181 = vst [vmem:[#allocation21_spill] sm:$0xff] %v16340_v56  ;;  %3478 = vmatprep.mubr.f32.mxu0 %v16046_v18  ;;  %v16371_v21 = vld [vmem:[#allocation2 + $0x108] sm:$0xff] }
 0x2f6   : > { %21182 = vst [vmem:[#allocation15_spill] sm:$0xff] %v16346_v7  ;;  %v2136_v23 = vpop.f32.mrb[148].mxu0  ;;  %v10560_v13 = vpop.f32.mrb[76].mxu1  ;;  %v16415_v7 = vld [vmem:[#allocation2 + $0x130] sm:$0xff] }
 0x2f7   : > { %v2137_v22 = vadd.f32 %v2136_v23, %v16026_v34  ;;  %v16355_v15 = vadd.f32 %v10560_v13, %v16198_v31  ;;  %v2138_v59 = vpop.f32.mrb[149].mxu0  ;;  %v2316_v58 = vpop.f32.mrb[77].mxu1  ;;  %2841 = vmatmul.mubr.f32.gmra.mrb[118].mxu1 %v16357_v53  ;;  %v16379_v13 = vld [vmem:[#allocation2 + $0x111] sm:$0xff] }
 0x2f8   : > { %v16361_v30 = vadd.f32 %v16175_v2, %v2316_v58  ;;  %3479 = vmatmul.mubr.f32.gmra.mrb[244].mxu0 %v16061_v3  ;;  %2845 = vmatprep.mubr.f32.mxu1 %v16364_v63  ;;  %v21186_v2 = vld [vmem:[#allocation7_spill] sm:$0xff] }
 0x2f9   : > { %21183 = vst [vmem:[#allocation14_spill] sm:$0xff] %v16355_v15  ;;  %3483 = vmatprep.mubr.f32.mxu0 %v16065_v40  ;;  %v21188_v40 = vld [vmem:[#allocation8_spill] sm:$0xff] }
 0x2fa   : > { %21184 = vst [vmem:[#allocation23_spill] sm:$0xff] %v16361_v30  ;;  %v2141_v34 = vpop.f32.mrb[108].mxu0  ;;  %v10563_v18 = vpop.f32.mrb[78].mxu1 }
 0x2fb   : > { %v16369_v31 = vadd.f32 %v10563_v18, %v16236_v50  ;;  %v2143_v14 = vpop.f32.mrb[109].mxu0  ;;  %v2326_v19 = vpop.f32.mrb[79].mxu1  ;;  %2846 = vmatmul.mubr.f32.gmra.mrb[120].mxu1 %v16371_v21  ;;  %v12551_v23 = vadd.f32 %v2141_v34, %v21186_v2  ;;  %v16394_v2 = vld [vmem:[#allocation2 + $0x129] sm:$0xff] }
 0x2fc   : > { %v16376_v3 = vadd.f32 %v16216_v5, %v2326_v19  ;;  %3484 = vmatmul.mubr.f32.gmra.mrb[246].mxu0 %v16085_v37  ;;  %2850 = vmatprep.mubr.f32.mxu1 %v16379_v13  ;;  %v21190_v5 = vld [vmem:[#allocation6_spill] sm:$0xff]  ;;  %v21192_v19 = vld [vmem:[#allocation11_spill] sm:$0xff] }
 0x2fd   : > { %21185 = vst [vmem:[#allocation17_spill] sm:$0xff] %v16369_v31  ;;  %3488 = vmatprep.mubr.f32.mxu0 %v21188_v40  ;;  %v16386_v31 = vld [vmem:[#allocation2 + $0x110] sm:$0xff] }
 0x2fe   : > { %21187 = vst [vmem:[#allocation16_spill] sm:$0xff] %v16376_v3  ;;  %v2146_v50 = vpop.f32.mrb[150].mxu0  ;;  %v10566_v59 = vpop.f32.mrb[80].mxu1  ;;  %v21193_v40 = vld [vmem:[#allocation10_spill] sm:$0xff] }
 0x2ff   : > { %v16384_v58 = vadd.f32 %v10566_v59, %v16276_v27  ;;  %v2148_v18 = vpop.f32.mrb[151].mxu0  ;;  %v2336_v14 = vpop.f32.mrb[81].mxu1  ;;  %2851 = vmatmul.mubr.f32.gmra.mrb[122].mxu1 %v16386_v31  ;;  %v2147_v34 = vadd.f32 %v2146_v50, %v21190_v5 }
 0x300   : > { %v16391_v37 = vadd.f32 %v16259_v41, %v2336_v14  ;;  %3489 = vmatmul.mubr.f32.gmra.mrb[248].mxu0 %v21192_v19  ;;  %2855 = vmatprep.mubr.f32.mxu1 %v16394_v2  ;;  %v780_v18 = vld [vmem:[#allocation2 + $0x247] sm:$0xff]  ;;  %v21197_v19 = vld [vmem:[#allocation22_spill] sm:$0xff] }
 0x301   : > { %21189 = vst [vmem:[#allocation19_spill] sm:$0xff] %v16384_v58  ;;  %3493 = vmatprep.mubr.f32.mxu0 %v21193_v40  ;;  %v21194_v58 = vld [vmem:[#allocation9_spill] sm:$0xff]  ;;  %v16409_v40 = vld [vmem:[#allocation2 + $0x131] sm:$0xff] }
 0x302   : > { %21191 = vst [vmem:[#allocation18_spill] sm:$0xff] %v16391_v37  ;;  %v2151_v27 = vpop.f32.mrb[112].mxu0  ;;  %v10569_v59 = vpop.f32.mrb[82].mxu1  ;;  %v16402_v41 = vld [vmem:[#allocation2 + $0x128] sm:$0xff] }
 0x303   : > { %v12552_v3 = vadd.f32 %v2151_v27, %v21194_v58  ;;  %v16400_v15 = vadd.f32 %v10569_v59, %v16323_v28  ;;  %v2153_v50 = vpop.f32.mrb[113].mxu0  ;;  %v2346_v5 = vpop.f32.mrb[83].mxu1  ;;  %2856 = vmatmul.mubr.f32.gmra.mrb[124].mxu1 %v16402_v41  ;;  %v740_v58 = vld [vmem:[#allocation2 + $0x246] sm:$0xff]  ;;  %v781_v59 = vld [vmem:[#allocation2 + $0x24f] sm:$0xff] }
 0x304   : > { %v16406_v14 = vadd.f32 %v16300_v0, %v2346_v5  ;;  %3494 = vmatmul.mubr.f32.gmra.mrb[250].mxu0 %v21197_v19  ;;  %2860 = vmatprep.mubr.f32.mxu1 %v16409_v40  ;;  %v21198_v50 = vld [vmem:[#allocation13_spill] sm:$0xff] }
 0x305   : > { %21195 = vst [vmem:[#allocation25_spill] sm:$0xff] %v16400_v15  ;;  %3498 = vmatprep.mubr.f32.mxu0 %v780_v18  ;;  %v16421_v5 = vld [vmem:[#allocation2 + $0x149] sm:$0xff] }
 0x306   : > { %21196 = vst [vmem:[#allocation24_spill] sm:$0xff] %v16406_v14  ;;  %v2156_v27 = vpop.f32.mrb[152].mxu0  ;;  %v10572_v28 = vpop.f32.mrb[84].mxu1  ;;  %v741_v18 = vld [vmem:[#allocation2 + $0x24e] sm:$0xff] }
 0x307   : > { %v2157_v15 = vadd.f32 %v2156_v27, %v21198_v50  ;;  %v16413_v37 = vadd.f32 %v10572_v28, %v2137_v22  ;;  %v2158_v30 = vpop.f32.mrb[153].mxu0  ;;  %v2356_v56 = vpop.f32.mrb[85].mxu1  ;;  %2861 = vmatmul.mubr.f32.gmra.mrb[126].mxu1 %v16415_v7  ;;  %v16426_v50 = vld [vmem:[#allocation2 + $0x148] sm:$0xff]  ;;  %v16444_v14 = vld [vmem:[#allocation2 + $0x150] sm:$0xff] }
 0x308   : > { %v16419_v0 = vadd.f32 %v16337_v20, %v2356_v56  ;;  %3499 = vmatmul.mubr.f32.gmra.mrb[252].mxu0 %v740_v58  ;;  %2865 = vmatprep.mubr.f32.mxu1 %v16421_v5  ;;  %v9480_v56 = vld [vmem:[%s21006_s3 + $0xc10] sm:$0xff]  ;;  %v9481_v58 = vld [vmem:[%s21006_s3 + $0xc18] sm:$0xff] }
 0x309   : > { %21199 = vst [vmem:[#allocation5_spill] sm:$0xff] %v16413_v37  ;;  %3503 = vmatprep.mubr.f32.mxu0 %v781_v59  ;;  %v21202_v37 = vld [vmem:[#allocation12_spill] sm:$0xff] }
 0x30a   : > { %21200 = vst [vmem:[#allocation4_spill] sm:$0xff] %v16419_v0  ;;  %v2161_v19 = vpop.f32.mrb[116].mxu0  ;;  %v10575_v27 = vpop.f32.mrb[86].mxu1 }
 0x30b   : > { %v16424_v22 = vadd.f32 %v10575_v27, %v2147_v34  ;;  %v2163_v30 = vpop.f32.mrb[117].mxu0  ;;  %v2366_v28 = vpop.f32.mrb[87].mxu1  ;;  %2866 = vmatmul.mubr.f32.gmra.mrb[128].mxu1 %v16426_v50  ;;  %v12553_v20 = vadd.f32 %v2161_v19, %v21202_v37  ;;  %v16438_v34 = vld [vmem:[#allocation2 + $0x151] sm:$0xff]  ;;  %v11872_v37 = vpack.c.bf16 %v9481_v58, %v9480_v56 }
 0x30c   : > { %v16436_v59 = vadd.f32 %v12551_v23, %v2366_v28  ;;  %3504 = vmatmul.mubr.f32.gmra.mrb[254].mxu0 %v741_v18  ;;  %2870 = vmatprep.mubr.f32.mxu1 %v16438_v34  ;;  %v9482_v18 = vld [vmem:[%s21006_s3 + $0xc20] sm:$0xff] }
 0x30d   : > { %21201 = vst [vmem:[#allocation20_spill] sm:$0xff] %v16424_v22  ;;  %3573 = vmatprep.mubr.f32.mxu0 %v16169_v49  ;;  %v9483_v49 = vld [vmem:[%s21006_s3 + $0xc28] sm:$0xff] }
 0x30e   : > { %21203 = vst [vmem:[#allocation7_spill] sm:$0xff] %v16436_v59  ;;  %v2166_v27 = vpop.f32.mrb[154].mxu0  ;;  %v10578_v30 = vpop.f32.mrb[88].mxu1  ;;  %v11876_v56 = vpack.c.bf16 %v9483_v49, %v9482_v18 }
 0x30f   : > { %v16442_v19 = vadd.f32 %v10578_v30, %v2157_v15  ;;  %v2168_v22 = vpop.f32.mrb[155].mxu0  ;;  %v2376_v0 = vpop.f32.mrb[89].mxu1  ;;  %2871 = vmatmul.mubr.f32.gmra.mrb[130].mxu1 %v16444_v14  ;;  %v2167_v23 = vadd.f32 %v2166_v27, %v16153_v54  ;;  %v16457_v15 = vld [vmem:[#allocation2 + $0x169] sm:$0xff] }
 0x310   : > { %v16454_v28 = vadd.f32 %v12552_v3, %v2376_v0  ;;  %3574 = vmatmul.mubr.f32.vlgmr.msra.gmra.mrb[192].mxu0 %v16177_v61  ;;  %2875 = vmatprep.mubr.f32.mxu1 %v16457_v15  ;;  %v16465_v30 = vld [vmem:[#allocation2 + $0x168] sm:$0xff]  ;;  %v9484_v61 = vld [vmem:[%s21006_s3 + $0xc30] sm:$0xff] }
 0x311   : > { %21204 = vst [vmem:[#allocation8_spill] sm:$0xff] %v16442_v19  ;;  %3578 = vmatprep.mubr.f32.mxu0 %v16187_v12  ;;  %11871 = vmatpush3.bf16.msra.mxu0 %v16325_v46  ;;  %v9485_v12 = vld [vmem:[%s21006_s3 + $0xc38] sm:$0xff]  ;;  %v16639_v19 = vld [vmem:[#allocation2 + $0x228] sm:$0xff] }
 0x312   : > { %21205 = vst [vmem:[#allocation6_spill] sm:$0xff] %v16454_v28  ;;  %v2171_v54 = vpop.f32.mrb[120].mxu0  ;;  %v10581_v22 = vpop.f32.mrb[90].mxu1  ;;  %11873 = vmatprep.subr.bf16.mxu0 %v11872_v37  ;;  %v11880_v49 = vpack.c.bf16 %v9485_v12, %v9484_v61  ;;  %v16644_v28 = vld [vmem:[#allocation2 + $0x231] sm:$0xff] }
 0x313   : > { %v12554_v58 = vadd.f32 %v2171_v54, %v16157_v52  ;;  %v16463_v27 = vadd.f32 %v10581_v22, %v2167_v23  ;;  %v2173_v3 = vpop.f32.mrb[121].mxu0  ;;  %v2386_v0 = vpop.f32.mrb[91].mxu1  ;;  %2876 = vmatmul.mubr.f32.gmra.mrb[132].mxu1 %v16465_v30  ;;  %v16477_v52 = vld [vmem:[#allocation2 + $0x171] sm:$0xff] }
 0x314   : > { %v16474_v46 = vadd.f32 %v12553_v20, %v2386_v0  ;;  %3579 = vmatmul.mubr.f32.gmra.mrb[194].mxu0 %v16200_v48  ;;  %2880 = vmatprep.mubr.f32.mxu1 %v16477_v52  ;;  %v9486_v48 = vld [vmem:[%s21006_s3 + $0xc40] sm:$0xff] }
 0x315   : > { %21206 = vst [vmem:[#allocation11_spill] sm:$0xff] %v16463_v27  ;;  %3583 = vmatprep.mubr.f32.mxu0 %v16210_v11  ;;  %11875 = vmatpush3.bf16.msra.mxu0 %v11872_v37  ;;  %v16482_v27 = vld [vmem:[#allocation2 + $0x170] sm:$0xff]  ;;  %v9487_v11 = vld [vmem:[%s21006_s3 + $0xc48] sm:$0xff] }
 0x316   : > { %21207 = vst [vmem:[#allocation10_spill] sm:$0xff] %v16474_v46  ;;  %v2176_v23 = vpop.f32.mrb[156].mxu0  ;;  %v10584_v18 = vpop.f32.mrb[92].mxu1  ;;  %11877 = vmatprep.subr.bf16.mxu0 %v11876_v56  ;;  %v16494_v37 = vld [vmem:[#allocation2 + $0x189] sm:$0xff]  ;;  %v11884_v12 = vpack.c.bf16 %v9487_v11, %v9486_v48 }
 0x317   : > { %v2177_v54 = vadd.f32 %v2176_v23, %v16191_v55  ;;  %v2178_v22 = vpop.f32.mrb[157].mxu0  ;;  %v2396_v3 = vpop.f32.mrb[93].mxu1  ;;  %2881 = vmatmul.mubr.f32.gmra.mrb[134].mxu1 %v16482_v27  ;;  %v16632_v46 = vld [vmem:[#allocation2 + $0x229] sm:$0xff] }
 0x318   : > { %v16491_v20 = vadd.f32 %v12554_v58, %v2396_v3  ;;  %3584 = vmatmul.mubr.f32.gmra.mrb[196].mxu0 %v16218_v32  ;;  %2885 = vmatprep.mubr.f32.mxu1 %v16494_v37  ;;  %v16501_v3 = vld [vmem:[#allocation2 + $0x188] sm:$0xff]  ;;  %v9488_v32 = vld [vmem:[%s21006_s3 + $0xc50] sm:$0xff] }
 0x319   : > { %v16497_v55 = vadd.f32 %v10584_v18, %v2177_v54  ;;  %3588 = vmatprep.mubr.f32.mxu0 %v16228_v25  ;;  %11879 = vmatpush3.bf16.msra.mxu0 %v11876_v56  ;;  %v9489_v25 = vld [vmem:[%s21006_s3 + $0xc58] sm:$0xff] }
 0x31a   : > { %21208 = vst [vmem:[#allocation9_spill] sm:$0xff] %v16491_v20  ;;  %v2181_v0 = vpop.f32.mrb[124].mxu0  ;;  %v10587_v61 = vpop.f32.mrb[94].mxu1  ;;  %11881 = vmatprep.subr.bf16.mxu0 %v11880_v49  ;;  %v16511_v56 = vld [vmem:[#allocation2 + $0x191] sm:$0xff]  ;;  %v11888_v54 = vpack.c.bf16 %v9489_v25, %v9488_v32 }
 0x31b   : > { %21209 = vst [vmem:[#allocation22_spill] sm:$0xff] %v16497_v55  ;;  %v2183_v23 = vpop.f32.mrb[125].mxu0  ;;  %v12555_v22 = vadd.f32 %v2181_v0, %v16195_v60  ;;  %v2406_v58 = vpop.f32.mrb[95].mxu1  ;;  %2886 = vmatmul.mubr.f32.gmra.mrb[136].mxu1 %v16501_v3  ;;  %v16518_v0 = vld [vmem:[#allocation2 + $0x190] sm:$0xff] }
 0x31c   : > { %3589 = vmatmul.mubr.f32.gmra.mrb[198].mxu0 %v16241_v44  ;;  %2890 = vmatprep.mubr.f32.mxu1 %v16511_v56  ;;  %v9490_v44 = vld [vmem:[%s21006_s3 + $0xc60] sm:$0xff]  ;;  %v9491_v23 = vld [vmem:[%s21006_s3 + $0xc68] sm:$0xff]  ;;  %v16621_v55 = vld [vmem:[#allocation2 + $0x211] sm:$0xff] }
 0x31d   : > { %v16514_v60 = vadd.f32 %v12555_v22, %v2406_v58  ;;  %3593 = vmatprep.mubr.f32.mxu0 %v16254_v47  ;;  %11883 = vmatpush3.bf16.msra.mxu0 %v11880_v49  ;;  %v16528_v47 = vld [vmem:[#allocation2 + $0x1a9] sm:$0xff]  ;;  %v11892_v22 = vpack.c.bf16 %v9491_v23, %v9490_v44  ;;  %v16572_v44 = vld [vmem:[#allocation2 + $0x1d1] sm:$0xff] }
 0x31e   : > { %v2186_v18 = vpop.f32.mrb[158].mxu0  ;;  %11885 = vmatprep.subr.bf16.mxu0 %v11884_v12  ;;  %v16536_v58 = vld [vmem:[#allocation2 + $0x1a8] sm:$0xff]  ;;  %v16627_v20 = vld [vmem:[#allocation2 + $0x210] sm:$0xff] }
 0x31f   : > { %21210 = vst [vmem:[#allocation13_spill] sm:$0xff] %v16514_v60  ;;  %v2187_v48 = vadd.f32 %v2186_v18, %v16232_v51  ;;  %v2188_v11 = vpop.f32.mrb[159].mxu0  ;;  %2891 = vmatmul.mubr.f32.gmra.mrb[138].mxu1 %v16518_v0  ;;  %v16554_v18 = vld [vmem:[#allocation2 + $0x1b0] sm:$0xff]  ;;  %v16615_v60 = vld [vmem:[#allocation2 + $0x208] sm:$0xff] }
 0x320   : > { %3594 = vmatmul.mubr.f32.gmra.mrb[200].mxu0 %v16264_v16  ;;  %2895 = vmatprep.mubr.f32.mxu1 %v16528_v47  ;;  %v9492_v16 = vld [vmem:[%s21006_s3 + $0xc70] sm:$0xff] }
 0x321   : > { %3598 = vmatprep.mubr.f32.mxu0 %v16271_v42  ;;  %11887 = vmatpush3.bf16.msra.mxu0 %v11884_v12  ;;  %v16532_v51 = vadd.f32 %v10587_v61, %v2187_v48  ;;  %v9493_v42 = vld [vmem:[%s21006_s3 + $0xc78] sm:$0xff] }
 0x322   : > { %v16534_v49 = vpop.f32.mrb[160].mxu0  ;;  %11889 = vmatprep.subr.bf16.mxu0 %v11888_v54  ;;  %v16548_v61 = vld [vmem:[#allocation2 + $0x1b1] sm:$0xff]  ;;  %v11896_v25 = vpack.c.bf16 %v9493_v42, %v9492_v16 }
 0x323   : > { %21211 = vst [vmem:[#allocation12_spill] sm:$0xff] %v16532_v51  ;;  %2896 = vmatmul.mubr.f32.gmra.mrb[140].mxu1 %v16536_v58  ;;  %v16539_v32 = vpop.f32.mrb[161].mxu0  ;;  %v16597_v42 = vld [vmem:[#allocation2 + $0x1f1] sm:$0xff]  ;;  %v16609_v51 = vld [vmem:[#allocation2 + $0x209] sm:$0xff] }
 0x324   : > { %3599 = vmatmul.mubr.f32.gmra.mrb[202].mxu0 %v16281_v26  ;;  %2900 = vmatprep.mubr.f32.mxu1 %v16548_v61  ;;  %v16560_v26 = vld [vmem:[#allocation2 + $0x1c9] sm:$0xff] }
 0x325   : > { %3603 = vmatprep.mubr.f32.mxu0 %v16288_v29  ;;  %11891 = vmatpush3.bf16.msra.mxu0 %v11888_v54  ;;  %v16566_v54 = vld [vmem:[#allocation2 + $0x1c8] sm:$0xff] }
 0x326   : > { %v16552_v12 = vpop.f32.mrb[162].mxu0  ;;  %11893 = vmatprep.subr.bf16.mxu0 %v11892_v22 }
 0x327   : > { %2901 = vmatmul.mubr.f32.gmra.mrb[142].mxu1 %v16554_v18  ;;  %v16557_v48 = vpop.f32.mrb[163].mxu0 }
 0x328   : > { %3604 = vmatmul.mubr.f32.gmra.mrb[204].mxu0 %v16296_v45  ;;  %2905 = vmatprep.mubr.f32.mxu1 %v16560_v26 }
 0x329   : > { %3608 = vmatprep.mubr.f32.mxu0 %v16306_v39  ;;  %11895 = vmatpush3.bf16.msra.mxu0 %v11892_v22  ;;  %v16579_v39 = vld [vmem:[#allocation2 + $0x1d0] sm:$0xff]  ;;  %v16591_v22 = vld [vmem:[#allocation2 + $0x1e8] sm:$0xff] }
 0x32a   : > { %v16564_v29 = vpop.f32.mrb[164].mxu0  ;;  %11897 = vmatprep.subr.bf16.mxu0 %v11896_v25 }
 0x32b   : > { %2906 = vmatmul.mubr.f32.gmra.mrb[144].mxu1 %v16566_v54  ;;  %v16569_v11 = vpop.f32.mrb[165].mxu0 }
 0x32c   : > { %3609 = vmatmul.mubr.f32.gmra.mrb[206].mxu0 %v16319_v9  ;;  %2910 = vmatprep.mubr.f32.mxu1 %v16572_v44  ;;  %v16585_v9 = vld [vmem:[#allocation2 + $0x1e9] sm:$0xff] }
 0x32d   : > { %3613 = vmatprep.mubr.f32.mxu0 %v16331_v43  ;;  %11899 = vmatpush3.bf16.msra.mxu0 %v11896_v25  ;;  %v16603_v25 = vld [vmem:[#allocation2 + $0x1f0] sm:$0xff] }
 0x32e   : > { %v16576_v45 = vpop.f32.mrb[166].mxu0  ;;  %11900 = vmatprep.subr.bf16.mxu0 %v21127_v6 }
 0x32f   : > { %2911 = vmatmul.mubr.f32.gmra.mrb[146].mxu1 %v16579_v39  ;;  %v16582_v23 = vpop.f32.mrb[167].mxu0 }
 0x330   : > { %3614 = vmatmul.mubr.f32.gmra.mrb[208].mxu0 %v16342_v36  ;;  %2915 = vmatprep.mubr.f32.mxu1 %v16585_v9 }
 0x331   : > { %3618 = vmatprep.mubr.f32.mxu0 %v16349_v8 }
 0x332   : > { %v16589_v43 = vpop.f32.mrb[168].mxu0 }
 0x333   : > { %2916 = vmatmul.mubr.f32.gmra.mrb[148].mxu1 %v16591_v22  ;;  %v16594_v16 = vpop.f32.mrb[169].mxu0 }
 0x334   : > { %3619 = vmatmul.mubr.f32.gmra.mrb[210].mxu0 %v16357_v53  ;;  %2920 = vmatprep.mubr.f32.mxu1 %v16597_v42 }
 0x335   : > { %3623 = vmatprep.mubr.f32.mxu0 %v16364_v63 }
 0x336   : > { %v16601_v36 = vpop.f32.mrb[170].mxu0 }
 0x337   : > { %2921 = vmatmul.mubr.f32.gmra.mrb[150].mxu1 %v16603_v25  ;;  %v16606_v8 = vpop.f32.mrb[171].mxu0 }
 0x338   : > { %3624 = vmatmul.mubr.f32.gmra.mrb[212].mxu0 %v16371_v21  ;;  %2925 = vmatprep.mubr.f32.mxu1 %v16609_v51 }
 0x339   : > { %3628 = vmatprep.mubr.f32.mxu0 %v16379_v13 }
 0x33a   : > { %v16613_v53 = vpop.f32.mrb[172].mxu0 }
 0x33b   : > { %21212 = vst [vmem:[#allocation26_spill] sm:$0xff] %v16613_v53  ;;  %2926 = vmatmul.mubr.f32.gmra.mrb[152].mxu1 %v16615_v60  ;;  %v16618_v63 = vpop.f32.mrb[173].mxu0 }
 0x33c   : > { %21213 = vst [vmem:[#allocation27_spill] sm:$0xff] %v16618_v63  ;;  %3629 = vmatmul.mubr.f32.gmra.mrb[214].mxu0 %v16386_v31  ;;  %2930 = vmatprep.mubr.f32.mxu1 %v16621_v55  ;;  %v13344_v63 = vld [vmem:[#allocation2 + $0x8f] sm:$0xff] }
 0x33d   : > { %3633 = vmatprep.mubr.f32.mxu0 %v16394_v2 }
 0x33e   : > { %v16625_v21 = vpop.f32.mrb[174].mxu0 }
 0x33f   : > { %21214 = vst [vmem:[#allocation28_spill] sm:$0xff] %v16625_v21  ;;  %2931 = vmatmul.mubr.f32.gmra.mrb[154].mxu1 %v16627_v20  ;;  %v16630_v13 = vpop.f32.mrb[175].mxu0  ;;  %v9416_v21 = vld [vmem:[%s21006_s3 + $0xa10] sm:$0xff] }
 0x340   : > { %21215 = vst [vmem:[#allocation29_spill] sm:$0xff] %v16630_v13  ;;  %3634 = vmatmul.mubr.f32.gmra.mrb[216].mxu0 %v16402_v41  ;;  %2935 = vmatprep.mubr.f32.mxu1 %v16632_v46  ;;  %v9414_v41 = vld [vmem:[%s21006_s3 + $0xa00] sm:$0xff] }
 0x341   : > { %3638 = vmatprep.mubr.f32.mxu0 %v16409_v40  ;;  %v9415_v40 = vld [vmem:[%s21006_s3 + $0xa08] sm:$0xff] }
 0x342   : > { %v16637_v31 = vpop.f32.mrb[176].mxu0 }
 0x343   : > { %21216 = vst [vmem:[#allocation30_spill] sm:$0xff] %v16637_v31  ;;  %2936 = vmatmul.mubr.f32.gmra.mrb[156].mxu1 %v16639_v19  ;;  %v16642_v2 = vpop.f32.mrb[177].mxu0  ;;  %v16657_v31 = vld [vmem:[#allocation2 + $0x230] sm:$0xff] }
 0x344   : > { %21217 = vst [vmem:[#allocation31_spill] sm:$0xff] %v16642_v2  ;;  %3639 = vmatmul.mubr.f32.gmra.mrb[218].mxu0 %v16415_v7  ;;  %2940 = vmatprep.mubr.f32.mxu1 %v16644_v28  ;;  %v13311_v7 = vld [vmem:[#allocation2 + $0x6a] sm:$0xff] }
 0x345   : > { %3643 = vmatprep.mubr.f32.mxu0 %v16421_v5  ;;  %v11773_v5 = vpack.c.bf16 %v9415_v40, %v9414_v41  ;;  %v9418_v41 = vld [vmem:[%s21006_s3 + $0xa20] sm:$0xff]  ;;  %v9419_v40 = vld [vmem:[%s21006_s3 + $0xa28] sm:$0xff] }
 0x346   : > { %v16655_v59 = vpop.f32.mrb[178].mxu0 }
 0x347   : > { %21218 = vst [vmem:[#allocation32_spill] sm:$0xff] %v16655_v59  ;;  %2941 = vmatmul.mubr.f32.gmra.mrb[158].mxu1 %v16657_v31  ;;  %v16660_v2 = vpop.f32.mrb[179].mxu0  ;;  %v9417_v59 = vld [vmem:[%s21006_s3 + $0xa18] sm:$0xff] }
 0x348   : > { %21219 = vst [vmem:[#allocation33_spill] sm:$0xff] %v16660_v2  ;;  %3644 = vmatmul.mubr.f32.gmra.mrb[220].mxu0 %v16426_v50  ;;  %10700 = vmatprep.mubr.f32.mxu1 %v13311_v7  ;;  %v13312_v2 = vld [vmem:[#allocation2 + $0x72] sm:$0xff]  ;;  %v11776_v50 = vpack.c.bf16 %v9417_v59, %v9416_v21  ;;  %v16695_v21 = vld [vmem:[#allocation2 + $0xaa] sm:$0xff] }
 0x349   : > { %3648 = vmatprep.mubr.f32.mxu0 %v16438_v34  ;;  %v16676_v34 = vld [vmem:[#allocation2 + $0x8a] sm:$0xff]  ;;  %v16690_v59 = vld [vmem:[#allocation2 + $0x92] sm:$0xff] }
 0x34a   : > { %v16670_v13 = vpop.f32.mrb[180].mxu0 }
 0x34b   : > { %21220 = vst [vmem:[#allocation34_spill] sm:$0xff] %v16670_v13  ;;  %v16672_v53 = vpop.f32.mrb[181].mxu0  ;;  %10701 = vmatmul.mubr.f32.vlgmr.msra.gmra.mrb[160].mxu1 %v13312_v2  ;;  %v9420_v2 = vld [vmem:[%s21006_s3 + $0xa30] sm:$0xff] }
 0x34c   : > { %21221 = vst [vmem:[#allocation35_spill] sm:$0xff] %v16672_v53  ;;  %3649 = vmatmul.mubr.f32.gmra.mrb[222].mxu0 %v16444_v14  ;;  %11774 = vmatpush1.bf16.msra.mxu1 %v11773_v5  ;;  %v9421_v5 = vld [vmem:[%s21006_s3 + $0xa38] sm:$0xff]  ;;  %v13343_v53 = vld [vmem:[#allocation2 + $0x86] sm:$0xff] }
 0x34d   : > { %3653 = vmatprep.mubr.f32.mxu0 %v16457_v15  ;;  %10703 = vmatprep.mubr.f32.mxu1 %v16676_v34  ;;  %v11779_v15 = vpack.c.bf16 %v9419_v40, %v9418_v41  ;;  %v16714_v41 = vld [vmem:[#allocation2 + $0xca] sm:$0xff]  ;;  %v9422_v40 = vld [vmem:[%s21006_s3 + $0xa40] sm:$0xff] }
 0x34e   : > { %v16685_v7 = vpop.f32.mrb[182].mxu0  ;;  %11775 = vmatprep.subr.bf16.mxu1 %v21127_v6  ;;  %v861_v13 = vld [vmem:[#allocation2 + $0x251] sm:$0xff] }
 0x34f   : > { %21222 = vst [vmem:[#allocation36_spill] sm:$0xff] %v16685_v7  ;;  %v16688_v14 = vpop.f32.mrb[183].mxu0  ;;  %10704 = vmatmul.mubr.f32.gmra.mrb[162].mxu1 %v16690_v59 }
 0x350   : > { %21223 = vst [vmem:[#allocation37_spill] sm:$0xff] %v16688_v14  ;;  %3654 = vmatmul.mubr.f32.gmra.mrb[224].mxu0 %v16465_v30  ;;  %11777 = vmatpush1.bf16.msra.mxu1 %v11776_v50  ;;  %v16709_v50 = vld [vmem:[#allocation2 + $0xb2] sm:$0xff]  ;;  %v9447_v14 = vld [vmem:[%s21006_s3 + $0xb08] sm:$0xff] }
 0x351   : > { %3658 = vmatprep.mubr.f32.mxu0 %v16477_v52  ;;  %10706 = vmatprep.mubr.f32.mxu1 %v16695_v21  ;;  %v11782_v52 = vpack.c.bf16 %v9421_v5, %v9420_v2  ;;  %v16733_v2 = vld [vmem:[#allocation2 + $0xea] sm:$0xff] }
 0x352   : > { %v16704_v7 = vpop.f32.mrb[184].mxu0  ;;  %11778 = vmatprep.subr.bf16.mxu1 %v21127_v6  ;;  %v9424_v5 = vld [vmem:[%s21006_s3 + $0xa50] sm:$0xff] }
 0x353   : > { %21224 = vst [vmem:[#allocation38_spill] sm:$0xff] %v16704_v7  ;;  %v16707_v30 = vpop.f32.mrb[185].mxu0  ;;  %10707 = vmatmul.mubr.f32.gmra.mrb[164].mxu1 %v16709_v50  ;;  %v9423_v7 = vld [vmem:[%s21006_s3 + $0xa48] sm:$0xff] }
 0x354   : > { %21225 = vst [vmem:[#allocation39_spill] sm:$0xff] %v16707_v30  ;;  %3659 = vmatmul.mubr.f32.gmra.mrb[226].mxu0 %v16482_v27  ;;  %11780 = vmatpush1.bf16.msra.mxu1 %v11779_v15  ;;  %v16728_v15 = vld [vmem:[#allocation2 + $0xd2] sm:$0xff] }
 0x355   : > { %3663 = vmatprep.mubr.f32.mxu0 %v16494_v37  ;;  %10709 = vmatprep.mubr.f32.mxu1 %v16714_v41  ;;  %v11785_v37 = vpack.c.bf16 %v9423_v7, %v9422_v40  ;;  %v16747_v7 = vld [vmem:[#allocation2 + $0xf2] sm:$0xff]  ;;  %v9426_v40 = vld [vmem:[%s21006_s3 + $0xa60] sm:$0xff] }
 0x356   : > { %v16723_v30 = vpop.f32.mrb[186].mxu0  ;;  %11781 = vmatprep.subr.bf16.mxu1 %v21127_v6 }
 0x357   : > { %21226 = vst [vmem:[#allocation40_spill] sm:$0xff] %v16723_v30  ;;  %v16726_v27 = vpop.f32.mrb[187].mxu0  ;;  %10710 = vmatmul.mubr.f32.gmra.mrb[166].mxu1 %v16728_v15  ;;  %v9425_v30 = vld [vmem:[%s21006_s3 + $0xa58] sm:$0xff] }
 0x358   : > { %21227 = vst [vmem:[#allocation41_spill] sm:$0xff] %v16726_v27  ;;  %3664 = vmatmul.mubr.f32.gmra.mrb[228].mxu0 %v16501_v3  ;;  %11783 = vmatpush1.bf16.msra.mxu1 %v11782_v52  ;;  %v16752_v52 = vld [vmem:[#allocation2 + $0x10a] sm:$0xff] }
 0x359   : > { %3668 = vmatprep.mubr.f32.mxu0 %v16511_v56  ;;  %10712 = vmatprep.mubr.f32.mxu1 %v16733_v2  ;;  %v11788_v56 = vpack.c.bf16 %v9425_v30, %v9424_v5  ;;  %v16766_v30 = vld [vmem:[#allocation2 + $0x112] sm:$0xff] }
 0x35a   : > { %v16742_v27 = vpop.f32.mrb[188].mxu0  ;;  %11784 = vmatprep.subr.bf16.mxu1 %v21127_v6  ;;  %v9428_v5 = vld [vmem:[%s21006_s3 + $0xa70] sm:$0xff] }
 0x35b   : > { %21228 = vst [vmem:[#allocation42_spill] sm:$0xff] %v16742_v27  ;;  %v16745_v3 = vpop.f32.mrb[189].mxu0  ;;  %10713 = vmatmul.mubr.f32.gmra.mrb[168].mxu1 %v16747_v7  ;;  %v9427_v27 = vld [vmem:[%s21006_s3 + $0xa68] sm:$0xff] }
 0x35c   : > { %21229 = vst [vmem:[#allocation43_spill] sm:$0xff] %v16745_v3  ;;  %3669 = vmatmul.mubr.f32.gmra.mrb[230].mxu0 %v16518_v0  ;;  %11786 = vmatpush1.bf16.msra.mxu1 %v11785_v37  ;;  %v16771_v37 = vld [vmem:[#allocation2 + $0x12a] sm:$0xff] }
 0x35d   : > { %3673 = vmatprep.mubr.f32.mxu0 %v16528_v47  ;;  %10715 = vmatprep.mubr.f32.mxu1 %v16752_v52  ;;  %v11791_v47 = vpack.c.bf16 %v9427_v27, %v9426_v40  ;;  %v9430_v27 = vld [vmem:[%s21006_s3 + $0xa80] sm:$0xff]  ;;  %v16796_v40 = vld [vmem:[#allocation2 + $0x152] sm:$0xff] }
 0x35e   : > { %v16761_v3 = vpop.f32.mrb[190].mxu0  ;;  %11787 = vmatprep.subr.bf16.mxu1 %v21127_v6 }
 0x35f   : > { %21230 = vst [vmem:[#allocation44_spill] sm:$0xff] %v16761_v3  ;;  %v16764_v0 = vpop.f32.mrb[191].mxu0  ;;  %10716 = vmatmul.mubr.f32.gmra.mrb[170].mxu1 %v16766_v30  ;;  %v9429_v3 = vld [vmem:[%s21006_s3 + $0xa78] sm:$0xff] }
 0x360   : > { %21231 = vst [vmem:[#allocation45_spill] sm:$0xff] %v16764_v0  ;;  %3674 = vmatmul.mubr.f32.gmra.mrb[232].mxu0 %v16536_v58  ;;  %11789 = vmatpush1.bf16.msra.mxu1 %v11788_v56  ;;  %v16781_v0 = vld [vmem:[#allocation2 + $0x132] sm:$0xff]  ;;  %v11794_v58 = vpack.c.bf16 %v9429_v3, %v9428_v5  ;;  %v9431_v56 = vld [vmem:[%s21006_s3 + $0xa88] sm:$0xff] }
 0x361   : > { %3678 = vmatprep.mubr.f32.mxu0 %v16548_v61  ;;  %10718 = vmatprep.mubr.f32.mxu1 %v16771_v37  ;;  %v16786_v61 = vld [vmem:[#allocation2 + $0x14a] sm:$0xff]  ;;  %v16811_v5 = vld [vmem:[#allocation2 + $0x172] sm:$0xff] }
 0x362   : > { %11790 = vmatprep.subr.bf16.mxu1 %v21127_v6  ;;  %v9432_v3 = vld [vmem:[%s21006_s3 + $0xa90] sm:$0xff] }
 0x363   : > { %10719 = vmatmul.mubr.f32.gmra.mrb[172].mxu1 %v16781_v0 }
 0x364   : > { %3679 = vmatmul.mubr.f32.gmra.mrb[234].mxu0 %v16554_v18  ;;  %11792 = vmatpush1.bf16.msra.mxu1 %v11791_v47  ;;  %v11797_v18 = vpack.c.bf16 %v9431_v56, %v9430_v27  ;;  %v9433_v47 = vld [vmem:[%s21006_s3 + $0xa98] sm:$0xff]  ;;  %v9435_v27 = vld [vmem:[%s21006_s3 + $0xaa8] sm:$0xff] }
 0x365   : > { %3683 = vmatprep.mubr.f32.mxu0 %v16560_v26  ;;  %10721 = vmatprep.mubr.f32.mxu1 %v16786_v61  ;;  %v16801_v26 = vld [vmem:[#allocation2 + $0x16a] sm:$0xff]  ;;  %v16826_v56 = vld [vmem:[#allocation2 + $0x192] sm:$0xff] }
 0x366   : > { %11793 = vmatprep.subr.bf16.mxu1 %v21127_v6 }
 0x367   : > { %10722 = vmatmul.mubr.f32.gmra.mrb[174].mxu1 %v16796_v40 }
 0x368   : > { %3684 = vmatmul.mubr.f32.gmra.mrb[236].mxu0 %v16566_v54  ;;  %11795 = vmatpush1.bf16.msra.mxu1 %v11794_v58  ;;  %v11800_v54 = vpack.c.bf16 %v9433_v47, %v9432_v3  ;;  %v9434_v58 = vld [vmem:[%s21006_s3 + $0xaa0] sm:$0xff]  ;;  %v9437_v3 = vld [vmem:[%s21006_s3 + $0xab8] sm:$0xff] }
 0x369   : > { %3688 = vmatprep.mubr.f32.mxu0 %v16572_v44  ;;  %10724 = vmatprep.mubr.f32.mxu1 %v16801_v26  ;;  %v16816_v44 = vld [vmem:[#allocation2 + $0x18a] sm:$0xff]  ;;  %v16841_v47 = vld [vmem:[#allocation2 + $0x1b2] sm:$0xff] }
 0x36a   : > { %11796 = vmatprep.subr.bf16.mxu1 %v21127_v6 }
 0x36b   : > { %10725 = vmatmul.mubr.f32.gmra.mrb[176].mxu1 %v16811_v5 }
 0x36c   : > { %3689 = vmatmul.mubr.f32.gmra.mrb[238].mxu0 %v16579_v39  ;;  %11798 = vmatpush1.bf16.msra.mxu1 %v11797_v18  ;;  %v11803_v39 = vpack.c.bf16 %v9435_v27, %v9434_v58  ;;  %v9436_v18 = vld [vmem:[%s21006_s3 + $0xab0] sm:$0xff]  ;;  %v9439_v58 = vld [vmem:[%s21006_s3 + $0xac8] sm:$0xff] }
 0x36d   : > { %3693 = vmatprep.mubr.f32.mxu0 %v16585_v9  ;;  %10727 = vmatprep.mubr.f32.mxu1 %v16816_v44  ;;  %v16831_v9 = vld [vmem:[#allocation2 + $0x1aa] sm:$0xff]  ;;  %v16856_v27 = vld [vmem:[#allocation2 + $0x1d2] sm:$0xff] }
 0x36e   : > { %11799 = vmatprep.subr.bf16.mxu1 %v21127_v6 }
 0x36f   : > { %10728 = vmatmul.mubr.f32.gmra.mrb[178].mxu1 %v16826_v56 }
 0x370   : > { %3694 = vmatmul.mubr.f32.gmra.mrb[240].mxu0 %v16591_v22  ;;  %11801 = vmatpush1.bf16.msra.mxu1 %v11800_v54  ;;  %v11806_v22 = vpack.c.bf16 %v9437_v3, %v9436_v18  ;;  %v9438_v54 = vld [vmem:[%s21006_s3 + $0xac0] sm:$0xff]  ;;  %v9441_v18 = vld [vmem:[%s21006_s3 + $0xad8] sm:$0xff] }
 0x371   : > { %3698 = vmatprep.mubr.f32.mxu0 %v16597_v42  ;;  %10730 = vmatprep.mubr.f32.mxu1 %v16831_v9  ;;  %v16846_v42 = vld [vmem:[#allocation2 + $0x1ca] sm:$0xff]  ;;  %v16871_v3 = vld [vmem:[#allocation2 + $0x1f2] sm:$0xff] }
 0x372   : > { %11802 = vmatprep.subr.bf16.mxu1 %v21127_v6 }
 0x373   : > { %10731 = vmatmul.mubr.f32.gmra.mrb[180].mxu1 %v16841_v47 }
 0x374   : > { %3699 = vmatmul.mubr.f32.gmra.mrb[242].mxu0 %v16603_v25  ;;  %11804 = vmatpush1.bf16.msra.mxu1 %v11803_v39  ;;  %v16861_v25 = vld [vmem:[#allocation2 + $0x1ea] sm:$0xff] }
 0x375   : > { %3703 = vmatprep.mubr.f32.mxu0 %v16609_v51  ;;  %10733 = vmatprep.mubr.f32.mxu1 %v16846_v42  ;;  %v11809_v51 = vpack.c.bf16 %v9439_v58, %v9438_v54  ;;  %v9440_v39 = vld [vmem:[%s21006_s3 + $0xad0] sm:$0xff]  ;;  %v9443_v54 = vld [vmem:[%s21006_s3 + $0xae8] sm:$0xff] }
 0x376   : > { %11805 = vmatprep.subr.bf16.mxu1 %v21127_v6  ;;  %v16886_v58 = vld [vmem:[#allocation2 + $0x212] sm:$0xff] }
 0x377   : > { %10734 = vmatmul.mubr.f32.gmra.mrb[182].mxu1 %v16856_v27 }
 0x378   : > { %3704 = vmatmul.mubr.f32.gmra.mrb[244].mxu0 %v16615_v60  ;;  %11807 = vmatpush1.bf16.msra.mxu1 %v11806_v22  ;;  %v16876_v60 = vld [vmem:[#allocation2 + $0x20a] sm:$0xff]  ;;  %v9442_v22 = vld [vmem:[%s21006_s3 + $0xae0] sm:$0xff] }
 0x379   : > { %3708 = vmatprep.mubr.f32.mxu0 %v16621_v55  ;;  %10736 = vmatprep.mubr.f32.mxu1 %v16861_v25  ;;  %v11812_v55 = vpack.c.bf16 %v9441_v18, %v9440_v39  ;;  %v9445_v39 = vld [vmem:[%s21006_s3 + $0xaf8] sm:$0xff]  ;;  %v860_v18 = vld [vmem:[#allocation2 + $0x249] sm:$0xff] }
 0x37a   : > { %11808 = vmatprep.subr.bf16.mxu1 %v21127_v6 }
 0x37b   : > { %10737 = vmatmul.mubr.f32.gmra.mrb[184].mxu1 %v16871_v3 }
 0x37c   : > { %3709 = vmatmul.mubr.f32.gmra.mrb[246].mxu0 %v16627_v20  ;;  %11810 = vmatpush1.bf16.msra.mxu1 %v11809_v51  ;;  %v16891_v20 = vld [vmem:[#allocation2 + $0x22a] sm:$0xff] }
 0x37d   : > { %3713 = vmatprep.mubr.f32.mxu0 %v16632_v46  ;;  %10739 = vmatprep.mubr.f32.mxu1 %v16876_v60  ;;  %v11815_v46 = vpack.c.bf16 %v9443_v54, %v9442_v22  ;;  %v9444_v51 = vld [vmem:[%s21006_s3 + $0xaf0] sm:$0xff]  ;;  %v9446_v54 = vld [vmem:[%s21006_s3 + $0xb00] sm:$0xff] }
 0x37e   : > { %11811 = vmatprep.subr.bf16.mxu1 %v21127_v6  ;;  %v11818_v22 = vpack.c.bf16 %v9445_v39, %v9444_v51  ;;  %v13342_v51 = vld [vmem:[#allocation2 + $0x87] sm:$0xff]  ;;  %v9448_v39 = vld [vmem:[%s21006_s3 + $0xb10] sm:$0xff] }
 0x37f   : > { %10740 = vmatmul.mubr.f32.gmra.mrb[186].mxu1 %v16886_v58 }
 0x380   : > { %3714 = vmatmul.mubr.f32.gmra.mrb[248].mxu0 %v16639_v19  ;;  %11813 = vmatpush1.bf16.msra.mxu1 %v11812_v55  ;;  %v16901_v19 = vld [vmem:[#allocation2 + $0x24a] sm:$0xff]  ;;  %v16903_v55 = vld [vmem:[#allocation2 + $0x232] sm:$0xff] }
 0x381   : > { %3718 = vmatprep.mubr.f32.mxu0 %v16644_v28  ;;  %10742 = vmatprep.mubr.f32.mxu1 %v16891_v20  ;;  %v16907_v28 = vld [vmem:[#allocation2 + $0x252] sm:$0xff] }
 0x382   : > { %11814 = vmatprep.subr.bf16.mxu1 %v21127_v6 }
 0x383   : > { %10743 = vmatmul.mubr.f32.gmra.mrb[188].mxu1 %v16903_v55 }
 0x384   : > { %3719 = vmatmul.mubr.f32.gmra.mrb[250].mxu0 %v16657_v31  ;;  %11816 = vmatpush1.bf16.msra.mxu1 %v11815_v46  ;;  %v13341_v31 = vld [vmem:[#allocation2] sm:$0xff]  ;;  %v11821_v46 = vpack.c.bf16 %v9447_v14, %v9446_v54  ;;  %v13345_v54 = vld [vmem:[#allocation2 + $0x8e] sm:$0xff] }
 0x385   : > { %3723 = vmatprep.mubr.f32.mxu0 %v860_v18  ;;  %10745 = vmatprep.mubr.f32.mxu1 %v16901_v19  ;;  %v9449_v18 = vld [vmem:[%s21006_s3 + $0xb18] sm:$0xff] }
 0x386   : > { %11817 = vmatprep.subr.bf16.mxu1 %v21127_v6  ;;  %v11824_v14 = vpack.c.bf16 %v9449_v18, %v9448_v39  ;;  %v9455_v39 = vld [vmem:[%s21006_s3 + $0xb48] sm:$0xff] }
 0x387   : > { %10746 = vmatmul.mubr.f32.gmra.mrb[190].mxu1 %v16907_v28  ;;  %v13349_v18 = vld [vmem:[#allocation2 + $0xae] sm:$0xff] }
 0x388   : > { %3724 = vmatmul.mubr.f32.gmra.mrb[252].mxu0 %v13341_v31  ;;  %11819 = vmatpush1.bf16.msra.mxu1 %v11818_v22  ;;  %v9451_v22 = vld [vmem:[%s21006_s3 + $0xb28] sm:$0xff] }
 0x389   : > { %4136 = vmatprep.mubr.f32.mxu1 %v13342_v51  ;;  %3728 = vmatprep.mubr.f32.mxu0 %v861_v13  ;;  %v9450_v13 = vld [vmem:[%s21006_s3 + $0xb20] sm:$0xff] }
 0x38a   : > { %11820 = vmatprep.subr.bf16.mxu1 %v21127_v6  ;;  %v9454_v51 = vld [vmem:[%s21006_s3 + $0xb40] sm:$0xff] }
 0x38b   : > { %4137 = vmatmul.mubr.f32.vlgmr.msra.gmra.mrb[192].mxu1 %v13343_v53  ;;  %v13346_v53 = vld [vmem:[#allocation2 + $0xa7] sm:$0xff] }
 0x38c   : > { %3729 = vmatmul.mubr.f32.gmra.mrb[254].mxu0 %v13341_v31  ;;  %11822 = vmatpush1.bf16.msra.mxu1 %v11821_v46  ;;  %v9453_v31 = vld [vmem:[%s21006_s3 + $0xb38] sm:$0xff]  ;;  %v13347_v46 = vld [vmem:[#allocation2 + $0xa6] sm:$0xff] }
 0x38d   : > { %4141 = vmatprep.mubr.f32.mxu1 %v13344_v63  ;;  %10780 = vmatprep.mubr.f32.mxu0 %v16676_v34  ;;  %v11827_v63 = vpack.c.bf16 %v9451_v22, %v9450_v13  ;;  %v9452_v34 = vld [vmem:[%s21006_s3 + $0xb30] sm:$0xff]  ;;  %v9457_v13 = vld [vmem:[%s21006_s3 + $0xb58] sm:$0xff]  ;;  %v13351_v22 = vld [vmem:[#allocation2 + $0xc6] sm:$0xff] }
 0x38e   : > { %11823 = vmatprep.subr.bf16.mxu1 %v21127_v6 }
 0x38f   : > { %4142 = vmatmul.mubr.f32.gmra.mrb[194].mxu1 %v13345_v54 }
 0x390   : > { %10781 = vmatmul.mubr.f32.vlgmr.msra.gmra.mrb[0].mxu0 %v16690_v59  ;;  %4146 = vmatprep.mubr.f32.mxu1 %v13346_v53  ;;  %v13348_v59 = vld [vmem:[#allocation2 + $0xaf] sm:$0xff]  ;;  %v9458_v53 = vld [vmem:[%s21006_s3 + $0xb60] sm:$0xff] }
 0x391   : > { %10783 = vmatprep.mubr.f32.mxu0 %v16695_v21  ;;  %11825 = vmatpush1.bf16.msra.mxu1 %v11824_v14  ;;  %v11830_v21 = vpack.c.bf16 %v9453_v31, %v9452_v34  ;;  %v9456_v14 = vld [vmem:[%s21006_s3 + $0xb50] sm:$0xff] }
 0x392   : > { %11826 = vmatprep.subr.bf16.mxu1 %v21127_v6  ;;  %v13353_v31 = vld [vmem:[#allocation2 + $0xce] sm:$0xff] }
 0x393   : > { %4147 = vmatmul.mubr.f32.gmra.mrb[196].mxu1 %v13347_v46 }
 0x394   : > { %10784 = vmatmul.mubr.f32.gmra.mrb[2].mxu0 %v16709_v50  ;;  %4151 = vmatprep.mubr.f32.mxu1 %v13348_v59  ;;  %v13350_v50 = vld [vmem:[#allocation2 + $0xc7] sm:$0xff] }
 0x395   : > { %10786 = vmatprep.mubr.f32.mxu0 %v16714_v41  ;;  %11828 = vmatpush1.bf16.msra.mxu1 %v11827_v63  ;;  %v11833_v41 = vpack.c.bf16 %v9455_v39, %v9454_v51  ;;  %v9459_v63 = vld [vmem:[%s21006_s3 + $0xb68] sm:$0xff] }
 0x396   : > { %11829 = vmatprep.subr.bf16.mxu1 %v21127_v6  ;;  %v11839_v59 = vpack.c.bf16 %v9459_v63, %v9458_v53 }
 0x397   : > { %4152 = vmatmul.mubr.f32.gmra.mrb[198].mxu1 %v13349_v18 }
 0x398   : > { %10787 = vmatmul.mubr.f32.gmra.mrb[4].mxu0 %v16728_v15  ;;  %4156 = vmatprep.mubr.f32.mxu1 %v13350_v50  ;;  %v13352_v15 = vld [vmem:[#allocation2 + $0xcf] sm:$0xff] }
 0x399   : > { %10789 = vmatprep.mubr.f32.mxu0 %v16733_v2  ;;  %11831 = vmatpush1.bf16.msra.mxu1 %v11830_v21  ;;  %v11836_v2 = vpack.c.bf16 %v9457_v13, %v9456_v14 }
 0x39a   : > { %11832 = vmatprep.subr.bf16.mxu1 %v21127_v6 }
 0x39b   : > { %4157 = vmatmul.mubr.f32.gmra.mrb[200].mxu1 %v13351_v22 }
 0x39c   : > { %10790 = vmatmul.mubr.f32.gmra.mrb[6].mxu0 %v16747_v7  ;;  %4161 = vmatprep.mubr.f32.mxu1 %v13352_v15 }
 0x39d   : > { %10792 = vmatprep.mubr.f32.mxu0 %v16752_v52  ;;  %11834 = vmatpush1.bf16.msra.mxu1 %v11833_v41  ;;  %v13354_v52 = vld [vmem:[#allocation2 + $0xe7] sm:$0xff] }
 0x39e   : > { %v2787_v54 = vpop.f32.mrb[96].mxu1  ;;  %11835 = vmatprep.subr.bf16.mxu1 %v21127_v6 }
 0x39f   : > { %v3013_v34 = vadd.f32 %v16539_v32, %v2787_v54  ;;  %v2789_v7 = vpop.f32.mrb[97].mxu1  ;;  %4162 = vmatmul.mubr.f32.gmra.mrb[202].mxu1 %v13353_v31  ;;  %v9460_v32 = vld [vmem:[%s21006_s3 + $0xb70] sm:$0xff] }
 0x3a0   : > { %10793 = vmatmul.mubr.f32.gmra.mrb[8].mxu0 %v16766_v30  ;;  %4166 = vmatprep.mubr.f32.mxu1 %v13354_v52  ;;  %v9461_v30 = vld [vmem:[%s21006_s3 + $0xb78] sm:$0xff] }
 0x3a1   : > { %v16972_v46 = vadd.f32 %v3013_v34, %v16251_v35  ;;  %10795 = vmatprep.mubr.f32.mxu0 %v16771_v37  ;;  %11837 = vmatpush1.bf16.msra.mxu1 %v11836_v2  ;;  %v13355_v35 = vld [vmem:[#allocation2 + $0xe6] sm:$0xff]  ;;  %v13356_v37 = vld [vmem:[#allocation2 + $0xef] sm:$0xff]  ;;  %v11842_v50 = vpack.c.bf16 %v9461_v30, %v9460_v32 }
 0x3a2   : > { %v2792_v21 = vpop.f32.mrb[98].mxu1  ;;  %11838 = vmatprep.subr.bf16.mxu1 %v21127_v6 }
 0x3a3   : > { %v3018_v51 = vadd.f32 %v16534_v49, %v2792_v21  ;;  %v2794_v39 = vpop.f32.mrb[99].mxu1  ;;  %4167 = vmatmul.mubr.f32.gmra.mrb[204].mxu1 %v13355_v35  ;;  %v9462_v49 = vld [vmem:[%s21006_s3 + $0xb80] sm:$0xff] }
 0x3a4   : > { %10796 = vmatmul.mubr.f32.gmra.mrb[10].mxu0 %v16781_v0  ;;  %4171 = vmatprep.mubr.f32.mxu1 %v13356_v37  ;;  %v9463_v0 = vld [vmem:[%s21006_s3 + $0xb88] sm:$0xff] }
 0x3a5   : > { %v16985_v18 = vadd.f32 %v3018_v51, %v16239_v17  ;;  %10798 = vmatprep.mubr.f32.mxu0 %v16786_v61  ;;  %11840 = vmatpush1.bf16.msra.mxu1 %v11839_v59  ;;  %v13357_v17 = vld [vmem:[#allocation2 + $0xee] sm:$0xff]  ;;  %v11845_v15 = vpack.c.bf16 %v9463_v0, %v9462_v49 }
 0x3a6   : > { %v2797_v41 = vpop.f32.mrb[100].mxu1  ;;  %11841 = vmatprep.subr.bf16.mxu1 %v21127_v6  ;;  %v13358_v61 = vld [vmem:[#allocation2 + $0x107] sm:$0xff] }
 0x3a7   : > { %v3023_v14 = vadd.f32 %v16557_v48, %v2797_v41  ;;  %v2799_v13 = vpop.f32.mrb[101].mxu1  ;;  %4172 = vmatmul.mubr.f32.gmra.mrb[206].mxu1 %v13357_v17  ;;  %v9464_v48 = vld [vmem:[%s21006_s3 + $0xb90] sm:$0xff] }
 0x3a8   : > { %10799 = vmatmul.mubr.f32.gmra.mrb[12].mxu0 %v16796_v40  ;;  %4176 = vmatprep.mubr.f32.mxu1 %v13358_v61  ;;  %v9465_v40 = vld [vmem:[%s21006_s3 + $0xb98] sm:$0xff] }
 0x3a9   : > { %v16998_v22 = vadd.f32 %v3023_v14, %v16268_v1  ;;  %10801 = vmatprep.mubr.f32.mxu0 %v16801_v26  ;;  %11843 = vmatpush1.bf16.msra.mxu1 %v11842_v50  ;;  %v13359_v1 = vld [vmem:[#allocation2 + $0x106] sm:$0xff]  ;;  %v13360_v26 = vld [vmem:[#allocation2 + $0x10f] sm:$0xff]  ;;  %v11848_v34 = vpack.c.bf16 %v9465_v40, %v9464_v48 }
 0x3aa   : > { %v2802_v2 = vpop.f32.mrb[102].mxu1  ;;  %11844 = vmatprep.subr.bf16.mxu1 %v21127_v6 }
 0x3ab   : > { %v3028_v54 = vadd.f32 %v16552_v12, %v2802_v2  ;;  %v2804_v53 = vpop.f32.mrb[103].mxu1  ;;  %4177 = vmatmul.mubr.f32.gmra.mrb[208].mxu1 %v13359_v1  ;;  %v9466_v12 = vld [vmem:[%s21006_s3 + $0xba0] sm:$0xff] }
 0x3ac   : > { %10802 = vmatmul.mubr.f32.gmra.mrb[14].mxu0 %v16811_v5  ;;  %4181 = vmatprep.mubr.f32.mxu1 %v13360_v26  ;;  %v9467_v5 = vld [vmem:[%s21006_s3 + $0xba8] sm:$0xff] }
 0x3ad   : > { %v17011_v63 = vadd.f32 %v3028_v54, %v16262_v24  ;;  %10804 = vmatprep.mubr.f32.mxu0 %v16816_v44  ;;  %11846 = vmatpush1.bf16.msra.mxu1 %v11845_v15  ;;  %v13361_v24 = vld [vmem:[#allocation2 + $0x10e] sm:$0xff]  ;;  %v11851_v21 = vpack.c.bf16 %v9467_v5, %v9466_v12 }
 0x3ae   : > { %v2807_v7 = vpop.f32.mrb[104].mxu1  ;;  %11847 = vmatprep.subr.bf16.mxu1 %v21127_v6  ;;  %v13362_v44 = vld [vmem:[#allocation2 + $0x127] sm:$0xff] }
 0x3af   : > { %v3033_v31 = vadd.f32 %v16569_v11, %v2807_v7  ;;  %v2809_v52 = vpop.f32.mrb[105].mxu1  ;;  %4182 = vmatmul.mubr.f32.gmra.mrb[210].mxu1 %v13361_v24  ;;  %v9468_v11 = vld [vmem:[%s21006_s3 + $0xbb0] sm:$0xff]  ;;  %v13374_v24 = vld [vmem:[#allocation2 + $0x187] sm:$0xff] }
 0x3b0   : > { %10805 = vmatmul.mubr.f32.gmra.mrb[16].mxu0 %v16826_v56  ;;  %4186 = vmatprep.mubr.f32.mxu1 %v13362_v44  ;;  %v9469_v56 = vld [vmem:[%s21006_s3 + $0xbb8] sm:$0xff]  ;;  %v13373_v52 = vld [vmem:[#allocation2 + $0x16e] sm:$0xff] }
 0x3b1   : > { %v17024_v59 = vadd.f32 %v3033_v31, %v16285_v62  ;;  %10807 = vmatprep.mubr.f32.mxu0 %v16831_v9  ;;  %11849 = vmatpush1.bf16.msra.mxu1 %v11848_v34  ;;  %v13363_v62 = vld [vmem:[#allocation2 + $0x126] sm:$0xff]  ;;  %v13364_v9 = vld [vmem:[#allocation2 + $0x12f] sm:$0xff]  ;;  %v11854_v35 = vpack.c.bf16 %v9469_v56, %v9468_v11 }
 0x3b2   : > { %v2812_v32 = vpop.f32.mrb[106].mxu1  ;;  %11850 = vmatprep.subr.bf16.mxu1 %v21127_v6  ;;  %v13376_v11 = vld [vmem:[#allocation2 + $0x18f] sm:$0xff] }
 0x3b3   : > { %v3038_v30 = vadd.f32 %v16564_v29, %v2812_v32  ;;  %v2814_v51 = vpop.f32.mrb[107].mxu1  ;;  %4187 = vmatmul.mubr.f32.gmra.mrb[212].mxu1 %v13363_v62  ;;  %v9470_v29 = vld [vmem:[%s21006_s3 + $0xbc0] sm:$0xff] }
 0x3b4   : > { %10808 = vmatmul.mubr.f32.gmra.mrb[18].mxu0 %v16841_v47  ;;  %4191 = vmatprep.mubr.f32.mxu1 %v13364_v9  ;;  %v9471_v47 = vld [vmem:[%s21006_s3 + $0xbc8] sm:$0xff]  ;;  %v21234_v51 = vld [vmem:[#allocation27_spill] sm:$0xff] }
 0x3b5   : > { %v17037_v39 = vadd.f32 %v3038_v30, %v16279_v10  ;;  %10810 = vmatprep.mubr.f32.mxu0 %v16846_v42  ;;  %11852 = vmatpush1.bf16.msra.mxu1 %v11851_v21  ;;  %v13365_v10 = vld [vmem:[#allocation2 + $0x12e] sm:$0xff]  ;;  %v11857_v0 = vpack.c.bf16 %v9471_v47, %v9470_v29  ;;  %v13375_v32 = vld [vmem:[#allocation2 + $0x186] sm:$0xff] }
 0x3b6   : > { %v2817_v37 = vpop.f32.mrb[108].mxu1  ;;  %11853 = vmatprep.subr.bf16.mxu1 %v21127_v6  ;;  %v13366_v42 = vld [vmem:[#allocation2 + $0x147] sm:$0xff]  ;;  %v21236_v47 = vld [vmem:[#allocation26_spill] sm:$0xff] }
 0x3b7   : > { %v3043_v50 = vadd.f32 %v16582_v23, %v2817_v37  ;;  %v2819_v41 = vpop.f32.mrb[109].mxu1  ;;  %4192 = vmatmul.mubr.f32.gmra.mrb[214].mxu1 %v13365_v10  ;;  %v9472_v23 = vld [vmem:[%s21006_s3 + $0xbd0] sm:$0xff]  ;;  %v21235_v37 = vld [vmem:[#allocation23_spill] sm:$0xff]  ;;  %v13379_v10 = vld [vmem:[#allocation2 + $0x1a6] sm:$0xff] }
 0x3b8   : > { %10811 = vmatmul.mubr.f32.gmra.mrb[20].mxu0 %v16856_v27  ;;  %4196 = vmatprep.mubr.f32.mxu1 %v13366_v42  ;;  %v9473_v27 = vld [vmem:[%s21006_s3 + $0xbd8] sm:$0xff]  ;;  %v13380_v42 = vld [vmem:[#allocation2 + $0x1af] sm:$0xff] }
 0x3b9   : > { %v17050_v49 = vadd.f32 %v3043_v50, %v16303_v38  ;;  %10813 = vmatprep.mubr.f32.mxu0 %v16861_v25  ;;  %11855 = vmatpush1.bf16.msra.mxu1 %v11854_v35  ;;  %v13367_v38 = vld [vmem:[#allocation2 + $0x146] sm:$0xff]  ;;  %v13368_v25 = vld [vmem:[#allocation2 + $0x14f] sm:$0xff]  ;;  %v11860_v15 = vpack.c.bf16 %v9473_v27, %v9472_v23 }
 0x3ba   : > { %v2822_v14 = vpop.f32.mrb[110].mxu1  ;;  %11856 = vmatprep.subr.bf16.mxu1 %v21127_v6  ;;  %v13378_v35 = vld [vmem:[#allocation2 + $0x1a7] sm:$0xff] }
 0x3bb   : > { %v3048_v13 = vadd.f32 %v16576_v45, %v2822_v14  ;;  %v2824_v17 = vpop.f32.mrb[111].mxu1  ;;  %4197 = vmatmul.mubr.f32.gmra.mrb[216].mxu1 %v13367_v38  ;;  %v9474_v45 = vld [vmem:[%s21006_s3 + $0xbe0] sm:$0xff]  ;;  %v21238_v27 = vld [vmem:[#allocation29_spill] sm:$0xff] }
 0x3bc   : > { %10814 = vmatmul.mubr.f32.gmra.mrb[22].mxu0 %v16871_v3  ;;  %4201 = vmatprep.mubr.f32.mxu1 %v13368_v25  ;;  %v9475_v3 = vld [vmem:[%s21006_s3 + $0xbe8] sm:$0xff] }
 0x3bd   : > { %v17063_v61 = vadd.f32 %v3048_v13, %v16294_v57  ;;  %10816 = vmatprep.mubr.f32.mxu0 %v16876_v60  ;;  %11858 = vmatpush1.bf16.msra.mxu1 %v11857_v0  ;;  %v13369_v57 = vld [vmem:[#allocation2 + $0x14e] sm:$0xff]  ;;  %v11863_v53 = vpack.c.bf16 %v9475_v3, %v9474_v45  ;;  %v21240_v3 = vld [vmem:[#allocation28_spill] sm:$0xff] }
 0x3be   : > { %v2827_v2 = vpop.f32.mrb[112].mxu1  ;;  %11859 = vmatprep.subr.bf16.mxu1 %v21127_v6  ;;  %v13370_v60 = vld [vmem:[#allocation2 + $0x167] sm:$0xff]  ;;  %v21237_v0 = vld [vmem:[#allocation14_spill] sm:$0xff] }
 0x3bf   : > { %v3053_v48 = vadd.f32 %v16594_v16, %v2827_v2  ;;  %v2829_v40 = vpop.f32.mrb[113].mxu1  ;;  %4202 = vmatmul.mubr.f32.gmra.mrb[218].mxu1 %v13369_v57  ;;  %v9476_v16 = vld [vmem:[%s21006_s3 + $0xbf0] sm:$0xff]  ;;  %v13382_v25 = vld [vmem:[#allocation2 + $0x1c7] sm:$0xff] }
 0x3c0   : > { %10817 = vmatmul.mubr.f32.gmra.mrb[24].mxu0 %v16886_v58  ;;  %4206 = vmatprep.mubr.f32.mxu1 %v13370_v60  ;;  %v9477_v58 = vld [vmem:[%s21006_s3 + $0xbf8] sm:$0xff]  ;;  %v13381_v38 = vld [vmem:[#allocation2 + $0x1ae] sm:$0xff]  ;;  %v13383_v57 = vld [vmem:[#allocation2 + $0x1c6] sm:$0xff] }
 0x3c1   : > { %v17076_v54 = vadd.f32 %v3053_v48, %v16328_v4  ;;  %10819 = vmatprep.mubr.f32.mxu0 %v16891_v20  ;;  %11861 = vmatpush1.bf16.msra.mxu1 %v11860_v15  ;;  %v13371_v4 = vld [vmem:[#allocation2 + $0x166] sm:$0xff]  ;;  %v13372_v20 = vld [vmem:[#allocation2 + $0x16f] sm:$0xff]  ;;  %v11866_v12 = vpack.c.bf16 %v9477_v58, %v9476_v16  ;;  %v21242_v58 = vld [vmem:[#allocation31_spill] sm:$0xff] }
 0x3c2   : > { %v2832_v1 = vpop.f32.mrb[114].mxu1  ;;  %11862 = vmatprep.subr.bf16.mxu1 %v21127_v6  ;;  %v21239_v15 = vld [vmem:[#allocation16_spill] sm:$0xff]  ;;  %v13384_v60 = vld [vmem:[#allocation2 + $0x1cf] sm:$0xff] }
 0x3c3   : > { %v3058_v26 = vadd.f32 %v16589_v43, %v2832_v1  ;;  %v2834_v34 = vpop.f32.mrb[115].mxu1  ;;  %4207 = vmatmul.mubr.f32.gmra.mrb[220].mxu1 %v13371_v4  ;;  %v13385_v4 = vld [vmem:[#allocation2 + $0x1ce] sm:$0xff] }
 0x3c4   : > { %10820 = vmatmul.mubr.f32.gmra.mrb[26].mxu0 %v16903_v55  ;;  %4211 = vmatprep.mubr.f32.mxu1 %v13372_v20  ;;  %v21232_v55 = vld [vmem:[#allocation15_spill] sm:$0xff]  ;;  %v13386_v20 = vld [vmem:[#allocation2 + $0x1e7] sm:$0xff] }
 0x3c5   : > { %v17089_v7 = vadd.f32 %v3058_v26, %v16317_v33  ;;  %11864 = vmatpush1.bf16.msra.mxu1 %v11863_v53  ;;  %10822 = vmatprep.mubr.f32.mxu0 %v16901_v19  ;;  %v21241_v53 = vld [vmem:[#allocation17_spill] sm:$0xff] }
 0x3c6   : > { %v2837_v5 = vpop.f32.mrb[116].mxu1  ;;  %11865 = vmatprep.subr.bf16.mxu1 %v21127_v6 }
 0x3c7   : > { %v3063_v31 = vadd.f32 %v16606_v8, %v2837_v5  ;;  %v2839_v43 = vpop.f32.mrb[117].mxu1  ;;  %4212 = vmatmul.mubr.f32.gmra.mrb[222].mxu1 %v13373_v52  ;;  %v21233_v8 = vld [vmem:[#allocation21_spill] sm:$0xff] }
 0x3c8   : > { %4216 = vmatprep.mubr.f32.mxu1 %v13374_v24  ;;  %10823 = vmatmul.mubr.f32.gmra.mrb[28].mxu0 %v16907_v28  ;;  %v13377_v28 = vld [vmem:[#allocation2 + $0x18e] sm:$0xff] }
 0x3c9   : > { %v17096_v44 = vadd.f32 %v3063_v31, %v21232_v55  ;;  %11867 = vmatpush1.bf16.msra.mxu1 %v11866_v12  ;;  %v21243_v12 = vld [vmem:[#allocation18_spill] sm:$0xff] }
 0x3ca   : > { %v2842_v33 = vpop.f32.mrb[118].mxu1  ;;  %v21244_v43 = vld [vmem:[#allocation30_spill] sm:$0xff] }
 0x3cb   : > { %v3068_v21 = vadd.f32 %v16601_v36, %v2842_v33  ;;  %v2844_v19 = vpop.f32.mrb[119].mxu1  ;;  %4217 = vmatmul.mubr.f32.gmra.mrb[224].mxu1 %v13375_v32  ;;  %v13387_v33 = vld [vmem:[#allocation2 + $0x1e6] sm:$0xff]  ;;  %v21245_v32 = vld [vmem:[#allocation19_spill] sm:$0xff] }
 0x3cc   : > { %4221 = vmatprep.mubr.f32.mxu1 %v13376_v11  ;;  %v13388_v19 = vld [vmem:[#allocation2 + $0x1ef] sm:$0xff] }
 0x3cd   : > { %v17100_v56 = vadd.f32 %v3068_v21, %v21233_v8 }
 0x3ce   : > { %v2847_v30 = vpop.f32.mrb[120].mxu1 }
 0x3cf   : > { %v3073_v62 = vadd.f32 %v21234_v51, %v2847_v30  ;;  %v2849_v9 = vpop.f32.mrb[121].mxu1  ;;  %4222 = vmatmul.mubr.f32.gmra.mrb[226].mxu1 %v13377_v28  ;;  %v21246_v30 = vld [vmem:[#allocation33_spill] sm:$0xff] }
 0x3d0   : > { %4226 = vmatprep.mubr.f32.mxu1 %v13378_v35  ;;  %v13389_v28 = vld [vmem:[#allocation2 + $0x1ee] sm:$0xff] }
 0x3d1   : > { %v17104_v29 = vadd.f32 %v3073_v62, %v21235_v37  ;;  %v13390_v37 = vld [vmem:[#allocation2 + $0x207] sm:$0xff] }
 0x3d2   : > { %v2852_v36 = vpop.f32.mrb[122].mxu1 }
 0x3d3   : > { %v3078_v50 = vadd.f32 %v21236_v47, %v2852_v36  ;;  %v2854_v41 = vpop.f32.mrb[123].mxu1  ;;  %4227 = vmatmul.mubr.f32.gmra.mrb[228].mxu1 %v13379_v10  ;;  %v21247_v36 = vld [vmem:[#allocation24_spill] sm:$0xff] }
 0x3d4   : > { %4231 = vmatprep.mubr.f32.mxu1 %v13380_v42  ;;  %v21248_v41 = vld [vmem:[#allocation32_spill] sm:$0xff] }
 0x3d5   : > { %v17108_v14 = vadd.f32 %v3078_v50, %v21237_v0 }
 0x3d6   : > { %v2857_v23 = vpop.f32.mrb[124].mxu1 }
 0x3d7   : > { %v3083_v13 = vadd.f32 %v21238_v27, %v2857_v23  ;;  %v2859_v17 = vpop.f32.mrb[125].mxu1  ;;  %4232 = vmatmul.mubr.f32.gmra.mrb[230].mxu1 %v13381_v38  ;;  %v13391_v23 = vld [vmem:[#allocation2 + $0x206] sm:$0xff] }
 0x3d8   : > { %4236 = vmatprep.mubr.f32.mxu1 %v13382_v25  ;;  %v21249_v17 = vld [vmem:[#allocation25_spill] sm:$0xff] }
 0x3d9   : > { %v17112_v2 = vadd.f32 %v3083_v13, %v21239_v15  ;;  %v13392_v13 = vld [vmem:[#allocation2 + $0x20f] sm:$0xff]  ;;  %v21250_v15 = vld [vmem:[#allocation35_spill] sm:$0xff] }
 0x3da   : > { %v2862_v45 = vpop.f32.mrb[126].mxu1 }
 0x3db   : > { %v3088_v48 = vadd.f32 %v21240_v3, %v2862_v45  ;;  %v2864_v40 = vpop.f32.mrb[127].mxu1  ;;  %4237 = vmatmul.mubr.f32.gmra.mrb[232].mxu1 %v13383_v57 }
 0x3dc   : > { %4241 = vmatprep.mubr.f32.mxu1 %v13384_v60  ;;  %v13393_v40 = vld [vmem:[#allocation2 + $0x20e] sm:$0xff] }
 0x3dd   : > { %v17116_v1 = vadd.f32 %v3088_v48, %v21241_v53  ;;  %v13394_v60 = vld [vmem:[#allocation2 + $0x227] sm:$0xff] }
 0x3de   : > { %v2867_v16 = vpop.f32.mrb[128].mxu1  ;;  %v21251_v53 = vld [vmem:[#allocation4_spill] sm:$0xff] }
 0x3df   : > { %v3093_v26 = vadd.f32 %v21242_v58, %v2867_v16  ;;  %v2869_v34 = vpop.f32.mrb[129].mxu1  ;;  %4242 = vmatmul.mubr.f32.gmra.mrb[234].mxu1 %v13385_v4 }
 0x3e0   : > { %4246 = vmatprep.mubr.f32.mxu1 %v13386_v20 }
 0x3e1   : > { %v17120_v5 = vadd.f32 %v3093_v26, %v21243_v12  ;;  %v21252_v26 = vld [vmem:[#allocation34_spill] sm:$0xff]  ;;  %v13395_v12 = vld [vmem:[#allocation2 + $0x226] sm:$0xff] }
 0x3e2   : > { %v2872_v31 = vpop.f32.mrb[130].mxu1 }
 0x3e3   : > { %v3098_v52 = vadd.f32 %v21244_v43, %v2872_v31  ;;  %v17123_v24 = vpop.f32.mrb[192].mxu0  ;;  %v2874_v55 = vpop.f32.mrb[131].mxu1  ;;  %4247 = vmatmul.mubr.f32.gmra.mrb[236].mxu1 %v13387_v33  ;;  %v13396_v43 = vld [vmem:[#allocation2 + $0x22f] sm:$0xff] }
 0x3e4   : > { %v3577_v21 = vpop.f32.mrb[193].mxu0  ;;  %4251 = vmatprep.mubr.f32.mxu1 %v13388_v19 }
 0x3e5   : > { %v17126_v11 = vadd.f32 %v3098_v52, %v21245_v32  ;;  %v21253_v52 = vld [vmem:[#allocation5_spill] sm:$0xff] }
 0x3e6   : > { %v2877_v8 = vpop.f32.mrb[132].mxu1  ;;  %v21254_v21 = vld [vmem:[#allocation37_spill] sm:$0xff] }
 0x3e7   : > { %v3103_v51 = vadd.f32 %v21246_v30, %v2877_v8  ;;  %v17129_v62 = vpop.f32.mrb[194].mxu0  ;;  %v2879_v9 = vpop.f32.mrb[133].mxu1  ;;  %4252 = vmatmul.mubr.f32.gmra.mrb[238].mxu1 %v13389_v28  ;;  %v13397_v30 = vld [vmem:[#allocation2 + $0x22e] sm:$0xff]  ;;  %v21255_v28 = vld [vmem:[#allocation7_spill] sm:$0xff] }
 0x3e8   : > { %v3582_v35 = vpop.f32.mrb[195].mxu0  ;;  %4256 = vmatprep.mubr.f32.mxu1 %v13390_v37  ;;  %v13398_v9 = vld [vmem:[#allocation2 + $0x247] sm:$0xff] }
 0x3e9   : > { %v17132_v47 = vadd.f32 %v3103_v51, %v21247_v36  ;;  %v21256_v36 = vld [vmem:[#allocation36_spill] sm:$0xff] }
 0x3ea   : > { %v2882_v50 = vpop.f32.mrb[134].mxu1 }
 0x3eb   : > { %v3108_v10 = vadd.f32 %v21248_v41, %v2882_v50  ;;  %v17135_v42 = vpop.f32.mrb[196].mxu0  ;;  %v2884_v0 = vpop.f32.mrb[135].mxu1  ;;  %4257 = vmatmul.mubr.f32.gmra.mrb[240].mxu1 %v13391_v23 }
 0x3ec   : > { %v3587_v27 = vpop.f32.mrb[197].mxu0  ;;  %4261 = vmatprep.mubr.f32.mxu1 %v13392_v13  ;;  %v13399_v0 = vld [vmem:[#allocation2 + $0x246] sm:$0xff] }
 0x3ed   : > { %v17138_v38 = vadd.f32 %v3108_v10, %v21249_v17  ;;  %v13400_v27 = vld [vmem:[#allocation2 + $0x24f] sm:$0xff]  ;;  %v21257_v13 = vld [vmem:[#allocation20_spill] sm:$0xff] }
 0x3ee   : > { %v2887_v25 = vpop.f32.mrb[136].mxu1 }
 0x3ef   : > { %v3113_v45 = vadd.f32 %v21250_v15, %v2887_v25  ;;  %v17141_v3 = vpop.f32.mrb[198].mxu0  ;;  %v2889_v48 = vpop.f32.mrb[137].mxu1  ;;  %4262 = vmatmul.mubr.f32.gmra.mrb[242].mxu1 %v13393_v40  ;;  %v782_v25 = vld [vmem:[#allocation2 + $0x267] sm:$0xff] }
 0x3f0   : > { %v3592_v57 = vpop.f32.mrb[199].mxu0  ;;  %4266 = vmatprep.mubr.f32.mxu1 %v13394_v60  ;;  %v13401_v60 = vld [vmem:[#allocation2 + $0x24e] sm:$0xff] }
 0x3f1   : > { %v17144_v16 = vadd.f32 %v3113_v45, %v21251_v53  ;;  %v21258_v45 = vld [vmem:[#allocation39_spill] sm:$0xff] }
 0x3f2   : > { %v2892_v58 = vpop.f32.mrb[138].mxu1 }
 0x3f3   : > { %v3118_v34 = vadd.f32 %v21252_v26, %v2892_v58  ;;  %v17147_v4 = vpop.f32.mrb[200].mxu0  ;;  %v2894_v20 = vpop.f32.mrb[139].mxu1  ;;  %4267 = vmatmul.mubr.f32.gmra.mrb[244].mxu1 %v13395_v12  ;;  %v742_v58 = vld [vmem:[#allocation2 + $0x266] sm:$0xff]  ;;  %v783_v12 = vld [vmem:[#allocation2 + $0x26f] sm:$0xff] }
 0x3f4   : > { %v3597_v31 = vpop.f32.mrb[201].mxu0  ;;  %4271 = vmatprep.mubr.f32.mxu1 %v13396_v43  ;;  %v902_v26 = vld [vmem:[#allocation2 + $0x26a] sm:$0xff] }
 0x3f5   : > { %v17150_v55 = vadd.f32 %v3118_v34, %v21253_v52  ;;  %v21259_v34 = vld [vmem:[#allocation6_spill] sm:$0xff]  ;;  %10825 = vmatprep.mubr.f32.mxu0 %v902_v26  ;;  %v21265_v26 = vld [vmem:[#allocation11_spill] sm:$0xff] }
 0x3f6   : > { %v2897_v33 = vpop.f32.mrb[140].mxu1  ;;  %v21260_v43 = vld [vmem:[#allocation38_spill] sm:$0xff] }
 0x3f7   : > { %v3123_v19 = vadd.f32 %v21254_v21, %v2897_v33  ;;  %v17153_v32 = vpop.f32.mrb[202].mxu0  ;;  %v2899_v8 = vpop.f32.mrb[141].mxu1  ;;  %4272 = vmatmul.mubr.f32.gmra.mrb[246].mxu1 %v13397_v30  ;;  %v743_v30 = vld [vmem:[#allocation2 + $0x26e] sm:$0xff] }
 0x3f8   : > { %v3602_v51 = vpop.f32.mrb[203].mxu0  ;;  %4276 = vmatprep.mubr.f32.mxu1 %v13398_v9 }
 0x3f9   : > { %v17156_v35 = vadd.f32 %v3123_v19, %v21255_v28  ;;  %v903_v19 = vld [vmem:[#allocation2 + $0x272] sm:$0xff]  ;;  %v21261_v51 = vld [vmem:[#allocation8_spill] sm:$0xff] }
 0x3fa   : > { %v2902_v37 = vpop.f32.mrb[142].mxu1  ;;  %10826 = vmatmul.mubr.f32.gmra.mrb[30].mxu0 %v903_v19  ;;  %v13405_v19 = vld [vmem:[#allocation2 + $0x90] sm:$0xff] }
 0x3fb   : > { %v3128_v50 = vadd.f32 %v21256_v36, %v2902_v37  ;;  %v17159_v41 = vpop.f32.mrb[204].mxu0  ;;  %v2904_v10 = vpop.f32.mrb[143].mxu1  ;;  %4277 = vmatmul.mubr.f32.gmra.mrb[248].mxu1 %v13399_v0  ;;  %v21262_v37 = vld [vmem:[#allocation41_spill] sm:$0xff] }
 0x3fc   : > { %v3607_v23 = vpop.f32.mrb[205].mxu0  ;;  %4281 = vmatprep.mubr.f32.mxu1 %v13400_v27  ;;  %v21263_v27 = vld [vmem:[#allocation10_spill] sm:$0xff] }
 0x3fd   : > { %v17162_v17 = vadd.f32 %v3128_v50, %v21257_v13  ;;  %v13402_v23 = vld [vmem:[#allocation2 + $0x89] sm:$0xff] }
 0x3fe   : > { %v2907_v15 = vpop.f32.mrb[144].mxu1 }
 0x3ff   : > { %v3133_v48 = vadd.f32 %v21258_v45, %v2907_v15  ;;  %v17165_v40 = vpop.f32.mrb[206].mxu0  ;;  %v2909_v57 = vpop.f32.mrb[145].mxu1  ;;  %4282 = vmatmul.mubr.f32.gmra.mrb[250].mxu1 %v13401_v60  ;;  %v21264_v15 = vld [vmem:[#allocation40_spill] sm:$0xff]  ;;  %v13403_v60 = vld [vmem:[#allocation2 + $0x88] sm:$0xff] }
 0x400   : > { %v3612_v53 = vpop.f32.mrb[207].mxu0  ;;  %4286 = vmatprep.mubr.f32.mxu1 %v782_v25 }
 0x401   : > { %v17168_v20 = vadd.f32 %v3133_v48, %v21259_v34 }
 0x402   : > { %v2912_v31 = vpop.f32.mrb[146].mxu1 }
 0x403   : > { %v3138_v52 = vadd.f32 %v21260_v43, %v2912_v31  ;;  %v17171_v33 = vpop.f32.mrb[208].mxu0  ;;  %v2914_v21 = vpop.f32.mrb[147].mxu1  ;;  %4287 = vmatmul.mubr.f32.gmra.mrb[252].mxu1 %v742_v58  ;;  %v13404_v58 = vld [vmem:[#allocation2 + $0x91] sm:$0xff] }
 0x404   : > { %v3617_v8 = vpop.f32.mrb[209].mxu0  ;;  %4291 = vmatprep.mubr.f32.mxu1 %v783_v12  ;;  %v21266_v31 = vld [vmem:[#allocation43_spill] sm:$0xff] }
 0x405   : > { %v17174_v9 = vadd.f32 %v3138_v52, %v21261_v51  ;;  %v21267_v51 = vld [vmem:[#allocation9_spill] sm:$0xff] }
 0x406   : > { %v2917_v28 = vpop.f32.mrb[148].mxu1 }
 0x407   : > { %v3143_v36 = vadd.f32 %v21262_v37, %v2917_v28  ;;  %v17177_v50 = vpop.f32.mrb[210].mxu0  ;;  %v2919_v10 = vpop.f32.mrb[149].mxu1  ;;  %4292 = vmatmul.mubr.f32.gmra.mrb[254].mxu1 %v743_v30  ;;  %v13406_v30 = vld [vmem:[#allocation2 + $0xa9] sm:$0xff] }
 0x408   : > { %v3622_v0 = vpop.f32.mrb[211].mxu0  ;;  %4361 = vmatprep.mubr.f32.mxu1 %v13402_v23 }
 0x409   : > { %v17180_v13 = vadd.f32 %v3143_v36, %v21263_v27  ;;  %v21268_v36 = vld [vmem:[#allocation42_spill] sm:$0xff]  ;;  %v13407_v27 = vld [vmem:[#allocation2 + $0xa8] sm:$0xff] }
 0x40a   : > { %v2922_v25 = vpop.f32.mrb[150].mxu1 }
 0x40b   : > { %v3148_v45 = vadd.f32 %v21264_v15, %v2922_v25  ;;  %v17183_v48 = vpop.f32.mrb[212].mxu0  ;;  %v2924_v57 = vpop.f32.mrb[151].mxu1  ;;  %4362 = vmatmul.mubr.f32.vlgmr.msra.gmra.mrb[192].mxu1 %v13403_v60  ;;  %v13408_v15 = vld [vmem:[#allocation2 + $0xb1] sm:$0xff] }
 0x40c   : > { %v3627_v53 = vpop.f32.mrb[213].mxu0  ;;  %4366 = vmatprep.mubr.f32.mxu1 %v13404_v58 }
 0x40d   : > { %v17186_v34 = vadd.f32 %v3148_v45, %v21265_v26  ;;  %v21269_v45 = vld [vmem:[#allocation22_spill] sm:$0xff]  ;;  %v21270_v53 = vld [vmem:[#allocation45_spill] sm:$0xff] }
 0x40e   : > { %v2927_v12 = vpop.f32.mrb[152].mxu1 }
 0x40f   : > { %v3153_v43 = vadd.f32 %v21266_v31, %v2927_v12  ;;  %v17189_v52 = vpop.f32.mrb[214].mxu0  ;;  %v2929_v21 = vpop.f32.mrb[153].mxu1  ;;  %4367 = vmatmul.mubr.f32.gmra.mrb[194].mxu1 %v13405_v19  ;;  %v13409_v31 = vld [vmem:[#allocation2 + $0xb0] sm:$0xff]  ;;  %v9495_v19 = vld [vmem:[%s21008_s5 + $0x280] sm:$0xff] }
 0x410   : > { %v3632_v8 = vpop.f32.mrb[215].mxu0  ;;  %4371 = vmatprep.mubr.f32.mxu1 %v13406_v30  ;;  %v13410_v21 = vld [vmem:[#allocation2 + $0xc9] sm:$0xff] }
 0x411   : > { %v17192_v28 = vadd.f32 %v3153_v43, %v21267_v51  ;;  %v9496_v8 = vld [vmem:[%s21008_s5 + $0x288] sm:$0xff]  ;;  %v9497_v30 = vld [vmem:[%s21008_s5 + $0x290] sm:$0xff] }
 0x412   : > { %v2932_v37 = vpop.f32.mrb[154].mxu1  ;;  %v21271_v51 = vld [vmem:[#allocation13_spill] sm:$0xff] }
 0x413   : > { %v3158_v10 = vadd.f32 %v21268_v36, %v2932_v37  ;;  %v17195_v0 = vpop.f32.mrb[216].mxu0  ;;  %v2934_v23 = vpop.f32.mrb[155].mxu1  ;;  %4372 = vmatmul.mubr.f32.gmra.mrb[196].mxu1 %v13407_v27  ;;  %v11901_v36 = vpack.c.bf16 %v9496_v8, %v9495_v19  ;;  %v21272_v27 = vld [vmem:[#allocation44_spill] sm:$0xff] }
 0x414   : > { %v3637_v25 = vpop.f32.mrb[217].mxu0  ;;  %4376 = vmatprep.mubr.f32.mxu1 %v13408_v15 }
 0x415   : > { %v17198_v57 = vadd.f32 %v3158_v10, %v21269_v45  ;;  %v9498_v10 = vld [vmem:[%s21008_s5 + $0x298] sm:$0xff]  ;;  %11902 = vmatpush1.bf16.msra.mxu0 %v11901_v36 }
 0x416   : > { %v2937_v60 = vpop.f32.mrb[156].mxu1  ;;  %11903 = vmatprep.subr.bf16.mxu0 %v21127_v6 }
 0x417   : > { %v3163_v58 = vadd.f32 %v21270_v53, %v2937_v60  ;;  %v17201_v26 = vpop.f32.mrb[218].mxu0  ;;  %v2939_v12 = vpop.f32.mrb[157].mxu1  ;;  %4377 = vmatmul.mubr.f32.gmra.mrb[198].mxu1 %v13409_v31  ;;  %v13411_v60 = vld [vmem:[#allocation2 + $0xc8] sm:$0xff]  ;;  %v11904_v53 = vpack.c.bf16 %v9498_v10, %v9497_v30  ;;  %v13412_v31 = vld [vmem:[#allocation2 + $0xd1] sm:$0xff] }
 0x418   : > { %v3642_v43 = vpop.f32.mrb[219].mxu0  ;;  %4381 = vmatprep.mubr.f32.mxu1 %v13410_v21  ;;  %v21273_v21 = vld [vmem:[#allocation12_spill] sm:$0xff]  ;;  %v13413_v10 = vld [vmem:[#allocation2 + $0xd0] sm:$0xff] }
 0x419   : > { %v17213_v37 = vadd.f32 %v3163_v58, %v21271_v51  ;;  %v9499_v58 = vld [vmem:[%s21008_s5 + $0x2a0] sm:$0xff]  ;;  %v9500_v43 = vld [vmem:[%s21008_s5 + $0x2a8] sm:$0xff]  ;;  %11905 = vmatpush1.bf16.msra.mxu0 %v11904_v53  ;;  %v9502_v53 = vld [vmem:[%s21008_s5 + $0x2b8] sm:$0xff] }
 0x41a   : > { %v2942_v23 = vpop.f32.mrb[158].mxu1  ;;  %11906 = vmatprep.subr.bf16.mxu0 %v21127_v6 }
 0x41b   : > { %v3168_v25 = vadd.f32 %v21272_v27, %v2942_v23  ;;  %v17219_v15 = vpop.f32.mrb[220].mxu0  ;;  %v2944_v45 = vpop.f32.mrb[159].mxu1  ;;  %4382 = vmatmul.mubr.f32.gmra.mrb[200].mxu1 %v13411_v60  ;;  %v11907_v23 = vpack.c.bf16 %v9500_v43, %v9499_v58  ;;  %v9559_v27 = vld [vmem:[%s21008_s5 + $0x480] sm:$0xff]  ;;  %v9561_v58 = vld [vmem:[%s21008_s5 + $0x490] sm:$0xff] }
 0x41c   : > { %v3647_v12 = vpop.f32.mrb[221].mxu0  ;;  %4386 = vmatprep.mubr.f32.mxu1 %v13412_v31  ;;  %v9560_v45 = vld [vmem:[%s21008_s5 + $0x488] sm:$0xff] }
 0x41d   : > { %v17229_v19 = vadd.f32 %v3168_v25, %v21273_v21  ;;  %v13414_v12 = vld [vmem:[#allocation2 + $0xe9] sm:$0xff]  ;;  %v11996_v31 = vpack.c.bf16 %v9560_v45, %v9559_v27  ;;  %11908 = vmatpush1.bf16.msra.mxu0 %v11907_v23 }
 0x41e   : > { %v10702_v8 = vpop.f32.mrb[160].mxu1  ;;  %11909 = vmatprep.subr.bf16.mxu0 %v21127_v6  ;;  %v9504_v23 = vld [vmem:[%s21008_s5 + $0x2c8] sm:$0xff] }
 0x41f   : > { %v17231_v51 = vpop.f32.mrb[222].mxu0  ;;  %v3806_v30 = vadd.f32 %v10702_v8, %v17129_v62  ;;  %v3800_v36 = vpop.f32.mrb[161].mxu1  ;;  %4387 = vmatmul.mubr.f32.gmra.mrb[202].mxu1 %v13413_v10  ;;  %v9501_v62 = vld [vmem:[%s21008_s5 + $0x2b0] sm:$0xff]  ;;  %11997 = vmatprep.subr.bf16.mxu1 %v11996_v31 }
 0x420   : > { %v3652_v25 = vpop.f32.mrb[223].mxu0  ;;  %v3801_v60 = vadd.f32 %v3800_v36, %v17123_v24  ;;  %4391 = vmatprep.mubr.f32.mxu1 %v13414_v12  ;;  %v9562_v24 = vld [vmem:[%s21008_s5 + $0x498] sm:$0xff]  ;;  %11999 = vmatpush3.bf16.msra.mxu1 %v11996_v31 }
 0x421   : > { %v17252_v43 = vadd.f32 %v3806_v30, %v16985_v18  ;;  %v12000_v36 = vpack.c.bf16 %v9562_v24, %v9561_v58  ;;  %v13415_v25 = vld [vmem:[#allocation2 + $0xe8] sm:$0xff]  ;;  %v11910_v18 = vpack.c.bf16 %v9502_v53, %v9501_v62  ;;  %v9563_v30 = vld [vmem:[%s21008_s5 + $0x4a0] sm:$0xff]  ;;  %v13416_v58 = vld [vmem:[#allocation2 + $0xf1] sm:$0xff] }
 0x422   : > { %v17258_v21 = vadd.f32 %v3801_v60, %v16972_v46  ;;  %v10705_v8 = vpop.f32.mrb[162].mxu1  ;;  %v9564_v46 = vld [vmem:[%s21008_s5 + $0x4a8] sm:$0xff] }
 0x423   : > { %v17260_v10 = vpop.f32.mrb[224].mxu0  ;;  %v3816_v27 = vadd.f32 %v10705_v8, %v17141_v3  ;;  %v3810_v45 = vpop.f32.mrb[163].mxu1  ;;  %4392 = vmatmul.mubr.f32.gmra.mrb[204].mxu1 %v13415_v25  ;;  %v9503_v3 = vld [vmem:[%s21008_s5 + $0x2c0] sm:$0xff]  ;;  %12001 = vmatprep.subr.bf16.mxu1 %v12000_v36  ;;  %v12004_v24 = vpack.c.bf16 %v9564_v46, %v9563_v30  ;;  %v13418_v30 = vld [vmem:[#allocation2 + $0x109] sm:$0xff] }
 0x424   : > { %v3657_v60 = vpop.f32.mrb[225].mxu0  ;;  %v3811_v12 = vadd.f32 %v3810_v45, %v17135_v42  ;;  %4396 = vmatprep.mubr.f32.mxu1 %v13416_v58  ;;  %11911 = vmatpush1.bf16.msra.mxu0 %v11910_v18  ;;  %v11913_v58 = vpack.c.bf16 %v9504_v23, %v9503_v3  ;;  %v9506_v18 = vld [vmem:[%s21008_s5 + $0x2d8] sm:$0xff] }
 0x425   : > { %v17278_v62 = vadd.f32 %v3816_v27, %v17011_v63  ;;  %v13417_v60 = vld [vmem:[#allocation2 + $0xf0] sm:$0xff]  ;;  %11912 = vmatprep.subr.bf16.mxu0 %v21127_v6  ;;  %12003 = vmatpush3.bf16.msra.mxu1 %v12000_v36 }
 0x426   : > { %v17281_v53 = vadd.f32 %v3811_v12, %v16998_v22  ;;  %v10708_v42 = vpop.f32.mrb[164].mxu1  ;;  %v9565_v63 = vld [vmem:[%s21008_s5 + $0x4b0] sm:$0xff]  ;;  %v9566_v22 = vld [vmem:[%s21008_s5 + $0x4b8] sm:$0xff]  ;;  %12005 = vmatprep.subr.bf16.mxu1 %v12004_v24 }
 0x427   : > { %v17283_v8 = vpop.f32.mrb[226].mxu0  ;;  %v3826_v45 = vadd.f32 %v10708_v42, %v17153_v32  ;;  %v3820_v25 = vpop.f32.mrb[165].mxu1  ;;  %4397 = vmatmul.mubr.f32.gmra.mrb[206].mxu1 %v13417_v60  ;;  %v9505_v32 = vld [vmem:[%s21008_s5 + $0x2d0] sm:$0xff]  ;;  %v12008_v3 = vpack.c.bf16 %v9566_v22, %v9565_v63  ;;  %v13419_v60 = vld [vmem:[#allocation2 + $0x108] sm:$0xff] }
 0x428   : > { %v3662_v31 = vpop.f32.mrb[227].mxu0  ;;  %v3821_v27 = vadd.f32 %v3820_v25, %v17147_v4  ;;  %4401 = vmatprep.mubr.f32.mxu1 %v13418_v30  ;;  %11914 = vmatpush1.bf16.msra.mxu0 %v11913_v58 }
 0x429   : > { %v17301_v46 = vadd.f32 %v3826_v45, %v17037_v39  ;;  %v11916_v31 = vpack.c.bf16 %v9506_v18, %v9505_v32  ;;  %v13420_v45 = vld [vmem:[#allocation2 + $0x111] sm:$0xff]  ;;  %11915 = vmatprep.subr.bf16.mxu0 %v21127_v6  ;;  %12007 = vmatpush3.bf16.msra.mxu1 %v12004_v24 }
 0x42a   : > { %v17304_v12 = vadd.f32 %v3821_v27, %v17024_v59  ;;  %v10711_v4 = vpop.f32.mrb[166].mxu1  ;;  %v9507_v59 = vld [vmem:[%s21008_s5 + $0x2e0] sm:$0xff]  ;;  %12009 = vmatprep.subr.bf16.mxu1 %v12008_v3  ;;  %v13421_v32 = vld [vmem:[#allocation2 + $0x110] sm:$0xff] }
 0x42b   : > { %v17306_v23 = vpop.f32.mrb[228].mxu0  ;;  %v3836_v42 = vadd.f32 %v10711_v4, %v17165_v40  ;;  %v3830_v25 = vpop.f32.mrb[167].mxu1  ;;  %4402 = vmatmul.mubr.f32.gmra.mrb[208].mxu1 %v13419_v60  ;;  %v9508_v40 = vld [vmem:[%s21008_s5 + $0x2e8] sm:$0xff] }
 0x42c   : > { %v3667_v30 = vpop.f32.mrb[229].mxu0  ;;  %v3831_v39 = vadd.f32 %v3830_v25, %v17159_v41  ;;  %4406 = vmatprep.mubr.f32.mxu1 %v13420_v45  ;;  %11917 = vmatpush1.bf16.msra.mxu0 %v11916_v31  ;;  %v11919_v18 = vpack.c.bf16 %v9508_v40, %v9507_v59 }
 0x42d   : > { %v17318_v36 = vadd.f32 %v3836_v42, %v17063_v61  ;;  %v13422_v61 = vld [vmem:[#allocation2 + $0x129] sm:$0xff]  ;;  %11918 = vmatprep.subr.bf16.mxu0 %v21127_v6  ;;  %12011 = vmatpush3.bf16.msra.mxu1 %v12008_v3 }
 0x42e   : > { %v17321_v58 = vadd.f32 %v3831_v39, %v17050_v49  ;;  %v10714_v41 = vpop.f32.mrb[168].mxu1  ;;  %v9509_v49 = vld [vmem:[%s21008_s5 + $0x2f0] sm:$0xff]  ;;  %v13423_v39 = vld [vmem:[#allocation2 + $0x128] sm:$0xff] }
 0x42f   : > { %v17323_v63 = vpop.f32.mrb[230].mxu0  ;;  %v3846_v22 = vadd.f32 %v10714_v41, %v17177_v50  ;;  %v3840_v27 = vpop.f32.mrb[169].mxu1  ;;  %4407 = vmatmul.mubr.f32.gmra.mrb[210].mxu1 %v13421_v32  ;;  %v9510_v50 = vld [vmem:[%s21008_s5 + $0x2f8] sm:$0xff] }
 0x430   : > { %v3672_v4 = vpop.f32.mrb[231].mxu0  ;;  %v3841_v25 = vadd.f32 %v3840_v27, %v17171_v33  ;;  %4411 = vmatprep.mubr.f32.mxu1 %v13422_v61  ;;  %11920 = vmatpush1.bf16.msra.mxu0 %v11919_v18  ;;  %v11922_v45 = vpack.c.bf16 %v9510_v50, %v9509_v49  ;;  %v13424_v41 = vld [vmem:[#allocation2 + $0x131] sm:$0xff]  ;;  %v13426_v49 = vld [vmem:[#allocation2 + $0x149] sm:$0xff] }
 0x431   : > { %v17335_v24 = vadd.f32 %v3846_v22, %v17089_v7  ;;  %11921 = vmatprep.subr.bf16.mxu0 %v21127_v6  ;;  %v9512_v7 = vld [vmem:[%s21008_s5 + $0x308] sm:$0xff]  ;;  %v13425_v18 = vld [vmem:[#allocation2 + $0x130] sm:$0xff] }
 0x432   : > { %v17338_v42 = vadd.f32 %v3841_v25, %v17076_v54  ;;  %v10717_v33 = vpop.f32.mrb[170].mxu1  ;;  %v9511_v54 = vld [vmem:[%s21008_s5 + $0x300] sm:$0xff] }
 0x433   : > { %v17340_v60 = vpop.f32.mrb[232].mxu0  ;;  %v3856_v31 = vadd.f32 %v10717_v33, %v17189_v52  ;;  %v3850_v30 = vpop.f32.mrb[171].mxu1  ;;  %4412 = vmatmul.mubr.f32.gmra.mrb[212].mxu1 %v13423_v39  ;;  %v11925_v4 = vpack.c.bf16 %v9512_v7, %v9511_v54  ;;  %v13427_v39 = vld [vmem:[#allocation2 + $0x148] sm:$0xff] }
 0x434   : > { %v3677_v59 = vpop.f32.mrb[233].mxu0  ;;  %v3851_v40 = vadd.f32 %v3850_v30, %v17183_v48  ;;  %4416 = vmatprep.mubr.f32.mxu1 %v13424_v41  ;;  %11923 = vmatpush1.bf16.msra.mxu0 %v11922_v45  ;;  %v13428_v41 = vld [vmem:[#allocation2 + $0x151] sm:$0xff] }
 0x435   : > { %v17352_v52 = vadd.f32 %v3856_v31, %v17100_v56  ;;  %11924 = vmatprep.subr.bf16.mxu0 %v21127_v6  ;;  %v9514_v56 = vld [vmem:[%s21008_s5 + $0x318] sm:$0xff] }
 0x436   : > { %v17355_v3 = vadd.f32 %v3851_v40, %v17096_v44  ;;  %v10720_v22 = vpop.f32.mrb[172].mxu1  ;;  %v9513_v44 = vld [vmem:[%s21008_s5 + $0x310] sm:$0xff] }
 0x437   : > { %v17357_v48 = vpop.f32.mrb[234].mxu0  ;;  %v3866_v27 = vadd.f32 %v10720_v22, %v17201_v26  ;;  %v3860_v32 = vpop.f32.mrb[173].mxu1  ;;  %4417 = vmatmul.mubr.f32.gmra.mrb[214].mxu1 %v13425_v18  ;;  %v11928_v45 = vpack.c.bf16 %v9514_v56, %v9513_v44 }
 0x438   : > { %v3682_v25 = vpop.f32.mrb[235].mxu0  ;;  %v3861_v61 = vadd.f32 %v3860_v32, %v17195_v0  ;;  %4421 = vmatprep.mubr.f32.mxu1 %v13426_v49  ;;  %11926 = vmatpush1.bf16.msra.mxu0 %v11925_v4  ;;  %v13429_v32 = vld [vmem:[#allocation2 + $0x150] sm:$0xff] }
 0x439   : > { %v17369_v26 = vadd.f32 %v3866_v27, %v17108_v14  ;;  %11927 = vmatprep.subr.bf16.mxu0 %v21127_v6  ;;  %v9516_v14 = vld [vmem:[%s21008_s5 + $0x328] sm:$0xff] }
 0x43a   : > { %v17372_v50 = vadd.f32 %v3861_v61, %v17104_v29  ;;  %v10723_v33 = vpop.f32.mrb[174].mxu1  ;;  %v9515_v29 = vld [vmem:[%s21008_s5 + $0x320] sm:$0xff]  ;;  %v13430_v61 = vld [vmem:[#allocation2 + $0x169] sm:$0xff] }
 0x43b   : > { %v17374_v0 = vpop.f32.mrb[236].mxu0  ;;  %v3876_v31 = vadd.f32 %v10723_v33, %v17231_v51  ;;  %v3870_v30 = vpop.f32.mrb[175].mxu1  ;;  %4422 = vmatmul.mubr.f32.gmra.mrb[216].mxu1 %v13427_v39  ;;  %v11931_v18 = vpack.c.bf16 %v9516_v14, %v9515_v29 }
 0x43c   : > { %v3687_v59 = vpop.f32.mrb[237].mxu0  ;;  %v3871_v40 = vadd.f32 %v3870_v30, %v17219_v15  ;;  %4426 = vmatprep.mubr.f32.mxu1 %v13428_v41  ;;  %11929 = vmatpush1.bf16.msra.mxu0 %v11928_v45 }
 0x43d   : > { %v17386_v51 = vadd.f32 %v3876_v31, %v17116_v1  ;;  %11930 = vmatprep.subr.bf16.mxu0 %v21127_v6  ;;  %v9518_v1 = vld [vmem:[%s21008_s5 + $0x338] sm:$0xff]  ;;  %v13431_v31 = vld [vmem:[#allocation2 + $0x168] sm:$0xff] }
 0x43e   : > { %v17389_v54 = vadd.f32 %v3871_v40, %v17112_v2  ;;  %v10726_v7 = vpop.f32.mrb[176].mxu1  ;;  %v9517_v2 = vld [vmem:[%s21008_s5 + $0x330] sm:$0xff] }
 0x43f   : > { %v3690_v15 = vpop.f32.mrb[238].mxu0  ;;  %v3886_v22 = vadd.f32 %v10726_v7, %v17283_v8  ;;  %v3880_v27 = vpop.f32.mrb[177].mxu1  ;;  %4427 = vmatmul.mubr.f32.gmra.mrb[218].mxu1 %v13429_v32  ;;  %v11934_v30 = vpack.c.bf16 %v9518_v1, %v9517_v2  ;;  %v13432_v59 = vld [vmem:[#allocation2 + $0x171] sm:$0xff]  ;;  %v13435_v1 = vld [vmem:[#allocation2 + $0x188] sm:$0xff] }
 0x440   : > { %v3692_v4 = vpop.f32.mrb[239].mxu0  ;;  %v3881_v25 = vadd.f32 %v3880_v27, %v17260_v10  ;;  %4431 = vmatprep.mubr.f32.mxu1 %v13430_v61  ;;  %11932 = vmatpush1.bf16.msra.mxu0 %v11931_v18  ;;  %v13433_v7 = vld [vmem:[#allocation2 + $0x170] sm:$0xff] }
 0x441   : > { %v17401_v8 = vadd.f32 %v3886_v22, %v17126_v11  ;;  %11933 = vmatprep.subr.bf16.mxu0 %v21127_v6  ;;  %v9520_v11 = vld [vmem:[%s21008_s5 + $0x348] sm:$0xff] }
 0x442   : > { %v10729_v49 = vpop.f32.mrb[178].mxu1  ;;  %v17404_v44 = vadd.f32 %v3881_v25, %v17120_v5  ;;  %v9519_v5 = vld [vmem:[%s21008_s5 + $0x340] sm:$0xff]  ;;  %v13434_v18 = vld [vmem:[#allocation2 + $0x189] sm:$0xff] }
 0x443   : > { %v3695_v10 = vpop.f32.mrb[240].mxu0  ;;  %v3896_v56 = vadd.f32 %v10729_v49, %v17323_v63  ;;  %v3890_v33 = vpop.f32.mrb[179].mxu1  ;;  %4432 = vmatmul.mubr.f32.gmra.mrb[220].mxu1 %v13431_v31  ;;  %v11937_v22 = vpack.c.bf16 %v9520_v11, %v9519_v5  ;;  %v13436_v31 = vld [vmem:[#allocation2 + $0x191] sm:$0xff] }
 0x444   : > { %v3697_v39 = vpop.f32.mrb[241].mxu0  ;;  %v3891_v45 = vadd.f32 %v3890_v33, %v17306_v23  ;;  %4436 = vmatprep.mubr.f32.mxu1 %v13432_v59  ;;  %11935 = vmatpush1.bf16.msra.mxu0 %v11934_v30  ;;  %v13437_v59 = vld [vmem:[#allocation2 + $0x190] sm:$0xff] }
 0x445   : > { %v17416_v63 = vadd.f32 %v3896_v56, %v17138_v38  ;;  %11936 = vmatprep.subr.bf16.mxu0 %v21127_v6  ;;  %v9522_v38 = vld [vmem:[%s21008_s5 + $0x358] sm:$0xff] }
 0x446   : > { %v10732_v40 = vpop.f32.mrb[180].mxu1  ;;  %v17419_v41 = vadd.f32 %v3891_v45, %v17132_v47  ;;  %v9521_v47 = vld [vmem:[%s21008_s5 + $0x350] sm:$0xff] }
 0x447   : > { %v3700_v23 = vpop.f32.mrb[242].mxu0  ;;  %v3906_v29 = vadd.f32 %v10732_v40, %v17357_v48  ;;  %v3900_v14 = vpop.f32.mrb[181].mxu1  ;;  %4437 = vmatmul.mubr.f32.gmra.mrb[222].mxu1 %v13433_v7  ;;  %v11940_v49 = vpack.c.bf16 %v9522_v38, %v9521_v47  ;;  %v13439_v7 = vld [vmem:[#allocation2 + $0x1a8] sm:$0xff] }
 0x448   : > { %v3702_v27 = vpop.f32.mrb[243].mxu0  ;;  %v3901_v32 = vadd.f32 %v3900_v14, %v17340_v60  ;;  %4441 = vmatprep.mubr.f32.mxu1 %v13434_v18  ;;  %11938 = vmatpush1.bf16.msra.mxu0 %v11937_v22 }
 0x449   : > { %v17431_v48 = vadd.f32 %v3906_v29, %v17150_v55  ;;  %11939 = vmatprep.subr.bf16.mxu0 %v21127_v6 }
 0x44a   : > { %v10735_v4 = vpop.f32.mrb[182].mxu1  ;;  %v17434_v25 = vadd.f32 %v3901_v32, %v17144_v16  ;;  %v13440_v32 = vld [vmem:[#allocation2 + $0x1b1] sm:$0xff] }
 0x44b   : > { %v3705_v60 = vpop.f32.mrb[244].mxu0  ;;  %v3916_v61 = vadd.f32 %v10735_v4, %v3690_v15  ;;  %v3910_v2 = vpop.f32.mrb[183].mxu1  ;;  %4442 = vmatmul.mubr.f32.gmra.mrb[224].mxu1 %v13435_v1  ;;  %v13442_v1 = vld [vmem:[#allocation2 + $0x1c9] sm:$0xff] }
 0x44c   : > { %v3707_v56 = vpop.f32.mrb[245].mxu0  ;;  %v3911_v33 = vadd.f32 %v3910_v2, %v17374_v0  ;;  %4446 = vmatprep.mubr.f32.mxu1 %v13436_v31  ;;  %11941 = vmatpush1.bf16.msra.mxu0 %v11940_v49  ;;  %v13438_v0 = vld [vmem:[#allocation2 + $0x1a9] sm:$0xff] }
 0x44d   : > { %v17439_v55 = vadd.f32 %v3916_v61, %v17162_v17  ;;  %11942 = vmatprep.subr.bf16.mxu0 %v21127_v6 }
 0x44e   : > { %v10738_v30 = vpop.f32.mrb[184].mxu1  ;;  %v17442_v16 = vadd.f32 %v3911_v33, %v17156_v35 }
 0x44f   : > { %v3710_v15 = vpop.f32.mrb[246].mxu0  ;;  %v3926_v39 = vadd.f32 %v10738_v30, %v3700_v23  ;;  %v3920_v45 = vpop.f32.mrb[185].mxu1  ;;  %4447 = vmatmul.mubr.f32.gmra.mrb[226].mxu1 %v13437_v59  ;;  %v13445_v59 = vld [vmem:[#allocation2 + $0x1d0] sm:$0xff] }
 0x450   : > { %v3712_v5 = vpop.f32.mrb[247].mxu0  ;;  %v3921_v11 = vadd.f32 %v3920_v45, %v3695_v10  ;;  %4451 = vmatprep.mubr.f32.mxu1 %v13438_v0  ;;  %v13446_v0 = vld [vmem:[#allocation2 + $0x1e9] sm:$0xff] }
 0x451   : > { %v17446_v40 = vadd.f32 %v3926_v39, %v17174_v9 }
 0x452   : > { %v10741_v17 = vpop.f32.mrb[186].mxu1  ;;  %v17449_v29 = vadd.f32 %v3921_v11, %v17168_v20  ;;  %v13441_v20 = vld [vmem:[#allocation2 + $0x1b0] sm:$0xff] }
 0x453   : > { %21274 = vst [vmem:[#allocation15_spill] sm:$0xff] %v17446_v40  ;;  %v3715_v35 = vpop.f32.mrb[248].mxu0  ;;  %v3936_v14 = vadd.f32 %v10741_v17, %v3710_v15  ;;  %v3930_v23 = vpop.f32.mrb[187].mxu1  ;;  %4452 = vmatmul.mubr.f32.gmra.mrb[228].mxu1 %v13439_v7  ;;  %v13444_v15 = vld [vmem:[#allocation2 + $0x1d1] sm:$0xff]  ;;  %v9524_v17 = vld [vmem:[%s21008_s5 + $0x368] sm:$0xff] }
 0x454   : > { %v3717_v22 = vpop.f32.mrb[249].mxu0  ;;  %v3931_v27 = vadd.f32 %v3930_v23, %v3705_v60  ;;  %4456 = vmatprep.mubr.f32.mxu1 %v13440_v32  ;;  %v9570_v32 = vld [vmem:[%s21008_s5 + $0x4d8] sm:$0xff] }
 0x455   : > { %v17452_v10 = vadd.f32 %v3936_v14, %v17186_v34  ;;  %v13447_v22 = vld [vmem:[#allocation2 + $0x1e8] sm:$0xff]  ;;  %v9558_v40 = vld [vmem:[%s21008_s5 + $0x478] sm:$0xff] }
 0x456   : > { %v10744_v18 = vpop.f32.mrb[188].mxu1  ;;  %v17455_v9 = vadd.f32 %v3931_v27, %v17180_v13  ;;  %v13443_v13 = vld [vmem:[#allocation2 + $0x1c8] sm:$0xff]  ;;  %v9569_v27 = vld [vmem:[%s21008_s5 + $0x4d0] sm:$0xff] }
 0x457   : > { %21275 = vst [vmem:[#allocation21_spill] sm:$0xff] %v17452_v10  ;;  %v3720_v47 = vpop.f32.mrb[250].mxu0  ;;  %v3940_v38 = vpop.f32.mrb[189].mxu1  ;;  %4457 = vmatmul.mubr.f32.gmra.mrb[230].mxu1 %v13441_v20  ;;  %v12016_v20 = vpack.c.bf16 %v9570_v32, %v9569_v27  ;;  %v13454_v32 = vld [vmem:[#allocation2 + $0x229] sm:$0xff]  ;;  %v9543_v10 = vld [vmem:[%s21008_s5 + $0x400] sm:$0xff] }
 0x458   : > { %21276 = vst [vmem:[#allocation27_spill] sm:$0xff] %v17455_v9  ;;  %v3946_v4 = vadd.f32 %v10744_v18, %v3720_v47  ;;  %v3722_v61 = vpop.f32.mrb[251].mxu0  ;;  %v3941_v2 = vadd.f32 %v3940_v38, %v3715_v35  ;;  %4461 = vmatprep.mubr.f32.mxu1 %v13442_v1  ;;  %v13448_v47 = vld [vmem:[#allocation2 + $0x1f1] sm:$0xff]  ;;  %v9571_v1 = vld [vmem:[%s21008_s5 + $0x4e0] sm:$0xff] }
 0x459   : > { %v9526_v38 = vld [vmem:[%s21008_s5 + $0x378] sm:$0xff] }
 0x45a   : > { %v10747_v49 = vpop.f32.mrb[190].mxu1  ;;  %v17458_v60 = vadd.f32 %v3941_v2, %v17192_v28  ;;  %v17461_v34 = vadd.f32 %v3946_v4, %v17198_v57  ;;  %v9567_v28 = vld [vmem:[%s21008_s5 + $0x4c0] sm:$0xff]  ;;  %v9568_v57 = vld [vmem:[%s21008_s5 + $0x4c8] sm:$0xff]  ;;  %v13449_v2 = vld [vmem:[#allocation2 + $0x1f0] sm:$0xff] }
 0x45b   : > { %v3725_v56 = vpop.f32.mrb[252].mxu0  ;;  %v3950_v33 = vpop.f32.mrb[191].mxu1  ;;  %4462 = vmatmul.mubr.f32.gmra.mrb[232].mxu1 %v13443_v13  ;;  %v12012_v35 = vpack.c.bf16 %v9568_v57, %v9567_v28  ;;  %v5005_v13 = vld [vmem:[#allocation3 + $0x27] sm:$0xff]  ;;  %v9574_v28 = vld [vmem:[%s21008_s5 + $0x4f8] sm:$0xff] }
 0x45c   : > { %21277 = vst [vmem:[#allocation23_spill] sm:$0xff] %v17458_v60  ;;  %21278 = vst [vmem:[#allocation26_spill] sm:$0xff] %v17461_v34  ;;  %v3727_v31 = vpop.f32.mrb[253].mxu0  ;;  %v3951_v30 = vadd.f32 %v3950_v33, %v3725_v56  ;;  %4466 = vmatprep.mubr.f32.mxu1 %v13444_v15  ;;  %v13450_v33 = vld [vmem:[#allocation2 + $0x209] sm:$0xff]  ;;  %5388 = vmatprep.mubr.f32.mxu0 %v5005_v13 }
 0x45d   : > { %12013 = vmatprep.subr.bf16.mxu1 %v12012_v35  ;;  %v9541_v60 = vld [vmem:[%s21008_s5 + $0x3f0] sm:$0xff] }
 0x45e   : > { %v17464_v39 = vadd.f32 %v3951_v30, %v17213_v37  ;;  %v9523_v37 = vld [vmem:[%s21008_s5 + $0x360] sm:$0xff]  ;;  %12015 = vmatpush3.bf16.msra.mxu1 %v12012_v35  ;;  %v13453_v35 = vld [vmem:[#allocation2 + $0x210] sm:$0xff] }
 0x45f   : > { %v3730_v45 = vpop.f32.mrb[254].mxu0  ;;  %4467 = vmatmul.mubr.f32.gmra.mrb[234].mxu1 %v13445_v59  ;;  %v11943_v14 = vpack.c.bf16 %v9524_v17, %v9523_v37  ;;  %12017 = vmatprep.subr.bf16.mxu1 %v12016_v20  ;;  %v4965_v30 = vld [vmem:[#allocation3 + $0x26] sm:$0xff]  ;;  %v9573_v59 = vld [vmem:[%s21008_s5 + $0x4f0] sm:$0xff] }
 0x460   : > { %21279 = vst [vmem:[#allocation14_spill] sm:$0xff] %v17464_v39  ;;  %v3956_v5 = vadd.f32 %v10747_v49, %v3730_v45  ;;  %v3732_v11 = vpop.f32.mrb[255].mxu0  ;;  %4471 = vmatprep.mubr.f32.mxu1 %v13446_v0  ;;  %v9572_v49 = vld [vmem:[%s21008_s5 + $0x4e8] sm:$0xff]  ;;  %v12024_v0 = vpack.c.bf16 %v9574_v28, %v9573_v59  ;;  %v13459_v59 = vld [vmem:[#allocation2] sm:$0xff] }
 0x461   : > { %11944 = vmatpush1.bf16.msra.mxu0 %v11943_v14  ;;  %v12020_v31 = vpack.c.bf16 %v9572_v49, %v9571_v1  ;;  %v13451_v45 = vld [vmem:[#allocation2 + $0x208] sm:$0xff]  ;;  %v9527_v14 = vld [vmem:[%s21008_s5 + $0x380] sm:$0xff]  ;;  %v13457_v1 = vld [vmem:[#allocation2 + $0x230] sm:$0xff] }
 0x462   : > { %v17479_v23 = vadd.f32 %v3956_v5, %v17229_v19  ;;  %v9525_v19 = vld [vmem:[%s21008_s5 + $0x370] sm:$0xff]  ;;  %11945 = vmatprep.subr.bf16.mxu0 %v21127_v6  ;;  %12019 = vmatpush3.bf16.msra.mxu1 %v12016_v20 }
 0x463   : > { %v17481_v7 = vpop.f32.mrb[0].mxu0  ;;  %4472 = vmatmul.mubr.f32.gmra.mrb[236].mxu1 %v13447_v22  ;;  %v11946_v4 = vpack.c.bf16 %v9526_v38, %v9525_v19  ;;  %12021 = vmatprep.subr.bf16.mxu1 %v12020_v31  ;;  %v13452_v5 = vld [vmem:[#allocation2 + $0x211] sm:$0xff]  ;;  %v9528_v22 = vld [vmem:[%s21008_s5 + $0x388] sm:$0xff] }
 0x464   : > { %21280 = vst [vmem:[#allocation29_spill] sm:$0xff] %v17479_v23  ;;  %v17489_v18 = vpop.f32.mrb[1].mxu0  ;;  %4476 = vmatprep.mubr.f32.mxu1 %v13448_v47  ;;  %v5006_v11 = vld [vmem:[#allocation3 + $0x2f] sm:$0xff]  ;;  %v11949_v47 = vpack.c.bf16 %v9528_v22, %v9527_v14  ;;  %v9538_v23 = vld [vmem:[%s21008_s5 + $0x3d8] sm:$0xff] }
 0x465   : > { %11947 = vmatpush1.bf16.msra.mxu0 %v11946_v4  ;;  %v4966_v37 = vld [vmem:[#allocation3 + $0x2e] sm:$0xff] }
 0x466   : > { %11948 = vmatprep.subr.bf16.mxu0 %v21127_v6  ;;  %12023 = vmatpush3.bf16.msra.mxu1 %v12020_v31  ;;  %v13455_v38 = vld [vmem:[#allocation2 + $0x228] sm:$0xff]  ;;  %v13456_v4 = vld [vmem:[#allocation2 + $0x231] sm:$0xff] }
 0x467   : > { %v17498_v61 = vpop.f32.mrb[2].mxu0  ;;  %4477 = vmatmul.mubr.f32.gmra.mrb[238].mxu1 %v13449_v2  ;;  %12025 = vmatprep.subr.bf16.mxu1 %v12024_v0  ;;  %v9529_v49 = vld [vmem:[%s21008_s5 + $0x390] sm:$0xff] }
 0x468   : > { %v17506_v56 = vpop.f32.mrb[3].mxu0  ;;  %4481 = vmatprep.mubr.f32.mxu1 %v13450_v33  ;;  %5389 = vmatmul.mubr.f32.vlgmr.msra.gmra.mrb[32].mxu0 %v4965_v30  ;;  %v9530_v33 = vld [vmem:[%s21008_s5 + $0x398] sm:$0xff]  ;;  %v13458_v31 = vld [vmem:[#allocation2 + $0x249] sm:$0xff] }
 0x469   : > { %5393 = vmatprep.mubr.f32.mxu0 %v5006_v11  ;;  %11950 = vmatpush1.bf16.msra.mxu0 %v11949_v47  ;;  %v11952_v30 = vpack.c.bf16 %v9530_v33, %v9529_v49  ;;  %v862_v11 = vld [vmem:[#allocation2 + $0x269] sm:$0xff]  ;;  %v9534_v33 = vld [vmem:[%s21008_s5 + $0x3b8] sm:$0xff] }
 0x46a   : > { %12027 = vmatpush3.bf16.msra.mxu1 %v12024_v0  ;;  %11951 = vmatprep.subr.bf16.mxu0 %v21127_v6  ;;  %v9533_v49 = vld [vmem:[%s21008_s5 + $0x3b0] sm:$0xff] }
 0x46b   : > { %v17509_v15 = vpop.f32.mrb[4].mxu0  ;;  %4482 = vmatmul.mubr.f32.gmra.mrb[240].mxu1 %v13451_v45  ;;  %12028 = vmatprep.subr.bf16.mxu1 %v21127_v6 }
 0x46c   : > { %v17517_v57 = vpop.f32.mrb[5].mxu0  ;;  %4486 = vmatprep.mubr.f32.mxu1 %v13452_v5  ;;  %5394 = vmatmul.mubr.f32.gmra.mrb[34].mxu0 %v4966_v37  ;;  %v13460_v5 = vld [vmem:[#allocation2 + $0x251] sm:$0xff]  ;;  %v9531_v37 = vld [vmem:[%s21008_s5 + $0x3a0] sm:$0xff] }
 0x46d   : > { %11953 = vmatpush1.bf16.msra.mxu0 %v11952_v30  ;;  %v5126_v30 = vld [vmem:[#allocation3 + $0x32] sm:$0xff] }
 0x46e   : > { %11954 = vmatprep.subr.bf16.mxu0 %v21127_v6 }
 0x46f   : > { %v17519_v17 = vpop.f32.mrb[6].mxu0  ;;  %4487 = vmatmul.mubr.f32.gmra.mrb[242].mxu1 %v13453_v35  ;;  %v9532_v35 = vld [vmem:[%s21008_s5 + $0x3a8] sm:$0xff] }
 0x470   : > { %v17527_v27 = vpop.f32.mrb[7].mxu0  ;;  %4491 = vmatprep.mubr.f32.mxu1 %v13454_v32  ;;  %v11955_v22 = vpack.c.bf16 %v9532_v35, %v9531_v37  ;;  %v863_v32 = vld [vmem:[#allocation2 + $0x271] sm:$0xff]  ;;  %v9535_v35 = vld [vmem:[%s21008_s5 + $0x3c0] sm:$0xff] }
 0x472   : > { %11956 = vmatpush1.bf16.msra.mxu0 %v11955_v22  ;;  %v9536_v22 = vld [vmem:[%s21008_s5 + $0x3c8] sm:$0xff] }
 0x473   : > { %v17530_v19 = vpop.f32.mrb[8].mxu0  ;;  %4492 = vmatmul.mubr.f32.gmra.mrb[244].mxu1 %v13455_v38  ;;  %11957 = vmatprep.subr.bf16.mxu0 %v21127_v6 }
 0x474   : > { %v17533_v20 = vpop.f32.mrb[9].mxu0  ;;  %4496 = vmatprep.mubr.f32.mxu1 %v13456_v4  ;;  %v5125_v4 = vld [vmem:[#allocation3 + $0x2a] sm:$0xff] }
 0x477   : > { %v17535_v2 = vpop.f32.mrb[10].mxu0  ;;  %4497 = vmatmul.mubr.f32.gmra.mrb[246].mxu1 %v13457_v1 }
 0x478   : > { %v17543_v13 = vpop.f32.mrb[11].mxu0  ;;  %4501 = vmatprep.mubr.f32.mxu1 %v13458_v31 }
 0x47b   : > { %v17545_v45 = vpop.f32.mrb[12].mxu0  ;;  %4502 = vmatmul.mubr.f32.gmra.mrb[248].mxu1 %v13459_v59 }
 0x47c   : > { %v17548_v28 = vpop.f32.mrb[13].mxu0  ;;  %4506 = vmatprep.mubr.f32.mxu1 %v13460_v5  ;;  %v11958_v5 = vpack.c.bf16 %v9534_v33, %v9533_v49 }
 0x47e   : > { %11959 = vmatpush1.bf16.msra.mxu0 %v11958_v5  ;;  %v9537_v5 = vld [vmem:[%s21008_s5 + $0x3d0] sm:$0xff] }
 0x47f   : > { %v17550_v0 = vpop.f32.mrb[14].mxu0  ;;  %4507 = vmatmul.mubr.f32.gmra.mrb[250].mxu1 %v13459_v59  ;;  %11960 = vmatprep.subr.bf16.mxu0 %v21127_v6 }
 0x480   : > { %v17558_v14 = vpop.f32.mrb[15].mxu0  ;;  %4511 = vmatprep.mubr.f32.mxu1 %v862_v11 }
 0x483   : > { %v17560_v47 = vpop.f32.mrb[16].mxu0  ;;  %4512 = vmatmul.mubr.f32.gmra.mrb[252].mxu1 %v13459_v59 }
 0x484   : > { %v17563_v38 = vpop.f32.mrb[17].mxu0  ;;  %4516 = vmatprep.mubr.f32.mxu1 %v863_v32 }
 0x487   : > { %v17565_v1 = vpop.f32.mrb[18].mxu0  ;;  %4517 = vmatmul.mubr.f32.gmra.mrb[254].mxu1 %v13459_v59 }
 0x488   : > { %v17573_v31 = vpop.f32.mrb[19].mxu0  ;;  %10860 = vmatprep.mubr.f32.mxu1 %v5125_v4  ;;  %v11961_v4 = vpack.c.bf16 %v9536_v22, %v9535_v35  ;;  %v11964_v35 = vpack.c.bf16 %v9538_v23, %v9537_v5  ;;  %v9539_v22 = vld [vmem:[%s21008_s5 + $0x3e0] sm:$0xff]  ;;  %v9542_v23 = vld [vmem:[%s21008_s5 + $0x3f8] sm:$0xff] }
 0x489   : > { %v11970_v5 = vpack.c.bf16 %v9542_v23, %v9541_v60  ;;  %v5166_v60 = vld [vmem:[%s21008_s5 + $0x18] sm:$0xff] }
 0x48a   : > { %11962 = vmatpush1.bf16.msra.mxu0 %v11961_v4  ;;  %v9540_v4 = vld [vmem:[%s21008_s5 + $0x3e8] sm:$0xff] }
 0x48b   : > { %v17575_v11 = vpop.f32.mrb[20].mxu0  ;;  %10861 = vmatmul.mubr.f32.vlgmr.msra.gmra.mrb[0].mxu1 %v5126_v30  ;;  %11963 = vmatprep.subr.bf16.mxu0 %v21127_v6  ;;  %v11967_v34 = vpack.c.bf16 %v9540_v4, %v9539_v22  ;;  %v5164_v22 = vld [vmem:[%s21008_s5 + $0x8] sm:$0xff]  ;;  %v5165_v4 = vld [vmem:[%s21008_s5 + $0x10] sm:$0xff] }
 0x48c   : > { %v17578_v59 = vpop.f32.mrb[21].mxu0  ;;  %v12032_v23 = vpack.c.bf16 %v5166_v60, %v5165_v4  ;;  %v5170_v60 = vld [vmem:[%s21008_s5 + $0x38] sm:$0xff] }
 0x48e   : > { %11965 = vmatpush1.bf16.msra.mxu0 %v11964_v35  ;;  %v5163_v35 = vld [vmem:[%s21008_s5] sm:$0xff] }
 0x48f   : > { %v17580_v37 = vpop.f32.mrb[22].mxu0  ;;  %11966 = vmatprep.subr.bf16.mxu0 %v21127_v6 }
 0x490   : > { %v17588_v32 = vpop.f32.mrb[23].mxu0 }
 0x492   : > { %11968 = vmatpush1.bf16.msra.mxu0 %v11967_v34  ;;  %v12029_v34 = vpack.c.bf16 %v5164_v22, %v5163_v35  ;;  %v5167_v22 = vld [vmem:[%s21008_s5 + $0x20] sm:$0xff] }
 0x493   : > { %v17590_v49 = vpop.f32.mrb[24].mxu0  ;;  %11969 = vmatprep.subr.bf16.mxu0 %v21127_v6 }
 0x494   : > { %v17593_v33 = vpop.f32.mrb[25].mxu0  ;;  %12030 = vmatpush1.bf16.msra.mxu1 %v12029_v34  ;;  %v5168_v34 = vld [vmem:[%s21008_s5 + $0x28] sm:$0xff] }
 0x495   : > { %12031 = vmatprep.subr.bf16.mxu1 %v21127_v6  ;;  %v12035_v4 = vpack.c.bf16 %v5168_v34, %v5167_v22  ;;  %v5171_v34 = vld [vmem:[%s21008_s5 + $0x40] sm:$0xff] }
 0x496   : > { %11971 = vmatpush1.bf16.msra.mxu0 %v11970_v5  ;;  %v9544_v5 = vld [vmem:[%s21008_s5 + $0x408] sm:$0xff] }
 0x497   : > { %v17595_v30 = vpop.f32.mrb[26].mxu0  ;;  %11972 = vmatprep.subr.bf16.mxu0 %v21127_v6  ;;  %v11973_v35 = vpack.c.bf16 %v9544_v5, %v9543_v10  ;;  %v5169_v10 = vld [vmem:[%s21008_s5 + $0x30] sm:$0xff] }
 0x498   : > { %21281 = vst [vmem:[#allocation16_spill] sm:$0xff] %v17595_v30  ;;  %v17603_v39 = vpop.f32.mrb[27].mxu0  ;;  %12033 = vmatpush1.bf16.msra.mxu1 %v12032_v23  ;;  %v12038_v23 = vpack.c.bf16 %v5170_v60, %v5169_v10  ;;  %v9545_v5 = vld [vmem:[%s21008_s5 + $0x410] sm:$0xff] }
 0x499   : > { %21282 = vst [vmem:[#allocation28_spill] sm:$0xff] %v17603_v39  ;;  %12034 = vmatprep.subr.bf16.mxu1 %v21127_v6  ;;  %v5173_v60 = vld [vmem:[%s21008_s5 + $0x50] sm:$0xff] }
 0x49a   : > { %11974 = vmatpush1.bf16.msra.mxu0 %v11973_v35  ;;  %v9546_v35 = vld [vmem:[%s21008_s5 + $0x418] sm:$0xff] }
 0x49b   : > { %11975 = vmatprep.subr.bf16.mxu0 %v21127_v6  ;;  %v11976_v22 = vpack.c.bf16 %v9546_v35, %v9545_v5  ;;  %v9547_v35 = vld [vmem:[%s21008_s5 + $0x420] sm:$0xff] }
 0x49c   : > { %12036 = vmatpush1.bf16.msra.mxu1 %v12035_v4  ;;  %v5172_v4 = vld [vmem:[%s21008_s5 + $0x48] sm:$0xff] }
 0x49d   : > { %12037 = vmatprep.subr.bf16.mxu1 %v21127_v6  ;;  %v12041_v10 = vpack.c.bf16 %v5172_v4, %v5171_v34  ;;  %v5175_v4 = vld [vmem:[%s21008_s5 + $0x60] sm:$0xff] }
 0x49e   : > { %11977 = vmatpush1.bf16.msra.mxu0 %v11976_v22  ;;  %v9548_v22 = vld [vmem:[%s21008_s5 + $0x428] sm:$0xff] }
 0x49f   : > { %11978 = vmatprep.subr.bf16.mxu0 %v21127_v6  ;;  %v11979_v34 = vpack.c.bf16 %v9548_v22, %v9547_v35  ;;  %v9549_v22 = vld [vmem:[%s21008_s5 + $0x430] sm:$0xff] }
 0x4a0   : > { %12039 = vmatpush1.bf16.msra.mxu1 %v12038_v23  ;;  %v5174_v23 = vld [vmem:[%s21008_s5 + $0x58] sm:$0xff] }
 0x4a1   : > { %12040 = vmatprep.subr.bf16.mxu1 %v21127_v6  ;;  %v12044_v5 = vpack.c.bf16 %v5174_v23, %v5173_v60  ;;  %v5177_v23 = vld [vmem:[%s21008_s5 + $0x70] sm:$0xff] }
 0x4a2   : > { %11980 = vmatpush1.bf16.msra.mxu0 %v11979_v34  ;;  %v9550_v34 = vld [vmem:[%s21008_s5 + $0x438] sm:$0xff] }
 0x4a3   : > { %11981 = vmatprep.subr.bf16.mxu0 %v21127_v6 }
 0x4a4   : > { %12042 = vmatpush1.bf16.msra.mxu1 %v12041_v10  ;;  %v5176_v10 = vld [vmem:[%s21008_s5 + $0x68] sm:$0xff] }
 0x4a5   : > { %12043 = vmatprep.subr.bf16.mxu1 %v21127_v6  ;;  %v12047_v60 = vpack.c.bf16 %v5176_v10, %v5175_v4  ;;  %v11982_v4 = vpack.c.bf16 %v9550_v34, %v9549_v22  ;;  %v5179_v10 = vld [vmem:[%s21008_s5 + $0x80] sm:$0xff]  ;;  %v17717_v34 = vpop.f32.mrb[28].mxu0 }
 0x4a6   : > { %21283 = vst [vmem:[#allocation17_spill] sm:$0xff] %v17717_v34 }
 0x4a7   : > { %11983 = vmatpush1.bf16.msra.mxu0 %v11982_v4  ;;  %v9551_v4 = vld [vmem:[%s21008_s5 + $0x440] sm:$0xff] }
 0x4a8   : > { %12045 = vmatpush1.bf16.msra.mxu1 %v12044_v5  ;;  %v5178_v5 = vld [vmem:[%s21008_s5 + $0x78] sm:$0xff]  ;;  %11984 = vmatprep.subr.bf16.mxu0 %v21127_v6 }
 0x4a9   : > { %12046 = vmatprep.subr.bf16.mxu1 %v21127_v6  ;;  %v12050_v35 = vpack.c.bf16 %v5178_v5, %v5177_v23  ;;  %v5181_v5 = vld [vmem:[%s21008_s5 + $0x90] sm:$0xff] }
 0x4ac   : > { %12048 = vmatpush1.bf16.msra.mxu1 %v12047_v60  ;;  %v5180_v60 = vld [vmem:[%s21008_s5 + $0x88] sm:$0xff] }
 0x4ad   : > { %12049 = vmatprep.subr.bf16.mxu1 %v21127_v6  ;;  %v12053_v23 = vpack.c.bf16 %v5180_v60, %v5179_v10  ;;  %v9552_v10 = vld [vmem:[%s21008_s5 + $0x448] sm:$0xff]  ;;  %v17725_v60 = vpop.f32.mrb[29].mxu0 }
 0x4ae   : > { %21284 = vst [vmem:[#allocation31_spill] sm:$0xff] %v17725_v60  ;;  %v9553_v60 = vld [vmem:[%s21008_s5 + $0x450] sm:$0xff] }
 0x4b0   : > { %12051 = vmatpush1.bf16.msra.mxu1 %v12050_v35  ;;  %v5182_v35 = vld [vmem:[%s21008_s5 + $0x98] sm:$0xff] }
 0x4b1   : > { %12052 = vmatprep.subr.bf16.mxu1 %v21127_v6  ;;  %v12056_v22 = vpack.c.bf16 %v5182_v35, %v5181_v5  ;;  %v5183_v5 = vld [vmem:[%s21008_s5 + $0xa0] sm:$0xff]  ;;  %v5184_v35 = vld [vmem:[%s21008_s5 + $0xa8] sm:$0xff] }
 0x4b2   : > { %v12059_v34 = vpack.c.bf16 %v5184_v35, %v5183_v5 }
 0x4b4   : > { %12054 = vmatpush1.bf16.msra.mxu1 %v12053_v23  ;;  %v11985_v23 = vpack.c.bf16 %v9552_v10, %v9551_v4  ;;  %v5186_v4 = vld [vmem:[%s21008_s5 + $0xb8] sm:$0xff] }
 0x4b5   : > { %12055 = vmatprep.subr.bf16.mxu1 %v21127_v6 }
 0x4b6   : > { %11986 = vmatpush1.bf16.msra.mxu0 %v11985_v23  ;;  %v9554_v23 = vld [vmem:[%s21008_s5 + $0x458] sm:$0xff] }
 0x4b7   : > { %11987 = vmatprep.subr.bf16.mxu0 %v21127_v6  ;;  %v11988_v5 = vpack.c.bf16 %v9554_v23, %v9553_v60  ;;  %v5189_v60 = vld [vmem:[%s21008_s5 + $0xd0] sm:$0xff] }
 0x4b8   : > { %12057 = vmatpush1.bf16.msra.mxu1 %v12056_v22  ;;  %v5185_v22 = vld [vmem:[%s21008_s5 + $0xb0] sm:$0xff] }
 0x4b9   : > { %12058 = vmatprep.subr.bf16.mxu1 %v21127_v6  ;;  %v12062_v10 = vpack.c.bf16 %v5186_v4, %v5185_v22  ;;  %v5187_v22 = vld [vmem:[%s21008_s5 + $0xc0] sm:$0xff]  ;;  %v5188_v4 = vld [vmem:[%s21008_s5 + $0xc8] sm:$0xff] }
 0x4ba   : > { %v12065_v30 = vpack.c.bf16 %v5188_v4, %v5187_v22  ;;  %11989 = vmatpush1.bf16.msra.mxu0 %v11988_v5  ;;  %v9555_v5 = vld [vmem:[%s21008_s5 + $0x460] sm:$0xff] }
 0x4bb   : > { %11990 = vmatprep.subr.bf16.mxu0 %v21127_v6  ;;  %v17777_v22 = vld [vmem:[%s21007_s4] ss:$0 sm:$0xff] }
 0x4bc   : > { %12060 = vmatpush1.bf16.msra.mxu1 %v12059_v34 }
 0x4bd   : > { %12061 = vmatprep.subr.bf16.mxu1 %v21127_v6 }
 0x4c0   : > { %12063 = vmatpush1.bf16.msra.mxu1 %v12062_v10  ;;  %v5190_v10 = vld [vmem:[%s21008_s5 + $0xd8] sm:$0xff] }
 0x4c1   : > { %12064 = vmatprep.subr.bf16.mxu1 %v21127_v6  ;;  %v12068_v23 = vpack.c.bf16 %v5190_v10, %v5189_v60 }
 0x4c4   : > { %12066 = vmatpush1.bf16.msra.mxu1 %v12065_v30  ;;  %v9556_v30 = vld [vmem:[%s21008_s5 + $0x468] sm:$0xff] }
 0x4c5   : > { %12067 = vmatprep.subr.bf16.mxu1 %v21127_v6  ;;  %v11991_v4 = vpack.c.bf16 %v9556_v30, %v9555_v5  ;;  %v9557_v30 = vld [vmem:[%s21008_s5 + $0x470] sm:$0xff] }
 0x4c7   : > { %11992 = vmatpush1.bf16.msra.mxu0 %v11991_v4 }
 0x4c8   : > { %12069 = vmatpush1.bf16.msra.mxu1 %v12068_v23  ;;  %11993 = vmatprep.subr.bf16.mxu0 %v21127_v6 }
 0x4c9   : > { %12070 = vmatprep.subr.bf16.mxu1 %v21127_v6 }
 0x4cd   : > { %v17748_v34 = vpop.f32.mrb[30].mxu0 }
 0x4ce   : > { %21285 = vst [vmem:[#allocation18_spill] sm:$0xff] %v17748_v34  ;;  %v17750_v35 = vpop.f32.mrb[31].mxu0 }
 0x4cf   : > { %21286 = vst [vmem:[#allocation30_spill] sm:$0xff] %v17750_v35 }
 0x4de   : > { %v4363_v34 = vpop.f32.mrb[192].mxu1 }
 0x4df   : > { %v4589_v35 = vadd.f32 %v17489_v18, %v4363_v34  ;;  %v4365_v9 = vpop.f32.mrb[193].mxu1  ;;  %v5192_v18 = vld [vmem:[%s21008_s5 + $0xe8] sm:$0xff] }
 0x4e0   : > { %v5191_v9 = vld [vmem:[%s21008_s5 + $0xe0] sm:$0xff] }
 0x4e1   : > { %v4747_v34 = vadd.f32 %v4589_v35, %v17258_v21  ;;  %v12071_v60 = vpack.c.bf16 %v5192_v18, %v5191_v9  ;;  %v11994_v21 = vpack.c.bf16 %v9558_v40, %v9557_v30  ;;  %v5193_v35 = vld [vmem:[%s21008_s5 + $0xf0] sm:$0xff]  ;;  %v5228_v40 = vld [vmem:[%s21008_s5 + $0x208] sm:$0xff] }
 0x4e2   : > { %v4368_v10 = vpop.f32.mrb[194].mxu1 }
 0x4e3   : > { %v4786_v23 = vadd.f32 %v17777_v22, %v4747_v34  ;;  %v4594_v39 = vadd.f32 %v17481_v7, %v4368_v10  ;;  %v4370_v5 = vpop.f32.mrb[195].mxu1  ;;  %12072 = vmatpush1.bf16.msra.mxu1 %v12071_v60  ;;  %v5194_v7 = vld [vmem:[%s21008_s5 + $0xf8] sm:$0xff]  ;;  %v5227_v34 = vld [vmem:[%s21008_s5 + $0x200] sm:$0xff]  ;;  %11995 = vmatpush1.bf16.msra.mxu0 %v11994_v21 }
 0x4e4   : > { %12073 = vmatprep.subr.bf16.mxu1 %v21127_v6  ;;  %v12074_v18 = vpack.c.bf16 %v5194_v7, %v5193_v35  ;;  %v17810_v10 = vpack.c.bf16 %v5228_v40, %v5227_v34 }
 0x4e5   : > { %v4818_v4 = vmax.f32 %v4786_v23, 0.0  ;;  %v4748_v9 = vadd.f32 %v4594_v39, %v17252_v43 }
 0x4e6   : > { %v4373_v60 = vpop.f32.mrb[196].mxu1  ;;  %12125 = vmatprep.subr.bf16.mxu0 %v17810_v10 }
 0x4e7   : > { %4931 = vst [vmem:[#allocation3 + $0x48] sm:$0xff] %v4818_v4  ;;  %v4787_v5 = vadd.f32 %v17777_v22, %v4748_v9  ;;  %v4599_v23 = vadd.f32 %v17506_v56, %v4373_v60  ;;  %v4375_v30 = vpop.f32.mrb[197].mxu1  ;;  %12075 = vmatpush1.bf16.msra.mxu1 %v12074_v18 }
 0x4e8   : > { %12076 = vmatprep.subr.bf16.mxu1 %v21127_v6 }
 0x4e9   : > { %v4819_v43 = vmax.f32 %v4787_v5, 0.0  ;;  %v4749_v39 = vadd.f32 %v4599_v23, %v17281_v53 }
 0x4ea   : > { %v4378_v35 = vpop.f32.mrb[198].mxu1 }
 0x4eb   : > { %4932 = vst [vmem:[#allocation3 + $0x50] sm:$0xff] %v4819_v43  ;;  %v4788_v21 = vadd.f32 %v17777_v22, %v4749_v39  ;;  %v4604_v7 = vadd.f32 %v17498_v61, %v4378_v35  ;;  %v4380_v4 = vpop.f32.mrb[199].mxu1 }
 0x4ed   : > { %v4820_v34 = vmax.f32 %v4788_v21, 0.0  ;;  %v4750_v9 = vadd.f32 %v4604_v7, %v17278_v62 }
 0x4ee   : > { %v4383_v56 = vpop.f32.mrb[200].mxu1  ;;  %v17820_v40 = vld [vmem:[#allocation3 + $0x47] sm:$0xff] }
 0x4ef   : > { %v17822_v18 = vld [vmem:[#allocation3 + $0x46] sm:$0xff]  ;;  %4933 = vst [vmem:[#allocation3 + $0x68] sm:$0xff] %v4820_v34  ;;  %v4789_v60 = vadd.f32 %v17777_v22, %v4750_v9  ;;  %v4609_v53 = vadd.f32 %v17517_v57, %v4383_v56  ;;  %v4385_v5 = vpop.f32.mrb[201].mxu1  ;;  %5398 = vmatprep.mubr.f32.mxu0 %v17820_v40 }
 0x4f0   : > { %5399 = vmatmul.mubr.f32.gmra.mrb[36].mxu0 %v17822_v18 }
 0x4f1   : > { %v4821_v61 = vmax.f32 %v4789_v60, 0.0  ;;  %v4751_v23 = vadd.f32 %v4609_v53, %v17304_v12 }
 0x4f2   : > { %v4388_v30 = vpop.f32.mrb[202].mxu1  ;;  %v17829_v62 = vld [vmem:[#allocation3 + $0x4f] sm:$0xff] }
 0x4f3   : > { %v5127_v43 = vld [vmem:[#allocation3 + $0x4a] sm:$0xff]  ;;  %4934 = vst [vmem:[#allocation3 + $0x70] sm:$0xff] %v4821_v61  ;;  %v4790_v35 = vadd.f32 %v17777_v22, %v4751_v23  ;;  %v4614_v21 = vadd.f32 %v17509_v15, %v4388_v30  ;;  %v4390_v57 = vpop.f32.mrb[203].mxu1  ;;  %5403 = vmatprep.mubr.f32.mxu0 %v17829_v62  ;;  %v5128_v7 = vld [vmem:[#allocation3 + $0x52] sm:$0xff] }
 0x4f4   : > { %v17831_v39 = vld [vmem:[#allocation3 + $0x4e] sm:$0xff]  ;;  %10863 = vmatprep.mubr.f32.mxu1 %v5127_v43 }
 0x4f5   : > { %5404 = vmatmul.mubr.f32.gmra.mrb[38].mxu0 %v17831_v39  ;;  %10864 = vmatmul.mubr.f32.gmra.mrb[2].mxu1 %v5128_v7  ;;  %v4822_v12 = vmax.f32 %v4790_v35, 0.0  ;;  %v4752_v4 = vadd.f32 %v4614_v21, %v17301_v46 }
 0x4f6   : > { %v4393_v34 = vpop.f32.mrb[204].mxu1  ;;  %v17838_v9 = vld [vmem:[#allocation3 + $0x67] sm:$0xff] }
 0x4f7   : > { %v17840_v56 = vld [vmem:[#allocation3 + $0x66] sm:$0xff]  ;;  %4935 = vst [vmem:[#allocation3 + $0x88] sm:$0xff] %v4822_v12  ;;  %v4791_v60 = vadd.f32 %v17777_v22, %v4752_v4  ;;  %v4619_v15 = vadd.f32 %v17527_v27, %v4393_v34  ;;  %v4395_v53 = vpop.f32.mrb[205].mxu1  ;;  %5408 = vmatprep.mubr.f32.mxu0 %v17838_v9 }
 0x4f9   : > { %5409 = vmatmul.mubr.f32.gmra.mrb[40].mxu0 %v17840_v56  ;;  %v4823_v5 = vmax.f32 %v4791_v60, 0.0  ;;  %v4753_v61 = vadd.f32 %v4619_v15, %v17321_v58 }
 0x4fa   : > { %v4398_v23 = vpop.f32.mrb[206].mxu1  ;;  %v17847_v46 = vld [vmem:[#allocation3 + $0x6f] sm:$0xff] }
 0x4fb   : > { %v5129_v30 = vld [vmem:[#allocation3 + $0x6a] sm:$0xff]  ;;  %4936 = vst [vmem:[#allocation3 + $0x90] sm:$0xff] %v4823_v5  ;;  %v4792_v35 = vadd.f32 %v17777_v22, %v4753_v61  ;;  %v4624_v21 = vadd.f32 %v17519_v17, %v4398_v23  ;;  %v4400_v27 = vpop.f32.mrb[207].mxu1  ;;  %5413 = vmatprep.mubr.f32.mxu0 %v17847_v46  ;;  %v5130_v57 = vld [vmem:[#allocation3 + $0x72] sm:$0xff] }
 0x4fc   : > { %v17849_v43 = vld [vmem:[#allocation3 + $0x6e] sm:$0xff]  ;;  %10866 = vmatprep.mubr.f32.mxu1 %v5129_v30 }
 0x4fd   : > { %5414 = vmatmul.mubr.f32.gmra.mrb[42].mxu0 %v17849_v43  ;;  %10867 = vmatmul.mubr.f32.gmra.mrb[4].mxu1 %v5130_v57  ;;  %v4824_v58 = vmax.f32 %v4792_v35, 0.0  ;;  %v4754_v7 = vadd.f32 %v4624_v21, %v17318_v36 }
 0x4fe   : > { %v4403_v12 = vpop.f32.mrb[208].mxu1  ;;  %v17856_v4 = vld [vmem:[#allocation3 + $0x87] sm:$0xff] }
 0x4ff   : > { %v17858_v34 = vld [vmem:[#allocation3 + $0x86] sm:$0xff]  ;;  %4937 = vst [vmem:[#allocation3 + $0xa8] sm:$0xff] %v4824_v58  ;;  %v4793_v60 = vadd.f32 %v17777_v22, %v4754_v7  ;;  %v4629_v17 = vadd.f32 %v17533_v20, %v4403_v12  ;;  %v4405_v15 = vpop.f32.mrb[209].mxu1  ;;  %5418 = vmatprep.mubr.f32.mxu0 %v17856_v4 }
 0x501   : > { %5419 = vmatmul.mubr.f32.gmra.mrb[44].mxu0 %v17858_v34  ;;  %v4825_v53 = vmax.f32 %v4793_v60, 0.0  ;;  %v4755_v5 = vadd.f32 %v4629_v17, %v17338_v42 }
 0x502   : > { %v4408_v61 = vpop.f32.mrb[210].mxu1  ;;  %v17865_v36 = vld [vmem:[#allocation3 + $0x8f] sm:$0xff] }
 0x503   : > { %v5131_v23 = vld [vmem:[#allocation3 + $0x8a] sm:$0xff]  ;;  %4938 = vst [vmem:[#allocation3 + $0xb0] sm:$0xff] %v4825_v53  ;;  %v4794_v35 = vadd.f32 %v17777_v22, %v4755_v5  ;;  %v4634_v21 = vadd.f32 %v17530_v19, %v4408_v61  ;;  %v4410_v20 = vpop.f32.mrb[211].mxu1  ;;  %5423 = vmatprep.mubr.f32.mxu0 %v17865_v36  ;;  %v5132_v27 = vld [vmem:[#allocation3 + $0x92] sm:$0xff] }
 0x504   : > { %v17867_v30 = vld [vmem:[#allocation3 + $0x8e] sm:$0xff]  ;;  %10869 = vmatprep.mubr.f32.mxu1 %v5131_v23 }
 0x505   : > { %5424 = vmatmul.mubr.f32.gmra.mrb[46].mxu0 %v17867_v30  ;;  %10870 = vmatmul.mubr.f32.gmra.mrb[6].mxu1 %v5132_v27  ;;  %v4826_v42 = vmax.f32 %v4794_v35, 0.0  ;;  %v4756_v57 = vadd.f32 %v4634_v21, %v17335_v24 }
 0x506   : > { %v4413_v58 = vpop.f32.mrb[212].mxu1  ;;  %v17874_v7 = vld [vmem:[#allocation3 + $0xa7] sm:$0xff] }
 0x507   : > { %v17876_v12 = vld [vmem:[#allocation3 + $0xa6] sm:$0xff]  ;;  %4939 = vst [vmem:[#allocation3 + $0xc8] sm:$0xff] %v4826_v42  ;;  %v4795_v60 = vadd.f32 %v17777_v22, %v4756_v57  ;;  %v4639_v19 = vadd.f32 %v17543_v13, %v4413_v58  ;;  %v4415_v17 = vpop.f32.mrb[213].mxu1  ;;  %5428 = vmatprep.mubr.f32.mxu0 %v17874_v7 }
 0x509   : > { %5429 = vmatmul.mubr.f32.gmra.mrb[48].mxu0 %v17876_v12  ;;  %v4827_v15 = vmax.f32 %v4795_v60, 0.0  ;;  %v4757_v53 = vadd.f32 %v4639_v19, %v17355_v3 }
 0x50a   : > { %v4418_v5 = vpop.f32.mrb[214].mxu1  ;;  %v17883_v24 = vld [vmem:[#allocation3 + $0xaf] sm:$0xff] }
 0x50b   : > { %v5133_v61 = vld [vmem:[#allocation3 + $0xaa] sm:$0xff]  ;;  %4940 = vst [vmem:[#allocation3 + $0xd0] sm:$0xff] %v4827_v15  ;;  %v4796_v35 = vadd.f32 %v17777_v22, %v4757_v53  ;;  %v4644_v21 = vadd.f32 %v17535_v2, %v4418_v5  ;;  %v4420_v13 = vpop.f32.mrb[215].mxu1  ;;  %5433 = vmatprep.mubr.f32.mxu0 %v17883_v24  ;;  %v5134_v20 = vld [vmem:[#allocation3 + $0xb2] sm:$0xff] }
 0x50c   : > { %v17885_v23 = vld [vmem:[#allocation3 + $0xae] sm:$0xff]  ;;  %10872 = vmatprep.mubr.f32.mxu1 %v5133_v61 }
 0x50d   : > { %5434 = vmatmul.mubr.f32.gmra.mrb[50].mxu0 %v17885_v23  ;;  %10873 = vmatmul.mubr.f32.gmra.mrb[8].mxu1 %v5134_v20  ;;  %v4828_v3 = vmax.f32 %v4796_v35, 0.0  ;;  %v4758_v27 = vadd.f32 %v4644_v21, %v17352_v52 }
 0x50e   : > { %v4423_v42 = vpop.f32.mrb[216].mxu1  ;;  %v17892_v57 = vld [vmem:[#allocation3 + $0xc7] sm:$0xff] }
 0x50f   : > { %v17894_v58 = vld [vmem:[#allocation3 + $0xc6] sm:$0xff]  ;;  %4941 = vst [vmem:[#allocation3 + $0xe8] sm:$0xff] %v4828_v3  ;;  %v4797_v60 = vadd.f32 %v17777_v22, %v4758_v27  ;;  %v4649_v2 = vadd.f32 %v17548_v28, %v4423_v42  ;;  %v4425_v19 = vpop.f32.mrb[217].mxu1  ;;  %5438 = vmatprep.mubr.f32.mxu0 %v17892_v57 }
 0x511   : > { %5439 = vmatmul.mubr.f32.gmra.mrb[52].mxu0 %v17894_v58  ;;  %v4829_v17 = vmax.f32 %v4797_v60, 0.0  ;;  %v4759_v15 = vadd.f32 %v4649_v2, %v17372_v50 }
 0x512   : > { %v4428_v53 = vpop.f32.mrb[218].mxu1  ;;  %v17901_v52 = vld [vmem:[#allocation3 + $0xcf] sm:$0xff] }
 0x513   : > { %v5135_v5 = vld [vmem:[#allocation3 + $0xca] sm:$0xff]  ;;  %4942 = vst [vmem:[#allocation3 + $0xf0] sm:$0xff] %v4829_v17  ;;  %v4798_v35 = vadd.f32 %v17777_v22, %v4759_v15  ;;  %v4654_v21 = vadd.f32 %v17545_v45, %v4428_v53  ;;  %v4430_v28 = vpop.f32.mrb[219].mxu1  ;;  %5443 = vmatprep.mubr.f32.mxu0 %v17901_v52  ;;  %v5136_v13 = vld [vmem:[#allocation3 + $0xd2] sm:$0xff] }
 0x514   : > { %v17903_v61 = vld [vmem:[#allocation3 + $0xce] sm:$0xff]  ;;  %10875 = vmatprep.mubr.f32.mxu1 %v5135_v5 }
 0x515   : > { %5444 = vmatmul.mubr.f32.gmra.mrb[54].mxu0 %v17903_v61  ;;  %10876 = vmatmul.mubr.f32.gmra.mrb[10].mxu1 %v5136_v13  ;;  %v4830_v50 = vmax.f32 %v4798_v35, 0.0  ;;  %v4760_v20 = vadd.f32 %v4654_v21, %v17369_v26 }
 0x516   : > { %v4433_v3 = vpop.f32.mrb[220].mxu1  ;;  %v17910_v27 = vld [vmem:[#allocation3 + $0xe7] sm:$0xff] }
 0x517   : > { %v17912_v42 = vld [vmem:[#allocation3 + $0xe6] sm:$0xff]  ;;  %4943 = vst [vmem:[#allocation3 + $0x108] sm:$0xff] %v4830_v50  ;;  %v4799_v60 = vadd.f32 %v17777_v22, %v4760_v20  ;;  %v4659_v45 = vadd.f32 %v17558_v14, %v4433_v3  ;;  %v4435_v2 = vpop.f32.mrb[221].mxu1  ;;  %5448 = vmatprep.mubr.f32.mxu0 %v17910_v27 }
 0x519   : > { %5449 = vmatmul.mubr.f32.gmra.mrb[56].mxu0 %v17912_v42  ;;  %v4831_v19 = vmax.f32 %v4799_v60, 0.0  ;;  %v4761_v17 = vadd.f32 %v4659_v45, %v17389_v54 }
 0x51a   : > { %v4438_v15 = vpop.f32.mrb[222].mxu1  ;;  %v17919_v26 = vld [vmem:[#allocation3 + $0xef] sm:$0xff] }
 0x51b   : > { %v5137_v53 = vld [vmem:[#allocation3 + $0xea] sm:$0xff]  ;;  %4944 = vst [vmem:[#allocation3 + $0x110] sm:$0xff] %v4831_v19  ;;  %v4800_v35 = vadd.f32 %v17777_v22, %v4761_v17  ;;  %v4664_v21 = vadd.f32 %v17550_v0, %v4438_v15  ;;  %v4440_v14 = vpop.f32.mrb[223].mxu1  ;;  %5453 = vmatprep.mubr.f32.mxu0 %v17919_v26  ;;  %v5138_v28 = vld [vmem:[#allocation3 + $0xf2] sm:$0xff] }
 0x51c   : > { %v17921_v5 = vld [vmem:[#allocation3 + $0xee] sm:$0xff]  ;;  %10878 = vmatprep.mubr.f32.mxu1 %v5137_v53 }
 0x51d   : > { %5454 = vmatmul.mubr.f32.gmra.mrb[58].mxu0 %v17921_v5  ;;  %10879 = vmatmul.mubr.f32.gmra.mrb[12].mxu1 %v5138_v28  ;;  %v4832_v54 = vmax.f32 %v4800_v35, 0.0  ;;  %v4762_v13 = vadd.f32 %v4664_v21, %v17386_v51 }
 0x51e   : > { %v4443_v50 = vpop.f32.mrb[224].mxu1  ;;  %v17928_v20 = vld [vmem:[#allocation3 + $0x107] sm:$0xff] }
 0x51f   : > { %v17930_v3 = vld [vmem:[#allocation3 + $0x106] sm:$0xff]  ;;  %4945 = vst [vmem:[#allocation3 + $0x128] sm:$0xff] %v4832_v54  ;;  %v4801_v60 = vadd.f32 %v17777_v22, %v4762_v13  ;;  %v4669_v0 = vadd.f32 %v17563_v38, %v4443_v50  ;;  %v4445_v45 = vpop.f32.mrb[225].mxu1  ;;  %5458 = vmatprep.mubr.f32.mxu0 %v17928_v20 }
 0x521   : > { %5459 = vmatmul.mubr.f32.gmra.mrb[60].mxu0 %v17930_v3  ;;  %v4833_v2 = vmax.f32 %v4801_v60, 0.0  ;;  %v4763_v19 = vadd.f32 %v4669_v0, %v17404_v44 }
 0x522   : > { %v4448_v17 = vpop.f32.mrb[226].mxu1  ;;  %v17937_v51 = vld [vmem:[#allocation3 + $0x10f] sm:$0xff] }
 0x523   : > { %v5139_v15 = vld [vmem:[#allocation3 + $0x10a] sm:$0xff]  ;;  %4946 = vst [vmem:[#allocation3 + $0x130] sm:$0xff] %v4833_v2  ;;  %v17942_v35 = vadd.f32 %v17777_v22, %v4763_v19  ;;  %v4674_v38 = vadd.f32 %v17560_v47, %v4448_v17  ;;  %v4450_v21 = vpop.f32.mrb[227].mxu1  ;;  %5463 = vmatprep.mubr.f32.mxu0 %v17937_v51  ;;  %v5140_v14 = vld [vmem:[#allocation3 + $0x112] sm:$0xff] }
 0x524   : > { %v17939_v53 = vld [vmem:[#allocation3 + $0x10e] sm:$0xff]  ;;  %10881 = vmatprep.mubr.f32.mxu1 %v5139_v15 }
 0x525   : > { %5464 = vmatmul.mubr.f32.gmra.mrb[62].mxu0 %v17939_v53  ;;  %10882 = vmatmul.mubr.f32.gmra.mrb[14].mxu1 %v5140_v14  ;;  %v21022_v44 = vmax.f32 %v17942_v35, 0.0  ;;  %v4764_v28 = vadd.f32 %v4674_v38, %v17401_v8 }
 0x526   : > { %v4453_v54 = vpop.f32.mrb[228].mxu1  ;;  %v17949_v13 = vld [vmem:[#allocation3 + $0x127] sm:$0xff] }
 0x527   : > { %v17951_v50 = vld [vmem:[#allocation3 + $0x126] sm:$0xff]  ;;  %4947 = vst [vmem:[#allocation3 + $0x148] sm:$0xff] %v21022_v44  ;;  %v17956_v47 = vadd.f32 %v17777_v22, %v4764_v28  ;;  %v4679_v60 = vadd.f32 %v17573_v31, %v4453_v54  ;;  %v4455_v0 = vpop.f32.mrb[229].mxu1  ;;  %5468 = vmatprep.mubr.f32.mxu0 %v17949_v13 }
 0x529   : > { %5469 = vmatmul.mubr.f32.gmra.mrb[66].mxu0 %v17951_v50  ;;  %v21020_v8 = vmax.f32 %v17956_v47, 0.0  ;;  %v4765_v45 = vadd.f32 %v4679_v60, %v17419_v41 }
 0x52a   : > { %v4458_v2 = vpop.f32.mrb[230].mxu1  ;;  %v17963_v19 = vld [vmem:[#allocation3 + $0x12f] sm:$0xff] }
 0x52b   : > { %v5141_v17 = vld [vmem:[#allocation3 + $0x12a] sm:$0xff]  ;;  %4948 = vst [vmem:[#allocation3 + $0x150] sm:$0xff] %v21020_v8  ;;  %v17970_v31 = vadd.f32 %v17777_v22, %v4765_v45  ;;  %v4684_v38 = vadd.f32 %v17565_v1, %v4458_v2  ;;  %v4460_v21 = vpop.f32.mrb[231].mxu1  ;;  %5473 = vmatprep.mubr.f32.mxu0 %v17963_v19  ;;  %v5142_v14 = vld [vmem:[#allocation3 + $0x132] sm:$0xff] }
 0x52c   : > { %v17965_v15 = vld [vmem:[#allocation3 + $0x12e] sm:$0xff]  ;;  %10884 = vmatprep.mubr.f32.mxu1 %v5141_v17 }
 0x52d   : > { %5474 = vmatmul.mubr.f32.gmra.mrb[70].mxu0 %v17965_v15  ;;  %10885 = vmatmul.mubr.f32.gmra.mrb[16].mxu1 %v5142_v14  ;;  %v21021_v41 = vmax.f32 %v17970_v31, 0.0  ;;  %v4766_v28 = vadd.f32 %v4684_v38, %v17416_v63 }
 0x52e   : > { %v4463_v54 = vpop.f32.mrb[232].mxu1  ;;  %v17977_v60 = vld [vmem:[#allocation3 + $0x147] sm:$0xff] }
 0x52f   : > { %v17979_v0 = vld [vmem:[#allocation3 + $0x146] sm:$0xff]  ;;  %4949 = vst [vmem:[#allocation3 + $0x168] sm:$0xff] %v21021_v41  ;;  %v17984_v1 = vadd.f32 %v17777_v22, %v4766_v28  ;;  %v4689_v45 = vadd.f32 %v17578_v59, %v4463_v54  ;;  %v4465_v2 = vpop.f32.mrb[233].mxu1  ;;  %5478 = vmatprep.mubr.f32.mxu0 %v17977_v60 }
 0x531   : > { %5479 = vmatmul.mubr.f32.gmra.mrb[74].mxu0 %v17979_v0  ;;  %v21023_v63 = vmax.f32 %v17984_v1, 0.0  ;;  %v4767_v17 = vadd.f32 %v4689_v45, %v17434_v25 }
 0x532   : > { %v4468_v38 = vpop.f32.mrb[234].mxu1  ;;  %v17991_v21 = vld [vmem:[#allocation3 + $0x14f] sm:$0xff] }
 0x533   : > { %v5143_v14 = vld [vmem:[#allocation3 + $0x14a] sm:$0xff]  ;;  %4950 = vst [vmem:[#allocation3 + $0x170] sm:$0xff] %v21023_v63  ;;  %v17998_v59 = vadd.f32 %v17777_v22, %v4767_v17  ;;  %v4694_v28 = vadd.f32 %v17575_v11, %v4468_v38  ;;  %v4470_v54 = vpop.f32.mrb[235].mxu1  ;;  %5483 = vmatprep.mubr.f32.mxu0 %v17991_v21  ;;  %v5144_v2 = vld [vmem:[#allocation3 + $0x152] sm:$0xff] }
 0x534   : > { %v17993_v8 = vld [vmem:[#allocation3 + $0x14e] sm:$0xff]  ;;  %10887 = vmatprep.mubr.f32.mxu1 %v5143_v14 }
 0x535   : > { %21287 = vst [vmem:[#allocation19_spill] sm:$0xff] %v17998_v59  ;;  %5484 = vmatmul.mubr.f32.gmra.mrb[78].mxu0 %v17993_v8  ;;  %10888 = vmatmul.mubr.f32.gmra.mrb[18].mxu1 %v5144_v2  ;;  %v21025_v25 = vmax.f32 %v17998_v59, 0.0  ;;  %v4768_v45 = vadd.f32 %v4694_v28, %v17431_v48 }
 0x536   : > { %v4473_v41 = vpop.f32.mrb[236].mxu1  ;;  %v18005_v44 = vld [vmem:[#allocation3 + $0x167] sm:$0xff] }
 0x537   : > { %v18007_v63 = vld [vmem:[#allocation3 + $0x166] sm:$0xff]  ;;  %4951 = vst [vmem:[#allocation3 + $0x188] sm:$0xff] %v21025_v25  ;;  %v18012_v11 = vadd.f32 %v17777_v22, %v4768_v45  ;;  %v4699_v17 = vadd.f32 %v17588_v32, %v4473_v41  ;;  %v4475_v38 = vpop.f32.mrb[237].mxu1  ;;  %5488 = vmatprep.mubr.f32.mxu0 %v18005_v44 }
 0x539   : > { %21288 = vst [vmem:[#allocation33_spill] sm:$0xff] %v18012_v11  ;;  %5489 = vmatmul.mubr.f32.gmra.mrb[82].mxu0 %v18007_v63  ;;  %v21027_v48 = vmax.f32 %v18012_v11, 0.0  ;;  %v4769_v14 = vadd.f32 %v4699_v17, %v17442_v16 }
 0x53a   : > { %v4478_v28 = vpop.f32.mrb[238].mxu1  ;;  %v18019_v54 = vld [vmem:[#allocation3 + $0x16f] sm:$0xff] }
 0x53b   : > { %v5145_v2 = vld [vmem:[#allocation3 + $0x16a] sm:$0xff]  ;;  %4952 = vst [vmem:[#allocation3 + $0x190] sm:$0xff] %v21027_v48  ;;  %v18026_v32 = vadd.f32 %v17777_v22, %v4769_v14  ;;  %v4704_v41 = vadd.f32 %v17580_v37, %v4478_v28  ;;  %v4480_v45 = vpop.f32.mrb[239].mxu1  ;;  %5493 = vmatprep.mubr.f32.mxu0 %v18019_v54  ;;  %v5146_v38 = vld [vmem:[#allocation3 + $0x172] sm:$0xff] }
 0x53c   : > { %v18021_v59 = vld [vmem:[#allocation3 + $0x16e] sm:$0xff]  ;;  %10890 = vmatprep.mubr.f32.mxu1 %v5145_v2 }
 0x53d   : > { %21289 = vst [vmem:[#allocation24_spill] sm:$0xff] %v18021_v59  ;;  %21290 = vst [vmem:[#allocation32_spill] sm:$0xff] %v18026_v32  ;;  %5494 = vmatmul.mubr.f32.gmra.mrb[86].mxu0 %v18021_v59  ;;  %10891 = vmatmul.mubr.f32.gmra.mrb[20].mxu1 %v5146_v38  ;;  %v21029_v16 = vmax.f32 %v18026_v32, 0.0  ;;  %v4770_v17 = vadd.f32 %v4704_v41, %v17439_v55 }
 0x53e   : > { %v4483_v25 = vpop.f32.mrb[240].mxu1  ;;  %v18033_v11 = vld [vmem:[#allocation3 + $0x187] sm:$0xff] }
 0x53f   : > { %21291 = vst [vmem:[#allocation25_spill] sm:$0xff] %v18033_v11  ;;  %v18035_v48 = vld [vmem:[#allocation3 + $0x186] sm:$0xff]  ;;  %4953 = vst [vmem:[#allocation3 + $0x1a8] sm:$0xff] %v21029_v16  ;;  %v18040_v37 = vadd.f32 %v17777_v22, %v4770_v17  ;;  %v4709_v14 = vadd.f32 %v17593_v33, %v4483_v25  ;;  %v4485_v28 = vpop.f32.mrb[241].mxu1  ;;  %5498 = vmatprep.mubr.f32.mxu0 %v18033_v11 }
 0x540   : > { %21292 = vst [vmem:[#allocation35_spill] sm:$0xff] %v18035_v48 }
 0x541   : > { %21293 = vst [vmem:[#allocation4_spill] sm:$0xff] %v18040_v37  ;;  %5499 = vmatmul.mubr.f32.gmra.mrb[90].mxu0 %v18035_v48  ;;  %v21032_v55 = vmax.f32 %v18040_v37, 0.0  ;;  %v4771_v2 = vadd.f32 %v4709_v14, %v17449_v29  ;;  %v21297_v14 = vld [vmem:[#allocation15_spill] sm:$0xff] }
 0x542   : > { %v4488_v41 = vpop.f32.mrb[242].mxu1  ;;  %v18047_v45 = vld [vmem:[#allocation3 + $0x18f] sm:$0xff] }
 0x543   : > { %21294 = vst [vmem:[#allocation34_spill] sm:$0xff] %v18047_v45  ;;  %v5147_v38 = vld [vmem:[#allocation3 + $0x18a] sm:$0xff]  ;;  %4954 = vst [vmem:[#allocation3 + $0x1b0] sm:$0xff] %v21032_v55  ;;  %v18054_v33 = vadd.f32 %v17777_v22, %v4771_v2  ;;  %v4714_v25 = vadd.f32 %v17590_v49, %v4488_v41  ;;  %v4490_v17 = vpop.f32.mrb[243].mxu1  ;;  %5503 = vmatprep.mubr.f32.mxu0 %v18047_v45  ;;  %v5148_v28 = vld [vmem:[#allocation3 + $0x192] sm:$0xff] }
 0x544   : > { %v18049_v32 = vld [vmem:[#allocation3 + $0x18e] sm:$0xff]  ;;  %10893 = vmatprep.mubr.f32.mxu1 %v5147_v38  ;;  %v21301_v2 = vld [vmem:[#allocation28_spill] sm:$0xff]  ;;  %v21302_v17 = vld [vmem:[#allocation27_spill] sm:$0xff] }
 0x545   : > { %21295 = vst [vmem:[#allocation5_spill] sm:$0xff] %v18049_v32  ;;  %21296 = vst [vmem:[#allocation37_spill] sm:$0xff] %v18054_v33  ;;  %5504 = vmatmul.mubr.f32.gmra.mrb[94].mxu0 %v18049_v32  ;;  %10894 = vmatmul.mubr.f32.gmra.mrb[22].mxu1 %v5148_v28  ;;  %v21036_v29 = vmax.f32 %v18054_v33, 0.0  ;;  %v4772_v16 = vadd.f32 %v4714_v25, %v21297_v14 }
 0x546   : > { %v4493_v48 = vpop.f32.mrb[244].mxu1  ;;  %v18061_v37 = vld [vmem:[#allocation3 + $0x1a7] sm:$0xff] }
 0x547   : > { %21298 = vst [vmem:[#allocation7_spill] sm:$0xff] %v18061_v37  ;;  %v18063_v55 = vld [vmem:[#allocation3 + $0x1a6] sm:$0xff]  ;;  %4955 = vst [vmem:[#allocation3 + $0x1c8] sm:$0xff] %v21036_v29  ;;  %v18068_v49 = vadd.f32 %v17777_v22, %v4772_v16  ;;  %v4719_v41 = vadd.f32 %v21301_v2, %v4493_v48  ;;  %v4495_v38 = vpop.f32.mrb[245].mxu1  ;;  %5508 = vmatprep.mubr.f32.mxu0 %v18061_v37 }
 0x548   : > { %21299 = vst [vmem:[#allocation36_spill] sm:$0xff] %v18063_v55  ;;  %v21306_v16 = vld [vmem:[#allocation16_spill] sm:$0xff] }
 0x549   : > { %21300 = vst [vmem:[#allocation20_spill] sm:$0xff] %v18068_v49  ;;  %5509 = vmatmul.mubr.f32.gmra.mrb[98].mxu0 %v18063_v55  ;;  %v21040_v25 = vmax.f32 %v18068_v49, 0.0  ;;  %v4773_v28 = vadd.f32 %v4719_v41, %v21302_v17  ;;  %v21307_v17 = vld [vmem:[#allocation21_spill] sm:$0xff] }
 0x54a   : > { %v4498_v14 = vpop.f32.mrb[246].mxu1  ;;  %v18075_v32 = vld [vmem:[#allocation3 + $0x1af] sm:$0xff] }
 0x54b   : > { %21303 = vst [vmem:[#allocation39_spill] sm:$0xff] %v18075_v32  ;;  %v5149_v45 = vld [vmem:[#allocation3 + $0x1aa] sm:$0xff]  ;;  %4956 = vst [vmem:[#allocation3 + $0x1d0] sm:$0xff] %v21040_v25  ;;  %v18082_v48 = vadd.f32 %v17777_v22, %v4773_v28  ;;  %v4724_v2 = vadd.f32 %v21306_v16, %v4498_v14  ;;  %v4500_v38 = vpop.f32.mrb[247].mxu1  ;;  %5513 = vmatprep.mubr.f32.mxu0 %v18075_v32  ;;  %v5150_v29 = vld [vmem:[#allocation3 + $0x1b2] sm:$0xff] }
 0x54c   : > { %v18077_v33 = vld [vmem:[#allocation3 + $0x1ae] sm:$0xff]  ;;  %10896 = vmatprep.mubr.f32.mxu1 %v5149_v45  ;;  %v21311_v45 = vld [vmem:[#allocation31_spill] sm:$0xff] }
 0x54d   : > { %21304 = vst [vmem:[#allocation6_spill] sm:$0xff] %v18077_v33  ;;  %21305 = vst [vmem:[#allocation38_spill] sm:$0xff] %v18082_v48  ;;  %5514 = vmatmul.mubr.f32.gmra.mrb[102].mxu0 %v18077_v33  ;;  %10897 = vmatmul.mubr.f32.gmra.mrb[24].mxu1 %v5150_v29  ;;  %v21044_v41 = vmax.f32 %v18082_v48, 0.0  ;;  %v4774_v55 = vadd.f32 %v4724_v2, %v21307_v17  ;;  %v21312_v2 = vld [vmem:[#allocation23_spill] sm:$0xff] }
 0x54e   : > { %v4503_v37 = vpop.f32.mrb[248].mxu1  ;;  %v18089_v49 = vld [vmem:[#allocation3 + $0x1c7] sm:$0xff] }
 0x54f   : > { %21308 = vst [vmem:[#allocation8_spill] sm:$0xff] %v18089_v49  ;;  %v18091_v25 = vld [vmem:[#allocation3 + $0x1c6] sm:$0xff]  ;;  %4957 = vst [vmem:[#allocation3 + $0x1e8] sm:$0xff] %v21044_v41  ;;  %v18096_v28 = vadd.f32 %v17777_v22, %v4774_v55  ;;  %v4729_v14 = vadd.f32 %v21311_v45, %v4503_v37  ;;  %v4505_v16 = vpop.f32.mrb[249].mxu1  ;;  %5518 = vmatprep.mubr.f32.mxu0 %v18089_v49 }
 0x550   : > { %21309 = vst [vmem:[#allocation41_spill] sm:$0xff] %v18091_v25  ;;  %v21316_v55 = vld [vmem:[#allocation17_spill] sm:$0xff] }
 0x551   : > { %21310 = vst [vmem:[#allocation10_spill] sm:$0xff] %v18096_v28  ;;  %5519 = vmatmul.mubr.f32.gmra.mrb[106].mxu0 %v18091_v25  ;;  %v21048_v29 = vmax.f32 %v18096_v28, 0.0  ;;  %v4775_v38 = vadd.f32 %v4729_v14, %v21312_v2  ;;  %v21317_v2 = vld [vmem:[#allocation26_spill] sm:$0xff] }
 0x552   : > { %v4508_v17 = vpop.f32.mrb[250].mxu1  ;;  %v18103_v33 = vld [vmem:[#allocation3 + $0x1cf] sm:$0xff] }
 0x553   : > { %21313 = vst [vmem:[#allocation40_spill] sm:$0xff] %v18103_v33  ;;  %v5151_v32 = vld [vmem:[#allocation3 + $0x1ca] sm:$0xff]  ;;  %4958 = vst [vmem:[#allocation3 + $0x1f0] sm:$0xff] %v21048_v29  ;;  %v18110_v37 = vadd.f32 %v17777_v22, %v4775_v38  ;;  %v4734_v45 = vadd.f32 %v21316_v55, %v4508_v17  ;;  %v4510_v16 = vpop.f32.mrb[251].mxu1  ;;  %5523 = vmatprep.mubr.f32.mxu0 %v18103_v33  ;;  %v5152_v41 = vld [vmem:[#allocation3 + $0x1d2] sm:$0xff] }
 0x554   : > { %v18105_v48 = vld [vmem:[#allocation3 + $0x1ce] sm:$0xff]  ;;  %10899 = vmatprep.mubr.f32.mxu1 %v5151_v32 }
 0x555   : > { %21314 = vst [vmem:[#allocation11_spill] sm:$0xff] %v18105_v48  ;;  %21315 = vst [vmem:[#allocation43_spill] sm:$0xff] %v18110_v37  ;;  %5524 = vmatmul.mubr.f32.gmra.mrb[110].mxu0 %v18105_v48  ;;  %10900 = vmatmul.mubr.f32.gmra.mrb[26].mxu1 %v5152_v41  ;;  %v21052_v14 = vmax.f32 %v18110_v37, 0.0  ;;  %v4776_v25 = vadd.f32 %v4734_v45, %v21317_v2  ;;  %v21320_v32 = vld [vmem:[#allocation30_spill] sm:$0xff] }
 0x556   : > { %v4513_v49 = vpop.f32.mrb[252].mxu1  ;;  %v18117_v28 = vld [vmem:[#allocation3 + $0x1e7] sm:$0xff]  ;;  %v21321_v45 = vld [vmem:[#allocation14_spill] sm:$0xff] }
 0x557   : > { %21318 = vst [vmem:[#allocation9_spill] sm:$0xff] %v18117_v28  ;;  %v18119_v29 = vld [vmem:[#allocation3 + $0x1e6] sm:$0xff]  ;;  %4959 = vst [vmem:[#allocation3 + $0x208] sm:$0xff] %v21052_v14  ;;  %v18124_v38 = vadd.f32 %v17777_v22, %v4776_v25  ;;  %v4739_v17 = vadd.f32 %v21320_v32, %v4513_v49  ;;  %v4515_v55 = vpop.f32.mrb[253].mxu1  ;;  %5528 = vmatprep.mubr.f32.mxu0 %v18117_v28  ;;  %v21322_v25 = vld [vmem:[#allocation18_spill] sm:$0xff] }
 0x558   : > { %21319 = vst [vmem:[#allocation42_spill] sm:$0xff] %v18119_v29 }
 0x559   : > { %5529 = vmatmul.mubr.f32.gmra.mrb[114].mxu0 %v18119_v29  ;;  %v21057_v41 = vmax.f32 %v18124_v38, 0.0  ;;  %v4777_v16 = vadd.f32 %v4739_v17, %v21321_v45  ;;  %v21323_v45 = vld [vmem:[#allocation29_spill] sm:$0xff] }
 0x55a   : > { %v4518_v2 = vpop.f32.mrb[254].mxu1  ;;  %v18131_v48 = vld [vmem:[#allocation3 + $0x1ef] sm:$0xff] }
 0x55b   : > { %v5153_v33 = vld [vmem:[#allocation3 + $0x1ea] sm:$0xff]  ;;  %4960 = vst [vmem:[#allocation3 + $0x210] sm:$0xff] %v21057_v41  ;;  %v4816_v49 = vadd.f32 %v17777_v22, %v4777_v16  ;;  %v4744_v32 = vadd.f32 %v21322_v25, %v4518_v2  ;;  %v4520_v55 = vpop.f32.mrb[255].mxu1  ;;  %5533 = vmatprep.mubr.f32.mxu0 %v18131_v48  ;;  %v5154_v14 = vld [vmem:[#allocation3 + $0x1f2] sm:$0xff] }
 0x55c   : > { %v18133_v37 = vld [vmem:[#allocation3 + $0x1ee] sm:$0xff]  ;;  %10902 = vmatprep.mubr.f32.mxu1 %v5153_v33 }
 0x55d   : > { %5534 = vmatmul.mubr.f32.gmra.mrb[118].mxu0 %v18133_v37  ;;  %10903 = vmatmul.mubr.f32.gmra.mrb[28].mxu1 %v5154_v14  ;;  %v4848_v17 = vmax.f32 %v4816_v49, 0.0  ;;  %v4778_v29 = vadd.f32 %v4744_v32, %v21323_v45  ;;  %v18147_v33 = vld [vmem:[#allocation3 + $0x29] sm:$0xff] }
 0x55e   : > { %v5035_v28 = vld [vmem:[#allocation3 + $0x207] sm:$0xff]  ;;  %v18142_v59 = vpop.f32.mrb[0].mxu1 }
 0x55f   : > { %v4995_v11 = vld [vmem:[#allocation3 + $0x206] sm:$0xff]  ;;  %21324 = vst [vmem:[#allocation22_spill] sm:$0xff] %v18142_v59  ;;  %4961 = vst [vmem:[#allocation3 + $0x228] sm:$0xff] %v4848_v17  ;;  %v4817_v16 = vadd.f32 %v17777_v22, %v4778_v29  ;;  %5538 = vmatprep.mubr.f32.mxu0 %v5035_v28  ;;  %v18145_v2 = vpop.f32.mrb[1].mxu1  ;;  %v5229_v17 = vld [vmem:[%s21008_s5 + $0x210] sm:$0xff] }
 0x560   : > { %21325 = vst [vmem:[#allocation45_spill] sm:$0xff] %v18145_v2  ;;  %v5003_v55 = vld [vmem:[#allocation3 + $0x7] sm:$0xff]  ;;  %v5230_v22 = vld [vmem:[%s21008_s5 + $0x218] sm:$0xff] }
 0x561   : > { %5539 = vmatmul.mubr.f32.gmra.mrb[122].mxu0 %v4995_v11  ;;  %v4849_v25 = vmax.f32 %v4817_v16, 0.0  ;;  %v5195_v11 = vld [vmem:[%s21008_s5 + $0x100] sm:$0xff]  ;;  %v5196_v28 = vld [vmem:[%s21008_s5 + $0x108] sm:$0xff]  ;;  %v12128_v45 = vpack.c.bf16 %v5230_v22, %v5229_v17  ;;  %v5198_v17 = vld [vmem:[%s21008_s5 + $0x118] sm:$0xff] }
 0x562   : > { %v5036_v41 = vld [vmem:[#allocation3 + $0x20f] sm:$0xff]  ;;  %v4963_v29 = vld [vmem:[#allocation3 + $0x6] sm:$0xff] }
 0x563   : > { %v5155_v14 = vld [vmem:[#allocation3 + $0x20a] sm:$0xff]  ;;  %4962 = vst [vmem:[#allocation3 + $0x230] sm:$0xff] %v4849_v25  ;;  %5543 = vmatprep.mubr.f32.mxu0 %v5036_v41  ;;  %v5156_v32 = vld [vmem:[#allocation3 + $0x212] sm:$0xff]  ;;  %v5231_v25 = vld [vmem:[%s21008_s5 + $0x220] sm:$0xff] }
 0x564   : > { %v4996_v49 = vld [vmem:[#allocation3 + $0x20e] sm:$0xff]  ;;  %10905 = vmatprep.mubr.f32.mxu1 %v5155_v14  ;;  %v12077_v14 = vpack.c.bf16 %v5196_v28, %v5195_v11 }
 0x565   : > { %5544 = vmatmul.mubr.f32.gmra.mrb[126].mxu0 %v4996_v49  ;;  %10906 = vmatmul.mubr.f32.gmra.mrb[30].mxu1 %v5156_v32  ;;  %v18162_v41 = vld [vmem:[#allocation3 + $0x31] sm:$0xff]  ;;  %v18167_v49 = vld [vmem:[#allocation2] sm:$0xff]  ;;  %v5232_v32 = vld [vmem:[%s21008_s5 + $0x228] sm:$0xff] }
 0x566   : > { %5613 = vmatprep.mubr.f32.mxu0 %v18147_v33  ;;  %6063 = vmatprep.mubr.f32.mxu1 %v5003_v55  ;;  %v5004_v16 = vld [vmem:[#allocation3 + $0xf] sm:$0xff]  ;;  %v12132_v28 = vpack.c.bf16 %v5232_v32, %v5231_v25  ;;  %v13462_v32 = vld [vmem:[#allocation3 + $0x27] sm:$0xff] }
 0x567   : > { %v5197_v55 = vld [vmem:[%s21008_s5 + $0x110] sm:$0xff]  ;;  %v5200_v25 = vld [vmem:[%s21008_s5 + $0x128] sm:$0xff] }
 0x568   : > { %v4964_v22 = vld [vmem:[#allocation3 + $0xe] sm:$0xff]  ;;  %v12080_v59 = vpack.c.bf16 %v5198_v17, %v5197_v55 }
 0x569   : > { %5614 = vmatmul.mubr.f32.vlgmr.msra.gmra.mrb[32].mxu0 %v18167_v49  ;;  %6064 = vmatmul.mubr.f32.vlgmr.msra.gmra.mrb[32].mxu1 %v4963_v29  ;;  %v18181_v11 = vld [vmem:[#allocation3 + $0x49] sm:$0xff]  ;;  %v18200_v55 = vld [vmem:[#allocation3 + $0x51] sm:$0xff] }
 0x56a   : > { %12127 = vmatpush3.bf16.msra.mxu0 %v17810_v10  ;;  %5618 = vmatprep.mubr.f32.mxu0 %v18162_v41  ;;  %21326 = vst [vmem:[#allocation13_spill] sm:$0xff] %v18181_v11  ;;  %v5233_v29 = vld [vmem:[%s21008_s5 + $0x230] sm:$0xff]  ;;  %v5234_v10 = vld [vmem:[%s21008_s5 + $0x238] sm:$0xff]  ;;  %21328 = vst [vmem:[#allocation12_spill] sm:$0xff] %v18200_v55 }
 0x56b   : > { %6068 = vmatprep.mubr.f32.mxu1 %v5004_v16  ;;  %12129 = vmatprep.subr.bf16.mxu0 %v12128_v45  ;;  %v5199_v16 = vld [vmem:[%s21008_s5 + $0x120] sm:$0xff]  ;;  %v12136_v17 = vpack.c.bf16 %v5234_v10, %v5233_v29  ;;  %v5202_v29 = vld [vmem:[%s21008_s5 + $0x138] sm:$0xff]  ;;  %v18219_v10 = vld [vmem:[#allocation3 + $0x69] sm:$0xff] }
 0x56c   : > { %12078 = vmatpush1.bf16.msra.mxu1 %v12077_v14  ;;  %v18198_v14 = vld [vmem:[#allocation3 + $0x48] sm:$0xff]  ;;  %v12083_v2 = vpack.c.bf16 %v5200_v25, %v5199_v16 }
 0x56d   : > { %5619 = vmatmul.mubr.f32.gmra.mrb[34].mxu0 %v18167_v49  ;;  %6069 = vmatmul.mubr.f32.gmra.mrb[34].mxu1 %v4964_v22  ;;  %21327 = vst [vmem:[#allocation44_spill] sm:$0xff] %v18198_v14  ;;  %v5235_v22 = vld [vmem:[%s21008_s5 + $0x240] sm:$0xff] }
 0x56e   : > { %5623 = vmatprep.mubr.f32.mxu0 %v18181_v11  ;;  %6073 = vmatprep.mubr.f32.mxu1 %v13462_v32  ;;  %v13463_v11 = vld [vmem:[#allocation3 + $0x26] sm:$0xff]  ;;  %v5201_v32 = vld [vmem:[%s21008_s5 + $0x130] sm:$0xff] }
 0x56f   : > { %12131 = vmatpush3.bf16.msra.mxu0 %v12128_v45  ;;  %12079 = vmatprep.subr.bf16.mxu1 %v21127_v6  ;;  %v5236_v45 = vld [vmem:[%s21008_s5 + $0x248] sm:$0xff]  ;;  %v12086_v25 = vpack.c.bf16 %v5202_v29, %v5201_v32  ;;  %v5205_v29 = vld [vmem:[%s21008_s5 + $0x150] sm:$0xff] }
 0x570   : > { %12133 = vmatprep.subr.bf16.mxu0 %v12132_v28  ;;  %12081 = vmatpush1.bf16.msra.mxu1 %v12080_v59  ;;  %v13464_v59 = vld [vmem:[#allocation3 + $0x2f] sm:$0xff]  ;;  %v12140_v16 = vpack.c.bf16 %v5236_v45, %v5235_v22 }
 0x571   : > { %5624 = vmatmul.mubr.f32.gmra.mrb[36].mxu0 %v18198_v14  ;;  %6074 = vmatmul.mubr.f32.gmra.mrb[36].mxu1 %v13463_v11  ;;  %v18217_v11 = vld [vmem:[#allocation3 + $0x50] sm:$0xff] }
 0x572   : > { %5628 = vmatprep.mubr.f32.mxu0 %v18200_v55  ;;  %6078 = vmatprep.mubr.f32.mxu1 %v13464_v59  ;;  %v5237_v14 = vld [vmem:[%s21008_s5 + $0x250] sm:$0xff]  ;;  %v5203_v59 = vld [vmem:[%s21008_s5 + $0x140] sm:$0xff] }
 0x573   : > { %12135 = vmatpush3.bf16.msra.mxu0 %v12132_v28  ;;  %12082 = vmatprep.subr.bf16.mxu1 %v21127_v6  ;;  %v13465_v55 = vld [vmem:[#allocation3 + $0x2e] sm:$0xff]  ;;  %v5238_v28 = vld [vmem:[%s21008_s5 + $0x258] sm:$0xff] }
 0x574   : > { %12137 = vmatprep.subr.bf16.mxu0 %v12136_v17  ;;  %12084 = vmatpush1.bf16.msra.mxu1 %v12083_v2  ;;  %v5204_v2 = vld [vmem:[%s21008_s5 + $0x148] sm:$0xff]  ;;  %v18239_v22 = vld [vmem:[#allocation3 + $0x71] sm:$0xff]  ;;  %v12144_v45 = vpack.c.bf16 %v5238_v28, %v5237_v14 }
 0x575   : > { %5629 = vmatmul.mubr.f32.gmra.mrb[38].mxu0 %v18217_v11  ;;  %6079 = vmatmul.mubr.f32.gmra.mrb[38].mxu1 %v13465_v55  ;;  %v18237_v55 = vld [vmem:[#allocation3 + $0x68] sm:$0xff]  ;;  %v12089_v32 = vpack.c.bf16 %v5204_v2, %v5203_v59  ;;  %v5207_v59 = vld [vmem:[%s21008_s5 + $0x160] sm:$0xff] }
 0x576   : > { %5633 = vmatprep.mubr.f32.mxu0 %v18219_v10  ;;  %6083 = vmatprep.mubr.f32.mxu1 %v17820_v40  ;;  %v5206_v40 = vld [vmem:[%s21008_s5 + $0x158] sm:$0xff]  ;;  %v5240_v14 = vld [vmem:[%s21008_s5 + $0x268] sm:$0xff] }
 0x577   : > { %12139 = vmatpush3.bf16.msra.mxu0 %v12136_v17  ;;  %12085 = vmatprep.subr.bf16.mxu1 %v21127_v6  ;;  %v5239_v17 = vld [vmem:[%s21008_s5 + $0x260] sm:$0xff]  ;;  %v12092_v28 = vpack.c.bf16 %v5206_v40, %v5205_v29 }
 0x578   : > { %12141 = vmatprep.subr.bf16.mxu0 %v12140_v16  ;;  %12087 = vmatpush1.bf16.msra.mxu1 %v12086_v25  ;;  %v18260_v25 = vld [vmem:[#allocation3 + $0x89] sm:$0xff]  ;;  %v12148_v2 = vpack.c.bf16 %v5240_v14, %v5239_v17  ;;  %v18283_v17 = vld [vmem:[#allocation3 + $0x91] sm:$0xff] }
 0x579   : > { %5634 = vmatmul.mubr.f32.gmra.mrb[40].mxu0 %v18237_v55  ;;  %6084 = vmatmul.mubr.f32.gmra.mrb[40].mxu1 %v17822_v18  ;;  %v18258_v18 = vld [vmem:[#allocation3 + $0x70] sm:$0xff] }
 0x57a   : > { %5638 = vmatprep.mubr.f32.mxu0 %v18239_v22  ;;  %6088 = vmatprep.mubr.f32.mxu1 %v17829_v62  ;;  %v5208_v62 = vld [vmem:[%s21008_s5 + $0x168] sm:$0xff]  ;;  %v5209_v14 = vld [vmem:[%s21008_s5 + $0x170] sm:$0xff] }
 0x57b   : > { %12143 = vmatpush3.bf16.msra.mxu0 %v12140_v16  ;;  %12088 = vmatprep.subr.bf16.mxu1 %v21127_v6  ;;  %v5241_v16 = vld [vmem:[%s21008_s5 + $0x270] sm:$0xff]  ;;  %v12095_v29 = vpack.c.bf16 %v5208_v62, %v5207_v59  ;;  %v5211_v59 = vld [vmem:[%s21008_s5 + $0x180] sm:$0xff] }
 0x57c   : > { %12145 = vmatprep.subr.bf16.mxu0 %v12144_v45  ;;  %12090 = vmatpush1.bf16.msra.mxu1 %v12089_v32  ;;  %v5242_v32 = vld [vmem:[%s21008_s5 + $0x278] sm:$0xff] }
 0x57d   : > { %5639 = vmatmul.mubr.f32.gmra.mrb[42].mxu0 %v18258_v18  ;;  %6089 = vmatmul.mubr.f32.gmra.mrb[42].mxu1 %v17831_v39  ;;  %v18279_v39 = vld [vmem:[#allocation3 + $0x88] sm:$0xff]  ;;  %v12152_v40 = vpack.c.bf16 %v5242_v32, %v5241_v16  ;;  %v18314_v62 = vld [vmem:[#allocation3 + $0xb1] sm:$0xff] }
 0x57e   : > { %5643 = vmatprep.mubr.f32.mxu0 %v18260_v25  ;;  %6093 = vmatprep.mubr.f32.mxu1 %v17838_v9  ;;  %v5210_v9 = vld [vmem:[%s21008_s5 + $0x178] sm:$0xff]  ;;  %v5213_v16 = vld [vmem:[%s21008_s5 + $0x190] sm:$0xff] }
 0x57f   : > { %12147 = vmatpush3.bf16.msra.mxu0 %v12144_v45  ;;  %12091 = vmatprep.subr.bf16.mxu1 %v21127_v6  ;;  %v18294_v45 = vld [vmem:[#allocation3 + $0x90] sm:$0xff] }
 0x580   : > { %12093 = vmatpush1.bf16.msra.mxu1 %v12092_v28  ;;  %12149 = vmatprep.subr.bf16.mxu0 %v12148_v2  ;;  %v18298_v28 = vld [vmem:[#allocation3 + $0xa9] sm:$0xff] }
 0x581   : > { %5644 = vmatmul.mubr.f32.gmra.mrb[44].mxu0 %v18279_v39  ;;  %6094 = vmatmul.mubr.f32.gmra.mrb[44].mxu1 %v17840_v56  ;;  %v12098_v56 = vpack.c.bf16 %v5210_v9, %v5209_v14  ;;  %v18325_v32 = vld [vmem:[#allocation3 + $0xb0] sm:$0xff]  ;;  %v18340_v14 = vld [vmem:[#allocation3 + $0xc8] sm:$0xff] }
 0x582   : > { %5648 = vmatprep.mubr.f32.mxu0 %v18283_v17  ;;  %6098 = vmatprep.mubr.f32.mxu1 %v17847_v46  ;;  %v5212_v46 = vld [vmem:[%s21008_s5 + $0x188] sm:$0xff]  ;;  %v18344_v9 = vld [vmem:[#allocation3 + $0xd1] sm:$0xff] }
 0x583   : > { %12094 = vmatprep.subr.bf16.mxu1 %v21127_v6  ;;  %12151 = vmatpush3.bf16.msra.mxu0 %v12148_v2  ;;  %v18309_v2 = vld [vmem:[#allocation3 + $0xa8] sm:$0xff] }
 0x584   : > { %12096 = vmatpush1.bf16.msra.mxu1 %v12095_v29  ;;  %12153 = vmatprep.subr.bf16.mxu0 %v12152_v40  ;;  %v18329_v29 = vld [vmem:[#allocation3 + $0xc9] sm:$0xff] }
 0x585   : > { %5649 = vmatmul.mubr.f32.gmra.mrb[46].mxu0 %v18294_v45  ;;  %6099 = vmatmul.mubr.f32.gmra.mrb[46].mxu1 %v17849_v43  ;;  %v12101_v43 = vpack.c.bf16 %v5212_v46, %v5211_v59  ;;  %v18355_v59 = vld [vmem:[#allocation3 + $0xd0] sm:$0xff] }
 0x586   : > { %5653 = vmatprep.mubr.f32.mxu0 %v18298_v28  ;;  %6103 = vmatprep.mubr.f32.mxu1 %v17856_v4  ;;  %v5214_v4 = vld [vmem:[%s21008_s5 + $0x198] sm:$0xff]  ;;  %v18359_v46 = vld [vmem:[#allocation3 + $0xe9] sm:$0xff] }
 0x587   : > { %12097 = vmatprep.subr.bf16.mxu1 %v21127_v6  ;;  %12155 = vmatpush3.bf16.msra.mxu0 %v12152_v40  ;;  %v5215_v40 = vld [vmem:[%s21008_s5 + $0x1a0] sm:$0xff] }
 0x588   : > { %12099 = vmatpush1.bf16.msra.mxu1 %v12098_v56  ;;  %12156 = vmatprep.subr.bf16.mxu0 %v21127_v6  ;;  %v5217_v56 = vld [vmem:[%s21008_s5 + $0x1b0] sm:$0xff] }
 0x589   : > { %5654 = vmatmul.mubr.f32.gmra.mrb[48].mxu0 %v18309_v2  ;;  %6104 = vmatmul.mubr.f32.gmra.mrb[48].mxu1 %v17858_v34  ;;  %v12104_v34 = vpack.c.bf16 %v5214_v4, %v5213_v16  ;;  %v18370_v16 = vld [vmem:[#allocation3 + $0xe8] sm:$0xff]  ;;  %v18374_v4 = vld [vmem:[#allocation3 + $0xf1] sm:$0xff] }
 0x58a   : > { %5658 = vmatprep.mubr.f32.mxu0 %v18314_v62  ;;  %6108 = vmatprep.mubr.f32.mxu1 %v17865_v36  ;;  %v5216_v36 = vld [vmem:[%s21008_s5 + $0x1a8] sm:$0xff] }
 0x58b   : > { %12100 = vmatprep.subr.bf16.mxu1 %v21127_v6 }
 0x58c   : > { %12102 = vmatpush1.bf16.msra.mxu1 %v12101_v43  ;;  %v5219_v43 = vld [vmem:[%s21008_s5 + $0x1c0] sm:$0xff] }
 0x58d   : > { %5659 = vmatmul.mubr.f32.gmra.mrb[50].mxu0 %v18325_v32  ;;  %6109 = vmatmul.mubr.f32.gmra.mrb[50].mxu1 %v17867_v30  ;;  %v12107_v30 = vpack.c.bf16 %v5216_v36, %v5215_v40  ;;  %v18385_v40 = vld [vmem:[#allocation3 + $0xf0] sm:$0xff] }
 0x58e   : > { %5663 = vmatprep.mubr.f32.mxu0 %v18329_v29  ;;  %6113 = vmatprep.mubr.f32.mxu1 %v17874_v7  ;;  %v5218_v7 = vld [vmem:[%s21008_s5 + $0x1b8] sm:$0xff]  ;;  %v18389_v36 = vld [vmem:[#allocation3 + $0x109] sm:$0xff] }
 0x58f   : > { %12103 = vmatprep.subr.bf16.mxu1 %v21127_v6 }
 0x590   : > { %12105 = vmatpush1.bf16.msra.mxu1 %v12104_v34  ;;  %v5221_v34 = vld [vmem:[%s21008_s5 + $0x1d0] sm:$0xff] }
 0x591   : > { %5664 = vmatmul.mubr.f32.gmra.mrb[52].mxu0 %v18340_v14  ;;  %6114 = vmatmul.mubr.f32.gmra.mrb[52].mxu1 %v17876_v12  ;;  %v12110_v12 = vpack.c.bf16 %v5218_v7, %v5217_v56  ;;  %v18400_v56 = vld [vmem:[#allocation3 + $0x108] sm:$0xff]  ;;  %v18404_v7 = vld [vmem:[#allocation3 + $0x111] sm:$0xff] }
 0x592   : > { %5668 = vmatprep.mubr.f32.mxu0 %v18344_v9  ;;  %6118 = vmatprep.mubr.f32.mxu1 %v17883_v24  ;;  %v5220_v24 = vld [vmem:[%s21008_s5 + $0x1c8] sm:$0xff] }
 0x593   : > { %12106 = vmatprep.subr.bf16.mxu1 %v21127_v6 }
 0x594   : > { %12108 = vmatpush1.bf16.msra.mxu1 %v12107_v30  ;;  %v5223_v30 = vld [vmem:[%s21008_s5 + $0x1e0] sm:$0xff] }
 0x595   : > { %5669 = vmatmul.mubr.f32.gmra.mrb[54].mxu0 %v18355_v59  ;;  %6119 = vmatmul.mubr.f32.gmra.mrb[54].mxu1 %v17885_v23  ;;  %v12113_v23 = vpack.c.bf16 %v5220_v24, %v5219_v43  ;;  %v18415_v43 = vld [vmem:[#allocation3 + $0x110] sm:$0xff] }
 0x596   : > { %5673 = vmatprep.mubr.f32.mxu0 %v18359_v46  ;;  %6123 = vmatprep.mubr.f32.mxu1 %v17892_v57  ;;  %v5222_v57 = vld [vmem:[%s21008_s5 + $0x1d8] sm:$0xff]  ;;  %v18419_v24 = vld [vmem:[#allocation3 + $0x129] sm:$0xff] }
 0x597   : > { %12109 = vmatprep.subr.bf16.mxu1 %v21127_v6 }
 0x598   : > { %12111 = vmatpush1.bf16.msra.mxu1 %v12110_v12  ;;  %v5225_v12 = vld [vmem:[%s21008_s5 + $0x1f0] sm:$0xff] }
 0x599   : > { %5674 = vmatmul.mubr.f32.gmra.mrb[56].mxu0 %v18370_v16  ;;  %6124 = vmatmul.mubr.f32.gmra.mrb[56].mxu1 %v17894_v58  ;;  %v12116_v58 = vpack.c.bf16 %v5222_v57, %v5221_v34  ;;  %v18443_v34 = vld [vmem:[#allocation3 + $0x151] sm:$0xff]  ;;  %v21339_v57 = vld [vmem:[#allocation32_spill] sm:$0xff] }
 0x59a   : > { %5678 = vmatprep.mubr.f32.mxu0 %v18374_v4  ;;  %6128 = vmatprep.mubr.f32.mxu1 %v17901_v52  ;;  %v5224_v52 = vld [vmem:[%s21008_s5 + $0x1e8] sm:$0xff] }
 0x59b   : > { %12112 = vmatprep.subr.bf16.mxu1 %v21127_v6 }
 0x59c   : > { %12114 = vmatpush1.bf16.msra.mxu1 %v12113_v23  ;;  %v18424_v23 = vld [vmem:[#allocation3 + $0x128] sm:$0xff] }
 0x59d   : > { %5679 = vmatmul.mubr.f32.gmra.mrb[58].mxu0 %v18385_v40  ;;  %6129 = vmatmul.mubr.f32.gmra.mrb[58].mxu1 %v17903_v61  ;;  %v12119_v61 = vpack.c.bf16 %v5224_v52, %v5223_v30  ;;  %v21341_v52 = vld [vmem:[#allocation35_spill] sm:$0xff] }
 0x59e   : > { %5683 = vmatprep.mubr.f32.mxu0 %v18389_v36  ;;  %6133 = vmatprep.mubr.f32.mxu1 %v17910_v27  ;;  %v5226_v27 = vld [vmem:[%s21008_s5 + $0x1f8] sm:$0xff] }
 0x59f   : > { %12115 = vmatprep.subr.bf16.mxu1 %v21127_v6 }
 0x5a0   : > { %12117 = vmatpush1.bf16.msra.mxu1 %v12116_v58  ;;  %v21340_v58 = vmax.f32 %v21339_v57, 0.0 }
 0x5a1   : > { %5684 = vmatmul.mubr.f32.gmra.mrb[60].mxu0 %v18400_v56  ;;  %6134 = vmatmul.mubr.f32.gmra.mrb[60].mxu1 %v17912_v42  ;;  %v12122_v42 = vpack.c.bf16 %v5226_v27, %v5225_v12  ;;  %v21342_v27 = vld [vmem:[#allocation34_spill] sm:$0xff] }
 0x5a2   : > { %5688 = vmatprep.mubr.f32.mxu0 %v18404_v7  ;;  %6138 = vmatprep.mubr.f32.mxu1 %v17919_v26  ;;  %v18428_v26 = vld [vmem:[#allocation3 + $0x131] sm:$0xff] }
 0x5a3   : > { %12118 = vmatprep.subr.bf16.mxu1 %v21127_v6 }
 0x5a4   : > { %12120 = vmatpush1.bf16.msra.mxu1 %v12119_v61  ;;  %v18495_v61 = vld [vmem:[#allocation3 + $0x1b1] sm:$0xff] }
 0x5a5   : > { %5689 = vmatmul.mubr.f32.gmra.mrb[62].mxu0 %v18415_v43  ;;  %6139 = vmatmul.mubr.f32.gmra.mrb[62].mxu1 %v17921_v5  ;;  %v18432_v5 = vld [vmem:[#allocation3 + $0x130] sm:$0xff] }
 0x5a6   : > { %5693 = vmatprep.mubr.f32.mxu0 %v18419_v24  ;;  %6143 = vmatprep.mubr.f32.mxu1 %v17928_v20  ;;  %v18436_v20 = vld [vmem:[#allocation3 + $0x149] sm:$0xff] }
 0x5a7   : > { %12121 = vmatprep.subr.bf16.mxu1 %v21127_v6 }
 0x5a8   : > { %12123 = vmatpush1.bf16.msra.mxu1 %v12122_v42  ;;  %v21343_v42 = vld [vmem:[#allocation4_spill] sm:$0xff] }
 0x5a9   : > { %5694 = vmatmul.mubr.f32.gmra.mrb[66].mxu0 %v18424_v23  ;;  %6144 = vmatmul.mubr.f32.gmra.mrb[64].mxu1 %v17930_v3  ;;  %v21329_v3 = vmax.f32 %v17942_v35, 0.0  ;;  %v21331_v35 = vmax.f32 %v17970_v31, 0.0  ;;  %v18471_v31 = vld [vmem:[#allocation3 + $0x191] sm:$0xff] }
 0x5aa   : > { %5698 = vmatprep.mubr.f32.mxu0 %v18428_v26  ;;  %6148 = vmatprep.mubr.f32.mxu1 %v17937_v51  ;;  %v21330_v51 = vmax.f32 %v17956_v47, 0.0  ;;  %v18464_v47 = vld [vmem:[#allocation3 + $0x189] sm:$0xff] }
 0x5ad   : > { %5699 = vmatmul.mubr.f32.gmra.mrb[70].mxu0 %v18432_v5  ;;  %6149 = vmatmul.mubr.f32.gmra.mrb[66].mxu1 %v17939_v53  ;;  %v18450_v53 = vld [vmem:[#allocation3 + $0x169] sm:$0xff] }
 0x5ae   : > { %5703 = vmatprep.mubr.f32.mxu0 %v18436_v20  ;;  %6153 = vmatprep.mubr.f32.mxu1 %v17949_v13  ;;  %v18457_v13 = vld [vmem:[#allocation3 + $0x171] sm:$0xff] }
 0x5b1   : > { %5704 = vmatmul.mubr.f32.gmra.mrb[74].mxu0 %v21329_v3  ;;  %6154 = vmatmul.mubr.f32.gmra.mrb[68].mxu1 %v17951_v50  ;;  %v21332_v50 = vmax.f32 %v17984_v1, 0.0  ;;  %v18478_v1 = vld [vmem:[#allocation3 + $0x1a9] sm:$0xff]  ;;  %v21344_v3 = vmax.f32 %v21343_v42, 0.0 }
 0x5b2   : > { %5708 = vmatprep.mubr.f32.mxu0 %v18443_v34  ;;  %6158 = vmatprep.mubr.f32.mxu1 %v17963_v19  ;;  %v21333_v19 = vld [vmem:[#allocation19_spill] sm:$0xff] }
 0x5b5   : > { %5709 = vmatmul.mubr.f32.gmra.mrb[78].mxu0 %v21330_v51  ;;  %6159 = vmatmul.mubr.f32.gmra.mrb[70].mxu1 %v17965_v15  ;;  %v21334_v15 = vmax.f32 %v21333_v19, 0.0  ;;  %v21345_v51 = vld [vmem:[#allocation5_spill] sm:$0xff] }
 0x5b6   : > { %5713 = vmatprep.mubr.f32.mxu0 %v18450_v53  ;;  %6163 = vmatprep.mubr.f32.mxu1 %v17977_v60  ;;  %v21335_v60 = vld [vmem:[#allocation33_spill] sm:$0xff] }
 0x5b9   : > { %5714 = vmatmul.mubr.f32.gmra.mrb[82].mxu0 %v21331_v35  ;;  %6164 = vmatmul.mubr.f32.gmra.mrb[72].mxu1 %v17979_v0  ;;  %v21336_v0 = vmax.f32 %v21335_v60, 0.0  ;;  %v18505_v35 = vld [vmem:[#allocation3 + $0x1c9] sm:$0xff] }
 0x5ba   : > { %5718 = vmatprep.mubr.f32.mxu0 %v18457_v13  ;;  %6168 = vmatprep.mubr.f32.mxu1 %v17991_v21 }
 0x5bd   : > { %5719 = vmatmul.mubr.f32.gmra.mrb[86].mxu0 %v21332_v50  ;;  %6169 = vmatmul.mubr.f32.gmra.mrb[74].mxu1 %v17993_v8  ;;  %v21337_v8 = vld [vmem:[#allocation24_spill] sm:$0xff]  ;;  %v21346_v50 = vld [vmem:[#allocation7_spill] sm:$0xff] }
 0x5be   : > { %5723 = vmatprep.mubr.f32.mxu0 %v18464_v47  ;;  %6173 = vmatprep.mubr.f32.mxu1 %v18005_v44  ;;  %v21338_v44 = vld [vmem:[#allocation25_spill] sm:$0xff] }
 0x5c1   : > { %5724 = vmatmul.mubr.f32.gmra.mrb[90].mxu0 %v21334_v15  ;;  %6174 = vmatmul.mubr.f32.gmra.mrb[76].mxu1 %v18007_v63  ;;  %v9639_v63 = vld [vmem:[%s21008_s5 + $0x700] sm:$0xff]  ;;  %v21347_v15 = vld [vmem:[#allocation37_spill] sm:$0xff] }
 0x5c2   : > { %5728 = vmatprep.mubr.f32.mxu0 %v18471_v31  ;;  %6178 = vmatprep.mubr.f32.mxu1 %v18019_v54  ;;  %v9640_v54 = vld [vmem:[%s21008_s5 + $0x708] sm:$0xff]  ;;  %v21348_v60 = vmax.f32 %v21347_v15, 0.0 }
 0x5c3   : > { %v18497_v12 = vpack.c.bf16 %v9640_v54, %v9639_v63  ;;  %v21351_v63 = vld [vmem:[#allocation39_spill] sm:$0xff]  ;;  %v21352_v54 = vld [vmem:[#allocation20_spill] sm:$0xff]  ;;  %v21359_v15 = vld [vmem:[#allocation41_spill] sm:$0xff] }
 0x5c4   : > { %v21353_v57 = vmax.f32 %v21352_v54, 0.0 }
 0x5c5   : > { %5729 = vmatmul.mubr.f32.gmra.mrb[94].mxu0 %v21336_v0  ;;  %6179 = vmatmul.mubr.f32.gmra.mrb[78].mxu1 %v21337_v8  ;;  %v21349_v8 = vld [vmem:[#allocation36_spill] sm:$0xff] }
 0x5c6   : > { %5733 = vmatprep.mubr.f32.mxu0 %v18478_v1  ;;  %6183 = vmatprep.mubr.f32.mxu1 %v21338_v44  ;;  %v18516_v44 = vld [vmem:[#allocation3 + $0x1d1] sm:$0xff] }
 0x5c7   : > { %12253 = vmatprep.subr.bf16.mxu1 %v18497_v12  ;;  %21350 = vst [vmem:[#allocation15_spill] sm:$0xff] %v18516_v44 }
 0x5c8   : > { %v18482_v21 = vpop.f32.mrb[2].mxu1 }
 0x5c9   : > { %5734 = vmatmul.mubr.f32.gmra.mrb[98].mxu0 %v21340_v58  ;;  %v18492_v30 = vpop.f32.mrb[3].mxu1  ;;  %6184 = vmatmul.mubr.f32.gmra.mrb[80].mxu1 %v21341_v52  ;;  %v21354_v58 = vld [vmem:[#allocation6_spill] sm:$0xff] }
 0x5ca   : > { %5738 = vmatprep.mubr.f32.mxu0 %v18495_v61  ;;  %6188 = vmatprep.mubr.f32.mxu1 %v21342_v27  ;;  %v18523_v52 = vld [vmem:[#allocation3 + $0x1e9] sm:$0xff]  ;;  %v21356_v27 = vld [vmem:[#allocation8_spill] sm:$0xff] }
 0x5cb   : > { %21355 = vst [vmem:[#allocation28_spill] sm:$0xff] %v18523_v52 }
 0x5cd   : > { %5739 = vmatmul.mubr.f32.gmra.mrb[102].mxu0 %v21344_v3  ;;  %6189 = vmatmul.mubr.f32.gmra.mrb[82].mxu1 %v21345_v51  ;;  %v21357_v3 = vld [vmem:[#allocation38_spill] sm:$0xff] }
 0x5ce   : > { %5743 = vmatprep.mubr.f32.mxu0 %v18505_v35  ;;  %6193 = vmatprep.mubr.f32.mxu1 %v21346_v50  ;;  %v21358_v51 = vmax.f32 %v21357_v3, 0.0 }
 0x5d0   : > { %v18509_v19 = vpop.f32.mrb[4].mxu1 }
 0x5d1   : > { %5744 = vmatmul.mubr.f32.gmra.mrb[106].mxu0 %v21348_v60  ;;  %v18513_v0 = vpop.f32.mrb[5].mxu1  ;;  %6194 = vmatmul.mubr.f32.gmra.mrb[84].mxu1 %v21349_v8  ;;  %v18534_v60 = vld [vmem:[#allocation3 + $0x1f1] sm:$0xff]  ;;  %v21361_v8 = vld [vmem:[#allocation40_spill] sm:$0xff] }
 0x5d2   : > { %5748 = vmatprep.mubr.f32.mxu0 %v18516_v44  ;;  %6198 = vmatprep.mubr.f32.mxu1 %v21351_v63  ;;  %21360 = vst [vmem:[#allocation27_spill] sm:$0xff] %v18534_v60  ;;  %v21362_v63 = vld [vmem:[#allocation10_spill] sm:$0xff] }
 0x5d3   : > { %v21363_v54 = vmax.f32 %v21362_v63, 0.0  ;;  %v21369_v44 = vld [vmem:[#allocation42_spill] sm:$0xff] }
 0x5d4   : > { %v5123_v63 = vld [vmem:[#allocation3 + $0xa] sm:$0xff] }
 0x5d5   : > { %5749 = vmatmul.mubr.f32.gmra.mrb[110].mxu0 %v21353_v57  ;;  %6199 = vmatmul.mubr.f32.gmra.mrb[86].mxu1 %v21354_v58  ;;  %v21364_v57 = vld [vmem:[#allocation11_spill] sm:$0xff]  ;;  %v5115_v58 = vld [vmem:[#allocation3 + $0x209] sm:$0xff] }
 0x5d6   : > { %5753 = vmatprep.mubr.f32.mxu0 %v18523_v52  ;;  %6203 = vmatprep.mubr.f32.mxu1 %v21356_v27  ;;  %v21365_v27 = vld [vmem:[#allocation9_spill] sm:$0xff] }
 0x5d8   : > { %v18527_v42 = vpop.f32.mrb[6].mxu1 }
 0x5d9   : > { %5754 = vmatmul.mubr.f32.gmra.mrb[114].mxu0 %v21358_v51  ;;  %v18531_v50 = vpop.f32.mrb[7].mxu1  ;;  %6204 = vmatmul.mubr.f32.gmra.mrb[88].mxu1 %v21359_v15  ;;  %v21367_v51 = vld [vmem:[#allocation43_spill] sm:$0xff] }
 0x5da   : > { %5758 = vmatprep.mubr.f32.mxu0 %v18534_v60  ;;  %6208 = vmatprep.mubr.f32.mxu1 %v21361_v8  ;;  %v21368_v52 = vmax.f32 %v21367_v51, 0.0  ;;  %v5116_v60 = vld [vmem:[#allocation3 + $0x211] sm:$0xff]  ;;  %v5083_v8 = vld [vmem:[#allocation3 + $0x9] sm:$0xff] }
 0x5dd   : > { %5759 = vmatmul.mubr.f32.gmra.mrb[118].mxu0 %v21363_v54  ;;  %6209 = vmatmul.mubr.f32.gmra.mrb[90].mxu1 %v21364_v57  ;;  %v9575_v54 = vld [vmem:[%s21008_s5 + $0x500] sm:$0xff]  ;;  %v9576_v57 = vld [vmem:[%s21008_s5 + $0x508] sm:$0xff] }
 0x5de   : > { %5763 = vmatprep.mubr.f32.mxu0 %v5115_v58  ;;  %6213 = vmatprep.mubr.f32.mxu1 %v21365_v27  ;;  %v9577_v58 = vld [vmem:[%s21008_s5 + $0x510] sm:$0xff]  ;;  %v9578_v27 = vld [vmem:[%s21008_s5 + $0x518] sm:$0xff] }
 0x5e0   : > { %v18542_v3 = vpop.f32.mrb[8].mxu1 }
 0x5e1   : > { %21366 = vst [vmem:[#allocation16_spill] sm:$0xff] %v18542_v3  ;;  %5764 = vmatmul.mubr.f32.gmra.mrb[122].mxu0 %v21368_v52  ;;  %v18546_v15 = vpop.f32.mrb[9].mxu1  ;;  %6214 = vmatmul.mubr.f32.gmra.mrb[92].mxu1 %v21369_v44  ;;  %v21370_v52 = vmax.f32 %v18124_v38, 0.0  ;;  %v5124_v44 = vld [vmem:[#allocation3 + $0x12] sm:$0xff] }
 0x5e2   : > { %5768 = vmatprep.mubr.f32.mxu0 %v5116_v60  ;;  %6218 = vmatprep.mubr.f32.mxu1 %v18131_v48  ;;  %v12157_v60 = vpack.c.bf16 %v9576_v57, %v9575_v54  ;;  %v5084_v48 = vld [vmem:[#allocation3 + $0x11] sm:$0xff]  ;;  %v9579_v54 = vld [vmem:[%s21008_s5 + $0x520] sm:$0xff]  ;;  %v9580_v57 = vld [vmem:[%s21008_s5 + $0x528] sm:$0xff] }
 0x5e3   : > { %v9642_v38 = vld [vmem:[%s21008_s5 + $0x718] sm:$0xff] }
 0x5e5   : > { %5769 = vmatmul.mubr.f32.gmra.mrb[126].mxu0 %v21370_v52  ;;  %6219 = vmatmul.mubr.f32.gmra.mrb[94].mxu1 %v18133_v37  ;;  %v9641_v37 = vld [vmem:[%s21008_s5 + $0x710] sm:$0xff] }
 0x5e6   : > { %6288 = vmatprep.mubr.f32.mxu1 %v5083_v8  ;;  %10940 = vmatprep.mubr.f32.mxu0 %v5123_v63  ;;  %v12160_v8 = vpack.c.bf16 %v9578_v27, %v9577_v58  ;;  %v13466_v63 = vld [vmem:[#allocation3 + $0x2a] sm:$0xff]  ;;  %v12256_v52 = vpack.c.bf16 %v9642_v38, %v9641_v37  ;;  %v18601_v38 = vld [vmem:[#allocation3 + $0x52] sm:$0xff] }
 0x5e7   : > { %v9581_v58 = vld [vmem:[%s21008_s5 + $0x530] sm:$0xff] }
 0x5e8   : > { %v18565_v51 = vpop.f32.mrb[10].mxu1 }
 0x5e9   : > { %v18567_v3 = vpop.f32.mrb[11].mxu1  ;;  %6289 = vmatmul.mubr.f32.vlgmr.msra.gmra.mrb[32].mxu1 %v18167_v49  ;;  %10941 = vmatmul.mubr.f32.vlgmr.msra.gmra.mrb[64].mxu0 %v5124_v44  ;;  %v13467_v44 = vld [vmem:[#allocation3 + $0x32] sm:$0xff] }
 0x5ea   : > { %12158 = vmatpush1.bf16.msra.mxu0 %v12157_v60  ;;  %6293 = vmatprep.mubr.f32.mxu1 %v5084_v48  ;;  %v18585_v60 = vld [vmem:[#allocation3 + $0x4a] sm:$0xff]  ;;  %v12163_v48 = vpack.c.bf16 %v9580_v57, %v9579_v54  ;;  %v9583_v57 = vld [vmem:[%s21008_s5 + $0x540] sm:$0xff] }
 0x5eb   : > { %10943 = vmatprep.mubr.f32.mxu0 %v13466_v63  ;;  %12159 = vmatprep.subr.bf16.mxu0 %v21127_v6  ;;  %v18610_v63 = vld [vmem:[#allocation3 + $0x6a] sm:$0xff] }
 0x5ec   : > { %12255 = vmatpush3.bf16.msra.mxu1 %v18497_v12  ;;  %v9582_v12 = vld [vmem:[%s21008_s5 + $0x538] sm:$0xff] }
 0x5ed   : > { %6294 = vmatmul.mubr.f32.gmra.mrb[96].mxu1 %v18167_v49  ;;  %10944 = vmatmul.mubr.f32.gmra.mrb[128].mxu0 %v13467_v44  ;;  %v12166_v54 = vpack.c.bf16 %v9582_v12, %v9581_v58  ;;  %v9584_v44 = vld [vmem:[%s21008_s5 + $0x548] sm:$0xff] }
 0x5ee   : > { %12161 = vmatpush1.bf16.msra.mxu0 %v12160_v8  ;;  %10946 = vmatprep.mubr.f32.mxu0 %v18585_v60  ;;  %v9644_v8 = vld [vmem:[%s21008_s5 + $0x728] sm:$0xff]  ;;  %v12169_v58 = vpack.c.bf16 %v9584_v44, %v9583_v57  ;;  %v18641_v57 = vld [vmem:[#allocation3 + $0x92] sm:$0xff] }
 0x5ef   : > { %6298 = vmatprep.mubr.f32.mxu1 %v18147_v33  ;;  %12162 = vmatprep.subr.bf16.mxu0 %v21127_v6  ;;  %v9643_v33 = vld [vmem:[%s21008_s5 + $0x720] sm:$0xff]  ;;  %v18626_v12 = vld [vmem:[#allocation3 + $0x8a] sm:$0xff]  ;;  %21378 = vst [vmem:[#allocation30_spill] sm:$0xff] %v18641_v57 }
 0x5f0   : > { %v18596_v27 = vpop.f32.mrb[12].mxu1  ;;  %12257 = vmatprep.subr.bf16.mxu1 %v12256_v52  ;;  %21374 = vst [vmem:[#allocation23_spill] sm:$0xff] %v18626_v12  ;;  %v9645_v44 = vld [vmem:[%s21008_s5 + $0x730] sm:$0xff] }
 0x5f1   : > { %21371 = vst [vmem:[#allocation21_spill] sm:$0xff] %v18596_v27  ;;  %v18598_v37 = vpop.f32.mrb[13].mxu1  ;;  %6299 = vmatmul.mubr.f32.gmra.mrb[36].mxu1 %v18167_v49  ;;  %10947 = vmatmul.mubr.f32.gmra.mrb[68].mxu0 %v18601_v38  ;;  %v12260_v27 = vpack.c.bf16 %v9644_v8, %v9643_v33 }
 0x5f2   : > { %12164 = vmatpush1.bf16.msra.mxu0 %v12163_v48  ;;  %10949 = vmatprep.mubr.f32.mxu0 %v18610_v63  ;;  %v18622_v48 = vld [vmem:[#allocation3 + $0x72] sm:$0xff] }
 0x5f3   : > { %6303 = vmatprep.mubr.f32.mxu1 %v18162_v41  ;;  %12165 = vmatprep.subr.bf16.mxu0 %v21127_v6  ;;  %21372 = vst [vmem:[#allocation31_spill] sm:$0xff] %v18622_v48  ;;  %v21373_v41 = vld [vmem:[#allocation13_spill] sm:$0xff] }
 0x5f4   : > { %12259 = vmatpush3.bf16.msra.mxu1 %v12256_v52  ;;  %v9585_v52 = vld [vmem:[%s21008_s5 + $0x550] sm:$0xff] }
 0x5f5   : > { %6304 = vmatmul.mubr.f32.gmra.mrb[98].mxu1 %v18167_v49  ;;  %10950 = vmatmul.mubr.f32.gmra.mrb[130].mxu0 %v18622_v48  ;;  %v9586_v49 = vld [vmem:[%s21008_s5 + $0x558] sm:$0xff]  ;;  %v18651_v48 = vld [vmem:[#allocation3 + $0xaa] sm:$0xff] }
 0x5f6   : > { %12167 = vmatpush1.bf16.msra.mxu0 %v12166_v54  ;;  %6308 = vmatprep.mubr.f32.mxu1 %v21373_v41  ;;  %v21377_v54 = vld [vmem:[#allocation44_spill] sm:$0xff]  ;;  %v9646_v41 = vld [vmem:[%s21008_s5 + $0x738] sm:$0xff] }
 0x5f7   : > { %10952 = vmatprep.mubr.f32.mxu0 %v18626_v12  ;;  %12168 = vmatprep.subr.bf16.mxu0 %v21127_v6  ;;  %v21379_v12 = vld [vmem:[#allocation12_spill] sm:$0xff] }
 0x5f8   : > { %v18636_v33 = vpop.f32.mrb[14].mxu1  ;;  %12261 = vmatprep.subr.bf16.mxu1 %v12260_v27 }
 0x5f9   : > { %21375 = vst [vmem:[#allocation17_spill] sm:$0xff] %v18636_v33  ;;  %v18638_v8 = vpop.f32.mrb[15].mxu1  ;;  %6309 = vmatmul.mubr.f32.gmra.mrb[40].mxu1 %v21377_v54  ;;  %10953 = vmatmul.mubr.f32.gmra.mrb[72].mxu0 %v18641_v57  ;;  %v12172_v33 = vpack.c.bf16 %v9586_v49, %v9585_v52  ;;  %v9587_v54 = vld [vmem:[%s21008_s5 + $0x560] sm:$0xff]  ;;  %v12264_v57 = vpack.c.bf16 %v9646_v41, %v9645_v44  ;;  %v18666_v52 = vld [vmem:[#allocation3 + $0xca] sm:$0xff] }
 0x5fa   : > { %21376 = vst [vmem:[#allocation26_spill] sm:$0xff] %v18638_v8  ;;  %12170 = vmatpush1.bf16.msra.mxu0 %v12169_v58  ;;  %6313 = vmatprep.mubr.f32.mxu1 %v21379_v12  ;;  %v9588_v8 = vld [vmem:[%s21008_s5 + $0x568] sm:$0xff]  ;;  %v18662_v58 = vld [vmem:[#allocation3 + $0xb2] sm:$0xff] }
 0x5fb   : > { %10955 = vmatprep.mubr.f32.mxu0 %v18651_v48  ;;  %12171 = vmatprep.subr.bf16.mxu0 %v21127_v6  ;;  %v12175_v12 = vpack.c.bf16 %v9588_v8, %v9587_v54  ;;  %v9647_v8 = vld [vmem:[%s21008_s5 + $0x740] sm:$0xff]  ;;  %v9648_v44 = vld [vmem:[%s21008_s5 + $0x748] sm:$0xff] }
 0x5fc   : > { %12263 = vmatpush3.bf16.msra.mxu1 %v12260_v27  ;;  %v9589_v27 = vld [vmem:[%s21008_s5 + $0x570] sm:$0xff] }
 0x5fd   : > { %6314 = vmatmul.mubr.f32.gmra.mrb[100].mxu1 %v18217_v11  ;;  %10956 = vmatmul.mubr.f32.gmra.mrb[132].mxu0 %v18662_v58  ;;  %v9590_v11 = vld [vmem:[%s21008_s5 + $0x578] sm:$0xff]  ;;  %v18691_v54 = vld [vmem:[#allocation3 + $0xea] sm:$0xff] }
 0x5fe   : > { %12173 = vmatpush1.bf16.msra.mxu0 %v12172_v33  ;;  %6318 = vmatprep.mubr.f32.mxu1 %v18219_v10  ;;  %v18681_v10 = vld [vmem:[#allocation3 + $0xd2] sm:$0xff]  ;;  %v12178_v41 = vpack.c.bf16 %v9590_v11, %v9589_v27  ;;  %v18706_v27 = vld [vmem:[#allocation3 + $0x10a] sm:$0xff] }
 0x5ff   : > { %10958 = vmatprep.mubr.f32.mxu0 %v18666_v52  ;;  %12174 = vmatprep.subr.bf16.mxu0 %v21127_v6 }
 0x600   : > { %v18676_v49 = vpop.f32.mrb[16].mxu1  ;;  %12265 = vmatprep.subr.bf16.mxu1 %v12264_v57 }
 0x601   : > { %21380 = vst [vmem:[#allocation14_spill] sm:$0xff] %v18676_v49  ;;  %v18678_v33 = vpop.f32.mrb[17].mxu1  ;;  %6319 = vmatmul.mubr.f32.gmra.mrb[44].mxu1 %v18237_v55  ;;  %10959 = vmatmul.mubr.f32.gmra.mrb[76].mxu0 %v18681_v10  ;;  %v9591_v55 = vld [vmem:[%s21008_s5 + $0x580] sm:$0xff]  ;;  %v9592_v49 = vld [vmem:[%s21008_s5 + $0x588] sm:$0xff] }
 0x602   : > { %21381 = vst [vmem:[#allocation18_spill] sm:$0xff] %v18678_v33  ;;  %12176 = vmatpush1.bf16.msra.mxu0 %v12175_v12  ;;  %6323 = vmatprep.mubr.f32.mxu1 %v18239_v22  ;;  %v12268_v33 = vpack.c.bf16 %v9648_v44, %v9647_v8  ;;  %v18702_v22 = vld [vmem:[#allocation3 + $0xf2] sm:$0xff]  ;;  %v12181_v12 = vpack.c.bf16 %v9592_v49, %v9591_v55  ;;  %v18731_v55 = vld [vmem:[#allocation3 + $0x12a] sm:$0xff] }
 0x603   : > { %10961 = vmatprep.mubr.f32.mxu0 %v18691_v54  ;;  %12177 = vmatprep.subr.bf16.mxu0 %v21127_v6  ;;  %v9649_v49 = vld [vmem:[%s21008_s5 + $0x750] sm:$0xff]  ;;  %v9650_v44 = vld [vmem:[%s21008_s5 + $0x758] sm:$0xff] }
 0x604   : > { %12267 = vmatpush3.bf16.msra.mxu1 %v12264_v57  ;;  %v9593_v57 = vld [vmem:[%s21008_s5 + $0x590] sm:$0xff] }
 0x605   : > { %6324 = vmatmul.mubr.f32.gmra.mrb[102].mxu1 %v18258_v18  ;;  %10962 = vmatmul.mubr.f32.gmra.mrb[134].mxu0 %v18702_v22  ;;  %v9594_v18 = vld [vmem:[%s21008_s5 + $0x598] sm:$0xff] }
 0x606   : > { %12179 = vmatpush1.bf16.msra.mxu0 %v12178_v41  ;;  %6328 = vmatprep.mubr.f32.mxu1 %v18260_v25  ;;  %v18721_v25 = vld [vmem:[#allocation3 + $0x112] sm:$0xff]  ;;  %v12184_v41 = vpack.c.bf16 %v9594_v18, %v9593_v57  ;;  %v18746_v57 = vld [vmem:[#allocation3 + $0x14a] sm:$0xff] }
 0x607   : > { %10964 = vmatprep.mubr.f32.mxu0 %v18706_v27  ;;  %12180 = vmatprep.subr.bf16.mxu0 %v21127_v6 }
 0x608   : > { %v18716_v11 = vpop.f32.mrb[18].mxu1  ;;  %12269 = vmatprep.subr.bf16.mxu1 %v12268_v33 }
 0x609   : > { %21382 = vst [vmem:[#allocation29_spill] sm:$0xff] %v18716_v11  ;;  %v18718_v8 = vpop.f32.mrb[19].mxu1  ;;  %6329 = vmatmul.mubr.f32.gmra.mrb[48].mxu1 %v18279_v39  ;;  %10965 = vmatmul.mubr.f32.gmra.mrb[80].mxu0 %v18721_v25  ;;  %v9595_v39 = vld [vmem:[%s21008_s5 + $0x5a0] sm:$0xff]  ;;  %v9596_v11 = vld [vmem:[%s21008_s5 + $0x5a8] sm:$0xff] }
 0x60a   : > { %21383 = vst [vmem:[#allocation19_spill] sm:$0xff] %v18718_v8  ;;  %12182 = vmatpush1.bf16.msra.mxu0 %v12181_v12  ;;  %6333 = vmatprep.mubr.f32.mxu1 %v18283_v17  ;;  %v12272_v8 = vpack.c.bf16 %v9650_v44, %v9649_v49  ;;  %v18742_v17 = vld [vmem:[#allocation3 + $0x132] sm:$0xff]  ;;  %v12187_v12 = vpack.c.bf16 %v9596_v11, %v9595_v39  ;;  %v9651_v11 = vld [vmem:[%s21008_s5 + $0x760] sm:$0xff]  ;;  %v9652_v44 = vld [vmem:[%s21008_s5 + $0x768] sm:$0xff] }
 0x60b   : > { %10967 = vmatprep.mubr.f32.mxu0 %v18731_v55  ;;  %12183 = vmatprep.subr.bf16.mxu0 %v21127_v6  ;;  %v18771_v39 = vld [vmem:[#allocation3 + $0x16a] sm:$0xff] }
 0x60c   : > { %12271 = vmatpush3.bf16.msra.mxu1 %v12268_v33  ;;  %v9597_v33 = vld [vmem:[%s21008_s5 + $0x5b0] sm:$0xff] }
 0x60d   : > { %6334 = vmatmul.mubr.f32.gmra.mrb[104].mxu1 %v18294_v45  ;;  %10968 = vmatmul.mubr.f32.gmra.mrb[136].mxu0 %v18742_v17  ;;  %v9598_v45 = vld [vmem:[%s21008_s5 + $0x5b8] sm:$0xff] }
 0x60e   : > { %12185 = vmatpush1.bf16.msra.mxu0 %v12184_v41  ;;  %6338 = vmatprep.mubr.f32.mxu1 %v18298_v28  ;;  %v18761_v28 = vld [vmem:[#allocation3 + $0x152] sm:$0xff]  ;;  %v12190_v41 = vpack.c.bf16 %v9598_v45, %v9597_v33  ;;  %v18786_v33 = vld [vmem:[#allocation3 + $0x18a] sm:$0xff] }
 0x60f   : > { %10970 = vmatprep.mubr.f32.mxu0 %v18746_v57  ;;  %12186 = vmatprep.subr.bf16.mxu0 %v21127_v6 }
 0x610   : > { %v18756_v18 = vpop.f32.mrb[20].mxu1  ;;  %12273 = vmatprep.subr.bf16.mxu1 %v12272_v8 }
 0x611   : > { %21384 = vst [vmem:[#allocation33_spill] sm:$0xff] %v18756_v18  ;;  %v18758_v49 = vpop.f32.mrb[21].mxu1  ;;  %6339 = vmatmul.mubr.f32.gmra.mrb[52].mxu1 %v18309_v2  ;;  %10971 = vmatmul.mubr.f32.gmra.mrb[84].mxu0 %v18761_v28  ;;  %v9599_v2 = vld [vmem:[%s21008_s5 + $0x5c0] sm:$0xff]  ;;  %v9600_v18 = vld [vmem:[%s21008_s5 + $0x5c8] sm:$0xff] }
 0x612   : > { %21385 = vst [vmem:[#allocation24_spill] sm:$0xff] %v18758_v49  ;;  %12188 = vmatpush1.bf16.msra.mxu0 %v12187_v12  ;;  %6343 = vmatprep.mubr.f32.mxu1 %v18314_v62  ;;  %v12276_v49 = vpack.c.bf16 %v9652_v44, %v9651_v11  ;;  %v18782_v62 = vld [vmem:[#allocation3 + $0x172] sm:$0xff]  ;;  %v12193_v12 = vpack.c.bf16 %v9600_v18, %v9599_v2  ;;  %v18811_v2 = vld [vmem:[#allocation3 + $0x1aa] sm:$0xff] }
 0x613   : > { %10973 = vmatprep.mubr.f32.mxu0 %v18771_v39  ;;  %12189 = vmatprep.subr.bf16.mxu0 %v21127_v6  ;;  %v9653_v18 = vld [vmem:[%s21008_s5 + $0x770] sm:$0xff]  ;;  %v9654_v44 = vld [vmem:[%s21008_s5 + $0x778] sm:$0xff] }
 0x614   : > { %12275 = vmatpush3.bf16.msra.mxu1 %v12272_v8  ;;  %v9601_v8 = vld [vmem:[%s21008_s5 + $0x5d0] sm:$0xff] }
 0x615   : > { %6344 = vmatmul.mubr.f32.gmra.mrb[106].mxu1 %v18325_v32  ;;  %10974 = vmatmul.mubr.f32.gmra.mrb[138].mxu0 %v18782_v62  ;;  %v9602_v32 = vld [vmem:[%s21008_s5 + $0x5d8] sm:$0xff] }
 0x616   : > { %12191 = vmatpush1.bf16.msra.mxu0 %v12190_v41  ;;  %6348 = vmatprep.mubr.f32.mxu1 %v18329_v29  ;;  %v18801_v29 = vld [vmem:[#allocation3 + $0x192] sm:$0xff]  ;;  %v12196_v41 = vpack.c.bf16 %v9602_v32, %v9601_v8  ;;  %v18826_v8 = vld [vmem:[#allocation3 + $0x1ca] sm:$0xff] }
 0x617   : > { %10976 = vmatprep.mubr.f32.mxu0 %v18786_v33  ;;  %12192 = vmatprep.subr.bf16.mxu0 %v21127_v6 }
 0x618   : > { %v18796_v45 = vpop.f32.mrb[22].mxu1  ;;  %12277 = vmatprep.subr.bf16.mxu1 %v12276_v49 }
 0x619   : > { %21386 = vst [vmem:[#allocation25_spill] sm:$0xff] %v18796_v45  ;;  %v18798_v11 = vpop.f32.mrb[23].mxu1  ;;  %6349 = vmatmul.mubr.f32.gmra.mrb[56].mxu1 %v18340_v14  ;;  %10977 = vmatmul.mubr.f32.gmra.mrb[88].mxu0 %v18801_v29  ;;  %v9603_v14 = vld [vmem:[%s21008_s5 + $0x5e0] sm:$0xff]  ;;  %v9604_v45 = vld [vmem:[%s21008_s5 + $0x5e8] sm:$0xff] }
 0x61a   : > { %21387 = vst [vmem:[#allocation32_spill] sm:$0xff] %v18798_v11  ;;  %12194 = vmatpush1.bf16.msra.mxu0 %v12193_v12  ;;  %6353 = vmatprep.mubr.f32.mxu1 %v18344_v9  ;;  %v12280_v11 = vpack.c.bf16 %v9654_v44, %v9653_v18  ;;  %v18822_v9 = vld [vmem:[#allocation3 + $0x1b2] sm:$0xff]  ;;  %v12199_v12 = vpack.c.bf16 %v9604_v45, %v9603_v14  ;;  %v18845_v44 = vld [vmem:[#allocation3 + $0x1ea] sm:$0xff] }
 0x61b   : > { %10979 = vmatprep.mubr.f32.mxu0 %v18811_v2  ;;  %12195 = vmatprep.subr.bf16.mxu0 %v21127_v6  ;;  %v18856_v14 = vld [vmem:[#allocation3 + $0x1f2] sm:$0xff] }
 0x61c   : > { %12279 = vmatpush3.bf16.msra.mxu1 %v12276_v49  ;;  %v9605_v49 = vld [vmem:[%s21008_s5 + $0x5f0] sm:$0xff] }
 0x61d   : > { %6354 = vmatmul.mubr.f32.gmra.mrb[108].mxu1 %v18355_v59  ;;  %10980 = vmatmul.mubr.f32.gmra.mrb[140].mxu0 %v18822_v9  ;;  %v9606_v59 = vld [vmem:[%s21008_s5 + $0x5f8] sm:$0xff] }
 0x61e   : > { %12197 = vmatpush1.bf16.msra.mxu0 %v12196_v41  ;;  %6358 = vmatprep.mubr.f32.mxu1 %v18359_v46  ;;  %v18841_v46 = vld [vmem:[#allocation3 + $0x1d2] sm:$0xff]  ;;  %v12202_v45 = vpack.c.bf16 %v9606_v59, %v9605_v49  ;;  %v9607_v41 = vld [vmem:[%s21008_s5 + $0x600] sm:$0xff] }
 0x61f   : > { %10982 = vmatprep.mubr.f32.mxu0 %v18826_v8  ;;  %12198 = vmatprep.subr.bf16.mxu0 %v21127_v6 }
 0x620   : > { %v18836_v32 = vpop.f32.mrb[24].mxu1  ;;  %12281 = vmatprep.subr.bf16.mxu1 %v12280_v11 }
 0x621   : > { %v18838_v18 = vpop.f32.mrb[25].mxu1  ;;  %6359 = vmatmul.mubr.f32.gmra.mrb[60].mxu1 %v18370_v16  ;;  %10983 = vmatmul.mubr.f32.gmra.mrb[92].mxu0 %v18841_v46  ;;  %v9608_v16 = vld [vmem:[%s21008_s5 + $0x608] sm:$0xff] }
 0x622   : > { %12200 = vmatpush1.bf16.msra.mxu0 %v12199_v12  ;;  %6363 = vmatprep.mubr.f32.mxu1 %v18374_v4  ;;  %v12205_v4 = vpack.c.bf16 %v9608_v16, %v9607_v41  ;;  %v13496_v12 = vld [vmem:[#allocation3 + $0x47] sm:$0xff] }
 0x623   : > { %10985 = vmatprep.mubr.f32.mxu0 %v18845_v44  ;;  %12201 = vmatprep.subr.bf16.mxu0 %v21127_v6  ;;  %v9611_v16 = vld [vmem:[%s21008_s5 + $0x620] sm:$0xff] }
 0x624   : > { %12283 = vmatpush3.bf16.msra.mxu1 %v12280_v11  ;;  %v9609_v11 = vld [vmem:[%s21008_s5 + $0x610] sm:$0xff] }
 0x625   : > { %6364 = vmatmul.mubr.f32.gmra.mrb[110].mxu1 %v18385_v40  ;;  %10986 = vmatmul.mubr.f32.gmra.mrb[142].mxu0 %v18856_v14  ;;  %v9610_v40 = vld [vmem:[%s21008_s5 + $0x618] sm:$0xff] }
 0x626   : > { %12203 = vmatpush1.bf16.msra.mxu0 %v12202_v45  ;;  %6368 = vmatprep.mubr.f32.mxu1 %v18389_v36  ;;  %v13497_v36 = vld [vmem:[#allocation3 + $0x46] sm:$0xff]  ;;  %v13498_v45 = vld [vmem:[#allocation3 + $0x4f] sm:$0xff]  ;;  %v12208_v41 = vpack.c.bf16 %v9610_v40, %v9609_v11 }
 0x627   : > { %6819 = vmatprep.mubr.f32.mxu0 %v13496_v12  ;;  %12204 = vmatprep.subr.bf16.mxu0 %v21127_v6  ;;  %v9612_v12 = vld [vmem:[%s21008_s5 + $0x628] sm:$0xff]  ;;  %v9613_v40 = vld [vmem:[%s21008_s5 + $0x630] sm:$0xff] }
 0x628   : > { %v18861_v49 = vpop.f32.mrb[26].mxu1  ;;  %12284 = vmatprep.subr.bf16.mxu1 %v21127_v6 }
 0x629   : > { %v18870_v59 = vpop.f32.mrb[27].mxu1  ;;  %6369 = vmatmul.mubr.f32.gmra.mrb[64].mxu1 %v18400_v56  ;;  %6820 = vmatmul.mubr.f32.vlgmr.msra.gmra.mrb[96].mxu0 %v13497_v36  ;;  %v13499_v56 = vld [vmem:[#allocation3 + $0x4e] sm:$0xff] }
 0x62a   : > { %12206 = vmatpush1.bf16.msra.mxu0 %v12205_v4  ;;  %6373 = vmatprep.mubr.f32.mxu1 %v18404_v7  ;;  %v18883_v7 = vld [vmem:[#allocation3 + $0x67] sm:$0xff]  ;;  %v12211_v4 = vpack.c.bf16 %v9612_v12, %v9611_v16 }
 0x62b   : > { %6824 = vmatprep.mubr.f32.mxu0 %v13498_v45  ;;  %12207 = vmatprep.subr.bf16.mxu0 %v21127_v6  ;;  %v18902_v45 = vld [vmem:[#allocation3 + $0x6f] sm:$0xff]  ;;  %v9615_v16 = vld [vmem:[%s21008_s5 + $0x640] sm:$0xff] }
 0x62c   : > { %v18913_v12 = vld [vmem:[#allocation3 + $0x6e] sm:$0xff] }
 0x62d   : > { %6374 = vmatmul.mubr.f32.gmra.mrb[112].mxu1 %v18415_v43  ;;  %6825 = vmatmul.mubr.f32.gmra.mrb[144].mxu0 %v13499_v56  ;;  %v9614_v43 = vld [vmem:[%s21008_s5 + $0x638] sm:$0xff]  ;;  %21390 = vst [vmem:[#allocation4_spill] sm:$0xff] %v18913_v12 }
 0x62e   : > { %6378 = vmatprep.mubr.f32.mxu1 %v18419_v24  ;;  %6829 = vmatprep.mubr.f32.mxu0 %v18883_v7  ;;  %v18898_v24 = vld [vmem:[#allocation3 + $0x66] sm:$0xff] }
 0x62f   : > { %12209 = vmatpush1.bf16.msra.mxu0 %v12208_v41  ;;  %v12214_v41 = vpack.c.bf16 %v9614_v43, %v9613_v40  ;;  %v9618_v40 = vld [vmem:[%s21008_s5 + $0x658] sm:$0xff] }
 0x630   : > { %v18886_v11 = vpop.f32.mrb[28].mxu1  ;;  %12210 = vmatprep.subr.bf16.mxu0 %v21127_v6 }
 0x631   : > { %21388 = vst [vmem:[#allocation35_spill] sm:$0xff] %v18886_v11  ;;  %v18895_v36 = vpop.f32.mrb[29].mxu1  ;;  %6379 = vmatmul.mubr.f32.gmra.mrb[68].mxu1 %v18424_v23  ;;  %6830 = vmatmul.mubr.f32.gmra.mrb[100].mxu0 %v18898_v24  ;;  %v9616_v23 = vld [vmem:[%s21008_s5 + $0x648] sm:$0xff] }
 0x632   : > { %21389 = vst [vmem:[#allocation34_spill] sm:$0xff] %v18895_v36  ;;  %6383 = vmatprep.mubr.f32.mxu1 %v18428_v26  ;;  %6834 = vmatprep.mubr.f32.mxu0 %v18902_v45  ;;  %v18917_v26 = vld [vmem:[#allocation3 + $0x87] sm:$0xff]  ;;  %v12217_v56 = vpack.c.bf16 %v9616_v23, %v9615_v16 }
 0x633   : > { %12212 = vmatpush1.bf16.msra.mxu0 %v12211_v4  ;;  %21391 = vst [vmem:[#allocation5_spill] sm:$0xff] %v18917_v26  ;;  %v18931_v11 = vld [vmem:[#allocation3 + $0x86] sm:$0xff] }
 0x634   : > { %12213 = vmatprep.subr.bf16.mxu0 %v21127_v6  ;;  %21394 = vst [vmem:[#allocation36_spill] sm:$0xff] %v18931_v11 }
 0x635   : > { %6384 = vmatmul.mubr.f32.gmra.mrb[114].mxu1 %v18432_v5  ;;  %6835 = vmatmul.mubr.f32.gmra.mrb[146].mxu0 %v18913_v12  ;;  %v9617_v5 = vld [vmem:[%s21008_s5 + $0x650] sm:$0xff] }
 0x636   : > { %6388 = vmatprep.mubr.f32.mxu1 %v18436_v20  ;;  %6839 = vmatprep.mubr.f32.mxu0 %v18917_v26  ;;  %v13505_v20 = vld [vmem:[#allocation3 + $0x148] sm:$0xff]  ;;  %v12220_v16 = vpack.c.bf16 %v9618_v40, %v9617_v5  ;;  %v13508_v26 = vld [vmem:[#allocation3 + $0x150] sm:$0xff] }
 0x637   : > { %12215 = vmatpush1.bf16.msra.mxu0 %v12214_v41  ;;  %v18935_v41 = vld [vmem:[#allocation3 + $0x8f] sm:$0xff] }
 0x638   : > { %v18920_v4 = vpop.f32.mrb[30].mxu1  ;;  %12216 = vmatprep.subr.bf16.mxu0 %v21127_v6  ;;  %21395 = vst [vmem:[#allocation39_spill] sm:$0xff] %v18935_v41 }
 0x639   : > { %21392 = vst [vmem:[#allocation7_spill] sm:$0xff] %v18920_v4  ;;  %v18929_v43 = vpop.f32.mrb[31].mxu1  ;;  %6389 = vmatmul.mubr.f32.gmra.mrb[72].mxu1 %v13505_v20  ;;  %6840 = vmatmul.mubr.f32.gmra.mrb[104].mxu0 %v18931_v11  ;;  %v9619_v4 = vld [vmem:[%s21008_s5 + $0x660] sm:$0xff]  ;;  %v9620_v20 = vld [vmem:[%s21008_s5 + $0x668] sm:$0xff] }
 0x63a   : > { %21393 = vst [vmem:[#allocation37_spill] sm:$0xff] %v18929_v43  ;;  %6393 = vmatprep.mubr.f32.mxu1 %v18443_v34  ;;  %6844 = vmatprep.mubr.f32.mxu0 %v18935_v41  ;;  %v21396_v43 = vld [vmem:[#allocation45_spill] sm:$0xff]  ;;  %v12223_v5 = vpack.c.bf16 %v9620_v20, %v9619_v4 }
 0x63b   : > { %12218 = vmatpush1.bf16.msra.mxu0 %v12217_v56  ;;  %v18948_v41 = vld [vmem:[#allocation3 + $0x8e] sm:$0xff] }
 0x63c   : > { %v5615_v23 = vpop.f32.mrb[32].mxu0  ;;  %12219 = vmatprep.subr.bf16.mxu0 %v21127_v6  ;;  %21398 = vst [vmem:[#allocation6_spill] sm:$0xff] %v18948_v41  ;;  %v18952_v56 = vld [vmem:[#allocation3 + $0xa7] sm:$0xff] }
 0x63d   : > { %v18946_v11 = vadd.f32 %v21396_v43, %v5615_v23  ;;  %v5617_v34 = vpop.f32.mrb[33].mxu0  ;;  %6394 = vmatmul.mubr.f32.gmra.mrb[116].mxu1 %v13508_v26  ;;  %6845 = vmatmul.mubr.f32.gmra.mrb[148].mxu0 %v18948_v41  ;;  %21399 = vst [vmem:[#allocation8_spill] sm:$0xff] %v18952_v56  ;;  %v9621_v26 = vld [vmem:[%s21008_s5 + $0x670] sm:$0xff]  ;;  %v9622_v43 = vld [vmem:[%s21008_s5 + $0x678] sm:$0xff] }
 0x63e   : > { %6398 = vmatprep.mubr.f32.mxu1 %v18450_v53  ;;  %6849 = vmatprep.mubr.f32.mxu0 %v18952_v56  ;;  %v21400_v23 = vld [vmem:[#allocation22_spill] sm:$0xff]  ;;  %v18963_v56 = vld [vmem:[#allocation3 + $0xa6] sm:$0xff]  ;;  %v12226_v41 = vpack.c.bf16 %v9622_v43, %v9621_v26 }
 0x63f   : > { %21397 = vst [vmem:[#allocation20_spill] sm:$0xff] %v18946_v11  ;;  %12221 = vmatpush1.bf16.msra.mxu0 %v12220_v16  ;;  %v13511_v11 = vld [vmem:[#allocation3 + $0x168] sm:$0xff] }
 0x640   : > { %v5620_v40 = vpop.f32.mrb[34].mxu0  ;;  %v6070_v12 = vpop.f32.mrb[34].mxu1  ;;  %12222 = vmatprep.subr.bf16.mxu0 %v21127_v6  ;;  %v18967_v16 = vld [vmem:[#allocation3 + $0xaf] sm:$0xff] }
 0x641   : > { %v5846_v53 = vadd.f32 %v21400_v23, %v5620_v40  ;;  %v5622_v34 = vpop.f32.mrb[35].mxu0  ;;  %6399 = vmatmul.mubr.f32.gmra.mrb[76].mxu1 %v13511_v11  ;;  %6850 = vmatmul.mubr.f32.gmra.mrb[108].mxu0 %v18963_v56  ;;  %v6072_v4 = vpop.f32.mrb[35].mxu1  ;;  %v9623_v11 = vld [vmem:[%s21008_s5 + $0x680] sm:$0xff]  ;;  %v9624_v40 = vld [vmem:[%s21008_s5 + $0x688] sm:$0xff] }
 0x642   : > { %6403 = vmatprep.mubr.f32.mxu1 %v18457_v13  ;;  %6854 = vmatprep.mubr.f32.mxu0 %v18967_v16  ;;  %v13514_v34 = vld [vmem:[#allocation3 + $0x170] sm:$0xff]  ;;  %v12229_v26 = vpack.c.bf16 %v9624_v40, %v9623_v11 }
 0x643   : > { %v18970_v20 = vadd.f32 %v6070_v12, %v5846_v53  ;;  %12224 = vmatpush1.bf16.msra.mxu0 %v12223_v5  ;;  %v18982_v12 = vld [vmem:[#allocation3 + $0xae] sm:$0xff] }
 0x644   : > { %v5625_v36 = vpop.f32.mrb[36].mxu0  ;;  %12225 = vmatprep.subr.bf16.mxu0 %v21127_v6  ;;  %v18986_v5 = vld [vmem:[#allocation3 + $0xc7] sm:$0xff]  ;;  %v19001_v11 = vld [vmem:[#allocation3 + $0xcf] sm:$0xff] }
 0x645   : > { %21401 = vst [vmem:[#allocation38_spill] sm:$0xff] %v18970_v20  ;;  %v18980_v13 = vadd.f32 %v18492_v30, %v5625_v36  ;;  %v5627_v23 = vpop.f32.mrb[37].mxu0  ;;  %6404 = vmatmul.mubr.f32.gmra.mrb[118].mxu1 %v13514_v34  ;;  %6855 = vmatmul.mubr.f32.gmra.mrb[150].mxu0 %v18982_v12  ;;  %v9625_v30 = vld [vmem:[%s21008_s5 + $0x690] sm:$0xff]  ;;  %v9626_v36 = vld [vmem:[%s21008_s5 + $0x698] sm:$0xff]  ;;  %v18997_v34 = vld [vmem:[#allocation3 + $0xc6] sm:$0xff] }
 0x646   : > { %6408 = vmatprep.mubr.f32.mxu1 %v18464_v47  ;;  %6859 = vmatprep.mubr.f32.mxu0 %v18986_v5  ;;  %v13517_v23 = vld [vmem:[#allocation3 + $0x188] sm:$0xff] }
 0x647   : > { %21402 = vst [vmem:[#allocation41_spill] sm:$0xff] %v18980_v13  ;;  %12227 = vmatpush1.bf16.msra.mxu0 %v12226_v41  ;;  %v12232_v13 = vpack.c.bf16 %v9626_v36, %v9625_v30 }
 0x648   : > { %v5630_v43 = vpop.f32.mrb[38].mxu0  ;;  %v6080_v53 = vpop.f32.mrb[38].mxu1  ;;  %12228 = vmatprep.subr.bf16.mxu0 %v21127_v6 }
 0x649   : > { %v5856_v47 = vadd.f32 %v18482_v21, %v5630_v43  ;;  %v5632_v4 = vpop.f32.mrb[39].mxu0  ;;  %6409 = vmatmul.mubr.f32.gmra.mrb[80].mxu1 %v13517_v23  ;;  %6860 = vmatmul.mubr.f32.gmra.mrb[112].mxu0 %v18997_v34  ;;  %v6082_v41 = vpop.f32.mrb[39].mxu1  ;;  %v9627_v21 = vld [vmem:[%s21008_s5 + $0x6a0] sm:$0xff]  ;;  %v9628_v43 = vld [vmem:[%s21008_s5 + $0x6a8] sm:$0xff]  ;;  %v13520_v23 = vld [vmem:[#allocation3 + $0x190] sm:$0xff] }
 0x64a   : > { %6413 = vmatprep.mubr.f32.mxu1 %v18471_v31  ;;  %6864 = vmatprep.mubr.f32.mxu0 %v19001_v11  ;;  %v12235_v30 = vpack.c.bf16 %v9628_v43, %v9627_v21  ;;  %v19035_v21 = vld [vmem:[#allocation3 + $0xef] sm:$0xff] }
 0x64b   : > { %v19004_v40 = vadd.f32 %v6080_v53, %v5856_v47  ;;  %12230 = vmatpush1.bf16.msra.mxu0 %v12229_v26  ;;  %v19016_v53 = vld [vmem:[#allocation3 + $0xce] sm:$0xff] }
 0x64c   : > { %v5635_v20 = vpop.f32.mrb[40].mxu0  ;;  %12231 = vmatprep.subr.bf16.mxu0 %v21127_v6  ;;  %v19020_v26 = vld [vmem:[#allocation3 + $0xe7] sm:$0xff] }
 0x64d   : > { %21403 = vst [vmem:[#allocation40_spill] sm:$0xff] %v19004_v40  ;;  %v19014_v31 = vadd.f32 %v18513_v0, %v5635_v20  ;;  %v5637_v4 = vpop.f32.mrb[41].mxu0  ;;  %6414 = vmatmul.mubr.f32.gmra.mrb[120].mxu1 %v13520_v23  ;;  %6865 = vmatmul.mubr.f32.gmra.mrb[152].mxu0 %v19016_v53  ;;  %v9629_v0 = vld [vmem:[%s21008_s5 + $0x6b0] sm:$0xff]  ;;  %v9630_v20 = vld [vmem:[%s21008_s5 + $0x6b8] sm:$0xff]  ;;  %v13523_v23 = vld [vmem:[#allocation3 + $0x1a8] sm:$0xff] }
 0x64e   : > { %6418 = vmatprep.mubr.f32.mxu1 %v18478_v1  ;;  %6869 = vmatprep.mubr.f32.mxu0 %v19020_v26 }
 0x64f   : > { %21404 = vst [vmem:[#allocation10_spill] sm:$0xff] %v19014_v31  ;;  %12233 = vmatpush1.bf16.msra.mxu0 %v12232_v13  ;;  %v19031_v13 = vld [vmem:[#allocation3 + $0xe6] sm:$0xff]  ;;  %v12238_v31 = vpack.c.bf16 %v9630_v20, %v9629_v0 }
 0x650   : > { %v5640_v36 = vpop.f32.mrb[42].mxu0  ;;  %v6090_v47 = vpop.f32.mrb[42].mxu1  ;;  %12234 = vmatprep.subr.bf16.mxu0 %v21127_v6 }
 0x651   : > { %v5866_v1 = vadd.f32 %v18509_v19, %v5640_v36  ;;  %v5642_v41 = vpop.f32.mrb[43].mxu0  ;;  %v6092_v4 = vpop.f32.mrb[43].mxu1  ;;  %6419 = vmatmul.mubr.f32.gmra.mrb[84].mxu1 %v13523_v23  ;;  %6870 = vmatmul.mubr.f32.gmra.mrb[116].mxu0 %v19031_v13  ;;  %v9631_v19 = vld [vmem:[%s21008_s5 + $0x6c0] sm:$0xff]  ;;  %v9632_v36 = vld [vmem:[%s21008_s5 + $0x6c8] sm:$0xff] }
 0x652   : > { %6423 = vmatprep.mubr.f32.mxu1 %v18495_v61  ;;  %6874 = vmatprep.mubr.f32.mxu0 %v19035_v21  ;;  %v13526_v4 = vld [vmem:[#allocation3 + $0x1b0] sm:$0xff]  ;;  %v12241_v0 = vpack.c.bf16 %v9632_v36, %v9631_v19  ;;  %v21408_v19 = vld [vmem:[#allocation15_spill] sm:$0xff] }
 0x653   : > { %v19038_v43 = vadd.f32 %v6090_v47, %v5866_v1  ;;  %12236 = vmatpush1.bf16.msra.mxu0 %v12235_v30  ;;  %v19050_v47 = vld [vmem:[#allocation3 + $0xee] sm:$0xff] }
 0x654   : > { %v5645_v40 = vpop.f32.mrb[44].mxu0  ;;  %12237 = vmatprep.subr.bf16.mxu0 %v21127_v6  ;;  %v19054_v30 = vld [vmem:[#allocation3 + $0x107] sm:$0xff]  ;;  %v19069_v36 = vld [vmem:[#allocation3 + $0x10f] sm:$0xff] }
 0x655   : > { %21405 = vst [vmem:[#allocation11_spill] sm:$0xff] %v19038_v43  ;;  %v19048_v61 = vadd.f32 %v18531_v50, %v5645_v40  ;;  %v5647_v41 = vpop.f32.mrb[45].mxu0  ;;  %6424 = vmatmul.mubr.f32.gmra.mrb[122].mxu1 %v13526_v4  ;;  %6875 = vmatmul.mubr.f32.gmra.mrb[154].mxu0 %v19050_v47  ;;  %21407 = vst [vmem:[#allocation43_spill] sm:$0xff] %v19054_v30  ;;  %v9633_v50 = vld [vmem:[%s21008_s5 + $0x6d0] sm:$0xff]  ;;  %v9634_v40 = vld [vmem:[%s21008_s5 + $0x6d8] sm:$0xff] }
 0x656   : > { %6428 = vmatprep.mubr.f32.mxu1 %v18505_v35  ;;  %6879 = vmatprep.mubr.f32.mxu0 %v19054_v30  ;;  %v13529_v4 = vld [vmem:[#allocation3 + $0x1c8] sm:$0xff]  ;;  %v12244_v43 = vpack.c.bf16 %v9634_v40, %v9633_v50 }
 0x657   : > { %21406 = vst [vmem:[#allocation9_spill] sm:$0xff] %v19048_v61  ;;  %12239 = vmatpush1.bf16.msra.mxu0 %v12238_v31  ;;  %v19065_v31 = vld [vmem:[#allocation3 + $0x106] sm:$0xff] }
 0x658   : > { %v5650_v20 = vpop.f32.mrb[46].mxu0  ;;  %v6100_v1 = vpop.f32.mrb[46].mxu1  ;;  %12240 = vmatprep.subr.bf16.mxu0 %v21127_v6  ;;  %v19088_v50 = vld [vmem:[#allocation3 + $0x127] sm:$0xff] }
 0x659   : > { %v5876_v35 = vadd.f32 %v18527_v42, %v5650_v20  ;;  %v5652_v23 = vpop.f32.mrb[47].mxu0  ;;  %v6102_v41 = vpop.f32.mrb[47].mxu1  ;;  %6429 = vmatmul.mubr.f32.gmra.mrb[88].mxu1 %v13529_v4  ;;  %6880 = vmatmul.mubr.f32.gmra.mrb[120].mxu0 %v19065_v31  ;;  %v9635_v42 = vld [vmem:[%s21008_s5 + $0x6e0] sm:$0xff]  ;;  %v9636_v20 = vld [vmem:[%s21008_s5 + $0x6e8] sm:$0xff]  ;;  %v13532_v4 = vld [vmem:[#allocation3 + $0x1d0] sm:$0xff]  ;;  %21413 = vst [vmem:[#allocation12_spill] sm:$0xff] %v19088_v50 }
 0x65a   : > { %6433 = vmatprep.mubr.f32.mxu1 %v21408_v19  ;;  %6884 = vmatprep.mubr.f32.mxu0 %v19069_v36  ;;  %v12247_v40 = vpack.c.bf16 %v9636_v20, %v9635_v42  ;;  %v9719_v42 = vld [vmem:[%s21008_s5 + $0x980] sm:$0xff]  ;;  %v9720_v20 = vld [vmem:[%s21008_s5 + $0x988] sm:$0xff] }
 0x65b   : > { %v19072_v61 = vadd.f32 %v6100_v1, %v5876_v35  ;;  %12242 = vmatpush1.bf16.msra.mxu0 %v12241_v0  ;;  %v19084_v1 = vld [vmem:[#allocation3 + $0x10e] sm:$0xff]  ;;  %v21412_v0 = vld [vmem:[#allocation28_spill] sm:$0xff] }
 0x65c   : > { %v5655_v30 = vpop.f32.mrb[48].mxu0  ;;  %12243 = vmatprep.subr.bf16.mxu0 %v21127_v6  ;;  %21411 = vst [vmem:[#allocation44_spill] sm:$0xff] %v19084_v1 }
 0x65d   : > { %21409 = vst [vmem:[#allocation42_spill] sm:$0xff] %v19072_v61  ;;  %v19082_v23 = vadd.f32 %v18546_v15, %v5655_v30  ;;  %v5657_v41 = vpop.f32.mrb[49].mxu0  ;;  %6434 = vmatmul.mubr.f32.gmra.mrb[124].mxu1 %v13532_v4  ;;  %6885 = vmatmul.mubr.f32.gmra.mrb[156].mxu0 %v19084_v1  ;;  %v9637_v15 = vld [vmem:[%s21008_s5 + $0x6f0] sm:$0xff]  ;;  %v9638_v30 = vld [vmem:[%s21008_s5 + $0x6f8] sm:$0xff]  ;;  %v13535_v61 = vld [vmem:[#allocation3 + $0x1e8] sm:$0xff] }
 0x65e   : > { %6438 = vmatprep.mubr.f32.mxu1 %v21412_v0  ;;  %6889 = vmatprep.mubr.f32.mxu0 %v19088_v50  ;;  %v21414_v41 = vld [vmem:[#allocation16_spill] sm:$0xff]  ;;  %v21416_v50 = vld [vmem:[#allocation27_spill] sm:$0xff]  ;;  %v19109_v1 = vld [vmem:[#allocation3 + $0x12f] sm:$0xff] }
 0x65f   : > { %21410 = vst [vmem:[#allocation13_spill] sm:$0xff] %v19082_v23  ;;  %12245 = vmatpush1.bf16.msra.mxu0 %v12244_v43  ;;  %v19099_v43 = vld [vmem:[#allocation3 + $0x126] sm:$0xff] }
 0x660   : > { %v5660_v35 = vpop.f32.mrb[50].mxu0  ;;  %v6110_v19 = vpop.f32.mrb[50].mxu1  ;;  %12246 = vmatprep.subr.bf16.mxu0 %v21127_v6  ;;  %21415 = vst [vmem:[#allocation45_spill] sm:$0xff] %v19099_v43 }
 0x661   : > { %v5886_v4 = vadd.f32 %v21414_v41, %v5660_v35  ;;  %v5662_v0 = vpop.f32.mrb[51].mxu0  ;;  %v6112_v23 = vpop.f32.mrb[51].mxu1  ;;  %6439 = vmatmul.mubr.f32.gmra.mrb[92].mxu1 %v13535_v61  ;;  %6890 = vmatmul.mubr.f32.gmra.mrb[124].mxu0 %v19099_v43  ;;  %v12250_v61 = vpack.c.bf16 %v9638_v30, %v9637_v15  ;;  %v9655_v41 = vld [vmem:[%s21008_s5 + $0x780] sm:$0xff] }
 0x662   : > { %6443 = vmatprep.mubr.f32.mxu1 %v21416_v50  ;;  %6894 = vmatprep.mubr.f32.mxu0 %v19109_v1  ;;  %v9656_v0 = vld [vmem:[%s21008_s5 + $0x788] sm:$0xff]  ;;  %v19121_v50 = vpack.c.bf16 %v9720_v20, %v9719_v42 }
 0x663   : > { %v19112_v23 = vadd.f32 %v6110_v19, %v5886_v4  ;;  %12248 = vmatpush1.bf16.msra.mxu0 %v12247_v40  ;;  %v13538_v4 = vld [vmem:[#allocation3 + $0x1f0] sm:$0xff]  ;;  %v19129_v15 = vld [vmem:[#allocation3 + $0x147] sm:$0xff]  ;;  %v12285_v30 = vpack.c.bf16 %v9656_v0, %v9655_v41 }
 0x664   : > { %v5665_v35 = vpop.f32.mrb[52].mxu0  ;;  %12249 = vmatprep.subr.bf16.mxu0 %v21127_v6  ;;  %v19126_v40 = vld [vmem:[#allocation3 + $0x12e] sm:$0xff] }
 0x665   : > { %21417 = vst [vmem:[#allocation22_spill] sm:$0xff] %v19112_v23  ;;  %v19124_v43 = vadd.f32 %v18567_v3, %v5665_v35  ;;  %v5667_v19 = vpop.f32.mrb[53].mxu0  ;;  %6444 = vmatmul.mubr.f32.gmra.mrb[126].mxu1 %v13538_v4  ;;  %6895 = vmatmul.mubr.f32.gmra.mrb[158].mxu0 %v19126_v40  ;;  %v9657_v3 = vld [vmem:[%s21008_s5 + $0x790] sm:$0xff]  ;;  %v9658_v35 = vld [vmem:[%s21008_s5 + $0x798] sm:$0xff]  ;;  %v19141_v23 = vld [vmem:[#allocation3 + $0x146] sm:$0xff] }
 0x666   : > { %6899 = vmatprep.mubr.f32.mxu0 %v19129_v15  ;;  %11020 = vmatprep.mubr.f32.mxu1 %v18585_v60  ;;  %v19145_v60 = vld [vmem:[#allocation3 + $0x14f] sm:$0xff]  ;;  %v12288_v41 = vpack.c.bf16 %v9658_v35, %v9657_v3  ;;  %v21424_v3 = vld [vmem:[#allocation23_spill] sm:$0xff] }
 0x667   : > { %21418 = vst [vmem:[#allocation15_spill] sm:$0xff] %v19124_v43  ;;  %12251 = vmatpush1.bf16.msra.mxu0 %v12250_v61 }
 0x668   : > { %v5670_v42 = vpop.f32.mrb[54].mxu0  ;;  %v6120_v20 = vpop.f32.mrb[54].mxu1  ;;  %12381 = vmatprep.subr.bf16.mxu0 %v19121_v50 }
 0x669   : > { %v5896_v19 = vadd.f32 %v18565_v51, %v5670_v42  ;;  %v5672_v4 = vpop.f32.mrb[55].mxu0  ;;  %v6122_v43 = vpop.f32.mrb[55].mxu1  ;;  %6900 = vmatmul.mubr.f32.gmra.mrb[160].mxu0 %v19141_v23  ;;  %11021 = vmatmul.mubr.f32.vlgmr.msra.gmra.mrb[128].mxu1 %v18601_v38  ;;  %v9659_v51 = vld [vmem:[%s21008_s5 + $0x7a0] sm:$0xff]  ;;  %v9660_v38 = vld [vmem:[%s21008_s5 + $0x7a8] sm:$0xff] }
 0x66a   : > { %6904 = vmatprep.mubr.f32.mxu0 %v19145_v60  ;;  %11023 = vmatprep.mubr.f32.mxu1 %v18610_v63  ;;  %v19161_v63 = vld [vmem:[#allocation3 + $0x14e] sm:$0xff]  ;;  %v12291_v35 = vpack.c.bf16 %v9660_v38, %v9659_v51 }
 0x66b   : > { %v19149_v61 = vadd.f32 %v6120_v20, %v5896_v19  ;;  %12286 = vmatpush1.bf16.msra.mxu1 %v12285_v30  ;;  %21421 = vst [vmem:[#allocation27_spill] sm:$0xff] %v19161_v63  ;;  %v21422_v30 = vld [vmem:[#allocation31_spill] sm:$0xff]  ;;  %v19165_v20 = vld [vmem:[#allocation3 + $0x167] sm:$0xff]  ;;  %v19181_v51 = vld [vmem:[#allocation3 + $0x16f] sm:$0xff] }
 0x66c   : > { %v5675_v0 = vpop.f32.mrb[56].mxu0  ;;  %12287 = vmatprep.subr.bf16.mxu1 %v21127_v6  ;;  %21423 = vst [vmem:[#allocation31_spill] sm:$0xff] %v19165_v20 }
 0x66d   : > { %21419 = vst [vmem:[#allocation28_spill] sm:$0xff] %v19149_v61  ;;  %v19159_v43 = vadd.f32 %v18598_v37, %v5675_v0  ;;  %v5677_v42 = vpop.f32.mrb[57].mxu0  ;;  %6905 = vmatmul.mubr.f32.gmra.mrb[162].mxu0 %v19161_v63  ;;  %11024 = vmatmul.mubr.f32.gmra.mrb[130].mxu1 %v21422_v30  ;;  %v9661_v37 = vld [vmem:[%s21008_s5 + $0x7b0] sm:$0xff]  ;;  %v9662_v0 = vld [vmem:[%s21008_s5 + $0x7b8] sm:$0xff] }
 0x66e   : > { %6909 = vmatprep.mubr.f32.mxu0 %v19165_v20  ;;  %11026 = vmatprep.mubr.f32.mxu1 %v21424_v3  ;;  %v21425_v42 = vld [vmem:[#allocation21_spill] sm:$0xff]  ;;  %v12294_v3 = vpack.c.bf16 %v9662_v0, %v9661_v37 }
 0x66f   : > { %21420 = vst [vmem:[#allocation16_spill] sm:$0xff] %v19159_v43  ;;  %12289 = vmatpush1.bf16.msra.mxu1 %v12288_v41  ;;  %v19177_v20 = vld [vmem:[#allocation3 + $0x166] sm:$0xff]  ;;  %v21426_v41 = vld [vmem:[#allocation30_spill] sm:$0xff] }
 0x670   : > { %v5680_v19 = vpop.f32.mrb[58].mxu0  ;;  %v6130_v4 = vpop.f32.mrb[58].mxu1  ;;  %12290 = vmatprep.subr.bf16.mxu1 %v21127_v6 }
 0x671   : > { %v5906_v30 = vadd.f32 %v21425_v42, %v5680_v19  ;;  %v5682_v43 = vpop.f32.mrb[59].mxu0  ;;  %v6132_v61 = vpop.f32.mrb[59].mxu1  ;;  %6910 = vmatmul.mubr.f32.gmra.mrb[164].mxu0 %v19177_v20  ;;  %11027 = vmatmul.mubr.f32.gmra.mrb[132].mxu1 %v21426_v41  ;;  %v21428_v19 = vld [vmem:[#allocation26_spill] sm:$0xff] }
 0x672   : > { %6914 = vmatprep.mubr.f32.mxu0 %v19181_v51  ;;  %11029 = vmatprep.mubr.f32.mxu1 %v18651_v48  ;;  %v9663_v61 = vld [vmem:[%s21008_s5 + $0x7c0] sm:$0xff]  ;;  %v9664_v43 = vld [vmem:[%s21008_s5 + $0x7c8] sm:$0xff] }
 0x673   : > { %v19185_v38 = vadd.f32 %v6130_v4, %v5906_v30  ;;  %12292 = vmatpush1.bf16.msra.mxu1 %v12291_v35  ;;  %v19197_v48 = vld [vmem:[#allocation3 + $0x16e] sm:$0xff]  ;;  %v12297_v4 = vpack.c.bf16 %v9664_v43, %v9663_v61 }
 0x674   : > { %v5685_v63 = vpop.f32.mrb[60].mxu0  ;;  %12293 = vmatprep.subr.bf16.mxu1 %v21127_v6  ;;  %v19201_v35 = vld [vmem:[#allocation3 + $0x187] sm:$0xff] }
 0x675   : > { %21427 = vst [vmem:[#allocation23_spill] sm:$0xff] %v19185_v38  ;;  %v19195_v42 = vadd.f32 %v21428_v19, %v5685_v63  ;;  %v5687_v41 = vpop.f32.mrb[61].mxu0  ;;  %6915 = vmatmul.mubr.f32.gmra.mrb[166].mxu0 %v19197_v48  ;;  %11030 = vmatmul.mubr.f32.gmra.mrb[134].mxu1 %v18662_v58  ;;  %v9665_v63 = vld [vmem:[%s21008_s5 + $0x7d0] sm:$0xff]  ;;  %v9666_v58 = vld [vmem:[%s21008_s5 + $0x7d8] sm:$0xff]  ;;  %v21430_v30 = vld [vmem:[#allocation17_spill] sm:$0xff] }
 0x676   : > { %6919 = vmatprep.mubr.f32.mxu0 %v19201_v35  ;;  %11032 = vmatprep.mubr.f32.mxu1 %v18666_v52  ;;  %v19213_v38 = vld [vmem:[#allocation3 + $0x186] sm:$0xff]  ;;  %v19217_v52 = vld [vmem:[#allocation3 + $0x18f] sm:$0xff]  ;;  %v12300_v61 = vpack.c.bf16 %v9666_v58, %v9665_v63 }
 0x677   : > { %21429 = vst [vmem:[#allocation21_spill] sm:$0xff] %v19195_v42  ;;  %12295 = vmatpush1.bf16.msra.mxu1 %v12294_v3 }
 0x678   : > { %v5690_v37 = vpop.f32.mrb[62].mxu0  ;;  %v6140_v0 = vpop.f32.mrb[62].mxu1  ;;  %12296 = vmatprep.subr.bf16.mxu1 %v21127_v6 }
 0x679   : > { %v5916_v19 = vadd.f32 %v21430_v30, %v5690_v37  ;;  %v5692_v41 = vpop.f32.mrb[63].mxu0  ;;  %v6142_v42 = vpop.f32.mrb[63].mxu1  ;;  %6920 = vmatmul.mubr.f32.gmra.mrb[168].mxu0 %v19213_v38  ;;  %11033 = vmatmul.mubr.f32.gmra.mrb[136].mxu1 %v18681_v10  ;;  %v9668_v10 = vld [vmem:[%s21008_s5 + $0x7e8] sm:$0xff]  ;;  %v21432_v37 = vld [vmem:[#allocation18_spill] sm:$0xff] }
 0x67a   : > { %6924 = vmatprep.mubr.f32.mxu0 %v19217_v52  ;;  %11035 = vmatprep.mubr.f32.mxu1 %v18691_v54  ;;  %v9667_v42 = vld [vmem:[%s21008_s5 + $0x7e0] sm:$0xff]  ;;  %v19233_v54 = vld [vmem:[#allocation3 + $0x18e] sm:$0xff] }
 0x67b   : > { %v19221_v3 = vadd.f32 %v6140_v0, %v5916_v19  ;;  %12298 = vmatpush1.bf16.msra.mxu1 %v12297_v4  ;;  %v19237_v4 = vld [vmem:[#allocation3 + $0x1a7] sm:$0xff]  ;;  %v12303_v0 = vpack.c.bf16 %v9668_v10, %v9667_v42  ;;  %v9669_v19 = vld [vmem:[%s21008_s5 + $0x7f0] sm:$0xff] }
 0x67c   : > { %v5695_v43 = vpop.f32.mrb[66].mxu0  ;;  %12299 = vmatprep.subr.bf16.mxu1 %v21127_v6 }
 0x67d   : > { %21431 = vst [vmem:[#allocation30_spill] sm:$0xff] %v19221_v3  ;;  %v19231_v30 = vadd.f32 %v21432_v37, %v5695_v43  ;;  %v5697_v41 = vpop.f32.mrb[67].mxu0  ;;  %6925 = vmatmul.mubr.f32.gmra.mrb[170].mxu0 %v19233_v54  ;;  %11036 = vmatmul.mubr.f32.gmra.mrb[138].mxu1 %v18702_v22  ;;  %v9670_v22 = vld [vmem:[%s21008_s5 + $0x7f8] sm:$0xff]  ;;  %v21434_v43 = vld [vmem:[#allocation14_spill] sm:$0xff]  ;;  %v19249_v3 = vld [vmem:[#allocation3 + $0x1a6] sm:$0xff] }
 0x67e   : > { %6929 = vmatprep.mubr.f32.mxu0 %v19237_v4  ;;  %11038 = vmatprep.mubr.f32.mxu1 %v18706_v27  ;;  %v19253_v27 = vld [vmem:[#allocation3 + $0x1af] sm:$0xff]  ;;  %v12306_v42 = vpack.c.bf16 %v9670_v22, %v9669_v19 }
 0x67f   : > { %21433 = vst [vmem:[#allocation26_spill] sm:$0xff] %v19231_v30  ;;  %12301 = vmatpush1.bf16.msra.mxu1 %v12300_v61 }
 0x680   : > { %v5700_v63 = vpop.f32.mrb[70].mxu0  ;;  %v6150_v58 = vpop.f32.mrb[66].mxu1  ;;  %12302 = vmatprep.subr.bf16.mxu1 %v21127_v6 }
 0x681   : > { %v5926_v37 = vadd.f32 %v21434_v43, %v5700_v63  ;;  %v5702_v41 = vpop.f32.mrb[71].mxu0  ;;  %v6152_v30 = vpop.f32.mrb[67].mxu1  ;;  %6930 = vmatmul.mubr.f32.gmra.mrb[172].mxu0 %v19249_v3  ;;  %11039 = vmatmul.mubr.f32.gmra.mrb[140].mxu1 %v18721_v25  ;;  %v9672_v25 = vld [vmem:[%s21008_s5 + $0x808] sm:$0xff]  ;;  %v21436_v63 = vld [vmem:[#allocation19_spill] sm:$0xff] }
 0x682   : > { %6934 = vmatprep.mubr.f32.mxu0 %v19253_v27  ;;  %11041 = vmatprep.mubr.f32.mxu1 %v18731_v55  ;;  %v9671_v30 = vld [vmem:[%s21008_s5 + $0x800] sm:$0xff]  ;;  %v19269_v55 = vld [vmem:[#allocation3 + $0x1ae] sm:$0xff] }
 0x683   : > { %v19257_v61 = vadd.f32 %v6150_v58, %v5926_v37  ;;  %12304 = vmatpush1.bf16.msra.mxu1 %v12303_v0  ;;  %v19273_v0 = vld [vmem:[#allocation3 + $0x1c7] sm:$0xff]  ;;  %v12309_v58 = vpack.c.bf16 %v9672_v25, %v9671_v30  ;;  %v9673_v37 = vld [vmem:[%s21008_s5 + $0x810] sm:$0xff] }
 0x684   : > { %v5705_v10 = vpop.f32.mrb[74].mxu0  ;;  %12305 = vmatprep.subr.bf16.mxu1 %v21127_v6 }
 0x685   : > { %21435 = vst [vmem:[#allocation17_spill] sm:$0xff] %v19257_v61  ;;  %v19267_v43 = vadd.f32 %v21436_v63, %v5705_v10  ;;  %v5707_v41 = vpop.f32.mrb[75].mxu0  ;;  %6935 = vmatmul.mubr.f32.gmra.mrb[174].mxu0 %v19269_v55  ;;  %11042 = vmatmul.mubr.f32.gmra.mrb[142].mxu1 %v18742_v17  ;;  %v9674_v17 = vld [vmem:[%s21008_s5 + $0x818] sm:$0xff]  ;;  %v21438_v10 = vld [vmem:[#allocation29_spill] sm:$0xff] }
 0x686   : > { %6939 = vmatprep.mubr.f32.mxu0 %v19273_v0  ;;  %11044 = vmatprep.mubr.f32.mxu1 %v18746_v57  ;;  %v19285_v61 = vld [vmem:[#allocation3 + $0x1c6] sm:$0xff]  ;;  %v19289_v57 = vld [vmem:[#allocation3 + $0x1cf] sm:$0xff]  ;;  %v12312_v30 = vpack.c.bf16 %v9674_v17, %v9673_v37 }
 0x687   : > { %21437 = vst [vmem:[#allocation18_spill] sm:$0xff] %v19267_v43  ;;  %12307 = vmatpush1.bf16.msra.mxu1 %v12306_v42 }
 0x688   : > { %v5710_v19 = vpop.f32.mrb[78].mxu0  ;;  %v6160_v22 = vpop.f32.mrb[70].mxu1  ;;  %12308 = vmatprep.subr.bf16.mxu1 %v21127_v6 }
 0x689   : > { %v5936_v63 = vadd.f32 %v21438_v10, %v5710_v19  ;;  %v5712_v41 = vpop.f32.mrb[79].mxu0  ;;  %v6162_v43 = vpop.f32.mrb[71].mxu1  ;;  %6940 = vmatmul.mubr.f32.gmra.mrb[176].mxu0 %v19285_v61  ;;  %11045 = vmatmul.mubr.f32.gmra.mrb[144].mxu1 %v18761_v28  ;;  %v9676_v28 = vld [vmem:[%s21008_s5 + $0x828] sm:$0xff]  ;;  %v21440_v19 = vld [vmem:[#allocation24_spill] sm:$0xff] }
 0x68a   : > { %6944 = vmatprep.mubr.f32.mxu0 %v19289_v57  ;;  %11047 = vmatprep.mubr.f32.mxu1 %v18771_v39  ;;  %v9675_v43 = vld [vmem:[%s21008_s5 + $0x820] sm:$0xff]  ;;  %v19305_v39 = vld [vmem:[#allocation3 + $0x1ce] sm:$0xff] }
 0x68b   : > { %v19293_v42 = vadd.f32 %v6160_v22, %v5936_v63  ;;  %12310 = vmatpush1.bf16.msra.mxu1 %v12309_v58  ;;  %v19309_v58 = vld [vmem:[#allocation3 + $0x1e7] sm:$0xff]  ;;  %v12315_v22 = vpack.c.bf16 %v9676_v28, %v9675_v43  ;;  %v9677_v63 = vld [vmem:[%s21008_s5 + $0x830] sm:$0xff] }
 0x68c   : > { %v5715_v25 = vpop.f32.mrb[82].mxu0  ;;  %12311 = vmatprep.subr.bf16.mxu1 %v21127_v6 }
 0x68d   : > { %21439 = vst [vmem:[#allocation14_spill] sm:$0xff] %v19293_v42  ;;  %v19303_v10 = vadd.f32 %v21440_v19, %v5715_v25  ;;  %v5717_v41 = vpop.f32.mrb[83].mxu0  ;;  %6945 = vmatmul.mubr.f32.gmra.mrb[178].mxu0 %v19305_v39  ;;  %11048 = vmatmul.mubr.f32.gmra.mrb[146].mxu1 %v18782_v62  ;;  %v9678_v62 = vld [vmem:[%s21008_s5 + $0x838] sm:$0xff]  ;;  %v21442_v25 = vld [vmem:[#allocation33_spill] sm:$0xff] }
 0x68e   : > { %6949 = vmatprep.mubr.f32.mxu0 %v19309_v58  ;;  %11050 = vmatprep.mubr.f32.mxu1 %v18786_v33  ;;  %v19321_v42 = vld [vmem:[#allocation3 + $0x1e6] sm:$0xff]  ;;  %v19325_v33 = vld [vmem:[#allocation3 + $0x1ef] sm:$0xff]  ;;  %v12318_v43 = vpack.c.bf16 %v9678_v62, %v9677_v63 }
 0x68f   : > { %21441 = vst [vmem:[#allocation19_spill] sm:$0xff] %v19303_v10  ;;  %12313 = vmatpush1.bf16.msra.mxu1 %v12312_v30 }
 0x690   : > { %v5720_v37 = vpop.f32.mrb[86].mxu0  ;;  %v6170_v17 = vpop.f32.mrb[74].mxu1  ;;  %12314 = vmatprep.subr.bf16.mxu1 %v21127_v6 }
 0x691   : > { %v5946_v19 = vadd.f32 %v21442_v25, %v5720_v37  ;;  %v5722_v41 = vpop.f32.mrb[87].mxu0  ;;  %v6172_v10 = vpop.f32.mrb[75].mxu1  ;;  %6950 = vmatmul.mubr.f32.gmra.mrb[180].mxu0 %v19321_v42  ;;  %11051 = vmatmul.mubr.f32.gmra.mrb[148].mxu1 %v18801_v29  ;;  %v9680_v29 = vld [vmem:[%s21008_s5 + $0x848] sm:$0xff]  ;;  %v21444_v37 = vld [vmem:[#allocation32_spill] sm:$0xff] }
 0x692   : > { %6954 = vmatprep.mubr.f32.mxu0 %v19325_v33  ;;  %11053 = vmatprep.mubr.f32.mxu1 %v18811_v2  ;;  %v9679_v10 = vld [vmem:[%s21008_s5 + $0x840] sm:$0xff]  ;;  %v19341_v2 = vld [vmem:[#allocation3 + $0x1ee] sm:$0xff] }
 0x693   : > { %v19329_v30 = vadd.f32 %v6170_v17, %v5946_v19  ;;  %12316 = vmatpush1.bf16.msra.mxu1 %v12315_v22  ;;  %v19345_v22 = vld [vmem:[#allocation3 + $0x207] sm:$0xff]  ;;  %v12321_v17 = vpack.c.bf16 %v9680_v29, %v9679_v10  ;;  %v9681_v19 = vld [vmem:[%s21008_s5 + $0x850] sm:$0xff] }
 0x694   : > { %v5725_v28 = vpop.f32.mrb[90].mxu0  ;;  %12317 = vmatprep.subr.bf16.mxu1 %v21127_v6 }
 0x695   : > { %21443 = vst [vmem:[#allocation29_spill] sm:$0xff] %v19329_v30  ;;  %v19339_v25 = vadd.f32 %v21444_v37, %v5725_v28  ;;  %v5727_v41 = vpop.f32.mrb[91].mxu0  ;;  %6955 = vmatmul.mubr.f32.gmra.mrb[182].mxu0 %v19341_v2  ;;  %11054 = vmatmul.mubr.f32.gmra.mrb[150].mxu1 %v18822_v9  ;;  %v9682_v9 = vld [vmem:[%s21008_s5 + $0x858] sm:$0xff]  ;;  %v21446_v28 = vld [vmem:[#allocation25_spill] sm:$0xff] }
 0x696   : > { %6959 = vmatprep.mubr.f32.mxu0 %v19345_v22  ;;  %11056 = vmatprep.mubr.f32.mxu1 %v18826_v8  ;;  %v19357_v30 = vld [vmem:[#allocation3 + $0x206] sm:$0xff]  ;;  %v19361_v8 = vld [vmem:[#allocation3 + $0x20f] sm:$0xff]  ;;  %v12324_v10 = vpack.c.bf16 %v9682_v9, %v9681_v19 }
 0x697   : > { %21445 = vst [vmem:[#allocation24_spill] sm:$0xff] %v19339_v25  ;;  %12319 = vmatpush1.bf16.msra.mxu1 %v12318_v43 }
 0x698   : > { %v5730_v63 = vpop.f32.mrb[94].mxu0  ;;  %v6180_v62 = vpop.f32.mrb[78].mxu1  ;;  %12320 = vmatprep.subr.bf16.mxu1 %v21127_v6 }
 0x699   : > { %v5956_v37 = vadd.f32 %v21446_v28, %v5730_v63  ;;  %v5732_v41 = vpop.f32.mrb[95].mxu0  ;;  %v6182_v25 = vpop.f32.mrb[79].mxu1  ;;  %6960 = vmatmul.mubr.f32.gmra.mrb[184].mxu0 %v19357_v30  ;;  %11057 = vmatmul.mubr.f32.gmra.mrb[152].mxu1 %v18841_v46  ;;  %v9684_v46 = vld [vmem:[%s21008_s5 + $0x868] sm:$0xff] }
 0x69a   : > { %6964 = vmatprep.mubr.f32.mxu0 %v19361_v8  ;;  %11059 = vmatprep.mubr.f32.mxu1 %v18845_v44  ;;  %v9683_v25 = vld [vmem:[%s21008_s5 + $0x860] sm:$0xff]  ;;  %v19377_v44 = vld [vmem:[#allocation3 + $0x20e] sm:$0xff] }
 0x69b   : > { %v19365_v43 = vadd.f32 %v6180_v62, %v5956_v37  ;;  %12322 = vmatpush1.bf16.msra.mxu1 %v12321_v17  ;;  %21449 = vst [vmem:[#allocation25_spill] sm:$0xff] %v19377_v44  ;;  %v19381_v17 = vld [vmem:[#allocation3 + $0x227] sm:$0xff]  ;;  %v12327_v19 = vpack.c.bf16 %v9684_v46, %v9683_v25  ;;  %v19395_v25 = vld [vmem:[#allocation3 + $0x22f] sm:$0xff] }
 0x69c   : > { %v5735_v29 = vpop.f32.mrb[98].mxu0  ;;  %12323 = vmatprep.subr.bf16.mxu1 %v21127_v6  ;;  %21450 = vst [vmem:[#allocation46_spill] sm:$0xff] %v19381_v17  ;;  %v13568_v62 = vld [vmem:[#allocation3 + $0x20a] sm:$0xff] }
 0x69d   : > { %21447 = vst [vmem:[#allocation33_spill] sm:$0xff] %v19365_v43  ;;  %v19375_v63 = vadd.f32 %v18838_v18, %v5735_v29  ;;  %v5737_v28 = vpop.f32.mrb[99].mxu0  ;;  %6965 = vmatmul.mubr.f32.gmra.mrb[186].mxu0 %v19377_v44  ;;  %11060 = vmatmul.mubr.f32.gmra.mrb[154].mxu1 %v18856_v14  ;;  %v19384_v41 = vld [vmem:[#allocation3 + $0x226] sm:$0xff]  ;;  %v9685_v18 = vld [vmem:[%s21008_s5 + $0x870] sm:$0xff]  ;;  %v9686_v14 = vld [vmem:[%s21008_s5 + $0x878] sm:$0xff] }
 0x69e   : > { %6969 = vmatprep.mubr.f32.mxu0 %v19381_v17  ;;  %11062 = vmatprep.mubr.f32.mxu1 %v13568_v62  ;;  %v5157_v46 = vld [vmem:[#allocation3 + $0x22a] sm:$0xff]  ;;  %v12330_v43 = vpack.c.bf16 %v9686_v14, %v9685_v18 }
 0x69f   : > { %21448 = vst [vmem:[#allocation32_spill] sm:$0xff] %v19375_v63  ;;  %12325 = vmatpush1.bf16.msra.mxu1 %v12324_v10  ;;  %v13569_v10 = vld [vmem:[#allocation3 + $0x212] sm:$0xff]  ;;  %v9688_v18 = vld [vmem:[%s21008_s5 + $0x888] sm:$0xff] }
 0x6a0   : > { %v5740_v9 = vpop.f32.mrb[102].mxu0  ;;  %v6190_v37 = vpop.f32.mrb[82].mxu1  ;;  %12326 = vmatprep.subr.bf16.mxu1 %v21127_v6  ;;  %v19400_v44 = vld [vmem:[#allocation3 + $0x22e] sm:$0xff] }
 0x6a1   : > { %v5966_v29 = vadd.f32 %v18836_v32, %v5740_v9  ;;  %v5742_v28 = vpop.f32.mrb[103].mxu0  ;;  %v6192_v62 = vpop.f32.mrb[83].mxu1  ;;  %6970 = vmatmul.mubr.f32.gmra.mrb[188].mxu0 %v19384_v41  ;;  %11063 = vmatmul.mubr.f32.gmra.mrb[156].mxu1 %v13569_v10  ;;  %v5158_v32 = vld [vmem:[#allocation3 + $0x232] sm:$0xff]  ;;  %v13570_v14 = vld [vmem:[#allocation3 + $0x49] sm:$0xff]  ;;  %v9723_v10 = vld [vmem:[%s21008_s5 + $0x9a0] sm:$0xff] }
 0x6a2   : > { %6974 = vmatprep.mubr.f32.mxu0 %v19395_v25  ;;  %11065 = vmatprep.mubr.f32.mxu1 %v5157_v46  ;;  %v9721_v9 = vld [vmem:[%s21008_s5 + $0x990] sm:$0xff] }
 0x6a3   : > { %v19398_v63 = vadd.f32 %v6190_v37, %v5966_v29  ;;  %12328 = vmatpush1.bf16.msra.mxu1 %v12327_v19  ;;  %v9722_v19 = vld [vmem:[%s21008_s5 + $0x998] sm:$0xff]  ;;  %v9687_v37 = vld [vmem:[%s21008_s5 + $0x880] sm:$0xff] }
 0x6a4   : > { %v5745_v17 = vpop.f32.mrb[106].mxu0  ;;  %12329 = vmatprep.subr.bf16.mxu1 %v21127_v6  ;;  %v12384_v29 = vpack.c.bf16 %v9722_v19, %v9721_v9  ;;  %v12333_v46 = vpack.c.bf16 %v9688_v18, %v9687_v37  ;;  %v9690_v9 = vld [vmem:[%s21008_s5 + $0x898] sm:$0xff]  ;;  %v9725_v37 = vld [vmem:[%s21008_s5 + $0x9b0] sm:$0xff] }
 0x6a5   : > { %21451 = vst [vmem:[#allocation47_spill] sm:$0xff] %v19398_v63  ;;  %v19407_v28 = vadd.f32 %v18870_v59, %v5745_v17  ;;  %v5747_v62 = vpop.f32.mrb[107].mxu0  ;;  %6975 = vmatmul.mubr.f32.gmra.mrb[190].mxu0 %v19400_v44  ;;  %11066 = vmatmul.mubr.f32.gmra.mrb[158].mxu1 %v5158_v32  ;;  %v13571_v63 = vld [vmem:[#allocation3 + $0x48] sm:$0xff] }
 0x6a6   : > { %7044 = vmatprep.mubr.f32.mxu0 %v13570_v14  ;;  %7607 = vmatprep.mubr.f32.mxu1 %v18883_v7  ;;  %v9724_v7 = vld [vmem:[%s21008_s5 + $0x9a8] sm:$0xff]  ;;  %v21454_v14 = vld [vmem:[#allocation34_spill] sm:$0xff] }
 0x6a7   : > { %21452 = vst [vmem:[#allocation48_spill] sm:$0xff] %v19407_v28  ;;  %12331 = vmatpush1.bf16.msra.mxu1 %v12330_v43  ;;  %v9689_v43 = vld [vmem:[%s21008_s5 + $0x890] sm:$0xff]  ;;  %v12388_v19 = vpack.c.bf16 %v9724_v7, %v9723_v10  ;;  %v9692_v10 = vld [vmem:[%s21008_s5 + $0x8a8] sm:$0xff] }
 0x6a8   : > { %v5750_v59 = vpop.f32.mrb[110].mxu0  ;;  %v6200_v17 = vpop.f32.mrb[86].mxu1  ;;  %12332 = vmatprep.subr.bf16.mxu1 %v21127_v6  ;;  %v12336_v18 = vpack.c.bf16 %v9690_v9, %v9689_v43 }
 0x6a9   : > { %v5976_v32 = vadd.f32 %v18861_v49, %v5750_v59  ;;  %v5752_v62 = vpop.f32.mrb[111].mxu0  ;;  %v6202_v28 = vpop.f32.mrb[87].mxu1  ;;  %7045 = vmatmul.mubr.f32.vlgmr.msra.gmra.mrb[96].mxu0 %v13571_v63 }
 0x6aa   : > { %7608 = vmatmul.mubr.f32.vlgmr.msra.gmra.mrb[160].mxu1 %v18898_v24  ;;  %12383 = vmatpush3.bf16.msra.mxu0 %v19121_v50  ;;  %v13572_v28 = vld [vmem:[#allocation3 + $0x51] sm:$0xff]  ;;  %v21458_v62 = vld [vmem:[#allocation5_spill] sm:$0xff] }
 0x6ab   : > { %v19436_v49 = vadd.f32 %v6200_v17, %v5976_v32  ;;  %7049 = vmatprep.mubr.f32.mxu0 %v13572_v28  ;;  %7612 = vmatprep.mubr.f32.mxu1 %v18902_v45  ;;  %v13573_v50 = vld [vmem:[#allocation3 + $0x50] sm:$0xff]  ;;  %v9726_v17 = vld [vmem:[%s21008_s5 + $0x9b8] sm:$0xff]  ;;  %v9691_v45 = vld [vmem:[%s21008_s5 + $0x8a0] sm:$0xff] }
 0x6ac   : > { %v5755_v63 = vpop.f32.mrb[114].mxu0  ;;  %12385 = vmatprep.subr.bf16.mxu0 %v12384_v29  ;;  %12334 = vmatpush1.bf16.msra.mxu1 %v12333_v46  ;;  %v21456_v46 = vld [vmem:[#allocation4_spill] sm:$0xff]  ;;  %v19456_v32 = vld [vmem:[#allocation3 + $0x69] sm:$0xff]  ;;  %v12392_v9 = vpack.c.bf16 %v9726_v17, %v9725_v37 }
 0x6ad   : > { %21453 = vst [vmem:[#allocation49_spill] sm:$0xff] %v19436_v49  ;;  %v19443_v59 = vadd.f32 %v21454_v14, %v5755_v63  ;;  %v5757_v24 = vpop.f32.mrb[115].mxu0  ;;  %7050 = vmatmul.mubr.f32.gmra.mrb[144].mxu0 %v13573_v50  ;;  %12335 = vmatprep.subr.bf16.mxu1 %v21127_v6  ;;  %21457 = vst [vmem:[#allocation4_spill] sm:$0xff] %v19456_v32  ;;  %v9727_v28 = vld [vmem:[%s21008_s5 + $0x9c0] sm:$0xff]  ;;  %v12339_v63 = vpack.c.bf16 %v9692_v10, %v9691_v45  ;;  %v21459_v14 = vld [vmem:[#allocation35_spill] sm:$0xff] }
 0x6ae   : > { %7613 = vmatmul.mubr.f32.gmra.mrb[162].mxu1 %v21456_v46  ;;  %7054 = vmatprep.mubr.f32.mxu0 %v19456_v32  ;;  %v9693_v37 = vld [vmem:[%s21008_s5 + $0x8b0] sm:$0xff]  ;;  %v21461_v17 = vld [vmem:[#allocation36_spill] sm:$0xff] }
 0x6af   : > { %21455 = vst [vmem:[#allocation34_spill] sm:$0xff] %v19443_v59  ;;  %7617 = vmatprep.mubr.f32.mxu1 %v21458_v62  ;;  %12387 = vmatpush3.bf16.msra.mxu0 %v12384_v29  ;;  %v19464_v59 = vld [vmem:[#allocation3 + $0x68] sm:$0xff]  ;;  %v19478_v45 = vld [vmem:[#allocation3 + $0x71] sm:$0xff] }
 0x6b0   : > { %v5760_v7 = vpop.f32.mrb[118].mxu0  ;;  %v6210_v43 = vpop.f32.mrb[90].mxu1  ;;  %12389 = vmatprep.subr.bf16.mxu0 %v12388_v19  ;;  %12337 = vmatpush1.bf16.msra.mxu1 %v12336_v18  ;;  %21460 = vst [vmem:[#allocation5_spill] sm:$0xff] %v19464_v59  ;;  %v9728_v29 = vld [vmem:[%s21008_s5 + $0x9c8] sm:$0xff]  ;;  %v9694_v18 = vld [vmem:[%s21008_s5 + $0x8b8] sm:$0xff]  ;;  %v19490_v32 = vld [vmem:[#allocation3 + $0x70] sm:$0xff] }
 0x6b1   : > { %v5986_v24 = vadd.f32 %v21459_v14, %v5760_v7  ;;  %v5762_v50 = vpop.f32.mrb[119].mxu0  ;;  %v6212_v46 = vpop.f32.mrb[91].mxu1  ;;  %7055 = vmatmul.mubr.f32.gmra.mrb[100].mxu0 %v19464_v59  ;;  %12338 = vmatprep.subr.bf16.mxu1 %v21127_v6  ;;  %v21463_v62 = vld [vmem:[#allocation39_spill] sm:$0xff]  ;;  %v12396_v14 = vpack.c.bf16 %v9728_v29, %v9727_v28  ;;  %v21464_v59 = vld [vmem:[#allocation37_spill] sm:$0xff]  ;;  %v21467_v28 = vld [vmem:[#allocation6_spill] sm:$0xff] }
 0x6b2   : > { %7618 = vmatmul.mubr.f32.gmra.mrb[164].mxu1 %v21461_v17  ;;  %7059 = vmatprep.mubr.f32.mxu0 %v19478_v45  ;;  %v12342_v50 = vpack.c.bf16 %v9694_v18, %v9693_v37  ;;  %v9695_v46 = vld [vmem:[%s21008_s5 + $0x8c0] sm:$0xff]  ;;  %21466 = vst [vmem:[#allocation39_spill] sm:$0xff] %v19490_v32 }
 0x6b3   : > { %v19481_v10 = vadd.f32 %v6210_v43, %v5986_v24  ;;  %7622 = vmatprep.mubr.f32.mxu1 %v21463_v62  ;;  %12391 = vmatpush3.bf16.msra.mxu0 %v12388_v19  ;;  %v9729_v19 = vld [vmem:[%s21008_s5 + $0x9d0] sm:$0xff]  ;;  %v9730_v43 = vld [vmem:[%s21008_s5 + $0x9d8] sm:$0xff] }
 0x6b4   : > { %v5765_v7 = vpop.f32.mrb[122].mxu0  ;;  %12393 = vmatprep.subr.bf16.mxu0 %v12392_v9  ;;  %12340 = vmatpush1.bf16.msra.mxu1 %v12339_v63  ;;  %v21469_v63 = vld [vmem:[#allocation8_spill] sm:$0xff]  ;;  %v12400_v37 = vpack.c.bf16 %v9730_v43, %v9729_v19  ;;  %v9697_v62 = vld [vmem:[%s21008_s5 + $0x8d0] sm:$0xff] }
 0x6b5   : > { %21462 = vst [vmem:[#allocation35_spill] sm:$0xff] %v19481_v10  ;;  %v19488_v17 = vadd.f32 %v21464_v59, %v5765_v7  ;;  %v5767_v49 = vpop.f32.mrb[123].mxu0  ;;  %7060 = vmatmul.mubr.f32.gmra.mrb[146].mxu0 %v19490_v32  ;;  %12341 = vmatprep.subr.bf16.mxu1 %v21127_v6  ;;  %v9696_v59 = vld [vmem:[%s21008_s5 + $0x8c8] sm:$0xff]  ;;  %v21470_v7 = vld [vmem:[#allocation7_spill] sm:$0xff] }
 0x6b6   : > { %7623 = vmatmul.mubr.f32.gmra.mrb[166].mxu1 %v21467_v28  ;;  %v19504_v49 = vld [vmem:[#allocation3 + $0x89] sm:$0xff]  ;;  %v12345_v18 = vpack.c.bf16 %v9696_v59, %v9695_v46 }
 0x6b7   : > { %21465 = vst [vmem:[#allocation36_spill] sm:$0xff] %v19488_v17  ;;  %21468 = vst [vmem:[#allocation37_spill] sm:$0xff] %v19504_v49  ;;  %7064 = vmatprep.mubr.f32.mxu0 %v19504_v49  ;;  %7627 = vmatprep.mubr.f32.mxu1 %v21469_v63  ;;  %v19512_v32 = vld [vmem:[#allocation3 + $0x88] sm:$0xff] }
 0x6b8   : > { %12395 = vmatpush3.bf16.msra.mxu0 %v12392_v9  ;;  %v5770_v24 = vpop.f32.mrb[126].mxu0  ;;  %v6220_v29 = vpop.f32.mrb[94].mxu1  ;;  %12343 = vmatpush1.bf16.msra.mxu1 %v12342_v50  ;;  %21471 = vst [vmem:[#allocation6_spill] sm:$0xff] %v19512_v32  ;;  %v9698_v9 = vld [vmem:[%s21008_s5 + $0x8d8] sm:$0xff]  ;;  %v9731_v50 = vld [vmem:[%s21008_s5 + $0x9e0] sm:$0xff]  ;;  %v9732_v46 = vld [vmem:[%s21008_s5 + $0x9e8] sm:$0xff] }
 0x6b9   : > { %12397 = vmatprep.subr.bf16.mxu0 %v12396_v14  ;;  %v5996_v17 = vadd.f32 %v21470_v7, %v5770_v24  ;;  %v5772_v28 = vpop.f32.mrb[127].mxu0  ;;  %v6222_v10 = vpop.f32.mrb[95].mxu1  ;;  %7065 = vmatmul.mubr.f32.gmra.mrb[104].mxu0 %v19512_v32  ;;  %v12348_v63 = vpack.c.bf16 %v9698_v9, %v9697_v62  ;;  %v9699_v24 = vld [vmem:[%s21008_s5 + $0x8e0] sm:$0xff]  ;;  %v12404_v7 = vpack.c.bf16 %v9732_v46, %v9731_v50  ;;  %v21476_v46 = vld [vmem:[#allocation38_spill] sm:$0xff] }
 0x6ba   : > { %12344 = vmatprep.subr.bf16.mxu1 %v21127_v6  ;;  %7628 = vmatmul.mubr.f32.gmra.mrb[168].mxu1 %v18963_v56  ;;  %v19526_v10 = vld [vmem:[#allocation3 + $0x91] sm:$0xff]  ;;  %v21474_v56 = vld [vmem:[#allocation20_spill] sm:$0xff] }
 0x6bb   : > { %21472 = vst [vmem:[#allocation8_spill] sm:$0xff] %v19526_v10  ;;  %7069 = vmatprep.mubr.f32.mxu0 %v19526_v10  ;;  %v19529_v19 = vadd.f32 %v6220_v29, %v5996_v17  ;;  %7632 = vmatprep.mubr.f32.mxu1 %v18967_v16  ;;  %v19536_v10 = vld [vmem:[#allocation3 + $0x90] sm:$0xff]  ;;  %v9700_v16 = vld [vmem:[%s21008_s5 + $0x8e8] sm:$0xff]  ;;  %v9734_v17 = vld [vmem:[%s21008_s5 + $0x9f8] sm:$0xff] }
 0x6bc   : > { %12399 = vmatpush3.bf16.msra.mxu0 %v12396_v14  ;;  %v6290_v43 = vpop.f32.mrb[32].mxu1  ;;  %v10942_v59 = vpop.f32.mrb[64].mxu0  ;;  %12346 = vmatpush1.bf16.msra.mxu1 %v12345_v18  ;;  %v9733_v14 = vld [vmem:[%s21008_s5 + $0x9f0] sm:$0xff]  ;;  %v12351_v9 = vpack.c.bf16 %v9700_v16, %v9699_v24 }
 0x6bd   : > { %21473 = vst [vmem:[#allocation7_spill] sm:$0xff] %v19529_v19  ;;  %12401 = vmatprep.subr.bf16.mxu0 %v12400_v37  ;;  %v12556_v28 = vadd.f32 %v6290_v43, %v21474_v56  ;;  %v6292_v32 = vpop.f32.mrb[33].mxu1  ;;  %v6515_v49 = vpop.f32.mrb[65].mxu0  ;;  %7070 = vmatmul.mubr.f32.gmra.mrb[148].mxu0 %v19536_v10  ;;  %v12408_v50 = vpack.c.bf16 %v9734_v17, %v9733_v14  ;;  %v19557_v19 = vld [vmem:[#allocation3 + $0xa8] sm:$0xff] }
 0x6be   : > { %12347 = vmatprep.subr.bf16.mxu1 %v21127_v6  ;;  %7633 = vmatmul.mubr.f32.gmra.mrb[170].mxu1 %v18982_v12  ;;  %v19550_v32 = vld [vmem:[#allocation3 + $0xa9] sm:$0xff] }
 0x6bf   : > { %7074 = vmatprep.mubr.f32.mxu0 %v19550_v32  ;;  %v19553_v29 = vadd.f32 %v12556_v28, %v6515_v49  ;;  %7637 = vmatprep.mubr.f32.mxu1 %v18986_v5  ;;  %v9701_v5 = vld [vmem:[%s21008_s5 + $0x8f0] sm:$0xff]  ;;  %v9702_v49 = vld [vmem:[%s21008_s5 + $0x8f8] sm:$0xff]  ;;  %v21478_v14 = vld [vmem:[#allocation41_spill] sm:$0xff] }
 0x6c0   : > { %12403 = vmatpush3.bf16.msra.mxu0 %v12400_v37  ;;  %v6295_v18 = vpop.f32.mrb[96].mxu1  ;;  %v10945_v62 = vpop.f32.mrb[128].mxu0  ;;  %12349 = vmatpush1.bf16.msra.mxu1 %v12348_v63  ;;  %v19568_v37 = vld [vmem:[#allocation3 + $0xb1] sm:$0xff]  ;;  %v12354_v16 = vpack.c.bf16 %v9702_v49, %v9701_v5  ;;  %v21480_v49 = vld [vmem:[#allocation40_spill] sm:$0xff] }
 0x6c1   : > { %21475 = vst [vmem:[#allocation20_spill] sm:$0xff] %v19553_v29  ;;  %12405 = vmatprep.subr.bf16.mxu0 %v12404_v7  ;;  %v6296_v43 = vadd.f32 %v6295_v18, %v21476_v46  ;;  %v6525_v56 = vpop.f32.mrb[129].mxu0  ;;  %7075 = vmatmul.mubr.f32.gmra.mrb[108].mxu0 %v19557_v19  ;;  %v6297_v12 = vpop.f32.mrb[97].mxu1 }
 0x6c2   : > { %12350 = vmatprep.subr.bf16.mxu1 %v21127_v6  ;;  %7638 = vmatmul.mubr.f32.gmra.mrb[172].mxu1 %v18997_v34  ;;  %v19577_v34 = vld [vmem:[#allocation3 + $0xb0] sm:$0xff] }
 0x6c3   : > { %7079 = vmatprep.mubr.f32.mxu0 %v19568_v37  ;;  %v19571_v63 = vadd.f32 %v10942_v59, %v6296_v43  ;;  %7642 = vmatprep.mubr.f32.mxu1 %v19001_v11  ;;  %v9703_v11 = vld [vmem:[%s21008_s5 + $0x900] sm:$0xff]  ;;  %v9704_v59 = vld [vmem:[%s21008_s5 + $0x908] sm:$0xff] }
 0x6c4   : > { %12407 = vmatpush3.bf16.msra.mxu0 %v12404_v7  ;;  %v6300_v24 = vpop.f32.mrb[36].mxu1  ;;  %v19574_v28 = vpop.f32.mrb[68].mxu0  ;;  %12352 = vmatpush1.bf16.msra.mxu1 %v12351_v9  ;;  %v19588_v7 = vld [vmem:[#allocation3 + $0xc9] sm:$0xff]  ;;  %v12357_v5 = vpack.c.bf16 %v9704_v59, %v9703_v11 }
 0x6c5   : > { %21477 = vst [vmem:[#allocation38_spill] sm:$0xff] %v19571_v63  ;;  %12409 = vmatprep.subr.bf16.mxu0 %v12408_v50  ;;  %v12557_v17 = vadd.f32 %v6300_v24, %v21478_v14  ;;  %v6302_v18 = vpop.f32.mrb[37].mxu1  ;;  %v6535_v46 = vpop.f32.mrb[69].mxu0  ;;  %7080 = vmatmul.mubr.f32.gmra.mrb[150].mxu0 %v19577_v34  ;;  %v19620_v63 = vld [vmem:[#allocation3 + $0xd0] sm:$0xff] }
 0x6c6   : > { %12353 = vmatprep.subr.bf16.mxu1 %v21127_v6  ;;  %7643 = vmatmul.mubr.f32.gmra.mrb[174].mxu1 %v19016_v53  ;;  %v19598_v53 = vld [vmem:[#allocation3 + $0xc8] sm:$0xff] }
 0x6c7   : > { %7084 = vmatprep.mubr.f32.mxu0 %v19588_v7  ;;  %v19591_v9 = vadd.f32 %v12557_v17, %v6525_v56  ;;  %7647 = vmatprep.mubr.f32.mxu1 %v19020_v26  ;;  %v9705_v26 = vld [vmem:[%s21008_s5 + $0x910] sm:$0xff] }
 0x6c8   : > { %12411 = vmatpush3.bf16.msra.mxu0 %v12408_v50  ;;  %v6305_v43 = vpop.f32.mrb[98].mxu1  ;;  %v19594_v12 = vpop.f32.mrb[130].mxu0  ;;  %12355 = vmatpush1.bf16.msra.mxu1 %v12354_v16  ;;  %v9706_v50 = vld [vmem:[%s21008_s5 + $0x918] sm:$0xff] }
 0x6c9   : > { %21479 = vst [vmem:[#allocation41_spill] sm:$0xff] %v19591_v9  ;;  %12412 = vmatprep.subr.bf16.mxu0 %v21127_v6  ;;  %v6306_v24 = vadd.f32 %v6305_v43, %v21480_v49  ;;  %v6545_v14 = vpop.f32.mrb[131].mxu0  ;;  %7085 = vmatmul.mubr.f32.gmra.mrb[112].mxu0 %v19598_v53  ;;  %v6307_v18 = vpop.f32.mrb[99].mxu1  ;;  %v19609_v56 = vld [vmem:[#allocation3 + $0xd1] sm:$0xff]  ;;  %v12360_v59 = vpack.c.bf16 %v9706_v50, %v9705_v26 }
 0x6ca   : > { %12356 = vmatprep.subr.bf16.mxu1 %v21127_v6  ;;  %7648 = vmatmul.mubr.f32.gmra.mrb[176].mxu1 %v19031_v13  ;;  %v21482_v43 = vld [vmem:[#allocation10_spill] sm:$0xff]  ;;  %v9707_v13 = vld [vmem:[%s21008_s5 + $0x920] sm:$0xff] }
 0x6cb   : > { %7089 = vmatprep.mubr.f32.mxu0 %v19609_v56  ;;  %v19612_v16 = vadd.f32 %v10945_v62, %v6306_v24  ;;  %7652 = vmatprep.mubr.f32.mxu1 %v19035_v21  ;;  %21483 = vst [vmem:[#allocation10_spill] sm:$0xff] %v19620_v63  ;;  %v9708_v21 = vld [vmem:[%s21008_s5 + $0x928] sm:$0xff]  ;;  %v21486_v24 = vld [vmem:[#allocation43_spill] sm:$0xff] }
 0x6cc   : > { %v6310_v17 = vpop.f32.mrb[40].mxu1  ;;  %v19615_v11 = vpop.f32.mrb[72].mxu0  ;;  %12358 = vmatpush1.bf16.msra.mxu1 %v12357_v5  ;;  %v19631_v62 = vld [vmem:[#allocation3 + $0xe9] sm:$0xff] }
 0x6cd   : > { %21481 = vst [vmem:[#allocation40_spill] sm:$0xff] %v19612_v16  ;;  %v12558_v49 = vadd.f32 %v6310_v17, %v21482_v43  ;;  %v6312_v18 = vpop.f32.mrb[41].mxu1  ;;  %v19618_v9 = vpop.f32.mrb[73].mxu0  ;;  %7090 = vmatmul.mubr.f32.gmra.mrb[152].mxu0 %v19620_v63  ;;  %12359 = vmatprep.subr.bf16.mxu1 %v21127_v6  ;;  %21484 = vst [vmem:[#allocation50_spill] sm:$0xff] %v19631_v62  ;;  %v12363_v17 = vpack.c.bf16 %v9708_v21, %v9707_v13  ;;  %v21487_v43 = vld [vmem:[#allocation11_spill] sm:$0xff]  ;;  %v19642_v63 = vld [vmem:[#allocation3 + $0xe8] sm:$0xff] }
 0x6ce   : > { %7653 = vmatmul.mubr.f32.gmra.mrb[178].mxu1 %v19050_v47  ;;  %7094 = vmatprep.mubr.f32.mxu0 %v19631_v62  ;;  %21488 = vst [vmem:[#allocation43_spill] sm:$0xff] %v19642_v63  ;;  %v9709_v47 = vld [vmem:[%s21008_s5 + $0x930] sm:$0xff]  ;;  %v19687_v62 = vld [vmem:[#allocation3 + $0x108] sm:$0xff] }
 0x6cf   : > { %v19634_v5 = vadd.f32 %v12558_v49, %v6535_v46  ;;  %7657 = vmatprep.mubr.f32.mxu1 %v21486_v24  ;;  %v9710_v46 = vld [vmem:[%s21008_s5 + $0x938] sm:$0xff]  ;;  %v21491_v24 = vld [vmem:[#allocation9_spill] sm:$0xff] }
 0x6d0   : > { %v6315_v26 = vpop.f32.mrb[100].mxu1  ;;  %v19637_v50 = vpop.f32.mrb[132].mxu0  ;;  %12361 = vmatpush1.bf16.msra.mxu1 %v12360_v59  ;;  %v19653_v59 = vld [vmem:[#allocation3 + $0xf1] sm:$0xff]  ;;  %v12366_v21 = vpack.c.bf16 %v9710_v46, %v9709_v47  ;;  %v21495_v46 = vld [vmem:[#allocation12_spill] sm:$0xff] }
 0x6d1   : > { %21485 = vst [vmem:[#allocation51_spill] sm:$0xff] %v19634_v5  ;;  %v6316_v18 = vadd.f32 %v6315_v26, %v21487_v43  ;;  %v6317_v16 = vpop.f32.mrb[101].mxu1  ;;  %v19640_v29 = vpop.f32.mrb[133].mxu0  ;;  %7095 = vmatmul.mubr.f32.gmra.mrb[116].mxu0 %v19642_v63  ;;  %12362 = vmatprep.subr.bf16.mxu1 %v21127_v6  ;;  %21489 = vst [vmem:[#allocation11_spill] sm:$0xff] %v19653_v59 }
 0x6d2   : > { %7658 = vmatmul.mubr.f32.gmra.mrb[180].mxu1 %v19065_v31  ;;  %7099 = vmatprep.mubr.f32.mxu0 %v19653_v59  ;;  %v19665_v31 = vld [vmem:[#allocation3 + $0xf0] sm:$0xff]  ;;  %21497 = vst [vmem:[#allocation12_spill] sm:$0xff] %v19687_v62 }
 0x6d3   : > { %v19657_v16 = vadd.f32 %v19574_v28, %v6316_v18  ;;  %7662 = vmatprep.mubr.f32.mxu1 %v19069_v36  ;;  %21492 = vst [vmem:[#allocation9_spill] sm:$0xff] %v19665_v31  ;;  %v9711_v36 = vld [vmem:[%s21008_s5 + $0x940] sm:$0xff]  ;;  %v9712_v28 = vld [vmem:[%s21008_s5 + $0x948] sm:$0xff] }
 0x6d4   : > { %v6320_v49 = vpop.f32.mrb[44].mxu1  ;;  %v19660_v13 = vpop.f32.mrb[76].mxu0  ;;  %12364 = vmatpush1.bf16.msra.mxu1 %v12363_v17  ;;  %v21493_v17 = vld [vmem:[#allocation44_spill] sm:$0xff]  ;;  %v19676_v18 = vld [vmem:[#allocation3 + $0x109] sm:$0xff] }
 0x6d5   : > { %21490 = vst [vmem:[#allocation52_spill] sm:$0xff] %v19657_v16  ;;  %v12559_v26 = vadd.f32 %v6320_v49, %v21491_v24  ;;  %v6322_v43 = vpop.f32.mrb[45].mxu1  ;;  %v19663_v5 = vpop.f32.mrb[77].mxu0  ;;  %7100 = vmatmul.mubr.f32.gmra.mrb[154].mxu0 %v19665_v31  ;;  %12365 = vmatprep.subr.bf16.mxu1 %v21127_v6  ;;  %v21496_v16 = vld [vmem:[#allocation42_spill] sm:$0xff] }
 0x6d6   : > { %7663 = vmatmul.mubr.f32.gmra.mrb[182].mxu1 %v21493_v17  ;;  %7104 = vmatprep.mubr.f32.mxu0 %v19676_v18  ;;  %v12369_v43 = vpack.c.bf16 %v9712_v28, %v9711_v36 }
 0x6d7   : > { %v19679_v47 = vadd.f32 %v12559_v26, %v6545_v14  ;;  %7667 = vmatprep.mubr.f32.mxu1 %v21495_v46  ;;  %v9713_v14 = vld [vmem:[%s21008_s5 + $0x950] sm:$0xff]  ;;  %v21498_v26 = vld [vmem:[#allocation45_spill] sm:$0xff] }
 0x6d8   : > { %v6325_v49 = vpop.f32.mrb[102].mxu1  ;;  %v19682_v24 = vpop.f32.mrb[134].mxu0  ;;  %12367 = vmatpush1.bf16.msra.mxu1 %v12366_v21  ;;  %v9714_v21 = vld [vmem:[%s21008_s5 + $0x958] sm:$0xff]  ;;  %v21500_v46 = vld [vmem:[#allocation13_spill] sm:$0xff] }
 0x6d9   : > { %21494 = vst [vmem:[#allocation44_spill] sm:$0xff] %v19679_v47  ;;  %v6326_v31 = vadd.f32 %v6325_v49, %v21496_v16  ;;  %v6327_v59 = vpop.f32.mrb[103].mxu1  ;;  %v19685_v63 = vpop.f32.mrb[135].mxu0  ;;  %7105 = vmatmul.mubr.f32.gmra.mrb[120].mxu0 %v19687_v62  ;;  %12368 = vmatprep.subr.bf16.mxu1 %v21127_v6  ;;  %v19698_v16 = vld [vmem:[#allocation3 + $0x111] sm:$0xff]  ;;  %v12372_v17 = vpack.c.bf16 %v9714_v21, %v9713_v14 }
 0x6da   : > { %7668 = vmatmul.mubr.f32.gmra.mrb[184].mxu1 %v21498_v26  ;;  %7109 = vmatprep.mubr.f32.mxu0 %v19698_v16  ;;  %v19710_v26 = vld [vmem:[#allocation3 + $0x110] sm:$0xff] }
 0x6db   : > { %v19702_v59 = vadd.f32 %v19594_v12, %v6326_v31  ;;  %7672 = vmatprep.mubr.f32.mxu1 %v19109_v1  ;;  %21501 = vst [vmem:[#allocation45_spill] sm:$0xff] %v19710_v26  ;;  %v9715_v1 = vld [vmem:[%s21008_s5 + $0x960] sm:$0xff]  ;;  %v9716_v12 = vld [vmem:[%s21008_s5 + $0x968] sm:$0xff] }
 0x6dc   : > { %v6330_v36 = vpop.f32.mrb[48].mxu1  ;;  %v19705_v28 = vpop.f32.mrb[80].mxu0  ;;  %12370 = vmatpush1.bf16.msra.mxu1 %v12369_v43  ;;  %v19721_v31 = vld [vmem:[#allocation3 + $0x129] sm:$0xff]  ;;  %v12375_v21 = vpack.c.bf16 %v9716_v12, %v9715_v1 }
 0x6dd   : > { %21499 = vst [vmem:[#allocation42_spill] sm:$0xff] %v19702_v59  ;;  %v12560_v49 = vadd.f32 %v6330_v36, %v21500_v46  ;;  %v6332_v47 = vpop.f32.mrb[49].mxu1  ;;  %v19708_v62 = vpop.f32.mrb[81].mxu0  ;;  %7110 = vmatmul.mubr.f32.gmra.mrb[156].mxu0 %v19710_v26  ;;  %12371 = vmatprep.subr.bf16.mxu1 %v21127_v6  ;;  %v21503_v36 = vld [vmem:[#allocation22_spill] sm:$0xff] }
 0x6de   : > { %7673 = vmatmul.mubr.f32.gmra.mrb[186].mxu1 %v19126_v40  ;;  %7114 = vmatprep.mubr.f32.mxu0 %v19721_v31  ;;  %v19733_v40 = vld [vmem:[#allocation3 + $0x128] sm:$0xff] }
 0x6df   : > { %v19725_v47 = vadd.f32 %v12560_v49, %v19618_v9  ;;  %7677 = vmatprep.mubr.f32.mxu1 %v19129_v15  ;;  %21504 = vst [vmem:[#allocation22_spill] sm:$0xff] %v19733_v40  ;;  %v9717_v15 = vld [vmem:[%s21008_s5 + $0x970] sm:$0xff]  ;;  %v9718_v9 = vld [vmem:[%s21008_s5 + $0x978] sm:$0xff] }
 0x6e0   : > { %v6335_v43 = vpop.f32.mrb[104].mxu1  ;;  %v19728_v14 = vpop.f32.mrb[136].mxu0  ;;  %12373 = vmatpush1.bf16.msra.mxu1 %v12372_v17  ;;  %v19744_v17 = vld [vmem:[#allocation3 + $0x131] sm:$0xff]  ;;  %v12378_v12 = vpack.c.bf16 %v9718_v9, %v9717_v15  ;;  %v21511_v9 = vld [vmem:[#allocation28_spill] sm:$0xff] }
 0x6e1   : > { %21502 = vst [vmem:[#allocation13_spill] sm:$0xff] %v19725_v47  ;;  %v6336_v46 = vadd.f32 %v6335_v43, %v21503_v36  ;;  %v6337_v59 = vpop.f32.mrb[105].mxu1  ;;  %v19731_v26 = vpop.f32.mrb[137].mxu0  ;;  %7115 = vmatmul.mubr.f32.gmra.mrb[124].mxu0 %v19733_v40  ;;  %12374 = vmatprep.subr.bf16.mxu1 %v21127_v6  ;;  %v21506_v43 = vld [vmem:[#allocation15_spill] sm:$0xff] }
 0x6e2   : > { %7678 = vmatmul.mubr.f32.gmra.mrb[188].mxu1 %v19141_v23  ;;  %7119 = vmatprep.mubr.f32.mxu0 %v19744_v17  ;;  %v19756_v23 = vld [vmem:[#allocation3 + $0x130] sm:$0xff] }
 0x6e3   : > { %v19748_v59 = vadd.f32 %v19615_v11, %v6336_v46  ;;  %7682 = vmatprep.mubr.f32.mxu1 %v19145_v60  ;;  %21507 = vst [vmem:[#allocation15_spill] sm:$0xff] %v19756_v23  ;;  %v21508_v11 = vld [vmem:[#allocation27_spill] sm:$0xff]  ;;  %v19761_v46 = vld [vmem:[#allocation3 + $0x149] sm:$0xff] }
 0x6e4   : > { %v6340_v49 = vpop.f32.mrb[52].mxu1  ;;  %v19751_v1 = vpop.f32.mrb[84].mxu0  ;;  %12376 = vmatpush1.bf16.msra.mxu1 %v12375_v21  ;;  %v21510_v21 = vld [vmem:[#allocation31_spill] sm:$0xff] }
 0x6e5   : > { %21505 = vst [vmem:[#allocation53_spill] sm:$0xff] %v19748_v59  ;;  %v12561_v36 = vadd.f32 %v6340_v49, %v21506_v43  ;;  %v6342_v47 = vpop.f32.mrb[53].mxu1  ;;  %v19754_v40 = vpop.f32.mrb[85].mxu0  ;;  %7120 = vmatmul.mubr.f32.gmra.mrb[158].mxu0 %v19756_v23  ;;  %12377 = vmatprep.subr.bf16.mxu1 %v21127_v6  ;;  %v19773_v23 = vld [vmem:[#allocation3 + $0x148] sm:$0xff] }
 0x6e6   : > { %7683 = vmatmul.mubr.f32.gmra.mrb[190].mxu1 %v21508_v11  ;;  %7124 = vmatprep.mubr.f32.mxu0 %v19761_v46  ;;  %v19777_v11 = vld [vmem:[#allocation3 + $0x151] sm:$0xff] }
 0x6e7   : > { %v19765_v60 = vadd.f32 %v12561_v36, %v19640_v29  ;;  %7687 = vmatprep.mubr.f32.mxu1 %v21510_v21  ;;  %v21513_v21 = vld [vmem:[#allocation16_spill] sm:$0xff] }
 0x6e8   : > { %v6345_v47 = vpop.f32.mrb[106].mxu1  ;;  %v19768_v15 = vpop.f32.mrb[138].mxu0  ;;  %12379 = vmatpush1.bf16.msra.mxu1 %v12378_v12 }
 0x6e9   : > { %21509 = vst [vmem:[#allocation27_spill] sm:$0xff] %v19765_v60  ;;  %v6346_v49 = vadd.f32 %v6345_v47, %v21511_v9  ;;  %v6347_v43 = vpop.f32.mrb[107].mxu1  ;;  %v19771_v59 = vpop.f32.mrb[139].mxu0  ;;  %7125 = vmatmul.mubr.f32.gmra.mrb[160].mxu0 %v19773_v23  ;;  %v19789_v60 = vld [vmem:[#allocation3 + $0x150] sm:$0xff] }
 0x6ea   : > { %7688 = vmatmul.mubr.f32.gmra.mrb[192].mxu1 %v19177_v20  ;;  %7129 = vmatprep.mubr.f32.mxu0 %v19777_v11  ;;  %21514 = vst [vmem:[#allocation28_spill] sm:$0xff] %v19789_v60  ;;  %v19793_v20 = vld [vmem:[#allocation3 + $0x169] sm:$0xff] }
 0x6eb   : > { %v19781_v29 = vadd.f32 %v19637_v50, %v6346_v49  ;;  %7692 = vmatprep.mubr.f32.mxu1 %v19181_v51 }
 0x6ec   : > { %v6350_v12 = vpop.f32.mrb[56].mxu1  ;;  %v19784_v36 = vpop.f32.mrb[88].mxu0 }
 0x6ed   : > { %21512 = vst [vmem:[#allocation31_spill] sm:$0xff] %v19781_v29  ;;  %v12562_v47 = vadd.f32 %v6350_v12, %v21513_v21  ;;  %v6352_v9 = vpop.f32.mrb[57].mxu1  ;;  %v19787_v43 = vpop.f32.mrb[89].mxu0  ;;  %7130 = vmatmul.mubr.f32.gmra.mrb[162].mxu0 %v19789_v60  ;;  %v21516_v12 = vld [vmem:[#allocation23_spill] sm:$0xff]  ;;  %v19805_v60 = vld [vmem:[#allocation3 + $0x168] sm:$0xff] }
 0x6ee   : > { %7693 = vmatmul.mubr.f32.gmra.mrb[194].mxu1 %v19197_v48  ;;  %7134 = vmatprep.mubr.f32.mxu0 %v19793_v20  ;;  %21517 = vst [vmem:[#allocation23_spill] sm:$0xff] %v19805_v60  ;;  %v19809_v48 = vld [vmem:[#allocation3 + $0x171] sm:$0xff] }
 0x6ef   : > { %v19797_v51 = vadd.f32 %v12562_v47, %v19663_v5  ;;  %7697 = vmatprep.mubr.f32.mxu1 %v19201_v35 }
 0x6f0   : > { %v6355_v50 = vpop.f32.mrb[108].mxu1  ;;  %v19800_v49 = vpop.f32.mrb[140].mxu0 }
 0x6f1   : > { %21515 = vst [vmem:[#allocation16_spill] sm:$0xff] %v19797_v51  ;;  %v6356_v21 = vadd.f32 %v6355_v50, %v21516_v12  ;;  %v6357_v9 = vpop.f32.mrb[109].mxu1  ;;  %v19803_v29 = vpop.f32.mrb[141].mxu0  ;;  %7135 = vmatmul.mubr.f32.gmra.mrb[164].mxu0 %v19805_v60  ;;  %v21519_v50 = vld [vmem:[#allocation21_spill] sm:$0xff]  ;;  %v19821_v60 = vld [vmem:[#allocation3 + $0x170] sm:$0xff] }
 0x6f2   : > { %7698 = vmatmul.mubr.f32.gmra.mrb[196].mxu1 %v19213_v38  ;;  %7139 = vmatprep.mubr.f32.mxu0 %v19809_v48  ;;  %21520 = vst [vmem:[#allocation21_spill] sm:$0xff] %v19821_v60  ;;  %v19825_v38 = vld [vmem:[#allocation3 + $0x189] sm:$0xff] }
 0x6f3   : > { %v19813_v35 = vadd.f32 %v19660_v13, %v6356_v21  ;;  %7702 = vmatprep.mubr.f32.mxu1 %v19217_v52 }
 0x6f4   : > { %v6360_v5 = vpop.f32.mrb[60].mxu1  ;;  %v19816_v47 = vpop.f32.mrb[92].mxu0 }
 0x6f5   : > { %21518 = vst [vmem:[#allocation54_spill] sm:$0xff] %v19813_v35  ;;  %v12563_v12 = vadd.f32 %v6360_v5, %v21519_v50  ;;  %v6362_v9 = vpop.f32.mrb[61].mxu1  ;;  %v19819_v51 = vpop.f32.mrb[93].mxu0  ;;  %7140 = vmatmul.mubr.f32.gmra.mrb[166].mxu0 %v19821_v60  ;;  %v21522_v5 = vld [vmem:[#allocation30_spill] sm:$0xff]  ;;  %v19837_v60 = vld [vmem:[#allocation3 + $0x188] sm:$0xff] }
 0x6f6   : > { %7703 = vmatmul.mubr.f32.gmra.mrb[198].mxu1 %v19233_v54  ;;  %7144 = vmatprep.mubr.f32.mxu0 %v19825_v38  ;;  %v19841_v54 = vld [vmem:[#allocation3 + $0x191] sm:$0xff] }
 0x6f7   : > { %v19829_v52 = vadd.f32 %v12563_v12, %v19685_v63  ;;  %7707 = vmatprep.mubr.f32.mxu1 %v19237_v4  ;;  %v21524_v12 = vld [vmem:[#allocation26_spill] sm:$0xff] }
 0x6f8   : > { %v6365_v13 = vpop.f32.mrb[110].mxu1  ;;  %v19832_v21 = vpop.f32.mrb[142].mxu0 }
 0x6f9   : > { %21521 = vst [vmem:[#allocation55_spill] sm:$0xff] %v19829_v52  ;;  %v6366_v50 = vadd.f32 %v6365_v13, %v21522_v5  ;;  %v6367_v9 = vpop.f32.mrb[111].mxu1  ;;  %v19835_v35 = vpop.f32.mrb[143].mxu0  ;;  %7145 = vmatmul.mubr.f32.gmra.mrb[168].mxu0 %v19837_v60 }
 0x6fa   : > { %7708 = vmatmul.mubr.f32.gmra.mrb[200].mxu1 %v19249_v3  ;;  %7149 = vmatprep.mubr.f32.mxu0 %v19841_v54  ;;  %v19849_v9 = vld [vmem:[#allocation3 + $0x190] sm:$0xff] }
 0x6fb   : > { %v19845_v4 = vadd.f32 %v19682_v24, %v6366_v50  ;;  %7712 = vmatprep.mubr.f32.mxu1 %v19253_v27  ;;  %v19853_v3 = vld [vmem:[#allocation3 + $0x1a9] sm:$0xff] }
 0x6fc   : > { %v6370_v63 = vpop.f32.mrb[64].mxu1  ;;  %v21526_v24 = vld [vmem:[#allocation17_spill] sm:$0xff] }
 0x6fd   : > { %21523 = vst [vmem:[#allocation30_spill] sm:$0xff] %v19845_v4  ;;  %v12564_v13 = vadd.f32 %v6370_v63, %v21524_v12  ;;  %v6372_v5 = vpop.f32.mrb[65].mxu1  ;;  %7150 = vmatmul.mubr.f32.gmra.mrb[170].mxu0 %v19849_v9  ;;  %v19861_v12 = vld [vmem:[#allocation3 + $0x1a8] sm:$0xff] }
 0x6fe   : > { %7713 = vmatmul.mubr.f32.gmra.mrb[202].mxu1 %v19269_v55  ;;  %7154 = vmatprep.mubr.f32.mxu0 %v19853_v3  ;;  %v19865_v55 = vld [vmem:[#allocation3 + $0x1b1] sm:$0xff] }
 0x6ff   : > { %v19857_v52 = vadd.f32 %v12564_v13, %v19708_v62  ;;  %7717 = vmatprep.mubr.f32.mxu1 %v19273_v0  ;;  %v21528_v62 = vld [vmem:[#allocation18_spill] sm:$0xff] }
 0x700   : > { %v6375_v27 = vpop.f32.mrb[112].mxu1 }
 0x701   : > { %21525 = vst [vmem:[#allocation26_spill] sm:$0xff] %v19857_v52  ;;  %v6376_v50 = vadd.f32 %v6375_v27, %v21526_v24  ;;  %v6377_v63 = vpop.f32.mrb[113].mxu1  ;;  %7155 = vmatmul.mubr.f32.gmra.mrb[172].mxu0 %v19861_v12  ;;  %v19873_v24 = vld [vmem:[#allocation3 + $0x1b0] sm:$0xff]  ;;  %v21549_v52 = vld [vmem:[#allocation4_spill] sm:$0xff] }
 0x702   : > { %7718 = vmatmul.mubr.f32.gmra.mrb[204].mxu1 %v19285_v61  ;;  %7159 = vmatprep.mubr.f32.mxu0 %v19865_v55  ;;  %v19877_v61 = vld [vmem:[#allocation3 + $0x1c9] sm:$0xff] }
 0x703   : > { %v19869_v5 = vadd.f32 %v19705_v28, %v6376_v50  ;;  %7722 = vmatprep.mubr.f32.mxu1 %v19289_v57  ;;  %v9799_v28 = vld [vmem:[%s21008_s5 + $0xc00] sm:$0xff]  ;;  %v9800_v50 = vld [vmem:[%s21008_s5 + $0xc08] sm:$0xff] }
 0x704   : > { %v6380_v0 = vpop.f32.mrb[68].mxu1 }
 0x705   : > { %21527 = vst [vmem:[#allocation17_spill] sm:$0xff] %v19869_v5  ;;  %v12565_v13 = vadd.f32 %v6380_v0, %v21528_v62  ;;  %v6382_v27 = vpop.f32.mrb[69].mxu1  ;;  %7160 = vmatmul.mubr.f32.gmra.mrb[174].mxu0 %v19873_v24  ;;  %v21530_v0 = vld [vmem:[#allocation14_spill] sm:$0xff] }
 0x706   : > { %7723 = vmatmul.mubr.f32.gmra.mrb[206].mxu1 %v19305_v39  ;;  %7164 = vmatprep.mubr.f32.mxu0 %v19877_v61  ;;  %v19891_v27 = vld [vmem:[#allocation3 + $0x1c8] sm:$0xff]  ;;  %v19906_v5 = vld [vmem:[#allocation3 + $0x1d0] sm:$0xff] }
 0x707   : > { %v19881_v63 = vadd.f32 %v12565_v13, %v19731_v26  ;;  %7727 = vmatprep.mubr.f32.mxu1 %v19309_v58  ;;  %v19894_v26 = vpack.c.bf16 %v9800_v50, %v9799_v28  ;;  %v19897_v58 = vld [vmem:[#allocation3 + $0x1d1] sm:$0xff]  ;;  %v21534_v28 = vld [vmem:[#allocation29_spill] sm:$0xff] }
 0x708   : > { %v6385_v57 = vpop.f32.mrb[114].mxu1 }
 0x709   : > { %21529 = vst [vmem:[#allocation18_spill] sm:$0xff] %v19881_v63  ;;  %v6386_v39 = vadd.f32 %v6385_v57, %v21530_v0  ;;  %v6387_v62 = vpop.f32.mrb[115].mxu1  ;;  %7165 = vmatmul.mubr.f32.gmra.mrb[176].mxu0 %v19891_v27  ;;  %12509 = vmatprep.subr.bf16.mxu1 %v19894_v26  ;;  %v21532_v0 = vld [vmem:[#allocation19_spill] sm:$0xff] }
 0x70a   : > { %7728 = vmatmul.mubr.f32.gmra.mrb[208].mxu1 %v19321_v42  ;;  %7169 = vmatprep.mubr.f32.mxu0 %v19897_v58  ;;  %v19910_v42 = vld [vmem:[#allocation3 + $0x1e9] sm:$0xff] }
 0x70b   : > { %v19901_v13 = vadd.f32 %v19728_v14, %v6386_v39  ;;  %7732 = vmatprep.mubr.f32.mxu1 %v19325_v33 }
 0x70c   : > { %v6390_v57 = vpop.f32.mrb[72].mxu1 }
 0x70d   : > { %21531 = vst [vmem:[#allocation14_spill] sm:$0xff] %v19901_v13  ;;  %v12566_v62 = vadd.f32 %v6390_v57, %v21532_v0  ;;  %v6392_v63 = vpop.f32.mrb[73].mxu1  ;;  %7170 = vmatmul.mubr.f32.gmra.mrb[178].mxu0 %v19906_v5 }
 0x70e   : > { %7733 = vmatmul.mubr.f32.gmra.mrb[210].mxu1 %v19341_v2  ;;  %7174 = vmatprep.mubr.f32.mxu0 %v19910_v42  ;;  %v19918_v63 = vld [vmem:[#allocation3 + $0x1e8] sm:$0xff]  ;;  %v19922_v2 = vld [vmem:[#allocation3 + $0x1f1] sm:$0xff] }
 0x70f   : > { %v19914_v14 = vadd.f32 %v12566_v62, %v19754_v40  ;;  %7737 = vmatprep.mubr.f32.mxu1 %v19345_v22  ;;  %v21536_v40 = vld [vmem:[#allocation24_spill] sm:$0xff] }
 0x710   : > { %v6395_v33 = vpop.f32.mrb[116].mxu1 }
 0x711   : > { %21533 = vst [vmem:[#allocation19_spill] sm:$0xff] %v19914_v14  ;;  %v6396_v50 = vadd.f32 %v6395_v33, %v21534_v28  ;;  %v6397_v39 = vpop.f32.mrb[117].mxu1  ;;  %7175 = vmatmul.mubr.f32.gmra.mrb[180].mxu0 %v19918_v63  ;;  %v19930_v33 = vld [vmem:[#allocation3 + $0x1f0] sm:$0xff]  ;;  %v21537_v28 = vld [vmem:[#allocation25_spill] sm:$0xff] }
 0x712   : > { %7738 = vmatmul.mubr.f32.gmra.mrb[212].mxu1 %v19357_v30  ;;  %7179 = vmatprep.mubr.f32.mxu0 %v19922_v2  ;;  %v19934_v30 = vld [vmem:[#allocation3 + $0x209] sm:$0xff]  ;;  %v19968_v14 = vld [vmem:[#allocation3 + $0x231] sm:$0xff] }
 0x713   : > { %v19926_v57 = vadd.f32 %v19751_v1, %v6396_v50  ;;  %7742 = vmatprep.mubr.f32.mxu1 %v19361_v8  ;;  %v21539_v1 = vld [vmem:[#allocation46_spill] sm:$0xff]  ;;  %v21540_v50 = vld [vmem:[#allocation33_spill] sm:$0xff] }
 0x714   : > { %v6400_v22 = vpop.f32.mrb[76].mxu1 }
 0x715   : > { %21535 = vst [vmem:[#allocation29_spill] sm:$0xff] %v19926_v57  ;;  %v12567_v0 = vadd.f32 %v6400_v22, %v21536_v40  ;;  %v6402_v62 = vpop.f32.mrb[77].mxu1  ;;  %7180 = vmatmul.mubr.f32.gmra.mrb[182].mxu0 %v19930_v33  ;;  %v19942_v40 = vld [vmem:[#allocation3 + $0x208] sm:$0xff] }
 0x716   : > { %7743 = vmatmul.mubr.f32.gmra.mrb[214].mxu1 %v21537_v28  ;;  %7184 = vmatprep.mubr.f32.mxu0 %v19934_v30  ;;  %v19946_v62 = vld [vmem:[#allocation3 + $0x211] sm:$0xff] }
 0x717   : > { %v19938_v39 = vadd.f32 %v12567_v0, %v19771_v59  ;;  %7747 = vmatprep.mubr.f32.mxu1 %v21539_v1  ;;  %v5039_v0 = vld [vmem:[#allocation3 + $0x247] sm:$0xff] }
 0x718   : > { %v6405_v8 = vpop.f32.mrb[118].mxu1  ;;  %v21542_v1 = vld [vmem:[#allocation32_spill] sm:$0xff] }
 0x719   : > { %21538 = vst [vmem:[#allocation24_spill] sm:$0xff] %v19938_v39  ;;  %v6406_v57 = vadd.f32 %v6405_v8, %v21540_v50  ;;  %v6407_v22 = vpop.f32.mrb[119].mxu1  ;;  %7185 = vmatmul.mubr.f32.gmra.mrb[184].mxu0 %v19942_v40  ;;  %v19957_v39 = vld [vmem:[#allocation3 + $0x229] sm:$0xff] }
 0x71a   : > { %7748 = vmatmul.mubr.f32.gmra.mrb[216].mxu1 %v19384_v41  ;;  %7189 = vmatprep.mubr.f32.mxu0 %v19946_v62  ;;  %v19954_v22 = vld [vmem:[#allocation3 + $0x210] sm:$0xff] }
 0x71b   : > { %v19950_v28 = vadd.f32 %v19768_v15, %v6406_v57  ;;  %7752 = vmatprep.mubr.f32.mxu1 %v19395_v25  ;;  %v4999_v25 = vld [vmem:[#allocation3 + $0x246] sm:$0xff] }
 0x71c   : > { %v6410_v59 = vpop.f32.mrb[80].mxu1  ;;  %v19964_v57 = vld [vmem:[#allocation3 + $0x228] sm:$0xff] }
 0x71d   : > { %21541 = vst [vmem:[#allocation25_spill] sm:$0xff] %v19950_v28  ;;  %v12568_v8 = vadd.f32 %v6410_v59, %v21542_v1  ;;  %v6412_v50 = vpop.f32.mrb[81].mxu1  ;;  %7190 = vmatmul.mubr.f32.gmra.mrb[186].mxu0 %v19954_v22  ;;  %v5040_v59 = vld [vmem:[#allocation3 + $0x24f] sm:$0xff]  ;;  %v21544_v1 = vld [vmem:[#allocation47_spill] sm:$0xff] }
 0x71e   : > { %7753 = vmatmul.mubr.f32.gmra.mrb[218].mxu1 %v19400_v44  ;;  %7194 = vmatprep.mubr.f32.mxu0 %v19957_v39 }
 0x71f   : > { %v19962_v41 = vadd.f32 %v12568_v8, %v19787_v43  ;;  %7757 = vmatprep.mubr.f32.mxu1 %v5039_v0  ;;  %v5000_v43 = vld [vmem:[#allocation3 + $0x24e] sm:$0xff]  ;;  %v9735_v0 = vld [vmem:[%s21008_s5 + $0xa00] sm:$0xff] }
 0x720   : > { %v6415_v15 = vpop.f32.mrb[120].mxu1 }
 0x721   : > { %21543 = vst [vmem:[#allocation46_spill] sm:$0xff] %v19962_v41  ;;  %v6416_v50 = vadd.f32 %v6415_v15, %v21544_v1  ;;  %v6417_v28 = vpop.f32.mrb[121].mxu1  ;;  %7195 = vmatmul.mubr.f32.gmra.mrb[188].mxu0 %v19964_v57  ;;  %v19980_v15 = vld [vmem:[#allocation3 + $0x230] sm:$0xff]  ;;  %v21547_v1 = vld [vmem:[#allocation48_spill] sm:$0xff] }
 0x722   : > { %7758 = vmatmul.mubr.f32.gmra.mrb[220].mxu1 %v4999_v25  ;;  %7199 = vmatprep.mubr.f32.mxu0 %v19968_v14  ;;  %v9736_v28 = vld [vmem:[%s21008_s5 + $0xa08] sm:$0xff]  ;;  %21546 = vst [vmem:[#allocation32_spill] sm:$0xff] %v19980_v15 }
 0x723   : > { %v19972_v44 = vadd.f32 %v19784_v36, %v6416_v50  ;;  %7762 = vmatprep.mubr.f32.mxu1 %v5040_v59  ;;  %v13630_v36 = vld [vmem:[#allocation3 + $0x6a] sm:$0xff]  ;;  %v12413_v59 = vpack.c.bf16 %v9736_v28, %v9735_v0 }
 0x724   : > { %v6420_v8 = vpop.f32.mrb[84].mxu1  ;;  %v9801_v50 = vld [vmem:[%s21008_s5 + $0xc10] sm:$0xff]  ;;  %v21550_v28 = vld [vmem:[#allocation49_spill] sm:$0xff] }
 0x725   : > { %21545 = vst [vmem:[#allocation33_spill] sm:$0xff] %v19972_v44  ;;  %v12569_v25 = vadd.f32 %v6420_v8, %v21547_v1  ;;  %v6422_v41 = vpop.f32.mrb[85].mxu1  ;;  %7200 = vmatmul.mubr.f32.gmra.mrb[190].mxu0 %v19980_v15  ;;  %v9802_v44 = vld [vmem:[%s21008_s5 + $0xc18] sm:$0xff]  ;;  %v21551_v15 = vld [vmem:[#allocation5_spill] sm:$0xff] }
 0x726   : > { %7763 = vmatmul.mubr.f32.gmra.mrb[222].mxu1 %v5000_v43  ;;  %11100 = vmatprep.mubr.f32.mxu0 %v13630_v36  ;;  %v9737_v41 = vld [vmem:[%s21008_s5 + $0xa10] sm:$0xff]  ;;  %v9738_v43 = vld [vmem:[%s21008_s5 + $0xa18] sm:$0xff]  ;;  %v12512_v4 = vpack.c.bf16 %v9802_v44, %v9801_v50  ;;  %v9739_v44 = vld [vmem:[%s21008_s5 + $0xa20] sm:$0xff] }
 0x727   : > { %v19991_v13 = vadd.f32 %v12569_v25, %v19803_v29  ;;  %7832 = vmatprep.mubr.f32.mxu1 %v21549_v52  ;;  %v13631_v36 = vld [vmem:[#allocation3 + $0x72] sm:$0xff]  ;;  %v12416_v29 = vpack.c.bf16 %v9738_v43, %v9737_v41  ;;  %v9803_v52 = vld [vmem:[%s21008_s5 + $0xc20] sm:$0xff]  ;;  %v9804_v25 = vld [vmem:[%s21008_s5 + $0xc28] sm:$0xff] }
 0x728   : > { %v6425_v0 = vpop.f32.mrb[122].mxu1  ;;  %v20024_v41 = vld [vmem:[#allocation3 + $0x92] sm:$0xff]  ;;  %v12516_v43 = vpack.c.bf16 %v9804_v25, %v9803_v52 }
 0x729   : > { %21548 = vst [vmem:[#allocation47_spill] sm:$0xff] %v19991_v13  ;;  %v6426_v8 = vadd.f32 %v6425_v0, %v21550_v28  ;;  %v6427_v1 = vpop.f32.mrb[123].mxu1  ;;  %11101 = vmatmul.mubr.f32.vlgmr.msra.gmra.mrb[192].mxu0 %v13631_v36  ;;  %v20012_v0 = vld [vmem:[#allocation3 + $0x8a] sm:$0xff]  ;;  %v21554_v28 = vld [vmem:[#allocation39_spill] sm:$0xff] }
 0x72a   : > { %7833 = vmatmul.mubr.f32.vlgmr.msra.gmra.mrb[160].mxu1 %v21551_v15  ;;  %12414 = vmatpush1.bf16.msra.mxu0 %v12413_v59  ;;  %v9740_v15 = vld [vmem:[%s21008_s5 + $0xa28] sm:$0xff]  ;;  %v9805_v1 = vld [vmem:[%s21008_s5 + $0xc30] sm:$0xff]  ;;  %v9742_v52 = vld [vmem:[%s21008_s5 + $0xa38] sm:$0xff] }
 0x72b   : > { %v20009_v13 = vadd.f32 %v19800_v49, %v6426_v8  ;;  %7837 = vmatprep.mubr.f32.mxu1 %v19478_v45  ;;  %11103 = vmatprep.mubr.f32.mxu0 %v20012_v0  ;;  %v21553_v49 = vld [vmem:[#allocation34_spill] sm:$0xff]  ;;  %v12419_v8 = vpack.c.bf16 %v9740_v15, %v9739_v44 }
 0x72c   : > { %v6430_v59 = vpop.f32.mrb[88].mxu1  ;;  %12415 = vmatprep.subr.bf16.mxu0 %v21127_v6  ;;  %12511 = vmatpush3.bf16.msra.mxu1 %v19894_v26  ;;  %v9806_v26 = vld [vmem:[%s21008_s5 + $0xc38] sm:$0xff] }
 0x72d   : > { %21552 = vst [vmem:[#allocation48_spill] sm:$0xff] %v20009_v13  ;;  %v12570_v50 = vadd.f32 %v6430_v59, %v21553_v49  ;;  %v6432_v45 = vpop.f32.mrb[89].mxu1  ;;  %11104 = vmatmul.mubr.f32.gmra.mrb[194].mxu0 %v20024_v41  ;;  %12513 = vmatprep.subr.bf16.mxu1 %v12512_v4  ;;  %v21556_v59 = vld [vmem:[#allocation37_spill] sm:$0xff] }
 0x72e   : > { %7838 = vmatmul.mubr.f32.gmra.mrb[162].mxu1 %v21554_v28  ;;  %12417 = vmatpush1.bf16.msra.mxu0 %v12416_v29  ;;  %v20038_v49 = vld [vmem:[#allocation3 + $0xaa] sm:$0xff]  ;;  %v12520_v45 = vpack.c.bf16 %v9806_v26, %v9805_v1 }
 0x72f   : > { %v20035_v36 = vadd.f32 %v12570_v50, %v19819_v51  ;;  %7842 = vmatprep.mubr.f32.mxu1 %v21556_v59  ;;  %11106 = vmatprep.mubr.f32.mxu0 %v20038_v49  ;;  %v9741_v29 = vld [vmem:[%s21008_s5 + $0xa30] sm:$0xff]  ;;  %v21557_v51 = vld [vmem:[#allocation35_spill] sm:$0xff]  ;;  %v9744_v1 = vld [vmem:[%s21008_s5 + $0xa48] sm:$0xff] }
 0x730   : > { %v6435_v25 = vpop.f32.mrb[124].mxu1  ;;  %12418 = vmatprep.subr.bf16.mxu0 %v21127_v6  ;;  %12515 = vmatpush3.bf16.msra.mxu1 %v12512_v4  ;;  %v20049_v50 = vld [vmem:[#allocation3 + $0xb2] sm:$0xff]  ;;  %v12422_v59 = vpack.c.bf16 %v9742_v52, %v9741_v29  ;;  %v9808_v4 = vld [vmem:[%s21008_s5 + $0xc48] sm:$0xff] }
 0x731   : > { %21555 = vst [vmem:[#allocation4_spill] sm:$0xff] %v20035_v36  ;;  %v6436_v44 = vadd.f32 %v6435_v25, %v21557_v51  ;;  %v6437_v15 = vpop.f32.mrb[125].mxu1  ;;  %11107 = vmatmul.mubr.f32.gmra.mrb[196].mxu0 %v20049_v50  ;;  %12517 = vmatprep.subr.bf16.mxu1 %v12516_v43  ;;  %v21558_v28 = vld [vmem:[#allocation6_spill] sm:$0xff]  ;;  %v9807_v36 = vld [vmem:[%s21008_s5 + $0xc40] sm:$0xff] }
 0x732   : > { %7843 = vmatmul.mubr.f32.gmra.mrb[164].mxu1 %v21558_v28  ;;  %12420 = vmatpush1.bf16.msra.mxu0 %v12419_v8  ;;  %v21560_v51 = vld [vmem:[#allocation8_spill] sm:$0xff]  ;;  %v20063_v15 = vld [vmem:[#allocation3 + $0xca] sm:$0xff]  ;;  %v12524_v28 = vpack.c.bf16 %v9808_v4, %v9807_v36  ;;  %v9746_v36 = vld [vmem:[%s21008_s5 + $0xa58] sm:$0xff] }
 0x733   : > { %v20060_v25 = vadd.f32 %v19816_v47, %v6436_v44  ;;  %7847 = vmatprep.mubr.f32.mxu1 %v21560_v51  ;;  %11109 = vmatprep.mubr.f32.mxu0 %v20063_v15  ;;  %v9743_v8 = vld [vmem:[%s21008_s5 + $0xa40] sm:$0xff]  ;;  %v20074_v44 = vld [vmem:[#allocation3 + $0xd2] sm:$0xff] }
 0x734   : > { %v6440_v26 = vpop.f32.mrb[92].mxu1  ;;  %12421 = vmatprep.subr.bf16.mxu0 %v21127_v6  ;;  %12519 = vmatpush3.bf16.msra.mxu1 %v12516_v43  ;;  %v21561_v47 = vld [vmem:[#allocation36_spill] sm:$0xff]  ;;  %v12425_v51 = vpack.c.bf16 %v9744_v1, %v9743_v8  ;;  %v9810_v43 = vld [vmem:[%s21008_s5 + $0xc58] sm:$0xff] }
 0x735   : > { %21559 = vst [vmem:[#allocation49_spill] sm:$0xff] %v20060_v25  ;;  %v12571_v29 = vadd.f32 %v6440_v26, %v21561_v47  ;;  %v6442_v52 = vpop.f32.mrb[93].mxu1  ;;  %11110 = vmatmul.mubr.f32.gmra.mrb[198].mxu0 %v20074_v44  ;;  %12521 = vmatprep.subr.bf16.mxu1 %v12520_v45  ;;  %v9809_v25 = vld [vmem:[%s21008_s5 + $0xc50] sm:$0xff] }
 0x736   : > { %7848 = vmatmul.mubr.f32.gmra.mrb[166].mxu1 %v19536_v10  ;;  %12423 = vmatpush1.bf16.msra.mxu0 %v12422_v59  ;;  %v20088_v47 = vld [vmem:[#allocation3 + $0xea] sm:$0xff]  ;;  %v12528_v1 = vpack.c.bf16 %v9810_v43, %v9809_v25  ;;  %v9811_v52 = vld [vmem:[%s21008_s5 + $0xc60] sm:$0xff] }
 0x737   : > { %v20085_v26 = vadd.f32 %v12571_v29, %v19835_v35  ;;  %7852 = vmatprep.mubr.f32.mxu1 %v19550_v32  ;;  %11112 = vmatprep.mubr.f32.mxu0 %v20088_v47  ;;  %v9745_v10 = vld [vmem:[%s21008_s5 + $0xa50] sm:$0xff]  ;;  %v21563_v35 = vld [vmem:[#allocation7_spill] sm:$0xff]  ;;  %v9748_v25 = vld [vmem:[%s21008_s5 + $0xa68] sm:$0xff] }
 0x738   : > { %v6445_v59 = vpop.f32.mrb[126].mxu1  ;;  %12424 = vmatprep.subr.bf16.mxu0 %v21127_v6  ;;  %12523 = vmatpush3.bf16.msra.mxu1 %v12520_v45  ;;  %v20099_v32 = vld [vmem:[#allocation3 + $0xf2] sm:$0xff]  ;;  %v12428_v29 = vpack.c.bf16 %v9746_v36, %v9745_v10  ;;  %v9812_v45 = vld [vmem:[%s21008_s5 + $0xc68] sm:$0xff] }
 0x739   : > { %21562 = vst [vmem:[#allocation5_spill] sm:$0xff] %v20085_v26  ;;  %v6446_v4 = vadd.f32 %v6445_v59, %v21563_v35  ;;  %v6447_v8 = vpop.f32.mrb[127].mxu1  ;;  %11113 = vmatmul.mubr.f32.gmra.mrb[200].mxu0 %v20099_v32  ;;  %12525 = vmatprep.subr.bf16.mxu1 %v12524_v28  ;;  %v20113_v35 = vld [vmem:[#allocation3 + $0x10a] sm:$0xff]  ;;  %v12532_v43 = vpack.c.bf16 %v9812_v45, %v9811_v52 }
 0x73a   : > { %7853 = vmatmul.mubr.f32.gmra.mrb[168].mxu1 %v19557_v19  ;;  %12426 = vmatpush1.bf16.msra.mxu0 %v12425_v51  ;;  %v9747_v19 = vld [vmem:[%s21008_s5 + $0xa60] sm:$0xff]  ;;  %v9813_v36 = vld [vmem:[%s21008_s5 + $0xc70] sm:$0xff]  ;;  %v9750_v8 = vld [vmem:[%s21008_s5 + $0xa78] sm:$0xff] }
 0x73b   : > { %v20110_v59 = vadd.f32 %v19832_v21, %v6446_v4  ;;  %7857 = vmatprep.mubr.f32.mxu1 %v19568_v37  ;;  %11115 = vmatprep.mubr.f32.mxu0 %v20113_v35  ;;  %v20127_v37 = vld [vmem:[#allocation3 + $0x112] sm:$0xff]  ;;  %v12431_v10 = vpack.c.bf16 %v9748_v25, %v9747_v19  ;;  %v20138_v4 = vld [vmem:[#allocation3 + $0x12a] sm:$0xff] }
 0x73c   : > { %v20122_v51 = vpop.f32.mrb[128].mxu1  ;;  %12427 = vmatprep.subr.bf16.mxu0 %v21127_v6  ;;  %12527 = vmatpush3.bf16.msra.mxu1 %v12524_v28  ;;  %21565 = vst [vmem:[#allocation39_spill] sm:$0xff] %v20127_v37  ;;  %v9814_v28 = vld [vmem:[%s21008_s5 + $0xc78] sm:$0xff]  ;;  %21566 = vst [vmem:[#allocation37_spill] sm:$0xff] %v20138_v4  ;;  %v20157_v25 = vld [vmem:[#allocation3 + $0x14a] sm:$0xff] }
 0x73d   : > { %21564 = vst [vmem:[#allocation34_spill] sm:$0xff] %v20110_v59  ;;  %v20125_v21 = vpop.f32.mrb[129].mxu1  ;;  %11116 = vmatmul.mubr.f32.gmra.mrb[202].mxu0 %v20127_v37  ;;  %12529 = vmatprep.subr.bf16.mxu1 %v12528_v1  ;;  %v12536_v45 = vpack.c.bf16 %v9814_v28, %v9813_v36  ;;  %21568 = vst [vmem:[#allocation6_spill] sm:$0xff] %v20157_v25  ;;  %v9752_v59 = vld [vmem:[%s21008_s5 + $0xa88] sm:$0xff]  ;;  %v21571_v28 = vld [vmem:[#allocation50_spill] sm:$0xff] }
 0x73e   : > { %7858 = vmatmul.mubr.f32.gmra.mrb[170].mxu1 %v19577_v34  ;;  %12429 = vmatpush1.bf16.msra.mxu0 %v12428_v29  ;;  %v9749_v34 = vld [vmem:[%s21008_s5 + $0xa70] sm:$0xff] }
 0x73f   : > { %7862 = vmatprep.mubr.f32.mxu1 %v19588_v7  ;;  %11118 = vmatprep.mubr.f32.mxu0 %v20138_v4  ;;  %v20152_v7 = vld [vmem:[#allocation3 + $0x132] sm:$0xff]  ;;  %v12434_v19 = vpack.c.bf16 %v9750_v8, %v9749_v34  ;;  %v20176_v34 = vld [vmem:[#allocation3 + $0x16a] sm:$0xff] }
 0x740   : > { %v20147_v29 = vpop.f32.mrb[130].mxu1  ;;  %12430 = vmatprep.subr.bf16.mxu0 %v21127_v6  ;;  %12531 = vmatpush3.bf16.msra.mxu1 %v12528_v1  ;;  %21567 = vst [vmem:[#allocation35_spill] sm:$0xff] %v20152_v7  ;;  %v9751_v1 = vld [vmem:[%s21008_s5 + $0xa80] sm:$0xff]  ;;  %21572 = vst [vmem:[#allocation36_spill] sm:$0xff] %v20176_v34  ;;  %v9754_v8 = vld [vmem:[%s21008_s5 + $0xa98] sm:$0xff] }
 0x741   : > { %v20150_v52 = vpop.f32.mrb[131].mxu1  ;;  %11119 = vmatmul.mubr.f32.gmra.mrb[204].mxu0 %v20152_v7  ;;  %12533 = vmatprep.subr.bf16.mxu1 %v12532_v43  ;;  %v12437_v36 = vpack.c.bf16 %v9752_v59, %v9751_v1  ;;  %v21574_v1 = vld [vmem:[#allocation43_spill] sm:$0xff] }
 0x742   : > { %7863 = vmatmul.mubr.f32.gmra.mrb[172].mxu1 %v19598_v53  ;;  %12432 = vmatpush1.bf16.msra.mxu0 %v12431_v10  ;;  %v21570_v10 = vld [vmem:[#allocation10_spill] sm:$0xff] }
 0x743   : > { %7867 = vmatprep.mubr.f32.mxu1 %v19609_v56  ;;  %11121 = vmatprep.mubr.f32.mxu0 %v20157_v25  ;;  %v20171_v56 = vld [vmem:[#allocation3 + $0x152] sm:$0xff] }
 0x744   : > { %v20166_v26 = vpop.f32.mrb[132].mxu1  ;;  %12433 = vmatprep.subr.bf16.mxu0 %v21127_v6  ;;  %12535 = vmatpush3.bf16.msra.mxu1 %v12532_v43  ;;  %21569 = vst [vmem:[#allocation8_spill] sm:$0xff] %v20171_v56  ;;  %v9753_v43 = vld [vmem:[%s21008_s5 + $0xa90] sm:$0xff] }
 0x745   : > { %v20169_v53 = vpop.f32.mrb[133].mxu1  ;;  %11122 = vmatmul.mubr.f32.gmra.mrb[206].mxu0 %v20171_v56  ;;  %12537 = vmatprep.subr.bf16.mxu1 %v12536_v45  ;;  %v9756_v56 = vld [vmem:[%s21008_s5 + $0xaa8] sm:$0xff] }
 0x746   : > { %7868 = vmatmul.mubr.f32.gmra.mrb[174].mxu1 %v21570_v10  ;;  %12435 = vmatpush1.bf16.msra.mxu0 %v12434_v19  ;;  %v20190_v19 = vld [vmem:[#allocation3 + $0x172] sm:$0xff]  ;;  %v12440_v10 = vpack.c.bf16 %v9754_v8, %v9753_v43  ;;  %v21578_v8 = vld [vmem:[#allocation9_spill] sm:$0xff] }
 0x747   : > { %7872 = vmatprep.mubr.f32.mxu1 %v21571_v28  ;;  %11124 = vmatprep.mubr.f32.mxu0 %v20176_v34  ;;  %21573 = vst [vmem:[#allocation7_spill] sm:$0xff] %v20190_v19  ;;  %v21575_v28 = vld [vmem:[#allocation11_spill] sm:$0xff]  ;;  %v20195_v34 = vld [vmem:[#allocation3 + $0x18a] sm:$0xff] }
 0x748   : > { %v20185_v13 = vpop.f32.mrb[134].mxu1  ;;  %12436 = vmatprep.subr.bf16.mxu0 %v21127_v6  ;;  %12539 = vmatpush3.bf16.msra.mxu1 %v12536_v45  ;;  %21576 = vst [vmem:[#allocation10_spill] sm:$0xff] %v20195_v34  ;;  %v9755_v45 = vld [vmem:[%s21008_s5 + $0xaa0] sm:$0xff]  ;;  %v20209_v43 = vld [vmem:[#allocation3 + $0x192] sm:$0xff] }
 0x749   : > { %v20188_v59 = vpop.f32.mrb[135].mxu1  ;;  %11125 = vmatmul.mubr.f32.gmra.mrb[208].mxu0 %v20190_v19  ;;  %21577 = vst [vmem:[#allocation50_spill] sm:$0xff] %v20209_v43  ;;  %v9758_v19 = vld [vmem:[%s21008_s5 + $0xab8] sm:$0xff] }
 0x74a   : > { %7873 = vmatmul.mubr.f32.gmra.mrb[176].mxu1 %v21574_v1  ;;  %12438 = vmatpush1.bf16.msra.mxu0 %v12437_v36  ;;  %v12443_v1 = vpack.c.bf16 %v9756_v56, %v9755_v45  ;;  %v20228_v56 = vld [vmem:[#allocation3 + $0x1b2] sm:$0xff] }
 0x74b   : > { %7877 = vmatprep.mubr.f32.mxu1 %v21575_v28  ;;  %11127 = vmatprep.mubr.f32.mxu0 %v20195_v34  ;;  %v20214_v28 = vld [vmem:[#allocation3 + $0x1aa] sm:$0xff]  ;;  %21580 = vst [vmem:[#allocation11_spill] sm:$0xff] %v20228_v56 }
 0x74c   : > { %v20204_v25 = vpop.f32.mrb[136].mxu1  ;;  %12439 = vmatprep.subr.bf16.mxu0 %v21127_v6  ;;  %21579 = vst [vmem:[#allocation43_spill] sm:$0xff] %v20214_v28  ;;  %v9757_v34 = vld [vmem:[%s21008_s5 + $0xab0] sm:$0xff] }
 0x74d   : > { %v20207_v36 = vpop.f32.mrb[137].mxu1  ;;  %11128 = vmatmul.mubr.f32.gmra.mrb[210].mxu0 %v20209_v43  ;;  %v12446_v45 = vpack.c.bf16 %v9758_v19, %v9757_v34  ;;  %v9760_v43 = vld [vmem:[%s21008_s5 + $0xac8] sm:$0xff]  ;;  %v20247_v34 = vld [vmem:[#allocation3 + $0x1d2] sm:$0xff] }
 0x74e   : > { %7878 = vmatmul.mubr.f32.gmra.mrb[178].mxu1 %v21578_v8  ;;  %12441 = vmatpush1.bf16.msra.mxu0 %v12440_v10  ;;  %v20233_v8 = vld [vmem:[#allocation3 + $0x1ca] sm:$0xff] }
 0x74f   : > { %7882 = vmatprep.mubr.f32.mxu1 %v19676_v18  ;;  %11130 = vmatprep.mubr.f32.mxu0 %v20214_v28  ;;  %v21581_v18 = vld [vmem:[#allocation12_spill] sm:$0xff]  ;;  %21582 = vst [vmem:[#allocation9_spill] sm:$0xff] %v20233_v8 }
 0x750   : > { %v20223_v7 = vpop.f32.mrb[138].mxu1  ;;  %12442 = vmatprep.subr.bf16.mxu0 %v21127_v6  ;;  %v9759_v28 = vld [vmem:[%s21008_s5 + $0xac0] sm:$0xff]  ;;  %21583 = vst [vmem:[#allocation12_spill] sm:$0xff] %v20247_v34 }
 0x751   : > { %v20226_v10 = vpop.f32.mrb[139].mxu1  ;;  %11131 = vmatmul.mubr.f32.gmra.mrb[212].mxu0 %v20228_v56  ;;  %v12449_v19 = vpack.c.bf16 %v9760_v43, %v9759_v28  ;;  %v9762_v56 = vld [vmem:[%s21008_s5 + $0xad8] sm:$0xff] }
 0x752   : > { %7883 = vmatmul.mubr.f32.gmra.mrb[180].mxu1 %v21581_v18  ;;  %12444 = vmatpush1.bf16.msra.mxu0 %v12443_v1  ;;  %v20252_v18 = vld [vmem:[#allocation3 + $0x1ea] sm:$0xff]  ;;  %v20266_v43 = vld [vmem:[#allocation3 + $0x1f2] sm:$0xff] }
 0x753   : > { %7887 = vmatprep.mubr.f32.mxu1 %v19698_v16  ;;  %11133 = vmatprep.mubr.f32.mxu0 %v20233_v8  ;;  %v21584_v16 = vld [vmem:[#allocation45_spill] sm:$0xff]  ;;  %v9761_v8 = vld [vmem:[%s21008_s5 + $0xad0] sm:$0xff]  ;;  %21587 = vst [vmem:[#allocation57_spill] sm:$0xff] %v20266_v43 }
 0x754   : > { %v20242_v4 = vpop.f32.mrb[140].mxu1  ;;  %12445 = vmatprep.subr.bf16.mxu0 %v21127_v6  ;;  %21585 = vst [vmem:[#allocation45_spill] sm:$0xff] %v20252_v18  ;;  %v12452_v28 = vpack.c.bf16 %v9762_v56, %v9761_v8  ;;  %v20285_v56 = vld [vmem:[#allocation3 + $0x212] sm:$0xff] }
 0x755   : > { %v20245_v1 = vpop.f32.mrb[141].mxu1  ;;  %11134 = vmatmul.mubr.f32.gmra.mrb[214].mxu0 %v20247_v34  ;;  %v9764_v34 = vld [vmem:[%s21008_s5 + $0xae8] sm:$0xff]  ;;  %21591 = vst [vmem:[#allocation59_spill] sm:$0xff] %v20285_v56 }
 0x756   : > { %7888 = vmatmul.mubr.f32.gmra.mrb[182].mxu1 %v21584_v16  ;;  %12447 = vmatpush1.bf16.msra.mxu0 %v12446_v45  ;;  %v20271_v16 = vld [vmem:[#allocation3 + $0x20a] sm:$0xff] }
 0x757   : > { %7892 = vmatprep.mubr.f32.mxu1 %v19721_v31  ;;  %11136 = vmatprep.mubr.f32.mxu0 %v20252_v18  ;;  %v21588_v31 = vld [vmem:[#allocation22_spill] sm:$0xff]  ;;  %v9763_v18 = vld [vmem:[%s21008_s5 + $0xae0] sm:$0xff] }
 0x758   : > { %v20261_v37 = vpop.f32.mrb[142].mxu1  ;;  %12448 = vmatprep.subr.bf16.mxu0 %v21127_v6  ;;  %21589 = vst [vmem:[#allocation22_spill] sm:$0xff] %v20271_v16  ;;  %v12455_v8 = vpack.c.bf16 %v9764_v34, %v9763_v18  ;;  %v20310_v18 = vld [vmem:[#allocation3 + $0x252] sm:$0xff] }
 0x759   : > { %21586 = vst [vmem:[#allocation56_spill] sm:$0xff] %v20261_v37  ;;  %v20264_v45 = vpop.f32.mrb[143].mxu1  ;;  %11137 = vmatmul.mubr.f32.gmra.mrb[216].mxu0 %v20266_v43  ;;  %v9766_v43 = vld [vmem:[%s21008_s5 + $0xaf8] sm:$0xff]  ;;  %21597 = vst [vmem:[#allocation63_spill] sm:$0xff] %v20310_v18 }
 0x75a   : > { %7893 = vmatmul.mubr.f32.gmra.mrb[184].mxu1 %v21588_v31  ;;  %12450 = vmatpush1.bf16.msra.mxu0 %v12449_v19  ;;  %v20290_v31 = vld [vmem:[#allocation3 + $0x22a] sm:$0xff] }
 0x75b   : > { %7897 = vmatprep.mubr.f32.mxu1 %v19744_v17  ;;  %11139 = vmatprep.mubr.f32.mxu0 %v20271_v16  ;;  %v21592_v17 = vld [vmem:[#allocation15_spill] sm:$0xff]  ;;  %v9765_v16 = vld [vmem:[%s21008_s5 + $0xaf0] sm:$0xff] }
 0x75c   : > { %v20280_v37 = vpop.f32.mrb[144].mxu1  ;;  %12451 = vmatprep.subr.bf16.mxu0 %v21127_v6  ;;  %21593 = vst [vmem:[#allocation15_spill] sm:$0xff] %v20290_v31 }
 0x75d   : > { %21590 = vst [vmem:[#allocation58_spill] sm:$0xff] %v20280_v37  ;;  %v20283_v19 = vpop.f32.mrb[145].mxu1  ;;  %11140 = vmatmul.mubr.f32.gmra.mrb[218].mxu0 %v20285_v56  ;;  %v9768_v56 = vld [vmem:[%s21008_s5 + $0xb08] sm:$0xff] }
 0x75e   : > { %7898 = vmatmul.mubr.f32.gmra.mrb[186].mxu1 %v21592_v17  ;;  %12453 = vmatpush1.bf16.msra.mxu0 %v12452_v28  ;;  %v20302_v28 = vld [vmem:[#allocation3 + $0x24a] sm:$0xff]  ;;  %v12458_v17 = vpack.c.bf16 %v9766_v43, %v9765_v16  ;;  %v21598_v43 = vld [vmem:[#allocation28_spill] sm:$0xff] }
 0x75f   : > { %7902 = vmatprep.mubr.f32.mxu1 %v19761_v46  ;;  %11142 = vmatprep.mubr.f32.mxu0 %v20290_v31  ;;  %21595 = vst [vmem:[#allocation61_spill] sm:$0xff] %v20302_v28  ;;  %v20306_v46 = vld [vmem:[#allocation3 + $0x232] sm:$0xff]  ;;  %v9767_v31 = vld [vmem:[%s21008_s5 + $0xb00] sm:$0xff] }
 0x760   : > { %v20299_v37 = vpop.f32.mrb[146].mxu1  ;;  %12454 = vmatprep.subr.bf16.mxu0 %v21127_v6  ;;  %21596 = vst [vmem:[#allocation62_spill] sm:$0xff] %v20306_v46  ;;  %v13660_v16 = vld [vmem:[#allocation3 + $0x87] sm:$0xff] }
 0x761   : > { %21594 = vst [vmem:[#allocation60_spill] sm:$0xff] %v20299_v37  ;;  %v20304_v34 = vpop.f32.mrb[147].mxu1  ;;  %11143 = vmatmul.mubr.f32.gmra.mrb[220].mxu0 %v20306_v46 }
 0x762   : > { %7903 = vmatmul.mubr.f32.gmra.mrb[188].mxu1 %v19773_v23  ;;  %12456 = vmatpush1.bf16.msra.mxu0 %v12455_v8 }
 0x763   : > { %7907 = vmatprep.mubr.f32.mxu1 %v19777_v11  ;;  %11145 = vmatprep.mubr.f32.mxu0 %v20302_v28  ;;  %v12461_v11 = vpack.c.bf16 %v9768_v56, %v9767_v31  ;;  %v9769_v28 = vld [vmem:[%s21008_s5 + $0xb10] sm:$0xff]  ;;  %v21600_v56 = vld [vmem:[#allocation23_spill] sm:$0xff] }
 0x764   : > { %v20320_v37 = vpop.f32.mrb[148].mxu1  ;;  %12457 = vmatprep.subr.bf16.mxu0 %v21127_v6 }
 0x765   : > { %v20323_v23 = vpop.f32.mrb[149].mxu1  ;;  %11146 = vmatmul.mubr.f32.gmra.mrb[222].mxu0 %v20310_v18  ;;  %v9770_v18 = vld [vmem:[%s21008_s5 + $0xb18] sm:$0xff] }
 0x766   : > { %7908 = vmatmul.mubr.f32.gmra.mrb[190].mxu1 %v21598_v43  ;;  %12459 = vmatpush1.bf16.msra.mxu0 %v12458_v17  ;;  %v13661_v17 = vld [vmem:[#allocation3 + $0x86] sm:$0xff]  ;;  %v12464_v31 = vpack.c.bf16 %v9770_v18, %v9769_v28 }
 0x767   : > { %7912 = vmatprep.mubr.f32.mxu1 %v19793_v20  ;;  %8395 = vmatprep.mubr.f32.mxu0 %v13660_v16  ;;  %v13662_v20 = vld [vmem:[#allocation3 + $0x8f] sm:$0xff]  ;;  %v9771_v16 = vld [vmem:[%s21008_s5 + $0xb20] sm:$0xff] }
 0x768   : > { %v20328_v8 = vpop.f32.mrb[150].mxu1  ;;  %12460 = vmatprep.subr.bf16.mxu0 %v21127_v6 }
 0x769   : > { %21599 = vst [vmem:[#allocation28_spill] sm:$0xff] %v20328_v8  ;;  %v20337_v46 = vpop.f32.mrb[151].mxu1  ;;  %8396 = vmatmul.mubr.f32.vlgmr.msra.gmra.mrb[224].mxu0 %v13661_v17  ;;  %v9772_v17 = vld [vmem:[%s21008_s5 + $0xb28] sm:$0xff] }
 0x76a   : > { %7913 = vmatmul.mubr.f32.gmra.mrb[192].mxu1 %v21600_v56  ;;  %12462 = vmatpush1.bf16.msra.mxu0 %v12461_v11  ;;  %v13663_v11 = vld [vmem:[#allocation3 + $0x8e] sm:$0xff]  ;;  %v12467_v28 = vpack.c.bf16 %v9772_v17, %v9771_v16  ;;  %v9775_v17 = vld [vmem:[%s21008_s5 + $0xb40] sm:$0xff] }
 0x76b   : > { %7917 = vmatprep.mubr.f32.mxu1 %v19809_v48  ;;  %8400 = vmatprep.mubr.f32.mxu0 %v13662_v20  ;;  %v21602_v48 = vld [vmem:[#allocation21_spill] sm:$0xff]  ;;  %v9773_v20 = vld [vmem:[%s21008_s5 + $0xb30] sm:$0xff] }
 0x76c   : > { %v20341_v43 = vpop.f32.mrb[152].mxu1  ;;  %12463 = vmatprep.subr.bf16.mxu0 %v21127_v6  ;;  %v13664_v56 = vld [vmem:[#allocation3 + $0xa7] sm:$0xff] }
 0x76d   : > { %21601 = vst [vmem:[#allocation23_spill] sm:$0xff] %v20341_v43  ;;  %v20350_v8 = vpop.f32.mrb[153].mxu1  ;;  %8401 = vmatmul.mubr.f32.gmra.mrb[226].mxu0 %v13663_v11  ;;  %v9774_v11 = vld [vmem:[%s21008_s5 + $0xb38] sm:$0xff] }
 0x76e   : > { %7918 = vmatmul.mubr.f32.gmra.mrb[194].mxu1 %v21602_v48  ;;  %8405 = vmatprep.mubr.f32.mxu0 %v13664_v56  ;;  %v13665_v48 = vld [vmem:[#allocation3 + $0xa6] sm:$0xff] }
 0x76f   : > { %7922 = vmatprep.mubr.f32.mxu1 %v19825_v38  ;;  %12465 = vmatpush1.bf16.msra.mxu0 %v12464_v31  ;;  %v13666_v38 = vld [vmem:[#allocation3 + $0xaf] sm:$0xff]  ;;  %v12470_v31 = vpack.c.bf16 %v9774_v11, %v9773_v20 }
 0x770   : > { %v20354_v18 = vpop.f32.mrb[154].mxu1  ;;  %12466 = vmatprep.subr.bf16.mxu0 %v21127_v6  ;;  %v9776_v56 = vld [vmem:[%s21008_s5 + $0xb48] sm:$0xff]  ;;  %v9777_v11 = vld [vmem:[%s21008_s5 + $0xb50] sm:$0xff] }
 0x771   : > { %v20363_v43 = vpop.f32.mrb[155].mxu1  ;;  %8406 = vmatmul.mubr.f32.gmra.mrb[228].mxu0 %v13665_v48 }
 0x772   : > { %7923 = vmatmul.mubr.f32.gmra.mrb[196].mxu1 %v19837_v60  ;;  %8410 = vmatprep.mubr.f32.mxu0 %v13666_v38  ;;  %v13667_v60 = vld [vmem:[#allocation3 + $0xae] sm:$0xff]  ;;  %v9778_v38 = vld [vmem:[%s21008_s5 + $0xb58] sm:$0xff] }
 0x773   : > { %7927 = vmatprep.mubr.f32.mxu1 %v19841_v54  ;;  %12468 = vmatpush1.bf16.msra.mxu0 %v12467_v28  ;;  %v13668_v54 = vld [vmem:[#allocation3 + $0xc7] sm:$0xff]  ;;  %v12473_v28 = vpack.c.bf16 %v9776_v56, %v9775_v17 }
 0x774   : > { %v20367_v16 = vpop.f32.mrb[156].mxu1  ;;  %12469 = vmatprep.subr.bf16.mxu0 %v21127_v6  ;;  %v9779_v56 = vld [vmem:[%s21008_s5 + $0xb60] sm:$0xff] }
 0x775   : > { %v20376_v48 = vpop.f32.mrb[157].mxu1  ;;  %8411 = vmatmul.mubr.f32.gmra.mrb[230].mxu0 %v13667_v60 }
 0x776   : > { %7928 = vmatmul.mubr.f32.gmra.mrb[198].mxu1 %v19849_v9  ;;  %8415 = vmatprep.mubr.f32.mxu0 %v13668_v54  ;;  %v13669_v9 = vld [vmem:[#allocation3 + $0xc6] sm:$0xff] }
 0x777   : > { %7932 = vmatprep.mubr.f32.mxu1 %v19853_v3  ;;  %12471 = vmatpush1.bf16.msra.mxu0 %v12470_v31  ;;  %v13670_v3 = vld [vmem:[#allocation3 + $0xcf] sm:$0xff]  ;;  %v12476_v31 = vpack.c.bf16 %v9778_v38, %v9777_v11 }
 0x778   : > { %v20380_v20 = vpop.f32.mrb[158].mxu1  ;;  %12472 = vmatprep.subr.bf16.mxu0 %v21127_v6  ;;  %v9780_v54 = vld [vmem:[%s21008_s5 + $0xb68] sm:$0xff] }
 0x779   : > { %21603 = vst [vmem:[#allocation21_spill] sm:$0xff] %v20380_v20  ;;  %v20389_v60 = vpop.f32.mrb[159].mxu1  ;;  %8416 = vmatmul.mubr.f32.gmra.mrb[232].mxu0 %v13669_v9  ;;  %v13671_v20 = vld [vmem:[#allocation3 + $0xce] sm:$0xff]  ;;  %v12479_v38 = vpack.c.bf16 %v9780_v54, %v9779_v56 }
 0x77a   : > { %7933 = vmatmul.mubr.f32.gmra.mrb[200].mxu1 %v19861_v12  ;;  %8420 = vmatprep.mubr.f32.mxu0 %v13670_v3 }
 0x77b   : > { %7937 = vmatprep.mubr.f32.mxu1 %v19865_v55  ;;  %12474 = vmatpush1.bf16.msra.mxu0 %v12473_v28  ;;  %v13672_v55 = vld [vmem:[#allocation3 + $0xe7] sm:$0xff] }
 0x77c   : > { %v7046_v17 = vpop.f32.mrb[96].mxu0  ;;  %12475 = vmatprep.subr.bf16.mxu0 %v21127_v6  ;;  %v21604_v28 = vld [vmem:[#allocation20_spill] sm:$0xff] }
 0x77d   : > { %v7272_v9 = vadd.f32 %v20125_v21, %v7046_v17  ;;  %v7048_v12 = vpop.f32.mrb[97].mxu0  ;;  %8421 = vmatmul.mubr.f32.gmra.mrb[234].mxu0 %v13671_v20  ;;  %v9781_v21 = vld [vmem:[%s21008_s5 + $0xb70] sm:$0xff] }
 0x77e   : > { %7938 = vmatmul.mubr.f32.gmra.mrb[202].mxu1 %v19873_v24  ;;  %8425 = vmatprep.mubr.f32.mxu0 %v13672_v55  ;;  %v9782_v24 = vld [vmem:[%s21008_s5 + $0xb78] sm:$0xff] }
 0x77f   : > { %v20403_v11 = vadd.f32 %v7272_v9, %v21604_v28  ;;  %7942 = vmatprep.mubr.f32.mxu1 %v19877_v61  ;;  %12477 = vmatpush1.bf16.msra.mxu0 %v12476_v31  ;;  %v13673_v9 = vld [vmem:[#allocation3 + $0xe6] sm:$0xff]  ;;  %v13674_v61 = vld [vmem:[#allocation3 + $0xef] sm:$0xff]  ;;  %v12482_v54 = vpack.c.bf16 %v9782_v24, %v9781_v21 }
 0x780   : > { %v7051_v3 = vpop.f32.mrb[144].mxu0  ;;  %12478 = vmatprep.subr.bf16.mxu0 %v21127_v6  ;;  %v21605_v31 = vld [vmem:[#allocation38_spill] sm:$0xff] }
 0x781   : > { %v7277_v20 = vadd.f32 %v20122_v51, %v7051_v3  ;;  %v7053_v17 = vpop.f32.mrb[145].mxu0  ;;  %8426 = vmatmul.mubr.f32.gmra.mrb[236].mxu0 %v13673_v9  ;;  %v9783_v51 = vld [vmem:[%s21008_s5 + $0xb80] sm:$0xff]  ;;  %v13675_v3 = vld [vmem:[#allocation3 + $0xee] sm:$0xff] }
 0x782   : > { %7943 = vmatmul.mubr.f32.gmra.mrb[204].mxu1 %v19891_v27  ;;  %8430 = vmatprep.mubr.f32.mxu0 %v13674_v61  ;;  %v9784_v27 = vld [vmem:[%s21008_s5 + $0xb88] sm:$0xff] }
 0x783   : > { %v20416_v56 = vadd.f32 %v7277_v20, %v21605_v31  ;;  %7947 = vmatprep.mubr.f32.mxu1 %v19897_v58  ;;  %12480 = vmatpush1.bf16.msra.mxu0 %v12479_v38  ;;  %v13676_v58 = vld [vmem:[#allocation3 + $0x107] sm:$0xff]  ;;  %v12485_v24 = vpack.c.bf16 %v9784_v27, %v9783_v51 }
 0x784   : > { %v7056_v12 = vpop.f32.mrb[100].mxu0  ;;  %12481 = vmatprep.subr.bf16.mxu0 %v21127_v6  ;;  %v21606_v38 = vld [vmem:[#allocation41_spill] sm:$0xff]  ;;  %v21607_v31 = vld [vmem:[#allocation40_spill] sm:$0xff] }
 0x785   : > { %v7282_v55 = vadd.f32 %v20150_v52, %v7056_v12  ;;  %v7058_v28 = vpop.f32.mrb[101].mxu0  ;;  %8431 = vmatmul.mubr.f32.gmra.mrb[238].mxu0 %v13675_v3  ;;  %v9785_v52 = vld [vmem:[%s21008_s5 + $0xb90] sm:$0xff]  ;;  %v13677_v61 = vld [vmem:[#allocation3 + $0x106] sm:$0xff]  ;;  %v21608_v3 = vld [vmem:[#allocation51_spill] sm:$0xff] }
 0x786   : > { %7948 = vmatmul.mubr.f32.gmra.mrb[206].mxu1 %v19906_v5  ;;  %8435 = vmatprep.mubr.f32.mxu0 %v13676_v58  ;;  %v9786_v5 = vld [vmem:[%s21008_s5 + $0xb98] sm:$0xff]  ;;  %v13679_v28 = vld [vmem:[#allocation3 + $0x10e] sm:$0xff] }
 0x787   : > { %v20429_v21 = vadd.f32 %v7282_v55, %v21606_v38  ;;  %7952 = vmatprep.mubr.f32.mxu1 %v19910_v42  ;;  %12483 = vmatpush1.bf16.msra.mxu0 %v12482_v54  ;;  %v13678_v42 = vld [vmem:[#allocation3 + $0x10f] sm:$0xff]  ;;  %v12488_v12 = vpack.c.bf16 %v9786_v5, %v9785_v52  ;;  %v13681_v5 = vld [vmem:[#allocation3 + $0x126] sm:$0xff] }
 0x788   : > { %v7061_v20 = vpop.f32.mrb[146].mxu0  ;;  %12484 = vmatprep.subr.bf16.mxu0 %v21127_v6 }
 0x789   : > { %v7287_v17 = vadd.f32 %v20147_v29, %v7061_v20  ;;  %v7063_v9 = vpop.f32.mrb[147].mxu0  ;;  %8436 = vmatmul.mubr.f32.gmra.mrb[240].mxu0 %v13677_v61  ;;  %v9787_v29 = vld [vmem:[%s21008_s5 + $0xba0] sm:$0xff] }
 0x78a   : > { %7953 = vmatmul.mubr.f32.gmra.mrb[208].mxu1 %v19918_v63  ;;  %8440 = vmatprep.mubr.f32.mxu0 %v13678_v42  ;;  %v9788_v63 = vld [vmem:[%s21008_s5 + $0xba8] sm:$0xff] }
 0x78b   : > { %v20442_v54 = vadd.f32 %v7287_v17, %v21607_v31  ;;  %7957 = vmatprep.mubr.f32.mxu1 %v19922_v2  ;;  %12486 = vmatpush1.bf16.msra.mxu0 %v12485_v24  ;;  %v13680_v2 = vld [vmem:[#allocation3 + $0x127] sm:$0xff]  ;;  %v12491_v38 = vpack.c.bf16 %v9788_v63, %v9787_v29 }
 0x78c   : > { %v7066_v51 = vpop.f32.mrb[104].mxu0  ;;  %12487 = vmatprep.subr.bf16.mxu0 %v21127_v6  ;;  %v21609_v17 = vld [vmem:[#allocation52_spill] sm:$0xff] }
 0x78d   : > { %v7292_v27 = vadd.f32 %v20169_v53, %v7066_v51  ;;  %v7068_v55 = vpop.f32.mrb[105].mxu0  ;;  %8441 = vmatmul.mubr.f32.gmra.mrb[242].mxu0 %v13679_v28  ;;  %v9789_v53 = vld [vmem:[%s21008_s5 + $0xbb0] sm:$0xff]  ;;  %v21610_v29 = vld [vmem:[#allocation44_spill] sm:$0xff] }
 0x78e   : > { %7958 = vmatmul.mubr.f32.gmra.mrb[210].mxu1 %v19930_v33  ;;  %8445 = vmatprep.mubr.f32.mxu0 %v13680_v2  ;;  %v9790_v33 = vld [vmem:[%s21008_s5 + $0xbb8] sm:$0xff]  ;;  %v13683_v51 = vld [vmem:[#allocation3 + $0x12e] sm:$0xff] }
 0x78f   : > { %v20455_v58 = vadd.f32 %v7292_v27, %v21608_v3  ;;  %7962 = vmatprep.mubr.f32.mxu1 %v19934_v30  ;;  %12489 = vmatpush1.bf16.msra.mxu0 %v12488_v12  ;;  %v13682_v30 = vld [vmem:[#allocation3 + $0x12f] sm:$0xff]  ;;  %v12494_v61 = vpack.c.bf16 %v9790_v33, %v9789_v53  ;;  %v13685_v3 = vld [vmem:[#allocation3 + $0x146] sm:$0xff] }
 0x790   : > { %v7071_v24 = vpop.f32.mrb[148].mxu0  ;;  %12490 = vmatprep.subr.bf16.mxu0 %v21127_v6 }
 0x791   : > { %v7297_v20 = vadd.f32 %v20166_v26, %v7071_v24  ;;  %v7073_v52 = vpop.f32.mrb[149].mxu0  ;;  %8446 = vmatmul.mubr.f32.gmra.mrb[244].mxu0 %v13681_v5  ;;  %v9791_v26 = vld [vmem:[%s21008_s5 + $0xbc0] sm:$0xff] }
 0x792   : > { %7963 = vmatmul.mubr.f32.gmra.mrb[212].mxu1 %v19942_v40  ;;  %8450 = vmatprep.mubr.f32.mxu0 %v13682_v30  ;;  %v9792_v40 = vld [vmem:[%s21008_s5 + $0xbc8] sm:$0xff] }
 0x793   : > { %v20468_v9 = vadd.f32 %v7297_v20, %v21609_v17  ;;  %7967 = vmatprep.mubr.f32.mxu1 %v19946_v62  ;;  %12492 = vmatpush1.bf16.msra.mxu0 %v12491_v38  ;;  %v13684_v62 = vld [vmem:[#allocation3 + $0x147] sm:$0xff]  ;;  %v12497_v27 = vpack.c.bf16 %v9792_v40, %v9791_v26  ;;  %v21611_v38 = vld [vmem:[#allocation42_spill] sm:$0xff] }
 0x794   : > { %v7076_v42 = vpop.f32.mrb[108].mxu0  ;;  %12493 = vmatprep.subr.bf16.mxu0 %v21127_v6  ;;  %v20497_v20 = vld [vmem:[#allocation3 + $0x249] sm:$0xff] }
 0x795   : > { %v7302_v31 = vadd.f32 %v20188_v59, %v7076_v42  ;;  %v7078_v12 = vpop.f32.mrb[109].mxu0  ;;  %8451 = vmatmul.mubr.f32.gmra.mrb[246].mxu0 %v13683_v51  ;;  %v9793_v59 = vld [vmem:[%s21008_s5 + $0xbd0] sm:$0xff]  ;;  %v13688_v17 = vld [vmem:[#allocation3 + $0x167] sm:$0xff] }
 0x796   : > { %7968 = vmatmul.mubr.f32.gmra.mrb[214].mxu1 %v19954_v22  ;;  %8455 = vmatprep.mubr.f32.mxu0 %v13684_v62  ;;  %v9794_v22 = vld [vmem:[%s21008_s5 + $0xbd8] sm:$0xff]  ;;  %v13687_v30 = vld [vmem:[#allocation3 + $0x14e] sm:$0xff] }
 0x797   : > { %v20481_v63 = vadd.f32 %v7302_v31, %v21610_v29  ;;  %7972 = vmatprep.mubr.f32.mxu1 %v19957_v39  ;;  %12495 = vmatpush1.bf16.msra.mxu0 %v12494_v61  ;;  %v13686_v39 = vld [vmem:[#allocation3 + $0x14f] sm:$0xff]  ;;  %v12500_v53 = vpack.c.bf16 %v9794_v22, %v9793_v59  ;;  %v9798_v12 = vld [vmem:[%s21008_s5 + $0xbf8] sm:$0xff]  ;;  %v13689_v29 = vld [vmem:[#allocation3 + $0x166] sm:$0xff] }
 0x798   : > { %v7081_v55 = vpop.f32.mrb[150].mxu0  ;;  %12496 = vmatprep.subr.bf16.mxu0 %v21127_v6  ;;  %v21613_v61 = vld [vmem:[#allocation13_spill] sm:$0xff]  ;;  %v20512_v31 = vld [vmem:[#allocation3 + $0x251] sm:$0xff] }
 0x799   : > { %v7307_v28 = vadd.f32 %v20185_v13, %v7081_v55  ;;  %v7083_v2 = vpop.f32.mrb[151].mxu0  ;;  %8456 = vmatmul.mubr.f32.gmra.mrb[248].mxu0 %v13685_v3  ;;  %v9795_v13 = vld [vmem:[%s21008_s5 + $0xbe0] sm:$0xff]  ;;  %v13691_v55 = vld [vmem:[#allocation3 + $0x16f] sm:$0xff] }
 0x79a   : > { %7973 = vmatmul.mubr.f32.gmra.mrb[216].mxu1 %v19964_v57  ;;  %8460 = vmatprep.mubr.f32.mxu0 %v13686_v39  ;;  %v9796_v57 = vld [vmem:[%s21008_s5 + $0xbe8] sm:$0xff] }
 0x79b   : > { %v20494_v24 = vadd.f32 %v7307_v28, %v21611_v38  ;;  %7977 = vmatprep.mubr.f32.mxu1 %v19968_v14  ;;  %12498 = vmatpush1.bf16.msra.mxu0 %v12497_v27  ;;  %v21612_v14 = vld [vmem:[#allocation32_spill] sm:$0xff]  ;;  %v12503_v26 = vpack.c.bf16 %v9796_v57, %v9795_v13  ;;  %v21614_v59 = vld [vmem:[#allocation53_spill] sm:$0xff] }
 0x79c   : > { %v7086_v33 = vpop.f32.mrb[112].mxu0  ;;  %12499 = vmatprep.subr.bf16.mxu0 %v21127_v6  ;;  %v20522_v27 = vld [vmem:[#allocation2] sm:$0xff]  ;;  %v13692_v39 = vld [vmem:[#allocation3 + $0x16e] sm:$0xff] }
 0x79d   : > { %v7312_v52 = vadd.f32 %v20207_v36, %v7086_v33  ;;  %v7088_v5 = vpop.f32.mrb[113].mxu0  ;;  %8461 = vmatmul.mubr.f32.gmra.mrb[250].mxu0 %v13687_v30  ;;  %v9797_v36 = vld [vmem:[%s21008_s5 + $0xbf0] sm:$0xff]  ;;  %v13693_v38 = vld [vmem:[#allocation3 + $0x187] sm:$0xff] }
 0x79e   : > { %7978 = vmatmul.mubr.f32.gmra.mrb[218].mxu1 %v21612_v14  ;;  %8465 = vmatprep.mubr.f32.mxu0 %v13688_v17  ;;  %v12506_v28 = vpack.c.bf16 %v9798_v12, %v9797_v36  ;;  %v21616_v5 = vld [vmem:[#allocation31_spill] sm:$0xff] }
 0x79f   : > { %v20509_v42 = vadd.f32 %v7312_v52, %v21613_v61  ;;  %7982 = vmatprep.mubr.f32.mxu1 %v20497_v20  ;;  %12501 = vmatpush1.bf16.msra.mxu0 %v12500_v53  ;;  %v21615_v53 = vld [vmem:[#allocation27_spill] sm:$0xff]  ;;  %v13696_v61 = vld [vmem:[#allocation3 + $0x18e] sm:$0xff] }
 0x7a0   : > { %v7091_v40 = vpop.f32.mrb[152].mxu0  ;;  %12502 = vmatprep.subr.bf16.mxu0 %v21127_v6 }
 0x7a1   : > { %v7317_v51 = vadd.f32 %v20204_v25, %v7091_v40  ;;  %v7093_v62 = vpop.f32.mrb[153].mxu0  ;;  %8466 = vmatmul.mubr.f32.gmra.mrb[252].mxu0 %v13689_v29 }
 0x7a2   : > { %7983 = vmatmul.mubr.f32.gmra.mrb[220].mxu1 %v20522_v27  ;;  %8470 = vmatprep.mubr.f32.mxu0 %v13691_v55 }
 0x7a3   : > { %v20526_v22 = vadd.f32 %v7317_v51, %v21614_v59  ;;  %7987 = vmatprep.mubr.f32.mxu1 %v20512_v31  ;;  %12504 = vmatpush1.bf16.msra.mxu0 %v12503_v26  ;;  %v21617_v26 = vld [vmem:[#allocation16_spill] sm:$0xff]  ;;  %v21618_v51 = vld [vmem:[#allocation54_spill] sm:$0xff]  ;;  %v21619_v59 = vld [vmem:[#allocation55_spill] sm:$0xff] }
 0x7a4   : > { %v7096_v2 = vpop.f32.mrb[116].mxu0  ;;  %12505 = vmatprep.subr.bf16.mxu0 %v21127_v6  ;;  %v13694_v6 = vld [vmem:[#allocation3 + $0x186] sm:$0xff] }
 0x7a5   : > { %v7322_v25 = vadd.f32 %v20226_v10, %v7096_v2  ;;  %v7098_v3 = vpop.f32.mrb[117].mxu0  ;;  %8471 = vmatmul.mubr.f32.gmra.mrb[254].mxu0 %v13692_v39  ;;  %v13695_v10 = vld [vmem:[#allocation3 + $0x18f] sm:$0xff]  ;;  %v21620_v2 = vld [vmem:[#allocation56_spill] sm:$0xff]  ;;  %v21621_v39 = vld [vmem:[#allocation39_spill] sm:$0xff] }
 0x7a6   : > { %7988 = vmatmul.mubr.f32.gmra.mrb[222].mxu1 %v20522_v27  ;;  %8475 = vmatprep.mubr.f32.mxu0 %v13693_v38  ;;  %v21622_v38 = vld [vmem:[#allocation30_spill] sm:$0xff] }
 0x7a7   : > { %v20533_v33 = vadd.f32 %v7322_v25, %v21615_v53  ;;  %11180 = vmatprep.mubr.f32.mxu1 %v20012_v0  ;;  %12507 = vmatpush1.bf16.msra.mxu0 %v12506_v28 }
 0x7a8   : > { %v7101_v13 = vpop.f32.mrb[154].mxu0 }
 0x7a9   : > { %v7327_v57 = vadd.f32 %v20223_v7, %v7101_v13  ;;  %v7103_v52 = vpop.f32.mrb[155].mxu0  ;;  %8476 = vmatmul.mubr.f32.gmra.mrb[0].mxu0 %v13694_v6  ;;  %v13697_v7 = vld [vmem:[#allocation3 + $0x1a7] sm:$0xff]  ;;  %v21624_v6 = vld [vmem:[#allocation35_spill] sm:$0xff] }
 0x7aa   : > { %11181 = vmatmul.mubr.f32.vlgmr.msra.gmra.mrb[224].mxu1 %v20024_v41  ;;  %8480 = vmatprep.mubr.f32.mxu0 %v13695_v10  ;;  %v13705_v10 = vld [vmem:[#allocation3 + $0x1e7] sm:$0xff] }
 0x7ab   : > { %v20539_v30 = vadd.f32 %v7327_v57, %v21616_v5  ;;  %11183 = vmatprep.mubr.f32.mxu1 %v20038_v49  ;;  %v13698_v49 = vld [vmem:[#allocation3 + $0x1a6] sm:$0xff]  ;;  %v21625_v5 = vld [vmem:[#allocation26_spill] sm:$0xff] }
 0x7ac   : > { %v7106_v14 = vpop.f32.mrb[120].mxu0 }
 0x7ad   : > { %v7332_v17 = vadd.f32 %v20245_v1, %v7106_v14  ;;  %v7108_v0 = vpop.f32.mrb[121].mxu0  ;;  %8481 = vmatmul.mubr.f32.gmra.mrb[2].mxu0 %v13696_v61  ;;  %v13699_v1 = vld [vmem:[#allocation3 + $0x1af] sm:$0xff] }
 0x7ae   : > { %11184 = vmatmul.mubr.f32.gmra.mrb[226].mxu1 %v20049_v50  ;;  %8485 = vmatprep.mubr.f32.mxu0 %v13697_v7  ;;  %v21627_v61 = vld [vmem:[#allocation58_spill] sm:$0xff] }
 0x7af   : > { %v20545_v40 = vadd.f32 %v7332_v17, %v21617_v26  ;;  %11186 = vmatprep.mubr.f32.mxu1 %v20063_v15  ;;  %v13700_v15 = vld [vmem:[#allocation3 + $0x1ae] sm:$0xff] }
 0x7b0   : > { %v7111_v41 = vpop.f32.mrb[156].mxu0  ;;  %v21626_v17 = vld [vmem:[#allocation6_spill] sm:$0xff] }
 0x7b1   : > { %v7337_v36 = vadd.f32 %v20242_v4, %v7111_v41  ;;  %v7113_v12 = vpop.f32.mrb[157].mxu0  ;;  %8486 = vmatmul.mubr.f32.gmra.mrb[4].mxu0 %v13698_v49  ;;  %v13701_v4 = vld [vmem:[#allocation3 + $0x1c7] sm:$0xff] }
 0x7b2   : > { %11187 = vmatmul.mubr.f32.gmra.mrb[228].mxu1 %v20074_v44  ;;  %8490 = vmatprep.mubr.f32.mxu0 %v13699_v1  ;;  %v13706_v41 = vld [vmem:[#allocation3 + $0x1e6] sm:$0xff] }
 0x7b3   : > { %v20551_v62 = vadd.f32 %v7337_v36, %v21618_v51  ;;  %11189 = vmatprep.mubr.f32.mxu1 %v20088_v47  ;;  %v13702_v47 = vld [vmem:[#allocation3 + $0x1c6] sm:$0xff] }
 0x7b4   : > { %v7116_v50 = vpop.f32.mrb[124].mxu0  ;;  %v21628_v36 = vld [vmem:[#allocation8_spill] sm:$0xff]  ;;  %v21629_v12 = vld [vmem:[#allocation17_spill] sm:$0xff] }
 0x7b5   : > { %v7342_v29 = vadd.f32 %v20264_v45, %v7116_v50  ;;  %v7118_v55 = vpop.f32.mrb[125].mxu0  ;;  %8491 = vmatmul.mubr.f32.gmra.mrb[6].mxu0 %v13700_v15  ;;  %v13703_v45 = vld [vmem:[#allocation3 + $0x1cf] sm:$0xff]  ;;  %v21630_v1 = vld [vmem:[#allocation36_spill] sm:$0xff]  ;;  %v21631_v15 = vld [vmem:[#allocation7_spill] sm:$0xff] }
 0x7b6   : > { %11190 = vmatmul.mubr.f32.gmra.mrb[230].mxu1 %v20099_v32  ;;  %8495 = vmatprep.mubr.f32.mxu0 %v13701_v4  ;;  %v21623_v32 = vld [vmem:[#allocation37_spill] sm:$0xff] }
 0x7b7   : > { %v20557_v28 = vadd.f32 %v7342_v29, %v21619_v59  ;;  %11192 = vmatprep.mubr.f32.mxu1 %v20113_v35  ;;  %v13704_v35 = vld [vmem:[#allocation3 + $0x1ce] sm:$0xff] }
 0x7b8   : > { %v7121_v44 = vpop.f32.mrb[158].mxu0  ;;  %v13708_v55 = vld [vmem:[#allocation3 + $0x1ee] sm:$0xff] }
 0x7b9   : > { %v7347_v25 = vadd.f32 %v21620_v2, %v7121_v44  ;;  %v7123_v3 = vpop.f32.mrb[159].mxu0  ;;  %8496 = vmatmul.mubr.f32.gmra.mrb[8].mxu0 %v13702_v47  ;;  %v13709_v4 = vld [vmem:[#allocation3 + $0x207] sm:$0xff]  ;;  %v21632_v59 = vld [vmem:[#allocation18_spill] sm:$0xff] }
 0x7ba   : > { %11193 = vmatmul.mubr.f32.gmra.mrb[232].mxu1 %v21621_v39  ;;  %8500 = vmatprep.mubr.f32.mxu0 %v13703_v45  ;;  %v21633_v2 = vld [vmem:[#allocation10_spill] sm:$0xff]  ;;  %v21634_v3 = vld [vmem:[#allocation60_spill] sm:$0xff] }
 0x7bb   : > { %v20563_v53 = vadd.f32 %v7347_v25, %v21622_v38  ;;  %11195 = vmatprep.mubr.f32.mxu1 %v21623_v32  ;;  %v13710_v45 = vld [vmem:[#allocation3 + $0x206] sm:$0xff]  ;;  %v21635_v38 = vld [vmem:[#allocation50_spill] sm:$0xff] }
 0x7bc   : > { %v7126_v13 = vpop.f32.mrb[160].mxu0  ;;  %v21636_v32 = vld [vmem:[#allocation14_spill] sm:$0xff] }
 0x7bd   : > { %v7352_v57 = vadd.f32 %v20283_v19, %v7126_v13  ;;  %v7128_v52 = vpop.f32.mrb[161].mxu0  ;;  %8501 = vmatmul.mubr.f32.gmra.mrb[10].mxu0 %v13704_v35  ;;  %v13707_v19 = vld [vmem:[#allocation3 + $0x1ef] sm:$0xff] }
 0x7be   : > { %11196 = vmatmul.mubr.f32.gmra.mrb[234].mxu1 %v21624_v6  ;;  %8505 = vmatprep.mubr.f32.mxu0 %v13705_v10  ;;  %v13712_v10 = vld [vmem:[#allocation3 + $0x20e] sm:$0xff] }
 0x7bf   : > { %v20569_v14 = vadd.f32 %v7352_v57, %v21625_v5  ;;  %11198 = vmatprep.mubr.f32.mxu1 %v21626_v17  ;;  %v21637_v57 = vld [vmem:[#allocation43_spill] sm:$0xff]  ;;  %v13713_v17 = vld [vmem:[#allocation3 + $0x227] sm:$0xff] }
 0x7c0   : > { %v7131_v0 = vpop.f32.mrb[162].mxu0  ;;  %v21638_v5 = vld [vmem:[#allocation11_spill] sm:$0xff] }
 0x7c1   : > { %v7357_v7 = vadd.f32 %v21627_v61, %v7131_v0  ;;  %v7133_v26 = vpop.f32.mrb[163].mxu0  ;;  %8506 = vmatmul.mubr.f32.gmra.mrb[12].mxu0 %v13706_v41  ;;  %v21639_v0 = vld [vmem:[#allocation19_spill] sm:$0xff] }
 0x7c2   : > { %11199 = vmatmul.mubr.f32.gmra.mrb[236].mxu1 %v21628_v36  ;;  %8510 = vmatprep.mubr.f32.mxu0 %v13707_v19  ;;  %v13714_v19 = vld [vmem:[#allocation3 + $0x226] sm:$0xff] }
 0x7c3   : > { %v20575_v49 = vadd.f32 %v7357_v7, %v21629_v12  ;;  %11201 = vmatprep.mubr.f32.mxu1 %v21630_v1  ;;  %v21640_v7 = vld [vmem:[#allocation9_spill] sm:$0xff]  ;;  %v21641_v12 = vld [vmem:[#allocation12_spill] sm:$0xff] }
 0x7c4   : > { %v7136_v51 = vpop.f32.mrb[164].mxu0  ;;  %v21642_v1 = vld [vmem:[#allocation29_spill] sm:$0xff] }
 0x7c5   : > { %v7362_v50 = vadd.f32 %v20304_v34, %v7136_v51  ;;  %v7138_v29 = vpop.f32.mrb[165].mxu0  ;;  %8511 = vmatmul.mubr.f32.gmra.mrb[14].mxu0 %v13708_v55  ;;  %v13711_v34 = vld [vmem:[#allocation3 + $0x20f] sm:$0xff] }
 0x7c6   : > { %11202 = vmatmul.mubr.f32.gmra.mrb[238].mxu1 %v21631_v15  ;;  %8515 = vmatprep.mubr.f32.mxu0 %v13709_v4  ;;  %v13716_v4 = vld [vmem:[#allocation3 + $0x22e] sm:$0xff] }
 0x7c7   : > { %v20581_v44 = vadd.f32 %v7362_v50, %v21632_v59  ;;  %11204 = vmatprep.mubr.f32.mxu1 %v21633_v2  ;;  %v21643_v50 = vld [vmem:[#allocation45_spill] sm:$0xff]  ;;  %v21645_v2 = vld [vmem:[#allocation24_spill] sm:$0xff] }
 0x7c8   : > { %v7141_v25 = vpop.f32.mrb[166].mxu0  ;;  %v21644_v59 = vld [vmem:[#allocation57_spill] sm:$0xff] }
 0x7c9   : > { %v7367_v47 = vadd.f32 %v21634_v3, %v7141_v25  ;;  %v7143_v39 = vpop.f32.mrb[167].mxu0  ;;  %8516 = vmatmul.mubr.f32.gmra.mrb[16].mxu0 %v13710_v45  ;;  %v21646_v3 = vld [vmem:[#allocation22_spill] sm:$0xff] }
 0x7ca   : > { %11205 = vmatmul.mubr.f32.gmra.mrb[240].mxu1 %v21635_v38  ;;  %8520 = vmatprep.mubr.f32.mxu0 %v13711_v34  ;;  %v21647_v39 = vld [vmem:[#allocation28_spill] sm:$0xff] }
 0x7cb   : > { %v20587_v13 = vadd.f32 %v7367_v47, %v21636_v32  ;;  %11207 = vmatprep.mubr.f32.mxu1 %v21637_v57  ;;  %v13718_v34 = vld [vmem:[#allocation3 + $0x246] sm:$0xff]  ;;  %v21648_v32 = vld [vmem:[#allocation59_spill] sm:$0xff] }
 0x7cc   : > { %v7146_v52 = vpop.f32.mrb[168].mxu0  ;;  %v21649_v57 = vld [vmem:[#allocation25_spill] sm:$0xff] }
 0x7cd   : > { %v7372_v35 = vadd.f32 %v20323_v23, %v7146_v52  ;;  %v7148_v6 = vpop.f32.mrb[169].mxu0  ;;  %8521 = vmatmul.mubr.f32.gmra.mrb[18].mxu0 %v13712_v10  ;;  %v13715_v23 = vld [vmem:[#allocation3 + $0x22f] sm:$0xff] }
 0x7ce   : > { %11208 = vmatmul.mubr.f32.gmra.mrb[242].mxu1 %v21638_v5  ;;  %8525 = vmatprep.mubr.f32.mxu0 %v13713_v17  ;;  %v5041_v6 = vld [vmem:[#allocation3 + $0x267] sm:$0xff] }
 0x7cf   : > { %v20593_v61 = vadd.f32 %v7372_v35, %v21639_v0  ;;  %11210 = vmatprep.mubr.f32.mxu1 %v21640_v7  ;;  %v21650_v35 = vld [vmem:[#allocation15_spill] sm:$0xff]  ;;  %v13720_v0 = vld [vmem:[#allocation3 + $0x24e] sm:$0xff] }
 0x7d0   : > { %v7151_v26 = vpop.f32.mrb[170].mxu0  ;;  %v21651_v7 = vld [vmem:[#allocation62_spill] sm:$0xff] }
 0x7d1   : > { %v7377_v41 = vadd.f32 %v20320_v37, %v7151_v26  ;;  %v7153_v36 = vpop.f32.mrb[171].mxu0  ;;  %8526 = vmatmul.mubr.f32.gmra.mrb[20].mxu0 %v13714_v19  ;;  %v13717_v37 = vld [vmem:[#allocation3 + $0x247] sm:$0xff]  ;;  %v5042_v19 = vld [vmem:[#allocation3 + $0x26f] sm:$0xff] }
 0x7d2   : > { %11211 = vmatmul.mubr.f32.gmra.mrb[244].mxu1 %v21641_v12  ;;  %8530 = vmatprep.mubr.f32.mxu0 %v13715_v23  ;;  %v5001_v26 = vld [vmem:[#allocation3 + $0x266] sm:$0xff] }
 0x7d3   : > { %v20599_v51 = vadd.f32 %v7377_v41, %v21642_v1  ;;  %11213 = vmatprep.mubr.f32.mxu1 %v21643_v50  ;;  %v21652_v41 = vld [vmem:[#allocation46_spill] sm:$0xff]  ;;  %v21653_v12 = vld [vmem:[#allocation61_spill] sm:$0xff]  ;;  %v21654_v50 = vld [vmem:[#allocation23_spill] sm:$0xff] }
 0x7d4   : > { %v7156_v29 = vpop.f32.mrb[172].mxu0  ;;  %v5161_v1 = vld [vmem:[#allocation3 + $0x26a] sm:$0xff] }
 0x7d5   : > { %v7382_v55 = vadd.f32 %v20337_v46, %v7156_v29  ;;  %v7158_v15 = vpop.f32.mrb[173].mxu0  ;;  %8531 = vmatmul.mubr.f32.gmra.mrb[22].mxu0 %v13716_v4  ;;  %v13719_v46 = vld [vmem:[#allocation3 + $0x24f] sm:$0xff] }
 0x7d6   : > { %11214 = vmatmul.mubr.f32.gmra.mrb[246].mxu1 %v21644_v59  ;;  %8535 = vmatprep.mubr.f32.mxu0 %v13717_v37  ;;  %v21655_v15 = vld [vmem:[#allocation63_spill] sm:$0xff]  ;;  %v21656_v4 = vld [vmem:[#allocation33_spill] sm:$0xff] }
 0x7d7   : > { %v20605_v25 = vadd.f32 %v7382_v55, %v21645_v2  ;;  %11216 = vmatprep.mubr.f32.mxu1 %v21646_v3  ;;  %v5162_v37 = vld [vmem:[#allocation3 + $0x272] sm:$0xff] }
 0x7d8   : > { %v7161_v47 = vpop.f32.mrb[174].mxu0 }
 0x7d9   : > { %v7387_v45 = vadd.f32 %v21647_v39, %v7161_v47  ;;  %v7163_v38 = vpop.f32.mrb[175].mxu0  ;;  %8536 = vmatmul.mubr.f32.gmra.mrb[24].mxu0 %v13718_v34  ;;  %v13721_v39 = vld [vmem:[#allocation3 + $0x89] sm:$0xff] }
 0x7da   : > { %11217 = vmatmul.mubr.f32.gmra.mrb[248].mxu1 %v21648_v32  ;;  %8540 = vmatprep.mubr.f32.mxu0 %v13719_v46 }
 0x7db   : > { %v20611_v52 = vadd.f32 %v7387_v45, %v21649_v57  ;;  %11219 = vmatprep.mubr.f32.mxu1 %v21650_v35  ;;  %v21657_v45 = vld [vmem:[#allocation47_spill] sm:$0xff]  ;;  %v13722_v57 = vld [vmem:[#allocation3 + $0x88] sm:$0xff] }
 0x7dc   : > { %v7166_v10 = vpop.f32.mrb[176].mxu0  ;;  %v13723_v35 = vld [vmem:[#allocation3 + $0x91] sm:$0xff] }
 0x7dd   : > { %v7392_v5 = vadd.f32 %v20350_v8, %v7166_v10  ;;  %v7168_v17 = vpop.f32.mrb[177].mxu0  ;;  %8541 = vmatmul.mubr.f32.gmra.mrb[26].mxu0 %v13720_v0  ;;  %v5002_v8 = vld [vmem:[#allocation3 + $0x26e] sm:$0xff] }
 0x7de   : > { %11220 = vmatmul.mubr.f32.gmra.mrb[250].mxu1 %v21651_v7  ;;  %8545 = vmatprep.mubr.f32.mxu0 %v5041_v6  ;;  %v21658_v6 = vld [vmem:[#allocation48_spill] sm:$0xff]  ;;  %v13724_v0 = vld [vmem:[#allocation3 + $0x90] sm:$0xff] }
 0x7df   : > { %v20617_v36 = vadd.f32 %v7392_v5, %v21652_v41  ;;  %11222 = vmatprep.mubr.f32.mxu1 %v21653_v12  ;;  %v13725_v7 = vld [vmem:[#allocation3 + $0xa9] sm:$0xff] }
 0x7e0   : > { %v7171_v23 = vpop.f32.mrb[178].mxu0 }
 0x7e1   : > { %v7397_v29 = vadd.f32 %v21654_v50, %v7171_v23  ;;  %v7173_v55 = vpop.f32.mrb[179].mxu0  ;;  %8546 = vmatmul.mubr.f32.gmra.mrb[28].mxu0 %v5001_v26  ;;  %v21659_v26 = vld [vmem:[#allocation4_spill] sm:$0xff]  ;;  %v13726_v23 = vld [vmem:[#allocation3 + $0xa8] sm:$0xff] }
 0x7e2   : > { %8550 = vmatprep.mubr.f32.mxu0 %v5042_v19  ;;  %11223 = vmatmul.mubr.f32.gmra.mrb[252].mxu1 %v21655_v15  ;;  %v21660_v50 = vld [vmem:[#allocation49_spill] sm:$0xff]  ;;  %v13728_v15 = vld [vmem:[#allocation3 + $0xb0] sm:$0xff] }
 0x7e3   : > { %v20623_v59 = vadd.f32 %v7397_v29, %v21656_v4  ;;  %11225 = vmatprep.mubr.f32.mxu1 %v5161_v1  ;;  %v13727_v1 = vld [vmem:[#allocation3 + $0xb1] sm:$0xff]  ;;  %v13729_v4 = vld [vmem:[#allocation3 + $0xc9] sm:$0xff] }
 0x7e4   : > { %v7176_v2 = vpop.f32.mrb[180].mxu0 }
 0x7e5   : > { %v7402_v3 = vadd.f32 %v20363_v43, %v7176_v2  ;;  %v7178_v47 = vpop.f32.mrb[181].mxu0  ;;  %8551 = vmatmul.mubr.f32.gmra.mrb[30].mxu0 %v5002_v8 }
 0x7e6   : > { %8620 = vmatprep.mubr.f32.mxu0 %v13721_v39  ;;  %11226 = vmatmul.mubr.f32.gmra.mrb[254].mxu1 %v5162_v37  ;;  %v21661_v37 = vld [vmem:[#allocation5_spill] sm:$0xff] }
 0x7e7   : > { %v20627_v38 = vadd.f32 %v7402_v3, %v21657_v45  ;;  %v21662_v3 = vld [vmem:[#allocation21_spill] sm:$0xff] }
 0x7e8   : > { %v7181_v34 = vpop.f32.mrb[182].mxu0  ;;  %v13730_v45 = vld [vmem:[#allocation3 + $0xc8] sm:$0xff] }
 0x7e9   : > { %v7407_v32 = vadd.f32 %v20354_v18, %v7181_v34  ;;  %v7183_v46 = vpop.f32.mrb[183].mxu0  ;;  %8621 = vmatmul.mubr.f32.vlgmr.msra.gmra.mrb[224].mxu0 %v13722_v57  ;;  %v13731_v34 = vld [vmem:[#allocation3 + $0xd1] sm:$0xff] }
 0x7ea   : > { %8625 = vmatprep.mubr.f32.mxu0 %v13723_v35 }
 0x7eb   : > { %v20631_v10 = vadd.f32 %v7407_v32, %v21658_v6  ;;  %v21663_v32 = vld [vmem:[#allocation34_spill] sm:$0xff] }
 0x7ec   : > { %v7186_v43 = vpop.f32.mrb[184].mxu0  ;;  %v13732_v6 = vld [vmem:[#allocation3 + $0xd0] sm:$0xff] }
 0x7ed   : > { %v7412_v5 = vadd.f32 %v20376_v48, %v7186_v43  ;;  %v7188_v17 = vpop.f32.mrb[185].mxu0  ;;  %8626 = vmatmul.mubr.f32.gmra.mrb[226].mxu0 %v13724_v0 }
 0x7ee   : > { %8630 = vmatprep.mubr.f32.mxu0 %v13725_v7  ;;  %v13733_v17 = vld [vmem:[#allocation3 + $0xe9] sm:$0xff] }
 0x7ef   : > { %v20635_v41 = vadd.f32 %v7412_v5, %v21659_v26 }
 0x7f0   : > { %v7191_v18 = vpop.f32.mrb[186].mxu0 }
 0x7f1   : > { %v7417_v19 = vadd.f32 %v20367_v16, %v7191_v18  ;;  %v7193_v12 = vpop.f32.mrb[187].mxu0  ;;  %8631 = vmatmul.mubr.f32.gmra.mrb[228].mxu0 %v13726_v23 }
 0x7f2   : > { %8635 = vmatprep.mubr.f32.mxu0 %v13727_v1  ;;  %v13735_v1 = vld [vmem:[#allocation3 + $0xf1] sm:$0xff] }
 0x7f3   : > { %v20639_v29 = vadd.f32 %v7417_v19, %v21660_v50  ;;  %v13734_v19 = vld [vmem:[#allocation3 + $0xe8] sm:$0xff] }
 0x7f4   : > { %v7196_v48 = vpop.f32.mrb[188].mxu0 }
 0x7f5   : > { %v7422_v55 = vadd.f32 %v20389_v60, %v7196_v48  ;;  %v7198_v8 = vpop.f32.mrb[189].mxu0  ;;  %8636 = vmatmul.mubr.f32.gmra.mrb[230].mxu0 %v13728_v15  ;;  %v13736_v15 = vld [vmem:[#allocation3 + $0xf0] sm:$0xff] }
 0x7f6   : > { %8640 = vmatprep.mubr.f32.mxu0 %v13729_v4 }
 0x7f7   : > { %v20643_v2 = vadd.f32 %v7422_v55, %v21661_v37  ;;  %v13737_v37 = vld [vmem:[#allocation3 + $0x109] sm:$0xff] }
 0x7f8   : > { %v7201_v16 = vpop.f32.mrb[190].mxu0 }
 0x7f9   : > { %v7427_v47 = vadd.f32 %v21662_v3, %v7201_v16  ;;  %v7203_v39 = vpop.f32.mrb[191].mxu0  ;;  %8641 = vmatmul.mubr.f32.gmra.mrb[232].mxu0 %v13730_v45  ;;  %v13738_v45 = vld [vmem:[#allocation3 + $0x108] sm:$0xff] }
 0x7fa   : > { %8645 = vmatprep.mubr.f32.mxu0 %v13731_v34 }
 0x7fb   : > { %v20647_v46 = vadd.f32 %v7427_v47, %v21663_v32  ;;  %v13739_v32 = vld [vmem:[#allocation3 + $0x111] sm:$0xff] }
 0x7fc   : > { %v11102_v60 = vpop.f32.mrb[192].mxu0 }
 0x7fd   : > { %v7834_v57 = vpop.f32.mrb[160].mxu1  ;;  %v8059_v35 = vpop.f32.mrb[193].mxu0  ;;  %8646 = vmatmul.mubr.f32.gmra.mrb[234].mxu0 %v13732_v6 }
 0x7fe   : > { %v7836_v43 = vpop.f32.mrb[161].mxu1  ;;  %v8060_v5 = vadd.f32 %v8059_v35, %v7834_v57  ;;  %8650 = vmatprep.mubr.f32.mxu0 %v13733_v17  ;;  %v13741_v17 = vld [vmem:[#allocation3 + $0x129] sm:$0xff] }
 0x7ff   : > { %v13740_v43 = vld [vmem:[#allocation3 + $0x110] sm:$0xff] }
 0x800   : > { %v20650_v0 = vadd.f32 %v8060_v5, %v20403_v11  ;;  %v11105_v7 = vpop.f32.mrb[194].mxu0 }
 0x801   : > { %v7839_v26 = vpop.f32.mrb[162].mxu1  ;;  %v8069_v18 = vpop.f32.mrb[195].mxu0  ;;  %8651 = vmatmul.mubr.f32.gmra.mrb[236].mxu0 %v13734_v19 }
 0x802   : > { %v8065_v12 = vadd.f32 %v11102_v60, %v7839_v26  ;;  %v7841_v23 = vpop.f32.mrb[163].mxu1  ;;  %8655 = vmatprep.mubr.f32.mxu0 %v13735_v1  ;;  %v13743_v1 = vld [vmem:[#allocation3 + $0x131] sm:$0xff] }
 0x804   : > { %v20653_v50 = vadd.f32 %v8065_v12, %v20416_v56  ;;  %v11108_v48 = vpop.f32.mrb[196].mxu0  ;;  %v13742_v12 = vld [vmem:[#allocation3 + $0x128] sm:$0xff] }
 0x805   : > { %v7844_v55 = vpop.f32.mrb[164].mxu1  ;;  %v8079_v8 = vpop.f32.mrb[197].mxu0  ;;  %8656 = vmatmul.mubr.f32.gmra.mrb[238].mxu0 %v13736_v15 }
 0x806   : > { %v8070_v4 = vadd.f32 %v8069_v18, %v7844_v55  ;;  %v7846_v11 = vpop.f32.mrb[165].mxu1  ;;  %8660 = vmatprep.mubr.f32.mxu0 %v13737_v37 }
 0x808   : > { %v20656_v16 = vadd.f32 %v8070_v4, %v20429_v21  ;;  %v11111_v3 = vpop.f32.mrb[198].mxu0 }
 0x809   : > { %v7849_v47 = vpop.f32.mrb[166].mxu1  ;;  %v8089_v39 = vpop.f32.mrb[199].mxu0  ;;  %8661 = vmatmul.mubr.f32.gmra.mrb[240].mxu0 %v13738_v45 }
 0x80a   : > { %v8075_v34 = vadd.f32 %v11105_v7, %v7849_v47  ;;  %v7851_v56 = vpop.f32.mrb[167].mxu1  ;;  %8665 = vmatprep.mubr.f32.mxu0 %v13739_v32  ;;  %v13745_v47 = vld [vmem:[#allocation3 + $0x149] sm:$0xff] }
 0x80c   : > { %v20659_v60 = vadd.f32 %v8075_v34, %v20442_v54  ;;  %v11114_v57 = vpop.f32.mrb[200].mxu0 }
 0x80d   : > { %v7854_v35 = vpop.f32.mrb[168].mxu1  ;;  %v8099_v6 = vpop.f32.mrb[201].mxu0  ;;  %8666 = vmatmul.mubr.f32.gmra.mrb[242].mxu0 %v13740_v43  ;;  %v13747_v43 = vld [vmem:[#allocation3 + $0x151] sm:$0xff] }
 0x80e   : > { %v8080_v5 = vadd.f32 %v8079_v8, %v7854_v35  ;;  %v7856_v21 = vpop.f32.mrb[169].mxu1  ;;  %8670 = vmatprep.mubr.f32.mxu0 %v13741_v17 }
 0x810   : > { %v20662_v26 = vadd.f32 %v8080_v5, %v20455_v58  ;;  %v20664_v18 = vpop.f32.mrb[202].mxu0  ;;  %v13744_v58 = vld [vmem:[#allocation3 + $0x130] sm:$0xff] }
 0x811   : > { %v7859_v7 = vpop.f32.mrb[170].mxu1  ;;  %v8109_v19 = vpop.f32.mrb[203].mxu0  ;;  %8671 = vmatmul.mubr.f32.gmra.mrb[244].mxu0 %v13742_v12 }
 0x812   : > { %v8085_v54 = vadd.f32 %v11108_v48, %v7859_v7  ;;  %v7861_v23 = vpop.f32.mrb[171].mxu1  ;;  %8675 = vmatprep.mubr.f32.mxu0 %v13743_v1 }
 0x814   : > { %v20667_v55 = vadd.f32 %v8085_v54, %v20468_v9  ;;  %v20669_v8 = vpop.f32.mrb[204].mxu0  ;;  %v13746_v9 = vld [vmem:[#allocation3 + $0x148] sm:$0xff] }
 0x815   : > { %v7864_v15 = vpop.f32.mrb[172].mxu1  ;;  %v20671_v4 = vpop.f32.mrb[205].mxu0  ;;  %8676 = vmatmul.mubr.f32.gmra.mrb[246].mxu0 %v13744_v58  ;;  %v13749_v54 = vld [vmem:[#allocation3 + $0x169] sm:$0xff] }
 0x816   : > { %v8090_v11 = vadd.f32 %v8089_v39, %v7864_v15  ;;  %v7866_v37 = vpop.f32.mrb[173].mxu1  ;;  %8680 = vmatprep.mubr.f32.mxu0 %v13745_v47 }
 0x817   : > { %v13751_v37 = vld [vmem:[#allocation3 + $0x171] sm:$0xff] }
 0x818   : > { %v20674_v45 = vadd.f32 %v8090_v11, %v20481_v63  ;;  %v20676_v48 = vpop.f32.mrb[206].mxu0  ;;  %v13748_v63 = vld [vmem:[#allocation3 + $0x150] sm:$0xff] }
 0x819   : > { %v7869_v34 = vpop.f32.mrb[174].mxu1  ;;  %v20678_v56 = vpop.f32.mrb[207].mxu0  ;;  %8681 = vmatmul.mubr.f32.gmra.mrb[248].mxu0 %v13746_v9 }
 0x81a   : > { %v8095_v32 = vadd.f32 %v11111_v3, %v7869_v34  ;;  %v7871_v35 = vpop.f32.mrb[175].mxu1  ;;  %8685 = vmatprep.mubr.f32.mxu0 %v13747_v43  ;;  %v13753_v43 = vld [vmem:[#allocation3 + $0x189] sm:$0xff] }
 0x81c   : > { %v20681_v5 = vadd.f32 %v8095_v32, %v20494_v24  ;;  %v20683_v39 = vpop.f32.mrb[208].mxu0  ;;  %v13750_v24 = vld [vmem:[#allocation3 + $0x168] sm:$0xff] }
 0x81d   : > { %v7874_v21 = vpop.f32.mrb[176].mxu1  ;;  %v20685_v17 = vpop.f32.mrb[209].mxu0  ;;  %8686 = vmatmul.mubr.f32.gmra.mrb[250].mxu0 %v13748_v63 }
 0x81e   : > { %v8100_v7 = vadd.f32 %v8099_v6, %v7874_v21  ;;  %v7876_v12 = vpop.f32.mrb[177].mxu1  ;;  %8690 = vmatprep.mubr.f32.mxu0 %v13749_v54 }
 0x820   : > { %v20688_v23 = vadd.f32 %v8100_v7, %v20509_v42  ;;  %v20690_v3 = vpop.f32.mrb[210].mxu0  ;;  %v13752_v42 = vld [vmem:[#allocation3 + $0x170] sm:$0xff] }
 0x821   : > { %v7879_v1 = vpop.f32.mrb[178].mxu1  ;;  %v20692_v15 = vpop.f32.mrb[211].mxu0  ;;  %8691 = vmatmul.mubr.f32.gmra.mrb[252].mxu0 %v13750_v24 }
 0x822   : > { %v8105_v58 = vadd.f32 %v11114_v57, %v7879_v1  ;;  %v7881_v11 = vpop.f32.mrb[179].mxu1  ;;  %8695 = vmatprep.mubr.f32.mxu0 %v13751_v37  ;;  %v13755_v1 = vld [vmem:[#allocation3 + $0x191] sm:$0xff] }
 0x823   : > { %v13756_v11 = vld [vmem:[#allocation3 + $0x190] sm:$0xff] }
 0x824   : > { %v20695_v47 = vadd.f32 %v8105_v58, %v20526_v22  ;;  %v20697_v6 = vpop.f32.mrb[212].mxu0  ;;  %v13754_v22 = vld [vmem:[#allocation3 + $0x188] sm:$0xff] }
 0x825   : > { %v7884_v34 = vpop.f32.mrb[180].mxu1  ;;  %v20699_v9 = vpop.f32.mrb[213].mxu0  ;;  %8696 = vmatmul.mubr.f32.gmra.mrb[254].mxu0 %v13752_v42  ;;  %v13757_v42 = vld [vmem:[#allocation3 + $0x1a9] sm:$0xff] }
 0x826   : > { %v8110_v32 = vadd.f32 %v8109_v19, %v7884_v34  ;;  %v7886_v35 = vpop.f32.mrb[181].mxu1  ;;  %8700 = vmatprep.mubr.f32.mxu0 %v13753_v43  ;;  %v13758_v43 = vld [vmem:[#allocation3 + $0x1a8] sm:$0xff] }
 0x828   : > { %v20702_v21 = vadd.f32 %v8110_v32, %v20533_v33  ;;  %v20704_v57 = vpop.f32.mrb[214].mxu0 }
 0x829   : > { %v7889_v63 = vpop.f32.mrb[182].mxu1  ;;  %v20706_v7 = vpop.f32.mrb[215].mxu0  ;;  %8701 = vmatmul.mubr.f32.gmra.mrb[0].mxu0 %v13754_v22 }
 0x82a   : > { %v8115_v12 = vadd.f32 %v20664_v18, %v7889_v63  ;;  %v7891_v54 = vpop.f32.mrb[183].mxu1  ;;  %8705 = vmatprep.mubr.f32.mxu0 %v13755_v1 }
 0x82c   : > { %v20710_v19 = vadd.f32 %v8115_v12, %v20539_v30  ;;  %v20712_v24 = vpop.f32.mrb[216].mxu0  ;;  %v13759_v12 = vld [vmem:[#allocation3 + $0x1b1] sm:$0xff] }
 0x82d   : > { %v7894_v58 = vpop.f32.mrb[184].mxu1  ;;  %v20714_v33 = vpop.f32.mrb[217].mxu0  ;;  %8706 = vmatmul.mubr.f32.gmra.mrb[2].mxu0 %v13756_v11 }
 0x82e   : > { %v8120_v37 = vadd.f32 %v20671_v4, %v7894_v58  ;;  %v7896_v34 = vpop.f32.mrb[185].mxu1  ;;  %8710 = vmatprep.mubr.f32.mxu0 %v13757_v42  ;;  %v13760_v58 = vld [vmem:[#allocation3 + $0x1b0] sm:$0xff] }
 0x82f   : > { %v13761_v34 = vld [vmem:[#allocation3 + $0x1c9] sm:$0xff] }
 0x830   : > { %v20718_v18 = vadd.f32 %v8120_v37, %v20545_v40  ;;  %v20720_v32 = vpop.f32.mrb[218].mxu0 }
 0x831   : > { %v7899_v35 = vpop.f32.mrb[186].mxu1  ;;  %v20722_v30 = vpop.f32.mrb[219].mxu0  ;;  %8711 = vmatmul.mubr.f32.gmra.mrb[4].mxu0 %v13758_v43  ;;  %v13762_v43 = vld [vmem:[#allocation3 + $0x1c8] sm:$0xff] }
 0x832   : > { %v8125_v63 = vadd.f32 %v20669_v8, %v7899_v35  ;;  %v7901_v22 = vpop.f32.mrb[187].mxu1  ;;  %8715 = vmatprep.mubr.f32.mxu0 %v13759_v12  ;;  %v13763_v12 = vld [vmem:[#allocation3 + $0x1d1] sm:$0xff] }
 0x834   : > { %v20726_v4 = vadd.f32 %v8125_v63, %v20551_v62  ;;  %v20728_v54 = vpop.f32.mrb[220].mxu0 }
 0x835   : > { %v7904_v1 = vpop.f32.mrb[188].mxu1  ;;  %v20730_v40 = vpop.f32.mrb[221].mxu0  ;;  %8716 = vmatmul.mubr.f32.gmra.mrb[6].mxu0 %v13760_v58  ;;  %v13764_v58 = vld [vmem:[#allocation3 + $0x1d0] sm:$0xff] }
 0x836   : > { %v8130_v11 = vadd.f32 %v20678_v56, %v7904_v1  ;;  %v7906_v37 = vpop.f32.mrb[189].mxu1  ;;  %8720 = vmatprep.mubr.f32.mxu0 %v13761_v34 }
 0x837   : > { %v13765_v37 = vld [vmem:[#allocation3 + $0x1e9] sm:$0xff] }
 0x838   : > { %v20734_v8 = vadd.f32 %v8130_v11, %v20557_v28  ;;  %v20736_v42 = vpop.f32.mrb[222].mxu0 }
 0x839   : > { %v7909_v35 = vpop.f32.mrb[190].mxu1  ;;  %v20738_v62 = vpop.f32.mrb[223].mxu0  ;;  %8721 = vmatmul.mubr.f32.gmra.mrb[8].mxu0 %v13762_v43 }
 0x83a   : > { %21664 = vst [vmem:[#allocation20_spill] sm:$0xff] %v20734_v8  ;;  %v8135_v63 = vadd.f32 %v20676_v48, %v7909_v35  ;;  %v7911_v22 = vpop.f32.mrb[191].mxu1  ;;  %8725 = vmatprep.mubr.f32.mxu0 %v13763_v12  ;;  %v13766_v8 = vld [vmem:[#allocation3 + $0x1e8] sm:$0xff]  ;;  %v13768_v12 = vld [vmem:[#allocation3 + $0x1f0] sm:$0xff] }
 0x83b   : > { %v13767_v22 = vld [vmem:[#allocation3 + $0x1f1] sm:$0xff] }
 0x83c   : > { %v20742_v56 = vadd.f32 %v8135_v63, %v20563_v53 }
 0x83d   : > { %v7914_v1 = vpop.f32.mrb[192].mxu1  ;;  %8726 = vmatmul.mubr.f32.gmra.mrb[10].mxu0 %v13764_v58  ;;  %v13769_v58 = vld [vmem:[#allocation3 + $0x209] sm:$0xff] }
 0x83e   : > { %v8140_v28 = vadd.f32 %v20685_v17, %v7914_v1  ;;  %v7916_v11 = vpop.f32.mrb[193].mxu1  ;;  %8730 = vmatprep.mubr.f32.mxu0 %v13765_v37  ;;  %v13771_v37 = vld [vmem:[#allocation3 + $0x211] sm:$0xff] }
 0x840   : > { %v20746_v34 = vadd.f32 %v8140_v28, %v20569_v14  ;;  %v13770_v28 = vld [vmem:[#allocation3 + $0x208] sm:$0xff] }
 0x841   : > { %v7919_v43 = vpop.f32.mrb[194].mxu1  ;;  %8731 = vmatmul.mubr.f32.gmra.mrb[12].mxu0 %v13766_v8 }
 0x842   : > { %v8145_v48 = vadd.f32 %v20683_v39, %v7919_v43  ;;  %v7921_v35 = vpop.f32.mrb[195].mxu1  ;;  %8735 = vmatprep.mubr.f32.mxu0 %v13767_v22  ;;  %v13773_v22 = vld [vmem:[#allocation3 + $0x229] sm:$0xff] }
 0x844   : > { %v20750_v53 = vadd.f32 %v8145_v48, %v20575_v49  ;;  %v13772_v48 = vld [vmem:[#allocation3 + $0x210] sm:$0xff] }
 0x845   : > { %v7924_v63 = vpop.f32.mrb[196].mxu1  ;;  %8736 = vmatmul.mubr.f32.gmra.mrb[14].mxu0 %v13768_v12  ;;  %v13774_v12 = vld [vmem:[#allocation3 + $0x228] sm:$0xff] }
 0x846   : > { %v8150_v17 = vadd.f32 %v20692_v15, %v7924_v63  ;;  %v7926_v1 = vpop.f32.mrb[197].mxu1  ;;  %8740 = vmatprep.mubr.f32.mxu0 %v13769_v58 }
 0x847   : > { %v13775_v1 = vld [vmem:[#allocation3 + $0x231] sm:$0xff] }
 0x848   : > { %v20754_v14 = vadd.f32 %v8150_v17, %v20581_v44 }
 0x849   : > { %v7929_v8 = vpop.f32.mrb[198].mxu1  ;;  %8741 = vmatmul.mubr.f32.gmra.mrb[16].mxu0 %v13770_v28 }
 0x84a   : > { %v8155_v39 = vadd.f32 %v20690_v3, %v7929_v8  ;;  %v7931_v11 = vpop.f32.mrb[199].mxu1  ;;  %8745 = vmatprep.mubr.f32.mxu0 %v13771_v37  ;;  %v13776_v8 = vld [vmem:[#allocation3 + $0x230] sm:$0xff] }
 0x84c   : > { %v20758_v49 = vadd.f32 %v8155_v39, %v20587_v13 }
 0x84d   : > { %v7934_v43 = vpop.f32.mrb[200].mxu1  ;;  %8746 = vmatmul.mubr.f32.gmra.mrb[18].mxu0 %v13772_v48 }
 0x84e   : > { %v8160_v15 = vadd.f32 %v20699_v9, %v7934_v43  ;;  %v7936_v35 = vpop.f32.mrb[201].mxu1  ;;  %8750 = vmatprep.mubr.f32.mxu0 %v13773_v22 }
 0x850   : > { %v20762_v44 = vadd.f32 %v8160_v15, %v20593_v61 }
 0x851   : > { %v7939_v63 = vpop.f32.mrb[202].mxu1  ;;  %8751 = vmatmul.mubr.f32.gmra.mrb[20].mxu0 %v13774_v12 }
 0x852   : > { %v8165_v3 = vadd.f32 %v20697_v6, %v7939_v63  ;;  %v7941_v17 = vpop.f32.mrb[203].mxu1  ;;  %8755 = vmatprep.mubr.f32.mxu0 %v13775_v1 }
 0x854   : > { %v20766_v13 = vadd.f32 %v8165_v3, %v20599_v51  ;;  %v5121_v51 = vld [vmem:[#allocation3 + $0x269] sm:$0xff] }
 0x855   : > { %v7944_v58 = vpop.f32.mrb[204].mxu1  ;;  %8756 = vmatmul.mubr.f32.gmra.mrb[22].mxu0 %v13776_v8 }
 0x856   : > { %v8170_v9 = vadd.f32 %v20706_v7, %v7944_v58  ;;  %v7946_v28 = vpop.f32.mrb[205].mxu1  ;;  %8760 = vmatprep.mubr.f32.mxu0 %v20497_v20 }
 0x858   : > { %v20771_v61 = vadd.f32 %v8170_v9, %v20605_v25  ;;  %v5122_v25 = vld [vmem:[#allocation3 + $0x271] sm:$0xff] }
 0x859   : > { %v7949_v39 = vpop.f32.mrb[206].mxu1  ;;  %8761 = vmatmul.mubr.f32.gmra.mrb[24].mxu0 %v20522_v27 }
 0x85a   : > { %v8175_v6 = vadd.f32 %v20704_v57, %v7949_v39  ;;  %v7951_v11 = vpop.f32.mrb[207].mxu1  ;;  %8765 = vmatprep.mubr.f32.mxu0 %v20512_v31 }
 0x85c   : > { %v20777_v37 = vadd.f32 %v8175_v6, %v20611_v52 }
 0x85d   : > { %v7954_v43 = vpop.f32.mrb[208].mxu1  ;;  %8766 = vmatmul.mubr.f32.gmra.mrb[26].mxu0 %v20522_v27 }
 0x85e   : > { %v8180_v20 = vadd.f32 %v20714_v33, %v7954_v43  ;;  %v7956_v7 = vpop.f32.mrb[209].mxu1  ;;  %8770 = vmatprep.mubr.f32.mxu0 %v5121_v51 }
 0x860   : > { %v20782_v48 = vadd.f32 %v8180_v20, %v20617_v36 }
 0x861   : > { %v7959_v15 = vpop.f32.mrb[210].mxu1  ;;  %8771 = vmatmul.mubr.f32.gmra.mrb[28].mxu0 %v20522_v27 }
 0x862   : > { %v8185_v31 = vadd.f32 %v20712_v24, %v7959_v15  ;;  %v7961_v57 = vpop.f32.mrb[211].mxu1  ;;  %8775 = vmatprep.mubr.f32.mxu0 %v5122_v25 }
 0x864   : > { %v20787_v52 = vadd.f32 %v8185_v31, %v20623_v59 }
 0x865   : > { %v7964_v35 = vpop.f32.mrb[212].mxu1  ;;  %8776 = vmatmul.mubr.f32.gmra.mrb[30].mxu0 %v20522_v27 }
 0x866   : > { %v8190_v33 = vadd.f32 %v20722_v30, %v7964_v35  ;;  %v7966_v22 = vpop.f32.mrb[213].mxu1 }
 0x868   : > { %v20792_v63 = vadd.f32 %v8190_v33, %v20627_v38 }
 0x869   : > { %v7969_v36 = vpop.f32.mrb[214].mxu1 }
 0x86a   : > { %21665 = vst [vmem:[#allocation38_spill] sm:$0xff] %v20792_v63  ;;  %v8195_v12 = vadd.f32 %v20720_v32, %v7969_v36  ;;  %v7971_v3 = vpop.f32.mrb[215].mxu1 }
 0x86c   : > { %v20796_v24 = vadd.f32 %v8195_v12, %v20631_v10 }
 0x86d   : > { %v7974_v17 = vpop.f32.mrb[216].mxu1 }
 0x86e   : > { %21666 = vst [vmem:[#allocation41_spill] sm:$0xff] %v20796_v24  ;;  %v8200_v59 = vadd.f32 %v20730_v40, %v7974_v17  ;;  %v7976_v1 = vpop.f32.mrb[217].mxu1 }
 0x870   : > { %v20800_v58 = vadd.f32 %v8200_v59, %v20635_v41 }
 0x871   : > { %v7979_v27 = vpop.f32.mrb[218].mxu1 }
 0x872   : > { %21667 = vst [vmem:[#allocation40_spill] sm:$0xff] %v20800_v58  ;;  %v8205_v30 = vadd.f32 %v20728_v54, %v7979_v27  ;;  %v7981_v8 = vpop.f32.mrb[219].mxu1 }
 0x874   : > { %v20804_v38 = vadd.f32 %v8205_v30, %v20639_v29 }
 0x875   : > { %v7984_v9 = vpop.f32.mrb[220].mxu1 }
 0x876   : > { %21668 = vst [vmem:[#allocation51_spill] sm:$0xff] %v20804_v38  ;;  %v8210_v32 = vadd.f32 %v20738_v62, %v7984_v9  ;;  %v7986_v28 = vpop.f32.mrb[221].mxu1  ;;  %v20869_v38 = vld [vmem:[%s21009_s6] ss:$0 sm:$0xff] }
 0x878   : > { %v20808_v10 = vadd.f32 %v8210_v32, %v20643_v2 }
 0x879   : > { %v7989_v39 = vpop.f32.mrb[222].mxu1 }
 0x87a   : > { %21669 = vst [vmem:[#allocation52_spill] sm:$0xff] %v20808_v10  ;;  %v8215_v40 = vadd.f32 %v20736_v42, %v7989_v39  ;;  %v7991_v6 = vpop.f32.mrb[223].mxu1 }
 0x87c   : > { %v20812_v41 = vadd.f32 %v8215_v40, %v20647_v46 }
 0x87d   : > { %v11182_v11 = vpop.f32.mrb[224].mxu1 }
 0x87e   : > { %21670 = vst [vmem:[#allocation44_spill] sm:$0xff] %v20812_v41  ;;  %v8847_v54 = vpop.f32.mrb[225].mxu1 }
 0x881   : > { %v11185_v51 = vpop.f32.mrb[226].mxu1 }
 0x882   : > { %v8857_v43 = vpop.f32.mrb[227].mxu1 }
 0x885   : > { %v11188_v29 = vpop.f32.mrb[228].mxu1 }
 0x886   : > { %v8867_v20 = vpop.f32.mrb[229].mxu1 }
 0x889   : > { %v20814_v7 = vpop.f32.mrb[230].mxu1 }
 0x88a   : > { %v20816_v62 = vpop.f32.mrb[231].mxu1 }
 0x88d   : > { %v20818_v25 = vpop.f32.mrb[232].mxu1 }
 0x88e   : > { %v20820_v2 = vpop.f32.mrb[233].mxu1 }
 0x891   : > { %v20822_v15 = vpop.f32.mrb[234].mxu1 }
 0x892   : > { %v20824_v42 = vpop.f32.mrb[235].mxu1 }
 0x895   : > { %v20826_v46 = vpop.f32.mrb[236].mxu1 }
 0x896   : > { %v20828_v31 = vpop.f32.mrb[237].mxu1 }
 0x899   : > { %v20830_v57 = vpop.f32.mrb[238].mxu1 }
 0x89a   : > { %v20832_v35 = vpop.f32.mrb[239].mxu1 }
 0x89d   : > { %v20834_v33 = vpop.f32.mrb[240].mxu1 }
 0x89e   : > { %v20836_v22 = vpop.f32.mrb[241].mxu1 }
 0x8a1   : > { %v20838_v36 = vpop.f32.mrb[242].mxu1 }
 0x8a2   : > { %v20840_v12 = vpop.f32.mrb[243].mxu1 }
 0x8a5   : > { %v20842_v3 = vpop.f32.mrb[244].mxu1 }
 0x8a6   : > { %v20844_v17 = vpop.f32.mrb[245].mxu1 }
 0x8a9   : > { %v20846_v59 = vpop.f32.mrb[246].mxu1 }
 0x8aa   : > { %v20848_v1 = vpop.f32.mrb[247].mxu1 }
 0x8ad   : > { %v20850_v27 = vpop.f32.mrb[248].mxu1 }
 0x8ae   : > { %v20852_v30 = vpop.f32.mrb[249].mxu1 }
 0x8b1   : > { %v20854_v8 = vpop.f32.mrb[250].mxu1 }
 0x8b2   : > { %21671 = vst [vmem:[#allocation42_spill] sm:$0xff] %v20854_v8  ;;  %v20856_v9 = vpop.f32.mrb[251].mxu1 }
 0x8b3   : > { %21672 = vst [vmem:[#allocation32_spill] sm:$0xff] %v20856_v9 }
 0x8b5   : > { %v20858_v32 = vpop.f32.mrb[252].mxu1 }
 0x8b6   : > { %21673 = vst [vmem:[#allocation13_spill] sm:$0xff] %v20858_v32  ;;  %v20860_v28 = vpop.f32.mrb[253].mxu1 }
 0x8b7   : > { %21674 = vst [vmem:[#allocation53_spill] sm:$0xff] %v20860_v28 }
 0x8b9   : > { %v20862_v39 = vpop.f32.mrb[254].mxu1 }
 0x8ba   : > { %21675 = vst [vmem:[#allocation27_spill] sm:$0xff] %v20862_v39  ;;  %v20864_v40 = vpop.f32.mrb[255].mxu1 }
 0x8bb   : > { %21676 = vst [vmem:[#allocation31_spill] sm:$0xff] %v20864_v40 }
 0x8bc   : > { %v8622_v6 = vpop.f32.mrb[224].mxu0 }
 0x8bd   : > { %v8848_v41 = vadd.f32 %v8847_v54, %v8622_v6  ;;  %v8624_v10 = vpop.f32.mrb[225].mxu0 }
 0x8bf   : > { %v9006_v58 = vadd.f32 %v8848_v41, %v20650_v0 }
 0x8c0   : > { %v8627_v39 = vpop.f32.mrb[226].mxu0 }
 0x8c1   : > { %v9045_v54 = vadd.f32 %v20869_v38, %v9006_v58  ;;  %v8853_v10 = vadd.f32 %v11182_v11, %v8627_v39  ;;  %v8629_v6 = vpop.f32.mrb[227].mxu0 }
 0x8c3   : > { %9077 = vst [vmem:[%s20877_s11] sm:$0xff] %v9045_v54  ;;  %v9007_v40 = vadd.f32 %v8853_v10, %v20653_v50 }
 0x8c4   : > { %v8632_v32 = vpop.f32.mrb[228].mxu0 }
 0x8c5   : > { %v9046_v0 = vadd.f32 %v20869_v38, %v9007_v40  ;;  %v8858_v41 = vadd.f32 %v8857_v43, %v8632_v32  ;;  %v8634_v28 = vpop.f32.mrb[229].mxu0 }
 0x8c7   : > { %9078 = vst [vmem:[%s20877_s11 + $0x8] sm:$0xff] %v9046_v0  ;;  %v9008_v24 = vadd.f32 %v8858_v41, %v20656_v16 }
 0x8c8   : > { %v8637_v8 = vpop.f32.mrb[230].mxu0 }
 0x8c9   : > { %v9047_v63 = vadd.f32 %v20869_v38, %v9008_v24  ;;  %v8863_v9 = vadd.f32 %v11185_v51, %v8637_v8  ;;  %v8639_v58 = vpop.f32.mrb[231].mxu0 }
 0x8cb   : > { %9079 = vst [vmem:[%s20877_s11 + $0x10] sm:$0xff] %v9047_v63  ;;  %v9009_v11 = vadd.f32 %v8863_v9, %v20659_v60 }
 0x8cc   : > { %v8642_v39 = vpop.f32.mrb[232].mxu0 }
 0x8cd   : > { %v9048_v50 = vadd.f32 %v20869_v38, %v9009_v11  ;;  %v8868_v54 = vadd.f32 %v8867_v20, %v8642_v39  ;;  %v8644_v40 = vpop.f32.mrb[233].mxu0 }
 0x8cf   : > { %9080 = vst [vmem:[%s20877_s11 + $0x18] sm:$0xff] %v9048_v50  ;;  %v9010_v43 = vadd.f32 %v8868_v54, %v20662_v26 }
 0x8d0   : > { %v8647_v32 = vpop.f32.mrb[234].mxu0 }
 0x8d1   : > { %v9049_v16 = vadd.f32 %v20869_v38, %v9010_v43  ;;  %v8873_v28 = vadd.f32 %v11188_v29, %v8647_v32  ;;  %v8649_v24 = vpop.f32.mrb[235].mxu0 }
 0x8d3   : > { %9081 = vst [vmem:[%s20877_s11 + $0x20] sm:$0xff] %v9049_v16  ;;  %v9011_v63 = vadd.f32 %v8873_v28, %v20667_v55 }
 0x8d4   : > { %v8652_v51 = vpop.f32.mrb[236].mxu0 }
 0x8d5   : > { %v9050_v60 = vadd.f32 %v20869_v38, %v9011_v63  ;;  %v8878_v8 = vadd.f32 %v20816_v62, %v8652_v51  ;;  %v8654_v20 = vpop.f32.mrb[237].mxu0 }
 0x8d7   : > { %9082 = vst [vmem:[%s20877_s11 + $0x28] sm:$0xff] %v9050_v60  ;;  %v9012_v9 = vadd.f32 %v8878_v8, %v20674_v45 }
 0x8d8   : > { %v8657_v26 = vpop.f32.mrb[238].mxu0 }
 0x8d9   : > { %v9051_v10 = vadd.f32 %v20869_v38, %v9012_v9  ;;  %v8883_v29 = vadd.f32 %v20814_v7, %v8657_v26  ;;  %v8659_v6 = vpop.f32.mrb[239].mxu0 }
 0x8db   : > { %9083 = vst [vmem:[%s20877_s11 + $0x30] sm:$0xff] %v9051_v10  ;;  %v9013_v55 = vadd.f32 %v8883_v29, %v20681_v5  ;;  %v21677_v29 = vld [vmem:[#allocation20_spill] sm:$0xff] }
 0x8dc   : > { %v8662_v0 = vpop.f32.mrb[240].mxu0 }
 0x8dd   : > { %v9052_v41 = vadd.f32 %v20869_v38, %v9013_v55  ;;  %v8888_v62 = vadd.f32 %v20820_v2, %v8662_v0  ;;  %v8664_v58 = vpop.f32.mrb[241].mxu0 }
 0x8df   : > { %9084 = vst [vmem:[%s20877_s11 + $0x38] sm:$0xff] %v9052_v41  ;;  %v9014_v45 = vadd.f32 %v8888_v62, %v20688_v23 }
 0x8e0   : > { %v8667_v11 = vpop.f32.mrb[242].mxu0 }
 0x8e1   : > { %v9053_v39 = vadd.f32 %v20869_v38, %v9014_v45  ;;  %v8893_v7 = vadd.f32 %v20818_v25, %v8667_v11  ;;  %v8669_v50 = vpop.f32.mrb[243].mxu0 }
 0x8e3   : > { %9085 = vst [vmem:[%s20877_s11 + $0x40] sm:$0xff] %v9053_v39  ;;  %v9015_v5 = vadd.f32 %v8893_v7, %v20695_v47 }
 0x8e4   : > { %v8672_v54 = vpop.f32.mrb[244].mxu0 }
 0x8e5   : > { %v9054_v40 = vadd.f32 %v20869_v38, %v9015_v5  ;;  %v8898_v2 = vadd.f32 %v20824_v42, %v8672_v54  ;;  %v8674_v43 = vpop.f32.mrb[245].mxu0 }
 0x8e7   : > { %9086 = vst [vmem:[%s20877_s11 + $0x48] sm:$0xff] %v9054_v40  ;;  %v9016_v23 = vadd.f32 %v8898_v2, %v20702_v21 }
 0x8e8   : > { %v8677_v32 = vpop.f32.mrb[246].mxu0 }
 0x8e9   : > { %v9055_v16 = vadd.f32 %v20869_v38, %v9016_v23  ;;  %v8903_v25 = vadd.f32 %v20822_v15, %v8677_v32  ;;  %v8679_v28 = vpop.f32.mrb[247].mxu0 }
 0x8eb   : > { %9087 = vst [vmem:[%s20877_s11 + $0x50] sm:$0xff] %v9055_v16  ;;  %v9017_v47 = vadd.f32 %v8903_v25, %v20710_v19 }
 0x8ec   : > { %v8682_v24 = vpop.f32.mrb[248].mxu0 }
 0x8ed   : > { %v9056_v63 = vadd.f32 %v20869_v38, %v9017_v47  ;;  %v8908_v42 = vadd.f32 %v20828_v31, %v8682_v24  ;;  %v8684_v51 = vpop.f32.mrb[249].mxu0 }
 0x8ef   : > { %9088 = vst [vmem:[%s20877_s11 + $0x58] sm:$0xff] %v9056_v63  ;;  %v9018_v21 = vadd.f32 %v8908_v42, %v20718_v18 }
 0x8f0   : > { %v8687_v60 = vpop.f32.mrb[250].mxu0 }
 0x8f1   : > { %v9057_v8 = vadd.f32 %v20869_v38, %v9018_v21  ;;  %v8913_v15 = vadd.f32 %v20826_v46, %v8687_v60  ;;  %v8689_v20 = vpop.f32.mrb[251].mxu0 }
 0x8f3   : > { %9089 = vst [vmem:[%s20877_s11 + $0x60] sm:$0xff] %v9057_v8  ;;  %v9019_v19 = vadd.f32 %v8913_v15, %v20726_v4 }
 0x8f4   : > { %v8692_v9 = vpop.f32.mrb[252].mxu0 }
 0x8f5   : > { %v9058_v26 = vadd.f32 %v20869_v38, %v9019_v19  ;;  %v8918_v31 = vadd.f32 %v20832_v35, %v8692_v9  ;;  %v8694_v10 = vpop.f32.mrb[253].mxu0 }
 0x8f7   : > { %9090 = vst [vmem:[%s20877_s11 + $0x68] sm:$0xff] %v9058_v26  ;;  %v9020_v18 = vadd.f32 %v8918_v31, %v21677_v29  ;;  %v21678_v29 = vld [vmem:[#allocation32_spill] sm:$0xff] }
 0x8f8   : > { %v8697_v6 = vpop.f32.mrb[254].mxu0 }
 0x8f9   : > { %v9059_v55 = vadd.f32 %v20869_v38, %v9020_v18  ;;  %v8923_v46 = vadd.f32 %v20830_v57, %v8697_v6  ;;  %v8699_v0 = vpop.f32.mrb[255].mxu0  ;;  %v21679_v6 = vld [vmem:[#allocation38_spill] sm:$0xff] }
 0x8fa   : > { %v21680_v0 = vld [vmem:[#allocation42_spill] sm:$0xff] }
 0x8fb   : > { %9091 = vst [vmem:[%s20877_s11 + $0x70] sm:$0xff] %v9059_v55  ;;  %v9021_v4 = vadd.f32 %v8923_v46, %v20742_v56 }
 0x8fc   : > { %v8702_v41 = vpop.f32.mrb[0].mxu0 }
 0x8fd   : > { %v9060_v62 = vadd.f32 %v20869_v38, %v9021_v4  ;;  %v8928_v35 = vadd.f32 %v20836_v22, %v8702_v41  ;;  %v8704_v58 = vpop.f32.mrb[1].mxu0  ;;  %v21681_v41 = vld [vmem:[#allocation41_spill] sm:$0xff] }
 0x8fe   : > { %v21682_v58 = vld [vmem:[#allocation53_spill] sm:$0xff] }
 0x8ff   : > { %9092 = vst [vmem:[%s20877_s11 + $0x78] sm:$0xff] %v9060_v62  ;;  %v9022_v45 = vadd.f32 %v8928_v35, %v20746_v34 }
 0x900   : > { %v8707_v11 = vpop.f32.mrb[2].mxu0 }
 0x901   : > { %v9061_v39 = vadd.f32 %v20869_v38, %v9022_v45  ;;  %v8933_v57 = vadd.f32 %v20834_v33, %v8707_v11  ;;  %v8709_v7 = vpop.f32.mrb[3].mxu0 }
 0x903   : > { %9093 = vst [vmem:[%s20877_s11 + $0x80] sm:$0xff] %v9061_v39  ;;  %v9023_v56 = vadd.f32 %v8933_v57, %v20750_v53  ;;  %v21683_v39 = vld [vmem:[#allocation40_spill] sm:$0xff] }
 0x904   : > { %v8712_v50 = vpop.f32.mrb[4].mxu0 }
 0x905   : > { %v9062_v5 = vadd.f32 %v20869_v38, %v9023_v56  ;;  %v8938_v22 = vadd.f32 %v20840_v12, %v8712_v50  ;;  %v8714_v54 = vpop.f32.mrb[5].mxu0  ;;  %v21684_v50 = vld [vmem:[#allocation13_spill] sm:$0xff] }
 0x906   : > { %v21685_v54 = vld [vmem:[#allocation51_spill] sm:$0xff] }
 0x907   : > { %9094 = vst [vmem:[%s20877_s11 + $0x88] sm:$0xff] %v9062_v5  ;;  %v9024_v34 = vadd.f32 %v8938_v22, %v20754_v14 }
 0x908   : > { %v8717_v40 = vpop.f32.mrb[6].mxu0 }
 0x909   : > { %v9063_v2 = vadd.f32 %v20869_v38, %v9024_v34  ;;  %v8943_v33 = vadd.f32 %v20838_v36, %v8717_v40  ;;  %v8719_v43 = vpop.f32.mrb[7].mxu0 }
 0x90b   : > { %9095 = vst [vmem:[%s20877_s11 + $0x90] sm:$0xff] %v9063_v2  ;;  %v9025_v53 = vadd.f32 %v8943_v33, %v20758_v49  ;;  %v21686_v33 = vld [vmem:[#allocation31_spill] sm:$0xff] }
 0x90c   : > { %v8722_v23 = vpop.f32.mrb[8].mxu0 }
 0x90d   : > { %v9064_v32 = vadd.f32 %v20869_v38, %v9025_v53  ;;  %v8948_v12 = vadd.f32 %v20844_v17, %v8722_v23  ;;  %v8724_v16 = vpop.f32.mrb[9].mxu0  ;;  %v21687_v23 = vld [vmem:[#allocation52_spill] sm:$0xff] }
 0x90f   : > { %9096 = vst [vmem:[%s20877_s11 + $0x98] sm:$0xff] %v9064_v32  ;;  %v9026_v14 = vadd.f32 %v8948_v12, %v20762_v44 }
 0x910   : > { %v8727_v25 = vpop.f32.mrb[10].mxu0 }
 0x911   : > { %v9065_v28 = vadd.f32 %v20869_v38, %v9026_v14  ;;  %v8953_v36 = vadd.f32 %v20842_v3, %v8727_v25  ;;  %v8729_v47 = vpop.f32.mrb[11].mxu0  ;;  %v21688_v14 = vld [vmem:[#allocation27_spill] sm:$0xff] }
 0x913   : > { %9097 = vst [vmem:[%s20877_s11 + $0xa0] sm:$0xff] %v9065_v28  ;;  %v9027_v49 = vadd.f32 %v8953_v36, %v20766_v13  ;;  %v21689_v36 = vld [vmem:[#allocation44_spill] sm:$0xff] }
 0x914   : > { %v8732_v24 = vpop.f32.mrb[12].mxu0 }
 0x915   : > { %v9066_v63 = vadd.f32 %v20869_v38, %v9027_v49  ;;  %v8958_v17 = vadd.f32 %v20848_v1, %v8732_v24  ;;  %v8734_v42 = vpop.f32.mrb[13].mxu0 }
 0x917   : > { %9098 = vst [vmem:[%s20877_s11 + $0xa8] sm:$0xff] %v9066_v63  ;;  %v9028_v44 = vadd.f32 %v8958_v17, %v20771_v61 }
 0x918   : > { %v8737_v51 = vpop.f32.mrb[14].mxu0 }
 0x919   : > { %v9067_v21 = vadd.f32 %v20869_v38, %v9028_v44  ;;  %v8963_v3 = vadd.f32 %v20846_v59, %v8737_v51  ;;  %v8739_v60 = vpop.f32.mrb[15].mxu0 }
 0x91b   : > { %9099 = vst [vmem:[%s20877_s11 + $0xb0] sm:$0xff] %v9067_v21  ;;  %v9029_v13 = vadd.f32 %v8963_v3, %v20777_v37 }
 0x91c   : > { %v8742_v8 = vpop.f32.mrb[16].mxu0 }
 0x91d   : > { %v9068_v15 = vadd.f32 %v20869_v38, %v9029_v13  ;;  %v8968_v1 = vadd.f32 %v20852_v30, %v8742_v8  ;;  %v8744_v20 = vpop.f32.mrb[17].mxu0 }
 0x91f   : > { %9100 = vst [vmem:[%s20877_s11 + $0xb8] sm:$0xff] %v9068_v15  ;;  %v9030_v61 = vadd.f32 %v8968_v1, %v20782_v48 }
 0x920   : > { %v8747_v19 = vpop.f32.mrb[18].mxu0 }
 0x921   : > { %v9069_v9 = vadd.f32 %v20869_v38, %v9030_v61  ;;  %v8973_v59 = vadd.f32 %v20850_v27, %v8747_v19  ;;  %v8749_v26 = vpop.f32.mrb[19].mxu0 }
 0x923   : > { %9101 = vst [vmem:[%s20877_s11 + $0xc0] sm:$0xff] %v9069_v9  ;;  %v9031_v37 = vadd.f32 %v8973_v59, %v20787_v52 }
 0x924   : > { %v8752_v31 = vpop.f32.mrb[20].mxu0 }
 0x925   : > { %v9070_v10 = vadd.f32 %v20869_v38, %v9031_v37  ;;  %v8978_v30 = vadd.f32 %v21678_v29, %v8752_v31  ;;  %v8754_v18 = vpop.f32.mrb[21].mxu0 }
 0x927   : > { %9102 = vst [vmem:[%s20877_s11 + $0xc8] sm:$0xff] %v9070_v10  ;;  %v9032_v48 = vadd.f32 %v8978_v30, %v21679_v6 }
 0x928   : > { %v8757_v55 = vpop.f32.mrb[22].mxu0 }
 0x929   : > { %v9071_v46 = vadd.f32 %v20869_v38, %v9032_v48  ;;  %v8983_v27 = vadd.f32 %v21680_v0, %v8757_v55  ;;  %v8759_v4 = vpop.f32.mrb[23].mxu0 }
 0x92b   : > { %9103 = vst [vmem:[%s20877_s11 + $0xd0] sm:$0xff] %v9071_v46  ;;  %v9033_v52 = vadd.f32 %v8983_v27, %v21681_v41 }
 0x92c   : > { %v8762_v62 = vpop.f32.mrb[24].mxu0 }
 0x92d   : > { %v9072_v35 = vadd.f32 %v20869_v38, %v9033_v52  ;;  %v8988_v45 = vadd.f32 %v21682_v58, %v8762_v62  ;;  %v8764_v11 = vpop.f32.mrb[25].mxu0 }
 0x92f   : > { %9104 = vst [vmem:[%s20877_s11 + $0xd8] sm:$0xff] %v9072_v35  ;;  %v9034_v57 = vadd.f32 %v8988_v45, %v21683_v39 }
 0x930   : > { %v8767_v7 = vpop.f32.mrb[26].mxu0 }
 0x931   : > { %v9073_v56 = vadd.f32 %v20869_v38, %v9034_v57  ;;  %v8993_v5 = vadd.f32 %v21684_v50, %v8767_v7  ;;  %v8769_v22 = vpop.f32.mrb[27].mxu0 }
 0x933   : > { %9105 = vst [vmem:[%s20877_s11 + $0xe0] sm:$0xff] %v9073_v56  ;;  %v9035_v34 = vadd.f32 %v8993_v5, %v21685_v54 }
 0x934   : > { %v8772_v40 = vpop.f32.mrb[28].mxu0 }
 0x935   : > { %v9074_v2 = vadd.f32 %v20869_v38, %v9035_v34  ;;  %v8998_v43 = vadd.f32 %v21686_v33, %v8772_v40  ;;  %v8774_v53 = vpop.f32.mrb[29].mxu0 }
 0x937   : > { %9106 = vst [vmem:[%s20877_s11 + $0xe8] sm:$0xff] %v9074_v2  ;;  %v9036_v32 = vadd.f32 %v8998_v43, %v21687_v23 }
 0x938   : > { %v8777_v12 = vpop.f32.mrb[30].mxu0 }
 0x939   : > { %v9075_v16 = vadd.f32 %v20869_v38, %v9036_v32  ;;  %v9003_v25 = vadd.f32 %v21688_v14, %v8777_v12  ;;  %v8779_v28 = vpop.f32.mrb[31].mxu0 }
 0x93b   : > { %9107 = vst [vmem:[%s20877_s11 + $0xf0] sm:$0xff] %v9075_v16  ;;  %v9037_v47 = vadd.f32 %v9003_v25, %v21689_v36 }
 0x93d   : > { %v9076_v49 = vadd.f32 %v20869_v38, %v9037_v47 }
 0x93f   : > { %9108 = vst [vmem:[%s20877_s11 + $0xf8] sm:$0xff] %v9076_v49 }
 0x940 PF: > { %s17_s24 = sadd.s32 1, %s13783_s24  }
 0x941   : > { %p14_p4 = scmp.ge.s32.totalorder %s17_s24, 4  }
 0x943   :  { %16 = sbr.rel (!%p14_p4) target bundleno = 1 (0x1), region = 88 }

</bundles_post_ra>
